<compile_context>
chip_gen: v7x
topology: tpu7x:2x2x1
jax: 0.10.0
libtpu: 0.0.40
codegen_flags: <defaults>
</compile_context>

<pallas_src>
import functools

import jax
import jax.numpy as jnp
from jax.experimental import pallas as pl
from jax.experimental.pallas import tpu as pltpu

C_IN = 3          # conv1 input channels
C1 = 16           # conv1 output channels
C2 = 32           # conv2 output channels
N_CLASSES = 6     # fc1 output features
LANES = 128       # TPU lane width


def _round_up(x, m):
    return (x + m - 1) // m * m


K1 = _round_up(9 * C_IN, LANES)   # 128: dense conv1 contraction, lane-tile padded
K2 = _round_up(9 * C1, LANES)     # 256: dense conv2 contraction, lane-tile padded


def _im2col_dense(xe_ref, pad, Hc, Wc, Cc, k_pad):
    """Build the (Hc*Wc, k_pad) dense im2col matrix of a 3x3 / pad=1 conv.

    `xe_ref` is an extended VMEM buffer of shape (Hc*Wc + 2*pad, Cc) whose
    border rows are zero and whose rows [pad, pad+Hc*Wc) hold the activation
    in (h, w)-major / channel-minor order.  H-border taps land in the zero
    border rows; W-border wrap-around is masked per tap column.  Tap `idx`
    occupies lanes [idx*Cc, (idx+1)*Cc); lanes [9*Cc, k_pad) are zero and
    match zero rows in the pre-packed weights."""
    HW = Hc * Wc
    row = jax.lax.broadcasted_iota(jnp.int32, (HW, 1), 0)
    w_pos = row % Wc
    left_ok = w_pos >= 1              # kw=0 tap invalid at w == 0
    right_ok = w_pos <= Wc - 2        # kw=2 tap invalid at w == Wc-1
    taps = []
    for idx in range(9):
        kh, kw = idx // 3, idx % 3
        shift = (kh - 1) * Wc + (kw - 1)
        tap = xe_ref[pad + shift: pad + shift + HW, :]
        if kw == 0:
            tap = jnp.where(left_ok, tap, 0.0)
        elif kw == 2:
            tap = jnp.where(right_ok, tap, 0.0)
        taps.append(tap)
    if k_pad > 9 * Cc:
        taps.append(jnp.zeros((HW, k_pad - 9 * Cc), jnp.float32))
    return jnp.concatenate(taps, axis=1)


def _pool2x2(acc, Hc, Wc, Cc):
    """2x2 / stride-2 max pool of an (Hc*Wc, Cc) activation."""
    y = acc.reshape(Hc // 2, 2, Wc // 2, 2, Cc)
    y = jnp.max(jnp.max(y, axis=3), axis=1)
    return y.reshape((Hc // 2) * (Wc // 2), Cc)


def conv_stage_kernel(x_ref, w1_ref, b1_ref, w2_ref, b2_ref, feat_ref,
                      xe1_ref, xe2_ref, *, H, W, pad1, pad2):
    H2, W2 = H // 2, W // 2
    HW, HW2 = H * W, H2 * W2

    # ---- conv1 + bias + ReLU + pool -----------------------------------------
    # Zero only the small border rows (done every step => correct on both
    # megacore TensorCores), then drop the image in at row offset pad1.
    xe1_ref[0:pad1, :] = jnp.zeros((pad1, C_IN), jnp.float32)
    xe1_ref[pad1 + HW: pad1 + HW + pad1, :] = jnp.zeros((pad1, C_IN), jnp.float32)
    xe1_ref[pad1: pad1 + HW, :] = x_ref[0]
    col1 = _im2col_dense(xe1_ref, pad1, H, W, C_IN, K1)          # (HW, 128)
    acc1 = jnp.dot(col1, w1_ref[...], preferred_element_type=jnp.float32)
    acc1 = jnp.maximum(acc1 + b1_ref[...], 0.0)                  # (HW, 16)
    p1 = _pool2x2(acc1, H, W, C1)                                # (HW2, 16)

    # ---- conv2 + bias + ReLU + pool -----------------------------------------
    xe2_ref[0:pad2, :] = jnp.zeros((pad2, C1), jnp.float32)
    xe2_ref[pad2 + HW2: pad2 + HW2 + pad2, :] = jnp.zeros((pad2, C1), jnp.float32)
    xe2_ref[pad2: pad2 + HW2, :] = p1
    col2 = _im2col_dense(xe2_ref, pad2, H2, W2, C1, K2)          # (HW2, 256)
    acc2 = jnp.dot(col2, w2_ref[...], preferred_element_type=jnp.float32)
    acc2 = jnp.maximum(acc2 + b2_ref[...], 0.0)                  # (HW2, 32)
    p2 = _pool2x2(acc2, H2, W2, C2)                              # (HW4, 32)

    feat_ref[0] = p2


def fc_softmax_kernel(f_ref, wf_ref, bf_ref, o_ref):
    # Whole batch in one matmul: (N, fc_in) @ (fc_in, 128).
    logits = jnp.dot(f_ref[...], wf_ref[...], preferred_element_type=jnp.float32)
    logits = logits + bf_ref[...]          # padded class lanes carry -1e30 bias
    m = jnp.max(logits, axis=1, keepdims=True)
    e = jnp.exp(logits - m)
    o_ref[...] = e / jnp.sum(e, axis=1, keepdims=True)


def prepare_params(params, H, W):
    """One-time (offline) repacking into MXU-friendly slabs.

    Conv weights: (3,3,Cin,Cout) -> (9*Cin, Cout) dense contraction, rows
    padded with zeros up to the lane-tile-aligned K1/K2 to match the in-kernel
    im2col layout.  fc rows are permuted from PyTorch's NCHW-flatten order to
    the kernel's NHWC flatten order and the class dim is padded to 128 lanes;
    padded class lanes get a -1e30 bias so softmax zeroes them out."""
    H4, W4 = H // 4, W // 4
    w1p = (jnp.zeros((K1, C1), jnp.float32)
           .at[:9 * C_IN, :].set(params["w1"].reshape(9 * C_IN, C1)))
    b1p = params["b1"].reshape(1, C1)
    w2p = (jnp.zeros((K2, C2), jnp.float32)
           .at[:9 * C1, :].set(params["w2"].reshape(9 * C1, C2)))
    b2p = params["b2"].reshape(1, C2)
    # params["wf"]: (C2*H4*W4, 6), rows in PyTorch NCHW-flatten (c, h, w) order.
    wf_hwc = (params["wf"].reshape(C2, H4, W4, N_CLASSES)
              .transpose(1, 2, 0, 3)
              .reshape(H4 * W4 * C2, N_CLASSES))
    wfp = (jnp.zeros((H4 * W4 * C2, LANES), jnp.float32)
           .at[:, :N_CLASSES].set(wf_hwc))
    bfp = (jnp.full((1, LANES), -1e30, jnp.float32)
           .at[0, :N_CLASSES].set(params["bf"]))
    return {"w1p": w1p, "b1p": b1p, "w2p": w2p, "b2p": b2p, "wfp": wfp, "bfp": bfp}


def cnn_forward(x_nchw, prep, *, H, W):
    N = x_nchw.shape[0]
    assert H % 4 == 0 and W % 4 == 0 and (H * W) % 8 == 0
    H2, W2, H4, W4 = H // 2, W // 2, H // 4, W // 4
    HW, HW2, HW4 = H * W, H2 * W2, H4 * W4
    fc_in = HW4 * C2
    pad1 = _round_up(W + 1, 8)      # sublane-aligned halo for conv1 shifts
    pad2 = _round_up(W2 + 1, 8)     # sublane-aligned halo for conv2 shifts

    # Pre-flatten to (N, H*W, C_IN) in XLA glue (no in-kernel relayout).
    x_flat = jnp.transpose(x_nchw, (0, 2, 3, 1)).reshape(N, HW, C_IN)

    conv_kern = functools.partial(conv_stage_kernel, H=H, W=W,
                                  pad1=pad1, pad2=pad2)
    feats = pl.pallas_call(
        conv_kern,
        out_shape=jax.ShapeDtypeStruct((N, HW4, C2), jnp.float32),
        grid_spec=pltpu.PrefetchScalarGridSpec(
            num_scalar_prefetch=0,
            grid=(N,),                               # one image per grid step
            in_specs=[
                pl.BlockSpec((1, HW, C_IN), lambda i: (i, 0, 0)),
                pl.BlockSpec((K1, C1), lambda i: (0, 0)),
                pl.BlockSpec((1, C1), lambda i: (0, 0)),
                pl.BlockSpec((K2, C2), lambda i: (0, 0)),
                pl.BlockSpec((1, C2), lambda i: (0, 0)),
            ],
            out_specs=pl.BlockSpec((1, HW4, C2), lambda i: (i, 0, 0)),
            scratch_shapes=[
                pltpu.VMEM((HW + 2 * pad1, C_IN), jnp.float32),   # conv1 halo buf
                pltpu.VMEM((HW2 + 2 * pad2, C1), jnp.float32),    # conv2 halo buf
            ],
        ),
        compiler_params=pltpu.CompilerParams(
            dimension_semantics=("parallel",),       # images across TensorCores
        ),
    )(x_flat, prep["w1p"], prep["b1p"], prep["w2p"], prep["b2p"])

    # fc1 + softmax over the whole batch (real MXU M dimension).
    f = feats.reshape(N, fc_in)                      # NHWC flatten, matches wfp
    probs = pl.pallas_call(
        fc_softmax_kernel,
        out_shape=jax.ShapeDtypeStruct((N, LANES), jnp.float32),
        grid_spec=pltpu.PrefetchScalarGridSpec(
            num_scalar_prefetch=0,
            grid=(1,),
            in_specs=[
                pl.BlockSpec((N, fc_in), lambda i: (0, 0)),
                pl.BlockSpec((fc_in, LANES), lambda i: (0, 0)),
                pl.BlockSpec((1, LANES), lambda i: (0, 0)),
            ],
            out_specs=pl.BlockSpec((N, LANES), lambda i: (0, 0)),
        ),
    )(f, prep["wfp"], prep["bfp"])
    return probs[:, :N_CLASSES]


def init_params(key, H, W):
    fc_in = C2 * (H // 4) * (W // 4)
    k1, k2, k3, k4, k5, k6 = jax.random.split(key, 6)
    return {
        "w1": jax.random.normal(k1, (3, 3, C_IN, C1), jnp.float32) * 0.1,
        "b1": jax.random.normal(k2, (C1,), jnp.float32) * 0.01,
        "w2": jax.random.normal(k3, (3, 3, C1, C2), jnp.float32) * 0.05,
        "b2": jax.random.normal(k4, (C2,), jnp.float32) * 0.01,
        "wf": jax.random.normal(k5, (fc_in, N_CLASSES), jnp.float32) * 0.05,
        "bf": jax.random.normal(k6, (N_CLASSES,), jnp.float32) * 0.01,
    }


def cnn_reference(x_nchw, params):
    """Pure-JAX/XLA reference with PyTorch semantics (validation only)."""
    x = jnp.transpose(x_nchw, (0, 2, 3, 1))

    def conv_relu(x, w, b):
        y = jax.lax.conv_general_dilated(
            x, w, window_strides=(1, 1), padding=((1, 1), (1, 1)),
            dimension_numbers=("NHWC", "HWIO", "NHWC"))
        return jax.nn.relu(y + b)

    def pool(x):
        return jax.lax.reduce_window(x, -jnp.inf, jax.lax.max,
                                     (1, 2, 2, 1), (1, 2, 2, 1), "VALID")

    x = pool(conv_relu(x, params["w1"], params["b1"]))
    x = pool(conv_relu(x, params["w2"], params["b2"]))
    x = jnp.transpose(x, (0, 3, 1, 2)).reshape(x.shape[0], -1)   # NCHW flatten
    logits = x @ params["wf"] + params["bf"]
    return jax.nn.softmax(logits, axis=1)


if __name__ == "__main__":
    key = jax.random.PRNGKey(0)
    kx, kp = jax.random.split(key)

    N, H, W = 2, 16, 16
    x = jax.random.normal(kx, (N, C_IN, H, W), jnp.float32)
    params = init_params(kp, H, W)

    prep = prepare_params(params, H, W)          # one-time weight repacking
    fwd = jax.jit(functools.partial(cnn_forward, H=H, W=W))
    out = jax.block_until_ready(fwd(x, prep))

    ref = jax.block_until_ready(jax.jit(cnn_reference)(x, params))

    assert out.shape == (N, N_CLASSES)
    assert jnp.allclose(jnp.sum(out, axis=1), 1.0, atol=1e-5)
    # MXU default f32 precision (bf16 passes) => loose tolerance vs. XLA ref.
    assert jnp.allclose(out, ref, atol=2e-2), float(jnp.max(jnp.abs(out - ref)))
    print("KERNEL_OK")
</pallas_src>

<mosaic_0001>
module attributes {stable_mosaic.version = 11 : i64} {
  func.func @conv_stage_kernel(%arg0: i32, %arg1: memref<1x256x3xf32, #tpu.memory_space<vmem>>, %arg2: memref<128x16xf32, #tpu.memory_space<vmem>>, %arg3: memref<1x16xf32, #tpu.memory_space<vmem>>, %arg4: memref<256x32xf32, #tpu.memory_space<vmem>>, %arg5: memref<1x32xf32, #tpu.memory_space<vmem>>, %arg6: memref<1x16x32xf32, #tpu.memory_space<vmem>>, %arg7: memref<304x3xf32, #tpu.memory_space<vmem>>, %arg8: memref<96x16xf32, #tpu.memory_space<vmem>>) attributes {dimension_semantics = [#tpu.dimension_semantics<parallel>], iteration_bounds = array<i64: 2>, scalar_prefetch = 0 : i64, scratch_operands = 2 : i64, tpu.core_type = #tpu.core_type<tc>, window_params = [{transform_indices = @transform_0, window_bounds = array<i64: 1, 256, 3>}, {pipeline_mode = #tpu.pipeline_mode<synchronous>, transform_indices = @transform_1, window_bounds = array<i64: 128, 16>}, {pipeline_mode = #tpu.pipeline_mode<synchronous>, transform_indices = @transform_2, window_bounds = array<i64: 1, 16>}, {pipeline_mode = #tpu.pipeline_mode<synchronous>, transform_indices = @transform_3, window_bounds = array<i64: 256, 32>}, {pipeline_mode = #tpu.pipeline_mode<synchronous>, transform_indices = @transform_4, window_bounds = array<i64: 1, 32>}, {transform_indices = @transform_5, window_bounds = array<i64: 1, 16, 32>}]} {
    %cst = arith.constant 0.000000e+00 : f32
    %0 = vector.broadcast %cst : f32 to vector<24x3xf32>
    %c0 = arith.constant 0 : index
    %c0_0 = arith.constant 0 : index
    %1 = vector.load %arg7[%c0, %c0_0] : memref<304x3xf32, #tpu.memory_space<vmem>>, vector<24x3xf32>
    tpu.vector_store %arg7[%c0, %c0_0], %0 {strides = array<i32>} : memref<304x3xf32, #tpu.memory_space<vmem>>, vector<24x3xf32>,
    %cst_1 = arith.constant 0.000000e+00 : f32
    %2 = vector.broadcast %cst_1 : f32 to vector<24x3xf32>
    %c280 = arith.constant 280 : index
    %c0_2 = arith.constant 0 : index
    %3 = vector.load %arg7[%c280, %c0_2] : memref<304x3xf32, #tpu.memory_space<vmem>>, vector<24x3xf32>
    tpu.vector_store %arg7[%c280, %c0_2], %2 {strides = array<i32>} : memref<304x3xf32, #tpu.memory_space<vmem>>, vector<24x3xf32>,
    %c0_3 = arith.constant 0 : index
    %c0_4 = arith.constant 0 : index
    %c0_5 = arith.constant 0 : index
    %4 = vector.load %arg1[%c0_3, %c0_4, %c0_5] : memref<1x256x3xf32, #tpu.memory_space<vmem>>, vector<1x256x3xf32>
    %5 = vector.shape_cast %4 : vector<1x256x3xf32> to vector<256x3xf32>
    %c24 = arith.constant 24 : index
    %c0_6 = arith.constant 0 : index
    %6 = vector.load %arg7[%c24, %c0_6] : memref<304x3xf32, #tpu.memory_space<vmem>>, vector<256x3xf32>
    tpu.vector_store %arg7[%c24, %c0_6], %5 {strides = array<i32>} : memref<304x3xf32, #tpu.memory_space<vmem>>, vector<256x3xf32>,
    %7 = tpu.iota {dimensions = array<i32: 0>} : vector<256x1xi32>
    %c16_i32 = arith.constant 16 : i32
    %c0_i32 = arith.constant 0 : i32
    %8 = arith.cmpi eq, %c16_i32, %c0_i32 : i32
    %c1_i32 = arith.constant 1 : i32
    %9 = arith.select %8, %c1_i32, %c16_i32 : i32
    %10 = vector.broadcast %9 : i32 to vector<256x1xi32>
    %11 = arith.remsi %7, %10 : vector<256x1xi32>
    %c0_i32_7 = arith.constant 0 : i32
    %12 = vector.broadcast %c0_i32_7 : i32 to vector<256x1xi32>
    %13 = arith.cmpi ne, %11, %12 : vector<256x1xi32>
    %c0_i32_8 = arith.constant 0 : i32
    %14 = vector.broadcast %c0_i32_8 : i32 to vector<256x1xi32>
    %15 = arith.cmpi slt, %11, %14 : vector<256x1xi32>
    %c0_i32_9 = arith.constant 0 : i32
    %16 = arith.cmpi slt, %9, %c0_i32_9 : i32
    %17 = vector.broadcast %16 : i1 to vector<256x1xi1>
    %18 = vector.broadcast %17 : vector<256x1xi1> to vector<256x1xi1>
    %19 = arith.xori %15, %18 : vector<256x1xi1>
    %20 = arith.andi %19, %13 : vector<256x1xi1>
    %21 = vector.broadcast %9 : i32 to vector<256x1xi32>
    %22 = arith.addi %11, %21 : vector<256x1xi32>
    %23 = arith.select %20, %22, %11 : vector<256x1xi1>, vector<256x1xi32>
    %c1_i32_10 = arith.constant 1 : i32
    %24 = vector.broadcast %c1_i32_10 : i32 to vector<256x1xi32>
    %25 = arith.cmpi sge, %23, %24 : vector<256x1xi32>
    %c14_i32 = arith.constant 14 : i32
    %26 = vector.broadcast %c14_i32 : i32 to vector<256x1xi32>
    %27 = arith.cmpi sle, %23, %26 : vector<256x1xi32>
    %c7 = arith.constant 7 : index
    %c0_11 = arith.constant 0 : index
    %28 = vector.load %arg7[%c7, %c0_11] : memref<304x3xf32, #tpu.memory_space<vmem>>, vector<256x3xf32>
    %cst_12 = arith.constant 0.000000e+00 : f32
    %29 = vector.shape_cast %25 : vector<256x1xi1> to vector<256x1xi1>
    %30 = vector.broadcast %29 : vector<256x1xi1> to vector<256x3xi1>
    %31 = vector.broadcast %cst_12 : f32 to vector<256x3xf32>
    %32 = arith.select %30, %28, %31 : vector<256x3xi1>, vector<256x3xf32>
    %c8 = arith.constant 8 : index
    %c0_13 = arith.constant 0 : index
    %33 = vector.load %arg7[%c8, %c0_13] : memref<304x3xf32, #tpu.memory_space<vmem>>, vector<256x3xf32>
    %c9 = arith.constant 9 : index
    %c0_14 = arith.constant 0 : index
    %34 = vector.load %arg7[%c9, %c0_14] : memref<304x3xf32, #tpu.memory_space<vmem>>, vector<256x3xf32>
    %cst_15 = arith.constant 0.000000e+00 : f32
    %35 = vector.shape_cast %27 : vector<256x1xi1> to vector<256x1xi1>
    %36 = vector.broadcast %35 : vector<256x1xi1> to vector<256x3xi1>
    %37 = vector.broadcast %cst_15 : f32 to vector<256x3xf32>
    %38 = arith.select %36, %34, %37 : vector<256x3xi1>, vector<256x3xf32>
    %c23 = arith.constant 23 : index
    %c0_16 = arith.constant 0 : index
    %39 = vector.load %arg7[%c23, %c0_16] : memref<304x3xf32, #tpu.memory_space<vmem>>, vector<256x3xf32>
    %cst_17 = arith.constant 0.000000e+00 : f32
    %40 = vector.shape_cast %25 : vector<256x1xi1> to vector<256x1xi1>
    %41 = vector.broadcast %40 : vector<256x1xi1> to vector<256x3xi1>
    %42 = vector.broadcast %cst_17 : f32 to vector<256x3xf32>
    %43 = arith.select %41, %39, %42 : vector<256x3xi1>, vector<256x3xf32>
    %c24_18 = arith.constant 24 : index
    %c0_19 = arith.constant 0 : index
    %44 = vector.load %arg7[%c24_18, %c0_19] : memref<304x3xf32, #tpu.memory_space<vmem>>, vector<256x3xf32>
    %c25 = arith.constant 25 : index
    %c0_20 = arith.constant 0 : index
    %45 = vector.load %arg7[%c25, %c0_20] : memref<304x3xf32, #tpu.memory_space<vmem>>, vector<256x3xf32>
    %cst_21 = arith.constant 0.000000e+00 : f32
    %46 = vector.shape_cast %27 : vector<256x1xi1> to vector<256x1xi1>
    %47 = vector.broadcast %46 : vector<256x1xi1> to vector<256x3xi1>
    %48 = vector.broadcast %cst_21 : f32 to vector<256x3xf32>
    %49 = arith.select %47, %45, %48 : vector<256x3xi1>, vector<256x3xf32>
    %c39 = arith.constant 39 : index
    %c0_22 = arith.constant 0 : index
    %50 = vector.load %arg7[%c39, %c0_22] : memref<304x3xf32, #tpu.memory_space<vmem>>, vector<256x3xf32>
    %cst_23 = arith.constant 0.000000e+00 : f32
    %51 = vector.shape_cast %25 : vector<256x1xi1> to vector<256x1xi1>
    %52 = vector.broadcast %51 : vector<256x1xi1> to vector<256x3xi1>
    %53 = vector.broadcast %cst_23 : f32 to vector<256x3xf32>
    %54 = arith.select %52, %50, %53 : vector<256x3xi1>, vector<256x3xf32>
    %c40 = arith.constant 40 : index
    %c0_24 = arith.constant 0 : index
    %55 = vector.load %arg7[%c40, %c0_24] : memref<304x3xf32, #tpu.memory_space<vmem>>, vector<256x3xf32>
    %c41 = arith.constant 41 : index
    %c0_25 = arith.constant 0 : index
    %56 = vector.load %arg7[%c41, %c0_25] : memref<304x3xf32, #tpu.memory_space<vmem>>, vector<256x3xf32>
    %cst_26 = arith.constant 0.000000e+00 : f32
    %57 = vector.shape_cast %27 : vector<256x1xi1> to vector<256x1xi1>
    %58 = vector.broadcast %57 : vector<256x1xi1> to vector<256x3xi1>
    %59 = vector.broadcast %cst_26 : f32 to vector<256x3xf32>
    %60 = arith.select %58, %56, %59 : vector<256x3xi1>, vector<256x3xf32>
    %cst_27 = arith.constant 0.000000e+00 : f32
    %61 = vector.broadcast %cst_27 : f32 to vector<256x101xf32>
    %62 = tpu.concatenate %32, %33, %38, %43, %44, %49, %54, %55, %60, %61 in 1 : vector<256x3xf32>, vector<256x3xf32>, vector<256x3xf32>, vector<256x3xf32>, vector<256x3xf32>, vector<256x3xf32>, vector<256x3xf32>, vector<256x3xf32>, vector<256x3xf32>, vector<256x101xf32> -> vector<256x128xf32>
    %c0_28 = arith.constant 0 : index
    %c0_29 = arith.constant 0 : index
    %63 = vector.load %arg2[%c0_28, %c0_29] : memref<128x16xf32, #tpu.memory_space<vmem>>, vector<128x16xf32>
    %cst_30 = arith.constant dense<0.000000e+00> : vector<256x16xf32>
    %64 = tpu.matmul %62, %63, %cst_30 {dimension_numbers = #tpu.dot_dimension_numbers<[1], [0], [0], [1], [0, 0, 1, 1], [], []>} : vector<256x128xf32>, vector<128x16xf32>, vector<256x16xf32> -> vector<256x16xf32>
    %c0_31 = arith.constant 0 : index
    %c0_32 = arith.constant 0 : index
    %65 = vector.load %arg3[%c0_31, %c0_32] : memref<1x16xf32, #tpu.memory_space<vmem>>, vector<1x16xf32>
    %66 = vector.broadcast %65 : vector<1x16xf32> to vector<256x16xf32>
    %67 = arith.addf %64, %66 : vector<256x16xf32>
    %cst_33 = arith.constant 0.000000e+00 : f32
    %68 = vector.broadcast %cst_33 : f32 to vector<256x16xf32>
    %69 = arith.maximumf %67, %68 : vector<256x16xf32>
    %70 = vector.shape_cast %69 : vector<256x16xf32> to vector<8x2x8x2x16xf32>
    %cst_34 = arith.constant dense<0xFF800000> : vector<8x2x8x16xf32>
    %71 = vector.multi_reduction <maximumf>, %70, %cst_34 [3] : vector<8x2x8x2x16xf32> to vector<8x2x8x16xf32>
    %cst_35 = arith.constant dense<0xFF800000> : vector<8x8x16xf32>
    %72 = vector.multi_reduction <maximumf>, %71, %cst_35 [1] : vector<8x2x8x16xf32> to vector<8x8x16xf32>
    %73 = vector.shape_cast %72 : vector<8x8x16xf32> to vector<64x16xf32>
    %cst_36 = arith.constant 0.000000e+00 : f32
    %74 = vector.broadcast %cst_36 : f32 to vector<16x16xf32>
    %c0_37 = arith.constant 0 : index
    %c0_38 = arith.constant 0 : index
    %75 = vector.load %arg8[%c0_37, %c0_38] : memref<96x16xf32, #tpu.memory_space<vmem>>, vector<16x16xf32>
    tpu.vector_store %arg8[%c0_37, %c0_38], %74 {strides = array<i32>} : memref<96x16xf32, #tpu.memory_space<vmem>>, vector<16x16xf32>,
    %cst_39 = arith.constant 0.000000e+00 : f32
    %76 = vector.broadcast %cst_39 : f32 to vector<16x16xf32>
    %c80 = arith.constant 80 : index
    %c0_40 = arith.constant 0 : index
    %77 = vector.load %arg8[%c80, %c0_40] : memref<96x16xf32, #tpu.memory_space<vmem>>, vector<16x16xf32>
    tpu.vector_store %arg8[%c80, %c0_40], %76 {strides = array<i32>} : memref<96x16xf32, #tpu.memory_space<vmem>>, vector<16x16xf32>,
    %c16 = arith.constant 16 : index
    %c0_41 = arith.constant 0 : index
    %78 = vector.load %arg8[%c16, %c0_41] : memref<96x16xf32, #tpu.memory_space<vmem>>, vector<64x16xf32>
    tpu.vector_store %arg8[%c16, %c0_41], %73 {strides = array<i32>} : memref<96x16xf32, #tpu.memory_space<vmem>>, vector<64x16xf32>,
    %79 = tpu.iota {dimensions = array<i32: 0>} : vector<64x1xi32>
    %c8_i32 = arith.constant 8 : i32
    %c0_i32_42 = arith.constant 0 : i32
    %80 = arith.cmpi eq, %c8_i32, %c0_i32_42 : i32
    %c1_i32_43 = arith.constant 1 : i32
    %81 = arith.select %80, %c1_i32_43, %c8_i32 : i32
    %82 = vector.broadcast %81 : i32 to vector<64x1xi32>
    %83 = arith.remsi %79, %82 : vector<64x1xi32>
    %c0_i32_44 = arith.constant 0 : i32
    %84 = vector.broadcast %c0_i32_44 : i32 to vector<64x1xi32>
    %85 = arith.cmpi ne, %83, %84 : vector<64x1xi32>
    %c0_i32_45 = arith.constant 0 : i32
    %86 = vector.broadcast %c0_i32_45 : i32 to vector<64x1xi32>
    %87 = arith.cmpi slt, %83, %86 : vector<64x1xi32>
    %c0_i32_46 = arith.constant 0 : i32
    %88 = arith.cmpi slt, %81, %c0_i32_46 : i32
    %89 = vector.broadcast %88 : i1 to vector<64x1xi1>
    %90 = vector.broadcast %89 : vector<64x1xi1> to vector<64x1xi1>
    %91 = arith.xori %87, %90 : vector<64x1xi1>
    %92 = arith.andi %91, %85 : vector<64x1xi1>
    %93 = vector.broadcast %81 : i32 to vector<64x1xi32>
    %94 = arith.addi %83, %93 : vector<64x1xi32>
    %95 = arith.select %92, %94, %83 : vector<64x1xi1>, vector<64x1xi32>
    %c1_i32_47 = arith.constant 1 : i32
    %96 = vector.broadcast %c1_i32_47 : i32 to vector<64x1xi32>
    %97 = arith.cmpi sge, %95, %96 : vector<64x1xi32>
    %c6_i32 = arith.constant 6 : i32
    %98 = vector.broadcast %c6_i32 : i32 to vector<64x1xi32>
    %99 = arith.cmpi sle, %95, %98 : vector<64x1xi32>
    %c7_48 = arith.constant 7 : index
    %c0_49 = arith.constant 0 : index
    %100 = vector.load %arg8[%c7_48, %c0_49] : memref<96x16xf32, #tpu.memory_space<vmem>>, vector<64x16xf32>
    %cst_50 = arith.constant 0.000000e+00 : f32
    %101 = vector.shape_cast %97 : vector<64x1xi1> to vector<64x1xi1>
    %102 = vector.broadcast %101 : vector<64x1xi1> to vector<64x16xi1>
    %103 = vector.broadcast %cst_50 : f32 to vector<64x16xf32>
    %104 = arith.select %102, %100, %103 : vector<64x16xi1>, vector<64x16xf32>
    %c8_51 = arith.constant 8 : index
    %c0_52 = arith.constant 0 : index
    %105 = vector.load %arg8[%c8_51, %c0_52] : memref<96x16xf32, #tpu.memory_space<vmem>>, vector<64x16xf32>
    %c9_53 = arith.constant 9 : index
    %c0_54 = arith.constant 0 : index
    %106 = vector.load %arg8[%c9_53, %c0_54] : memref<96x16xf32, #tpu.memory_space<vmem>>, vector<64x16xf32>
    %cst_55 = arith.constant 0.000000e+00 : f32
    %107 = vector.shape_cast %99 : vector<64x1xi1> to vector<64x1xi1>
    %108 = vector.broadcast %107 : vector<64x1xi1> to vector<64x16xi1>
    %109 = vector.broadcast %cst_55 : f32 to vector<64x16xf32>
    %110 = arith.select %108, %106, %109 : vector<64x16xi1>, vector<64x16xf32>
    %c15 = arith.constant 15 : index
    %c0_56 = arith.constant 0 : index
    %111 = vector.load %arg8[%c15, %c0_56] : memref<96x16xf32, #tpu.memory_space<vmem>>, vector<64x16xf32>
    %cst_57 = arith.constant 0.000000e+00 : f32
    %112 = vector.shape_cast %97 : vector<64x1xi1> to vector<64x1xi1>
    %113 = vector.broadcast %112 : vector<64x1xi1> to vector<64x16xi1>
    %114 = vector.broadcast %cst_57 : f32 to vector<64x16xf32>
    %115 = arith.select %113, %111, %114 : vector<64x16xi1>, vector<64x16xf32>
    %c16_58 = arith.constant 16 : index
    %c0_59 = arith.constant 0 : index
    %116 = vector.load %arg8[%c16_58, %c0_59] : memref<96x16xf32, #tpu.memory_space<vmem>>, vector<64x16xf32>
    %c17 = arith.constant 17 : index
    %c0_60 = arith.constant 0 : index
    %117 = vector.load %arg8[%c17, %c0_60] : memref<96x16xf32, #tpu.memory_space<vmem>>, vector<64x16xf32>
    %cst_61 = arith.constant 0.000000e+00 : f32
    %118 = vector.shape_cast %99 : vector<64x1xi1> to vector<64x1xi1>
    %119 = vector.broadcast %118 : vector<64x1xi1> to vector<64x16xi1>
    %120 = vector.broadcast %cst_61 : f32 to vector<64x16xf32>
    %121 = arith.select %119, %117, %120 : vector<64x16xi1>, vector<64x16xf32>
    %c23_62 = arith.constant 23 : index
    %c0_63 = arith.constant 0 : index
    %122 = vector.load %arg8[%c23_62, %c0_63] : memref<96x16xf32, #tpu.memory_space<vmem>>, vector<64x16xf32>
    %cst_64 = arith.constant 0.000000e+00 : f32
    %123 = vector.shape_cast %97 : vector<64x1xi1> to vector<64x1xi1>
    %124 = vector.broadcast %123 : vector<64x1xi1> to vector<64x16xi1>
    %125 = vector.broadcast %cst_64 : f32 to vector<64x16xf32>
    %126 = arith.select %124, %122, %125 : vector<64x16xi1>, vector<64x16xf32>
    %c24_65 = arith.constant 24 : index
    %c0_66 = arith.constant 0 : index
    %127 = vector.load %arg8[%c24_65, %c0_66] : memref<96x16xf32, #tpu.memory_space<vmem>>, vector<64x16xf32>
    %c25_67 = arith.constant 25 : index
    %c0_68 = arith.constant 0 : index
    %128 = vector.load %arg8[%c25_67, %c0_68] : memref<96x16xf32, #tpu.memory_space<vmem>>, vector<64x16xf32>
    %cst_69 = arith.constant 0.000000e+00 : f32
    %129 = vector.shape_cast %99 : vector<64x1xi1> to vector<64x1xi1>
    %130 = vector.broadcast %129 : vector<64x1xi1> to vector<64x16xi1>
    %131 = vector.broadcast %cst_69 : f32 to vector<64x16xf32>
    %132 = arith.select %130, %128, %131 : vector<64x16xi1>, vector<64x16xf32>
    %cst_70 = arith.constant 0.000000e+00 : f32
    %133 = vector.broadcast %cst_70 : f32 to vector<64x112xf32>
    %134 = tpu.concatenate %104, %105, %110, %115, %116, %121, %126, %127, %132, %133 in 1 : vector<64x16xf32>, vector<64x16xf32>, vector<64x16xf32>, vector<64x16xf32>, vector<64x16xf32>, vector<64x16xf32>, vector<64x16xf32>, vector<64x16xf32>, vector<64x16xf32>, vector<64x112xf32> -> vector<64x256xf32>
    %c0_71 = arith.constant 0 : index
    %c0_72 = arith.constant 0 : index
    %135 = vector.load %arg4[%c0_71, %c0_72] : memref<256x32xf32, #tpu.memory_space<vmem>>, vector<256x32xf32>
    %cst_73 = arith.constant dense<0.000000e+00> : vector<64x32xf32>
    %136 = tpu.matmul %134, %135, %cst_73 {dimension_numbers = #tpu.dot_dimension_numbers<[1], [0], [0], [1], [0, 0, 1, 1], [], []>} : vector<64x256xf32>, vector<256x32xf32>, vector<64x32xf32> -> vector<64x32xf32>
    %c0_74 = arith.constant 0 : index
    %c0_75 = arith.constant 0 : index
    %137 = vector.load %arg5[%c0_74, %c0_75] : memref<1x32xf32, #tpu.memory_space<vmem>>, vector<1x32xf32>
    %138 = vector.broadcast %137 : vector<1x32xf32> to vector<64x32xf32>
    %139 = arith.addf %136, %138 : vector<64x32xf32>
    %cst_76 = arith.constant 0.000000e+00 : f32
    %140 = vector.broadcast %cst_76 : f32 to vector<64x32xf32>
    %141 = arith.maximumf %139, %140 : vector<64x32xf32>
    %142 = vector.shape_cast %141 : vector<64x32xf32> to vector<4x2x4x2x32xf32>
    %cst_77 = arith.constant dense<0xFF800000> : vector<4x2x4x32xf32>
    %143 = vector.multi_reduction <maximumf>, %142, %cst_77 [3] : vector<4x2x4x2x32xf32> to vector<4x2x4x32xf32>
    %cst_78 = arith.constant dense<0xFF800000> : vector<4x4x32xf32>
    %144 = vector.multi_reduction <maximumf>, %143, %cst_78 [1] : vector<4x2x4x32xf32> to vector<4x4x32xf32>
    %145 = vector.shape_cast %144 : vector<4x4x32xf32> to vector<16x32xf32>
    %c0_79 = arith.constant 0 : index
    %c0_80 = arith.constant 0 : index
    %c0_81 = arith.constant 0 : index
    %146 = vector.load %arg6[%c0_79, %c0_80, %c0_81] : memref<1x16x32xf32, #tpu.memory_space<vmem>>, vector<1x16x32xf32>
    %147 = vector.shape_cast %146 : vector<1x16x32xf32> to vector<16x32xf32>
    %148 = vector.shape_cast %145 : vector<16x32xf32> to vector<1x16x32xf32>
    tpu.vector_store %arg6[%c0_79, %c0_80, %c0_81], %148 {strides = array<i32>} : memref<1x16x32xf32, #tpu.memory_space<vmem>>, vector<1x16x32xf32>,
    return
  }
  func.func @transform_0(%arg0: i32) -> (i32, i32, i32) {
    %c0_i32 = arith.constant 0 : i32
    %c0_i32_0 = arith.constant 0 : i32
    %c0_i32_1 = arith.constant 0 : i32
    return %arg0, %c0_i32, %c0_i32_0 : i32, i32, i32
  }
  func.func @transform_1(%arg0: i32) -> (i32, i32) {
    %c0_i32 = arith.constant 0 : i32
    %c0_i32_0 = arith.constant 0 : i32
    %c0_i32_1 = arith.constant 0 : i32
    return %c0_i32, %c0_i32_0 : i32, i32
  }
  func.func @transform_2(%arg0: i32) -> (i32, i32) {
    %c0_i32 = arith.constant 0 : i32
    %c0_i32_0 = arith.constant 0 : i32
    %c0_i32_1 = arith.constant 0 : i32
    return %c0_i32, %c0_i32_0 : i32, i32
  }
  func.func @transform_3(%arg0: i32) -> (i32, i32) {
    %c0_i32 = arith.constant 0 : i32
    %c0_i32_0 = arith.constant 0 : i32
    %c0_i32_1 = arith.constant 0 : i32
    return %c0_i32, %c0_i32_0 : i32, i32
  }
  func.func @transform_4(%arg0: i32) -> (i32, i32) {
    %c0_i32 = arith.constant 0 : i32
    %c0_i32_0 = arith.constant 0 : i32
    %c0_i32_1 = arith.constant 0 : i32
    return %c0_i32, %c0_i32_0 : i32, i32
  }
  func.func @transform_5(%arg0: i32) -> (i32, i32, i32) {
    %c0_i32 = arith.constant 0 : i32
    %c0_i32_0 = arith.constant 0 : i32
    %c0_i32_1 = arith.constant 0 : i32
    return %arg0, %c0_i32, %c0_i32_0 : i32, i32, i32
  }
}

module attributes {stable_mosaic.version = 11 : i64} {
  func.func @fc_softmax_kernel(%arg0: i32, %arg1: memref<2x512xf32, #tpu.memory_space<vmem>>, %arg2: memref<512x128xf32, #tpu.memory_space<vmem>>, %arg3: memref<1x128xf32, #tpu.memory_space<vmem>>, %arg4: memref<2x128xf32, #tpu.memory_space<vmem>>) attributes {dimension_semantics = [#tpu.dimension_semantics<arbitrary>], iteration_bounds = array<i64: 1>, scalar_prefetch = 0 : i64, scratch_operands = 0 : i64, tpu.core_type = #tpu.core_type<tc>, window_params = [{pipeline_mode = #tpu.pipeline_mode<synchronous>, transform_indices = @transform_0, window_bounds = array<i64: 2, 512>}, {pipeline_mode = #tpu.pipeline_mode<synchronous>, transform_indices = @transform_1, window_bounds = array<i64: 512, 128>}, {pipeline_mode = #tpu.pipeline_mode<synchronous>, transform_indices = @transform_2, window_bounds = array<i64: 1, 128>}, {pipeline_mode = #tpu.pipeline_mode<synchronous>, transform_indices = @transform_3, window_bounds = array<i64: 2, 128>}]} {
    %c0 = arith.constant 0 : index
    %c0_0 = arith.constant 0 : index
    %0 = vector.load %arg1[%c0, %c0_0] : memref<2x512xf32, #tpu.memory_space<vmem>>, vector<2x512xf32>
    %c0_1 = arith.constant 0 : index
    %c0_2 = arith.constant 0 : index
    %1 = vector.load %arg2[%c0_1, %c0_2] : memref<512x128xf32, #tpu.memory_space<vmem>>, vector<512x128xf32>
    %cst = arith.constant dense<0.000000e+00> : vector<2x128xf32>
    %2 = tpu.matmul %0, %1, %cst {dimension_numbers = #tpu.dot_dimension_numbers<[1], [0], [0], [1], [0, 0, 1, 1], [], []>} : vector<2x512xf32>, vector<512x128xf32>, vector<2x128xf32> -> vector<2x128xf32>
    %c0_3 = arith.constant 0 : index
    %c0_4 = arith.constant 0 : index
    %3 = vector.load %arg3[%c0_3, %c0_4] : memref<1x128xf32, #tpu.memory_space<vmem>>, vector<1x128xf32>
    %4 = vector.broadcast %3 : vector<1x128xf32> to vector<2x128xf32>
    %5 = arith.addf %2, %4 : vector<2x128xf32>
    %cst_5 = arith.constant dense<0xFF800000> : vector<2xf32>
    %6 = vector.multi_reduction <maximumf>, %5, %cst_5 [1] : vector<2x128xf32> to vector<2xf32>
    %7 = vector.shape_cast %6 : vector<2xf32> to vector<2x1xf32>
    %8 = vector.broadcast %7 : vector<2x1xf32> to vector<2x128xf32>
    %9 = arith.subf %5, %8 : vector<2x128xf32>
    %10 = math.exp %9 : vector<2x128xf32>
    %cst_6 = arith.constant dense<0.000000e+00> : vector<2xf32>
    %11 = vector.multi_reduction <add>, %10, %cst_6 [1] : vector<2x128xf32> to vector<2xf32>
    %12 = vector.shape_cast %11 : vector<2xf32> to vector<2x1xf32>
    %13 = vector.broadcast %12 : vector<2x1xf32> to vector<2x128xf32>
    %14 = arith.divf %10, %13 : vector<2x128xf32>
    %c0_7 = arith.constant 0 : index
    %c0_8 = arith.constant 0 : index
    %15 = vector.load %arg4[%c0_7, %c0_8] : memref<2x128xf32, #tpu.memory_space<vmem>>, vector<2x128xf32>
    tpu.vector_store %arg4[%c0_7, %c0_8], %14 {strides = array<i32>} : memref<2x128xf32, #tpu.memory_space<vmem>>, vector<2x128xf32>,
    return
  }
  func.func @transform_0(%arg0: i32) -> (i32, i32) {
    %c0_i32 = arith.constant 0 : i32
    %c0_i32_0 = arith.constant 0 : i32
    %c0_i32_1 = arith.constant 0 : i32
    return %c0_i32, %c0_i32_0 : i32, i32
  }
  func.func @transform_1(%arg0: i32) -> (i32, i32) {
    %c0_i32 = arith.constant 0 : i32
    %c0_i32_0 = arith.constant 0 : i32
    %c0_i32_1 = arith.constant 0 : i32
    return %c0_i32, %c0_i32_0 : i32, i32
  }
  func.func @transform_2(%arg0: i32) -> (i32, i32) {
    %c0_i32 = arith.constant 0 : i32
    %c0_i32_0 = arith.constant 0 : i32
    %c0_i32_1 = arith.constant 0 : i32
    return %c0_i32, %c0_i32_0 : i32, i32
  }
  func.func @transform_3(%arg0: i32) -> (i32, i32) {
    %c0_i32 = arith.constant 0 : i32
    %c0_i32_0 = arith.constant 0 : i32
    %c0_i32_1 = arith.constant 0 : i32
    return %c0_i32, %c0_i32_0 : i32, i32
  }
}

</mosaic_0001>

<bundles_post_ra>
// kernel: cnn_forward.3
= control target key start
LH: loop header
LB: loop body
LE: loop exit
PB: predicated region body
PF: predicated region fallthrough
CT: control target
= control target key end

     0   :  { %v442_v47 = vmov 1983009808   ;;  %v92_v49 = vlaneseq  ;;  %s674_s0 = inlined_call_operand.vmem [shape: f32[2,512], index: 0, kind: input, shape index: {}]   ;;  %s675_s1 = inlined_call_operand.vmem [shape: f32[512,128], index: 1, kind: input, shape index: {}]   ;;  %s676_s2 = inlined_call_operand.vmem [shape: f32[1,128], index: 2, kind: input, shape index: {}]   ;;  %s677_s3 = inlined_call_operand.hbm [shape: f32[2,128], index: 3, kind: output, shape index: {}]  }
   0x1   :  { %v32_v0 = vld [vmem:[%s675_s1 + $0x80] sm:$0xff]  ;;  %v33_v1 = vld [vmem:[%s675_s1 + $0x88] sm:$0xff]  ;;  %v34_v11 = vld [vmem:[%s675_s1 + $0x90] sm:$0xff]  ;;  %v90_v48 = vunpack.c.l.s4 %v442_v47 }
   0x2   :  { %v16_v2 = vld [vmem:[%s675_s1] sm:$0xff]  ;;  %v347_v3 = vpack.c.bf16 %v33_v1, %v32_v0  ;;  %v17_v4 = vld [vmem:[%s675_s1 + $0x8] sm:$0xff]  ;;  %v35_v13 = vld [vmem:[%s675_s1 + $0x98] sm:$0xff]  ;;  %v93_v0 = vshrl.u32 %v92_v49, 7 }
   0x3   :  { %v64_v5 = vld [vmem:[%s675_s1 + $0x180] sm:$0xff]  ;;  %v65_v6 = vld [vmem:[%s675_s1 + $0x188] sm:$0xff]  ;;  %v349_v7 = vpack.c.bf16 %v17_v4, %v16_v2  ;;  %v18_v14 = vld [vmem:[%s675_s1 + $0x10] sm:$0xff]  ;;  %v351_v16 = vpack.c.bf16 %v35_v13, %v34_v11  ;;  %v91_v63 = vunpack.c.0.s8 %v90_v48 }
   0x4   :  { %v379_v8 = vpack.c.bf16 %v65_v6, %v64_v5  ;;  %v48_v9 = vld [vmem:[%s675_s1 + $0x100] sm:$0xff]  ;;  %v49_v10 = vld [vmem:[%s675_s1 + $0x108] sm:$0xff]  ;;  %348 = vmatprep.subr.bf16.mxu0 %v347_v3  ;;  %v19_v15 = vld [vmem:[%s675_s1 + $0x18] sm:$0xff] }
   0x5   :  { %v381_v12 = vpack.c.bf16 %v49_v10, %v48_v9  ;;  %350 = vmatpush3.bf16.msra.mxu0 %v349_v7  ;;  %v353_v17 = vpack.c.bf16 %v19_v15, %v18_v14  ;;  %v66_v18 = vld [vmem:[%s675_s1 + $0x190] sm:$0xff]  ;;  %v67_v19 = vld [vmem:[%s675_s1 + $0x198] sm:$0xff]  ;;  %v36_v23 = vld [vmem:[%s675_s1 + $0xa0] sm:$0xff]  ;;  %v94_v13 = vsub.s32 %v91_v63, %v93_v0 }
   0x6   :  { %380 = vmatprep.subr.bf16.mxu1 %v379_v8  ;;  %v50_v20 = vld [vmem:[%s675_s1 + $0x110] sm:$0xff]  ;;  %v383_v21 = vpack.c.bf16 %v67_v19, %v66_v18  ;;  %v51_v22 = vld [vmem:[%s675_s1 + $0x118] sm:$0xff]  ;;  %v37_v24 = vld [vmem:[%s675_s1 + $0xa8] sm:$0xff]  ;;  %352 = vmatprep.subr.bf16.mxu0 %v351_v16 }
   0x7   :  { %382 = vmatpush3.bf16.msra.mxu1 %v381_v12  ;;  %v385_v25 = vpack.c.bf16 %v51_v22, %v50_v20  ;;  %v355_v26 = vpack.c.bf16 %v37_v24, %v36_v23  ;;  %v20_v27 = vld [vmem:[%s675_s1 + $0x20] sm:$0xff]  ;;  %v21_v28 = vld [vmem:[%s675_s1 + $0x28] sm:$0xff]  ;;  %v38_v35 = vld [vmem:[%s675_s1 + $0xb0] sm:$0xff] }
   0x8   :  { %v68_v29 = vld [vmem:[%s675_s1 + $0x1a0] sm:$0xff]  ;;  %384 = vmatprep.subr.bf16.mxu1 %v383_v21  ;;  %v69_v30 = vld [vmem:[%s675_s1 + $0x1a8] sm:$0xff]  ;;  %v357_v33 = vpack.c.bf16 %v21_v28, %v20_v27  ;;  %v39_v36 = vld [vmem:[%s675_s1 + $0xb8] sm:$0xff] }
   0x9   :  { %v52_v31 = vld [vmem:[%s675_s1 + $0x120] sm:$0xff]  ;;  %v53_v32 = vld [vmem:[%s675_s1 + $0x128] sm:$0xff]  ;;  %354 = vmatpush3.bf16.msra.mxu0 %v353_v17  ;;  %v387_v34 = vpack.c.bf16 %v69_v30, %v68_v29  ;;  %v22_v37 = vld [vmem:[%s675_s1 + $0x30] sm:$0xff]  ;;  %v359_v39 = vpack.c.bf16 %v39_v36, %v38_v35 }
   0xa   :  { %356 = vmatprep.subr.bf16.mxu0 %v355_v26  ;;  %v389_v38 = vpack.c.bf16 %v53_v32, %v52_v31  ;;  %v23_v40 = vld [vmem:[%s675_s1 + $0x38] sm:$0xff]  ;;  %v70_v41 = vld [vmem:[%s675_s1 + $0x1b0] sm:$0xff]  ;;  %v40_v46 = vld [vmem:[%s675_s1 + $0xc0] sm:$0xff] }
   0xb   :  { %386 = vmatpush3.bf16.msra.mxu1 %v385_v25  ;;  %v71_v42 = vld [vmem:[%s675_s1 + $0x1b8] sm:$0xff]  ;;  %v54_v44 = vld [vmem:[%s675_s1 + $0x130] sm:$0xff]  ;;  %v41_v50 = vld [vmem:[%s675_s1 + $0xc8] sm:$0xff]  ;;  %v361_v51 = vpack.c.bf16 %v23_v40, %v22_v37 }
   0xc   :  { %388 = vmatprep.subr.bf16.mxu1 %v387_v34  ;;  %v391_v43 = vpack.c.bf16 %v71_v42, %v70_v41  ;;  %v55_v45 = vld [vmem:[%s675_s1 + $0x138] sm:$0xff]  ;;  %v72_v52 = vld [vmem:[%s675_s1 + $0x1c0] sm:$0xff]  ;;  %v73_v53 = vld [vmem:[%s675_s1 + $0x1c8] sm:$0xff]  ;;  %v363_v55 = vpack.c.bf16 %v41_v50, %v40_v46 }
   0xd   :  { %358 = vmatpush3.bf16.msra.mxu0 %v357_v33  ;;  %v393_v54 = vpack.c.bf16 %v55_v45, %v54_v44  ;;  %v24_v56 = vld [vmem:[%s675_s1 + $0x40] sm:$0xff]  ;;  %v25_v57 = vld [vmem:[%s675_s1 + $0x48] sm:$0xff]  ;;  %v395_v59 = vpack.c.bf16 %v73_v53, %v72_v52  ;;  %v42_v61 = vld [vmem:[%s675_s1 + $0xd0] sm:$0xff] }
   0xe   :  { %360 = vmatprep.subr.bf16.mxu0 %v359_v39  ;;  %v56_v58 = vld [vmem:[%s675_s1 + $0x140] sm:$0xff]  ;;  %v57_v60 = vld [vmem:[%s675_s1 + $0x148] sm:$0xff]  ;;  %v43_v62 = vld [vmem:[%s675_s1 + $0xd8] sm:$0xff]  ;;  %v365_v3 = vpack.c.bf16 %v25_v57, %v24_v56 }
   0xf   :  { %390 = vmatpush3.bf16.msra.mxu1 %v389_v38  ;;  %v74_v1 = vld [vmem:[%s675_s1 + $0x1d0] sm:$0xff]  ;;  %v75_v2 = vld [vmem:[%s675_s1 + $0x1d8] sm:$0xff]  ;;  %v397_v4 = vpack.c.bf16 %v57_v60, %v56_v58  ;;  %v367_v5 = vpack.c.bf16 %v43_v62, %v42_v61  ;;  %v44_v11 = vld [vmem:[%s675_s1 + $0xe0] sm:$0xff] }
  0x10   :  { %392 = vmatprep.subr.bf16.mxu1 %v391_v43  ;;  %v26_v6 = vld [vmem:[%s675_s1 + $0x50] sm:$0xff]  ;;  %v27_v7 = vld [vmem:[%s675_s1 + $0x58] sm:$0xff]  ;;  %v399_v9 = vpack.c.bf16 %v75_v2, %v74_v1  ;;  %v45_v12 = vld [vmem:[%s675_s1 + $0xe8] sm:$0xff] }
  0x11   :  { %362 = vmatpush3.bf16.msra.mxu0 %v361_v51  ;;  %v58_v8 = vld [vmem:[%s675_s1 + $0x150] sm:$0xff]  ;;  %v59_v10 = vld [vmem:[%s675_s1 + $0x158] sm:$0xff]  ;;  %v76_v14 = vld [vmem:[%s675_s1 + $0x1e0] sm:$0xff]  ;;  %v369_v16 = vpack.c.bf16 %v27_v7, %v26_v6  ;;  %v371_v20 = vpack.c.bf16 %v45_v12, %v44_v11 }
  0x12   :  { %364 = vmatprep.subr.bf16.mxu0 %v363_v55  ;;  %v77_v15 = vld [vmem:[%s675_s1 + $0x1e8] sm:$0xff]  ;;  %v28_v17 = vld [vmem:[%s675_s1 + $0x60] sm:$0xff]  ;;  %v401_v19 = vpack.c.bf16 %v59_v10, %v58_v8 }
  0x13   :  { %394 = vmatpush3.bf16.msra.mxu1 %v393_v54  ;;  %v29_v18 = vld [vmem:[%s675_s1 + $0x68] sm:$0xff]  ;;  %v60_v21 = vld [vmem:[%s675_s1 + $0x160] sm:$0xff] }
  0x14   :  { %396 = vmatprep.subr.bf16.mxu1 %v395_v59  ;;  %v15_v22 = vld [vmem:[%s674_s0] sm:$0xff] }
  0x15   :  { %366 = vmatpush3.bf16.msra.mxu0 %v365_v3 }
  0x16   :  { %368 = vmatprep.subr.bf16.mxu0 %v367_v5 }
  0x17   :  { %398 = vmatpush3.bf16.msra.mxu1 %v397_v4 }
  0x18   :  { %8 = vsyncpa [#allocation3], 0  ;;  %400 = vmatprep.subr.bf16.mxu1 %v399_v9  ;;  %v403_v23 = vpack.c.bf16 %v77_v15, %v76_v14  ;;  %v61_v24 = vld [vmem:[%s675_s1 + $0x168] sm:$0xff]  ;;  %v46_v25 = vld [vmem:[%s675_s1 + $0xf0] sm:$0xff]  ;;  %v95_v27 = vrot.slane %v15_v22, %v94_v13  ;;  %v88_v28 = vcombine.high %v15_v22, %v15_v22  ;;  %v373_v31 = vpack.c.bf16 %v29_v18, %v28_v17 }
  0x19   :  { %v47_v26 = vld [vmem:[%s675_s1 + $0xf8] sm:$0xff]  ;;  %v78_v29 = vld [vmem:[%s675_s1 + $0x1f0] sm:$0xff]  ;;  %370 = vmatpush3.bf16.msra.mxu0 %v369_v16  ;;  %v405_v34 = vpack.c.bf16 %v61_v24, %v60_v21  ;;  %v276_v45 = vld [vmem:[%s676_s2] ss:$0 sm:$0xff]  ;;  %vm249_vm0 = vcmask 1041408  }
  0x1a   :  { %v79_v30 = vld [vmem:[%s675_s1 + $0x1f8] sm:$0xff]  ;;  %v103_v32 = vcombine.high %v95_v27, %v95_v27  ;;  %v102_v33 = vrot.slane %v88_v28, %v94_v13  ;;  %372 = vmatprep.subr.bf16.mxu0 %v371_v20  ;;  %v375_v35 = vpack.c.bf16 %v47_v26, %v46_v25  ;;  %v30_v36 = vld [vmem:[%s675_s1 + $0x70] sm:$0xff] }
  0x1b   :  { %402 = vmatpush3.bf16.msra.mxu1 %v401_v19  ;;  %v31_v37 = vld [vmem:[%s675_s1 + $0x78] sm:$0xff]  ;;  %v407_v38 = vpack.c.bf16 %v79_v30, %v78_v29  ;;  %v62_v39 = vld [vmem:[%s675_s1 + $0x170] sm:$0xff] }
  0x1c   :  { %404 = vmatprep.subr.bf16.mxu1 %v403_v23  ;;  %v63_v40 = vld [vmem:[%s675_s1 + $0x178] sm:$0xff]  ;;  %173 = vmatprep.mubr.f32.mxu0 %v103_v32  ;;  %v104_v41 = vcombine.high %v102_v33, %v102_v33  ;;  %v377_v42 = vpack.c.bf16 %v31_v37, %v30_v36  ;;  %s443_s1 = smov [#allocation2]  }
  0x1d   :  { %374 = vmatpush3.bf16.msra.mxu0 %v373_v31  ;;  %v409_v43 = vpack.c.bf16 %v63_v40, %v62_v39  ;;  %s268_s2 = sshll.u32 %s443_s1, 4  ;;  %s269_s2 = int_to_ptr.vmem [resolvable:$true] %s268_s2 }
  0x1e   :  { %243 = vmatprep.mubr.f32.mxu1 %v104_v41  ;;  %376 = vmatprep.subr.bf16.mxu0 %v375_v35  ;;  %s418_s8 = scalar_lea.vmem %s269_s2, 32  ;;  %p423_p1 = scmp.lt.s32.totalorder %s269_s2, %s269_s2 }
  0x1f   :  { %406 = vmatpush3.bf16.msra.mxu1 %v405_v34  ;;  %p419_p0 = scmp.ne.s32.totalorder %s269_s2, %s418_s8  ;;  %p424_p2 = scmp.lt.s32.totalorder %s418_s8, %s418_s8 }
  0x20   :  { %408 = vmatprep.subr.bf16.mxu1 %v407_v38 }
  0x21   :  { %378 = vmatpush3.bf16.msra.mxu0 %v377_v42  ;;  %p425_p3 = por %p424_p2, %p423_p1 }
  0x23   :  { %410 = vmatpush3.bf16.msra.mxu1 %v409_v43  ;;  %p426_p4 = pnand %p425_p3, %p419_p0 }
  0x24   :  { %174 = vmatmul.mubr.f32.vlgmr.msra.gmra.mrb[0].mxu0 %v95_v27 }
  0x26   :  { %244 = vmatmul.mubr.f32.vlgmr.msra.gmra.mrb[0].mxu1 %v102_v33 }
  0xf7   :  { %v309_v44 = vpop.f32.mrb[0].mxu0 }
  0xf8   :  { %v310_v46 = vpop.f32.mrb[1].mxu0 }
  0xf9   :  { %v344_v47 = vpop.f32.mrb[0].mxu1  ;;  %v311_v48 = vadd.f32 %v310_v46, %v309_v44 }
  0xfa   :  { %v345_v49 = vpop.f32.mrb[1].mxu1 }
  0xfb   :  { %v346_v50 = vadd.f32 %v345_v49, %v344_v47  ;;  %v176_v51 = vadd.f32 %v311_v48, %v276_v45 }
  0xfd   :  { %v246_v52 = vadd.f32 %v346_v50, %v176_v51 }
  0xff   :  { %v250_v53 = vsel %vm249_vm0, %v246_v52, -inf }
 0x100   :  { %251 = vmax.xlane.f32.xlu0 %v250_v53 }
 0x18d   :  { %v252_v54 = vpop.xlane.xlu0 %251 }
 0x18e   :  { %v253_v55 = vsub.f32 %v246_v52, %v252_v54 }
 0x190   :  { %v254_v56 = vmul.f32 1.442695, %v253_v55 }
 0x192   :  { %414 = vpow2.f32 %v254_v56 }
 0x19c   :  { %v415_v57 = vpop.eup %414 }
 0x19d   :  { %v256_v58 = vsel %vm249_vm0, %v415_v57, 0.0 }
 0x19e   :  { %257 = vadd.xlane.f32.xlu0 %v256_v58 }
 0x22b   :  { %v258_v59 = vpop.xlane.xlu0 %257 }
 0x22c   :  { %416 = vrcp.f32 %v258_v59 }
 0x236   :  { %v417_v60 = vpop.eup %416 }
 0x237   :  { %v260_v61 = vmul.f32 %v417_v60, %v415_v57 }
 0x239   :  { %261 = vst [vmem:[#allocation2] sm:$0x3] %v260_v61 }
 0x23a   :  { %429 = shalt.err (!%p426_p4)
}
 0x23b   :  { %s430_s11 = scalar_lea.hbm %s677_s3, 32 }
 0x23c   :  { %p431_p5 = scmp.ne.s32.totalorder %s677_s3, %s430_s11  ;;  %p434_p6 = scmp.lt.u32.totalorder %s430_s11, %s677_s3 }
 0x23e   :  { %p436_p7 = pnand %p434_p6, %p431_p5 }
 0x240   :  { %439 = shalt.err (!%p436_p7)
}
 0x241   :  { %271 = dma.vmem_to_hbm [thread:$0]  %s269_s2, 32, %s677_s3, [#allocation3]  }
 0x242   :  { %440 = dma.done.wait [#allocation3], 32  }
 0x243   :  { %441 = vsyncadd [#allocation3], 4294967264 }
 0x244   :  { %275 = vsyncpa [#allocation3], 1 }

// kernel: cnn_forward.2
= control target key start
LH: loop header
LB: loop body
LE: loop exit
PB: predicated region body
PF: predicated region fallthrough
CT: control target
= control target key end

     0   :  { %s6408_s18 = smov 0   ;;  %s9461_s0 = inlined_call_operand.vmem [shape: f32[2,256,3], index: 0, kind: input, shape index: {}]   ;;  %s9462_s1 = inlined_call_operand.vmem [shape: f32[128,16], index: 1, kind: input, shape index: {}]   ;;  %s9463_s2 = inlined_call_operand.vmem [shape: f32[1,16], index: 2, kind: input, shape index: {}]   ;;  %s9464_s3 = inlined_call_operand.vmem [shape: f32[256,32], index: 3, kind: input, shape index: {}]   ;;  %s9465_s4 = inlined_call_operand.vmem [shape: f32[1,32], index: 4, kind: input, shape index: {}]   ;;  %s9466_s5 = inlined_call_operand.vmem [shape: f32[2,16,32], index: 5, kind: output, shape index: {}]  }
   0x1 LB: > { %s5878_s19 = sadd.s32 4294967295, %s6359_s18   ;;  %p5882_p0 = scmp.ge.s32.totalorder %s6359_s18, 1  ;;  %s6359_s18 = sphi %s6408_s18, %s15_s18  }
   0x2   : > { %p187_p1 = scmp.lt.s32.totalorder %s6359_s18, 3 }
   0x4   : > { %p188_p2 = pnand %p5882_p0, %p187_p1 }
   0x6   : > { %191 = sbr.rel (%p188_p2) target bundleno = 1308 (0x51c), region = 40 }
   0xd   : > { %vm9488_vm0 = vcmask 23552   ;;  %v6361_v0 = vmov 0.0   ;;  %p215_p3 = scmp.lt.s32.totalorder %s5878_s19, 1  ;;  %v296_v1 = vlaneseq  ;;  %s6362_s24 = smov 3   ;;  %v2465_v18 = vld [vmem:[%s9462_s1] sm:$0xff]  ;;  %v2466_v20 = vld [vmem:[%s9462_s1 + $0x8] sm:$0xff] }
   0xe   : > { %227 = vst.msk [vmem:[#allocation2 + $0x8] sm:$0xff] %vm9488_vm0, %v6361_v0  ;;  %226 = vst.msk [vmem:[#allocation2] sm:$0xff] %vm9488_vm0, %v6361_v0  ;;  %s6363_s25 = smov 6   ;;  %v6117_v24 = vpack.c.bf16 %v2466_v20, %v2465_v18  ;;  %s6364_s30 = smov 9   ;;  %v2467_v37 = vld [vmem:[%s9462_s1 + $0x10] sm:$0xff]  ;;  %v2468_v38 = vld [vmem:[%s9462_s1 + $0x18] sm:$0xff] }
   0xf   : > { %228 = vst.msk [vmem:[#allocation2 + $0x10] sm:$0xff] %vm9488_vm0, %v6361_v0  ;;  %229 = vst.msk [vmem:[#allocation2 + $0x118] sm:$0xff] %vm9488_vm0, %v6361_v0  ;;  %s10102_s19 = smov (!%p215_p3, %s5878_s19), 1  ;;  %v6436_v2 = vshrl.u32 %v296_v1, 7  ;;  %s6365_s6 = smov 12   ;;  %v6121_v40 = vpack.c.bf16 %v2468_v38, %v2467_v37  ;;  %v2469_v41 = vld [vmem:[%s9462_s1 + $0x20] sm:$0xff] }
  0x10   : > { %230 = vst.msk [vmem:[#allocation2 + $0x120] sm:$0xff] %vm9488_vm0, %v6361_v0  ;;  %231 = vst.msk [vmem:[#allocation2 + $0x128] sm:$0xff] %vm9488_vm0, %v6361_v0  ;;  %s5931_s20 = sshll.u32 %s10102_s19, 8  ;;  %6118 = vmatprep.subr.bf16.mxu0 %v6117_v24  ;;  %s6366_s7 = smov 15   ;;  %v2470_v42 = vld [vmem:[%s9462_s1 + $0x28] sm:$0xff]  ;;  %v2471_v45 = vld [vmem:[%s9462_s1 + $0x30] sm:$0xff] }
  0x11   : > { %s6434_s23 = scalar_lea.vmem %s9461_s0, %s5931_s20  ;;  %v6444_v8 = vadd.s32 16, %v6436_v2  ;;  %v6468_v19 = vadd.s32 8, %v6436_v2  ;;  %v333_v23 = vand.u32 15, %v6436_v2  ;;  %6120 = vmatpush3.bf16.msra.mxu0 %v6117_v24  ;;  %v6504_v35 = vadd.s32 24, %v6436_v2  ;;  %v2472_v46 = vld [vmem:[%s9462_s1 + $0x38] sm:$0xff]  ;;  %v2473_v53 = vld [vmem:[%s9462_s1 + $0x40] sm:$0xff] }
  0x12   : > { %v232_v3 = vld [vmem:[%s6434_s23] sm:$0xff]  ;;  %v233_v4 = vld [vmem:[%s6434_s23 + $0x8] sm:$0xff]  ;;  %v234_v5 = vld [vmem:[%s6434_s23 + $0x10] sm:$0xff]  ;;  %v6125_v44 = vpack.c.bf16 %v2470_v42, %v2469_v41  ;;  %6122 = vmatprep.subr.bf16.mxu0 %v6121_v40  ;;  %v6129_v50 = vpack.c.bf16 %v2472_v46, %v2471_v45  ;;  %v6542_v52 = vadd.s32 32, %v6436_v2  ;;  %s6367_s11 = smov 18   ;;  %s6368_s22 = smov 21  }
  0x13   : > { %264 = vst.msk [vmem:[#allocation2 + $0x18] sm:$0xff] %vm9488_vm0, %v232_v3  ;;  %265 = vst.msk [vmem:[#allocation2 + $0x20] sm:$0xff] %vm9488_vm0, %v233_v4  ;;  %v235_v9 = vld [vmem:[%s6434_s23 + $0x18] sm:$0xff]  ;;  %v236_v10 = vld [vmem:[%s6434_s23 + $0x20] sm:$0xff]  ;;  %v347_v15 = vand.u32 15, %v6444_v8  ;;  %v340_v29 = vand.u32 15, %v6468_v19 }
  0x14   : > { %9505 = vst [vmem:[#allocation4_spill] sm:$0xff] %v6444_v8  ;;  %266 = vst.msk [vmem:[#allocation2 + $0x28] sm:$0xff] %vm9488_vm0, %v234_v5  ;;  %v237_v12 = vld [vmem:[%s6434_s23 + $0x28] sm:$0xff]  ;;  %v238_v13 = vld [vmem:[%s6434_s23 + $0x30] sm:$0xff]  ;;  %vm6490_vm2 = vcmp.ge.s32.totalorder %v333_v23, 1  ;;  %v354_v43 = vand.u32 15, %v6504_v35 }
  0x15   : > { %v905_v6 = vld [vmem:[#allocation2 + $0x8] sm:$0xff]  ;;  %267 = vst.msk [vmem:[#allocation2 + $0x30] sm:$0xff] %vm9488_vm0, %v235_v9  ;;  %268 = vst.msk [vmem:[#allocation2 + $0x38] sm:$0xff] %vm9488_vm0, %v236_v10  ;;  %v239_v14 = vld [vmem:[%s6434_s23 + $0x38] sm:$0xff]  ;;  %vm6479_vm1 = vcmp.ge.s32.totalorder %v347_v15, 1  ;;  %vm6499_vm3 = vcmp.le.s32.totalorder %v340_v29, 14  ;;  %6124 = vmatpush3.bf16.msra.mxu0 %v6121_v40 }
  0x16   : > { %v937_v7 = vld [vmem:[#allocation2 + $0x9] sm:$0xff]  ;;  %1237 = vrot.lane.b32.xlu0 %v905_v6, %s6362_s24  ;;  %269 = vst.msk [vmem:[#allocation2 + $0x40] sm:$0xff] %vm9488_vm0, %v237_v12  ;;  %270 = vst.msk [vmem:[#allocation2 + $0x48] sm:$0xff] %vm9488_vm0, %v238_v13  ;;  %v240_v16 = vld [vmem:[%s6434_s23 + $0x40] sm:$0xff]  ;;  %6126 = vmatprep.subr.bf16.mxu0 %v6125_v44  ;;  %vm6537_vm4 = vcmp.le.s32.totalorder %v354_v43, 14  ;;  %v361_v59 = vand.u32 15, %v6542_v52 }
  0x17   : > { %1365 = vrot.lane.b32.xlu1 %v937_v7, %s6363_s25  ;;  %v906_v11 = vld [vmem:[#allocation2 + $0x10] sm:$0xff]  ;;  %271 = vst.msk [vmem:[#allocation2 + $0x50] sm:$0xff] %vm9488_vm0, %v239_v14  ;;  %272 = vst.msk [vmem:[#allocation2 + $0x58] sm:$0xff] %vm9488_vm0, %v240_v16  ;;  %v241_v17 = vld [vmem:[%s6434_s23 + $0x48] sm:$0xff]  ;;  %s6369_s26 = smov 24   ;;  %vm9480_vm11 = vcmask 48128  }
  0x18   : > { %9506 = vst [vmem:[#allocation5_spill] sm:$0xff] %v6468_v19  ;;  %273 = vst.msk [vmem:[#allocation2 + $0x60] sm:$0xff] %vm9488_vm0, %v241_v17  ;;  %v242_v47 = vld [vmem:[%s6434_s23 + $0x50] sm:$0xff]  ;;  %v2474_v54 = vld [vmem:[%s9462_s1 + $0x48] sm:$0xff]  ;;  %vm6573_vm5 = vcmp.ge.s32.totalorder %v361_v59, 1  ;;  %v6605_v17 = vadd.s32 40, %v6436_v2 }
  0x19   : > { %9513 = vst [vmem:[#allocation6_spill] sm:$0xff] %v6504_v35  ;;  %274 = vst.msk [vmem:[#allocation2 + $0x68] sm:$0xff] %vm9488_vm0, %v242_v47  ;;  %6128 = vmatpush3.bf16.msra.mxu0 %v6125_v44  ;;  %v243_v56 = vld [vmem:[%s6434_s23 + $0x58] sm:$0xff]  ;;  %v6133_v58 = vpack.c.bf16 %v2474_v54, %v2473_v53  ;;  %v2475_v60 = vld [vmem:[%s9462_s1 + $0x50] sm:$0xff]  ;;  %v6662_v44 = vadd.s32 56, %v6436_v2  ;;  %vm9479_vm12 = vcmask 72704  }
  0x1a   : > { %1239 = vrot.lane.b32.xlu0 %v906_v11, %s6362_s24  ;;  %v6474_v21 = vld [vmem:[#allocation2 + $0x1f] sm:$0xff]  ;;  %v6483_v26 = vld [vmem:[#allocation2 + $0x17] sm:$0xff]  ;;  %9516 = vst [vmem:[#allocation7_spill] sm:$0xff] %v6542_v52  ;;  %6130 = vmatprep.subr.bf16.mxu0 %v6129_v50  ;;  %275 = vst.msk [vmem:[#allocation2 + $0x70] sm:$0xff] %vm9488_vm0, %v243_v56  ;;  %v368_v20 = vand.u32 15, %v6605_v17  ;;  %vm9481_vm13 = vcmask 97280  }
  0x1b   : > { %v907_v22 = vld [vmem:[#allocation2 + $0x18] sm:$0xff]  ;;  %1495 = vrot.lane.b32.xlu1 %v6474_v21, %s6364_s30  ;;  %v875_v27 = vsel %vm6479_vm1, %v6483_v26, 0.0  ;;  %v908_v28 = vld [vmem:[#allocation2 + $0x20] sm:$0xff]  ;;  %v1067_v32 = vsel %vm6490_vm2, %v6483_v26, 0.0  ;;  %v2478_v5 = vld [vmem:[%s9462_s1 + $0x68] sm:$0xff]  ;;  %9519 = vst [vmem:[#allocation8_spill] sm:$0xff] %v6605_v17 }
  0x1c   : > { %v939_v31 = vld [vmem:[#allocation2 + $0x19] sm:$0xff]  ;;  %v938_v34 = vld [vmem:[#allocation2 + $0x11] sm:$0xff]  ;;  %v940_v39 = vld [vmem:[#allocation2 + $0x21] sm:$0xff]  ;;  %vm6618_vm6 = vcmp.le.s32.totalorder %v368_v20, 14  ;;  %9525 = vst [vmem:[#allocation10_spill] sm:$0xff] %v6662_v44  ;;  %v382_v46 = vand.u32 15, %v6662_v44 }
  0x1d   : > { %v1034_v36 = vsel %vm6499_vm3, %v938_v34, 0.0  ;;  %v1104_v48 = vsel %vm6499_vm3, %v940_v39, 0.0  ;;  %v6535_v49 = vld [vmem:[#allocation2 + $0x27] sm:$0xff]  ;;  %v1036_v57 = vsel %vm6537_vm4, %v940_v39, 0.0  ;;  %v2476_v61 = vld [vmem:[%s9462_s1 + $0x58] sm:$0xff]  ;;  %6132 = vmatpush3.bf16.msra.mxu0 %v6129_v50  ;;  %v6571_v63 = vld [vmem:[#allocation2 + $0x2f] sm:$0xff] }
  0x1e   : > { %1591 = vrot.lane.b32.xlu0 %v907_v22, %s6365_s6  ;;  %v1137_v55 = vsel %vm6490_vm2, %v6535_v49, 0.0  ;;  %v1069_v62 = vsel %vm6479_vm1, %v6535_v49, 0.0  ;;  %6134 = vmatprep.subr.bf16.mxu0 %v6133_v58  ;;  %v6137_v1 = vpack.c.bf16 %v2476_v61, %v2475_v60  ;;  %v2477_v4 = vld [vmem:[%s9462_s1 + $0x60] sm:$0xff]  ;;  %v877_v6 = vsel %vm6573_vm5, %v6535_v49, 0.0  ;;  %v909_v7 = vld [vmem:[#allocation2 + $0x28] sm:$0xff]  ;;  %v2479_v10 = vld [vmem:[%s9462_s1 + $0x70] sm:$0xff] }
  0x1f   : > { %1241 = vrot.lane.b32.xlu1 %v907_v22, %s6362_s24  ;;  %v6141_v9 = vpack.c.bf16 %v2478_v5, %v2477_v4  ;;  %v2480_v11 = vld [vmem:[%s9462_s1 + $0x78] sm:$0xff]  ;;  %v910_v12 = vld [vmem:[#allocation2 + $0x30] sm:$0xff]  ;;  %v244_v15 = vld [vmem:[%s6434_s23 + $0x60] sm:$0xff]  ;;  %vm6675_vm8 = vcmp.le.s32.totalorder %v382_v46, 14  ;;  %v305_v4 = vadd.s32 64, %v6436_v2  ;;  %vm9469_vm15 = vcmask 121856  }
  0x20   : > { %v6145_v13 = vpack.c.bf16 %v2480_v11, %v2479_v10  ;;  %v941_v14 = vld [vmem:[#allocation2 + $0x29] sm:$0xff]  ;;  %276 = vst.msk [vmem:[#allocation2 + $0x78] sm:$0xff] %vm9488_vm0, %v244_v15  ;;  %v942_v16 = vld [vmem:[#allocation2 + $0x31] sm:$0xff]  ;;  %v912_v40 = vld [vmem:[#allocation2 + $0x40] sm:$0xff]  ;;  %s6374_s28 = smov 64   ;;  %s6375_s10 = smov 80  }
  0x21   : > { %6136 = vmatpush3.bf16.msra.mxu0 %v6133_v58  ;;  %v1174_v18 = vsel %vm6499_vm3, %v942_v16, 0.0  ;;  %v1106_v22 = vsel %vm6537_vm4, %v942_v16, 0.0  ;;  %v6616_v23 = vld [vmem:[#allocation2 + $0x37] sm:$0xff]  ;;  %v944_v43 = vld [vmem:[#allocation2 + $0x41] sm:$0xff]  ;;  %v6693_v56 = vld [vmem:[#allocation2 + $0x4f] sm:$0xff]  ;;  %s6376_s17 = smov 96  }
  0x22   : > { %1593 = vrot.lane.b32.xlu0 %v908_v28, %s6365_s6  ;;  %6138 = vmatprep.subr.bf16.mxu0 %v6137_v1  ;;  %v1139_v29 = vsel %vm6479_vm1, %v6616_v23, 0.0  ;;  %v1071_v34 = vsel %vm6573_vm5, %v6616_v23, 0.0  ;;  %v911_v39 = vld [vmem:[#allocation2 + $0x38] sm:$0xff]  ;;  %v246_v42 = vld [vmem:[%s6434_s23 + $0x70] sm:$0xff]  ;;  %v1176_v45 = vsel %vm6537_vm4, %v944_v43, 0.0  ;;  %v1108_v47 = vsel %vm6618_vm6, %v944_v43, 0.0 }
  0x23   : > { %1719 = vrot.lane.b32.xlu1 %v939_v31, %s6366_s7  ;;  %v943_v41 = vld [vmem:[#allocation2 + $0x39] sm:$0xff]  ;;  %278 = vst.msk [vmem:[#allocation2 + $0x88] sm:$0xff] %vm9488_vm0, %v246_v42  ;;  %v1040_v54 = vsel %vm6675_vm8, %v944_v43, 0.0  ;;  %v914_v58 = vld [vmem:[#allocation2 + $0x50] sm:$0xff]  ;;  %vm9498_vm4 = vcmask 171008  }
  0x24   : > { %v247_v53 = vld [vmem:[%s6434_s23 + $0x78] sm:$0xff]  ;;  %v945_v59 = vld [vmem:[#allocation2 + $0x49] sm:$0xff]  ;;  %v248_v60 = vld [vmem:[%s6434_s23 + $0x80] sm:$0xff] }
  0x25   : > { %6140 = vmatpush3.bf16.msra.mxu0 %v6137_v1  ;;  %279 = vst.msk [vmem:[#allocation2 + $0x90] sm:$0xff] %vm9488_vm0, %v247_v53  ;;  %280 = vst.msk [vmem:[#allocation2 + $0x98] sm:$0xff] %vm9488_vm0, %v248_v60  ;;  %v946_v61 = vld [vmem:[#allocation2 + $0x51] sm:$0xff]  ;;  %v916_v42 = vld [vmem:[#allocation2 + $0x60] sm:$0xff] }
  0x26   : > { %1493 = vrot.lane.b32.xlu0 %v1067_v32, %s6364_s30  ;;  %6142 = vmatprep.subr.bf16.mxu0 %v6141_v9  ;;  %v1038_v32 = vsel %vm6618_vm6, %v942_v16, 0.0  ;;  %v1178_v1 = vsel %vm6618_vm6, %v946_v61, 0.0  ;;  %v1110_v10 = vsel %vm6675_vm8, %v946_v61, 0.0  ;;  %v6717_v11 = vld [vmem:[#allocation2 + $0x57] sm:$0xff]  ;;  %v249_v16 = vld [vmem:[%s6434_s23 + $0x88] sm:$0xff]  ;;  %vm9467_vm6 = vcmask 195584  }
  0x27   : > { %1367 = vrot.lane.b32.xlu1 %v1034_v36, %s6363_s25  ;;  %v6640_v36 = vld [vmem:[#allocation2 + $0x3f] sm:$0xff]  ;;  %281 = vst.msk [vmem:[#allocation2 + $0xa0] sm:$0xff] %vm9488_vm0, %v249_v16  ;;  %v777_v53 = vld [vmem:[#allocation2 + $0x7] sm:$0xff] }
  0x29   : > { %6144 = vmatpush3.bf16.msra.mxu0 %v6141_v9 }
  0x2a   : > { %1243 = vrot.lane.b32.xlu0 %v908_v28, %s6362_s24  ;;  %6146 = vmatprep.subr.bf16.mxu0 %v6145_v13  ;;  %v6623_v28 = vadd.s32 48, %v6436_v2 }
  0x2b   : > { %1369 = vrot.lane.b32.xlu1 %v939_v31, %s6363_s25  ;;  %v245_v31 = vld [vmem:[%s6434_s23 + $0x68] sm:$0xff] }
  0x2c   : > { %9522 = vst [vmem:[#allocation9_spill] sm:$0xff] %v6623_v28  ;;  %277 = vst.msk [vmem:[#allocation2 + $0x80] sm:$0xff] %vm9488_vm0, %v245_v31  ;;  %v375_v33 = vand.u32 15, %v6623_v28 }
  0x2d   : > { %6148 = vmatpush3.bf16.msra.mxu0 %v6145_v13 }
  0x2e   : > { %1721 = vrot.lane.b32.xlu0 %v1104_v48, %s6366_s7  ;;  %vm6642_vm7 = vcmp.ge.s32.totalorder %v375_v33, 1  ;;  %v6673_v48 = vld [vmem:[#allocation2 + $0x47] sm:$0xff] }
  0x2f   : > { %1847 = vrot.lane.b32.xlu1 %v1137_v55, %s6367_s11  ;;  %v879_v38 = vsel %vm6642_vm7, %v6616_v23, 0.0  ;;  %v1141_v51 = vsel %vm6573_vm5, %v6673_v48, 0.0  ;;  %v1073_v55 = vsel %vm6642_vm7, %v6673_v48, 0.0  ;;  %v1143_v15 = vsel %vm6642_vm7, %v6717_v11, 0.0 }
  0x32   : > { %1371 = vrot.lane.b32.xlu0 %v1036_v57, %s6363_s25  ;;  %v913_v57 = vld [vmem:[#allocation2 + $0x48] sm:$0xff] }
  0x33   : > { %1497 = vrot.lane.b32.xlu1 %v1069_v62, %s6364_s30  ;;  %v306_v62 = vadd.s32 72, %v6436_v2 }
  0x36   : > { %1849 = vrot.lane.b32.xlu0 %v6571_v63, %s6367_s11 }
  0x37   : > { %1945 = vrot.lane.b32.xlu1 %v909_v7, %s6368_s22 }
  0x3a   : > { %1499 = vrot.lane.b32.xlu0 %v6571_v63, %s6364_s30 }
  0x3b   : > { %1595 = vrot.lane.b32.xlu1 %v909_v7, %s6365_s6 }
  0x3e   : > { %1947 = vrot.lane.b32.xlu0 %v910_v12, %s6368_s22 }
  0x3f   : > { %2073 = vrot.lane.b32.xlu1 %v941_v14, %s6369_s26 }
  0x42   : > { %1245 = vrot.lane.b32.xlu0 %v909_v7, %s6362_s24  ;;  %v396_v7 = vand.u32 15, %v306_v62 }
  0x43   : > { %1597 = vrot.lane.b32.xlu1 %v910_v12, %s6365_s6 }
  0x44   : > { %vm6721_vm9 = vcmp.le.s32.totalorder %v396_v7, 14 }
  0x45   : > { %v1042_v20 = vsel %vm6721_vm9, %v946_v61, 0.0 }
  0x46   : > { %1723 = vrot.lane.b32.xlu0 %v941_v14, %s6366_s7 }
  0x47   : > { %2075 = vrot.lane.b32.xlu1 %v1174_v18, %s6369_s26 }
  0x4a   : > { %1247 = vrot.lane.b32.xlu0 %v910_v12, %s6362_s24  ;;  %v389_v12 = vand.u32 15, %v305_v4 }
  0x4b   : > { %1373 = vrot.lane.b32.xlu1 %v941_v14, %s6363_s25 }
  0x4c   : > { %vm6735_vm10 = vcmp.ge.s32.totalorder %v389_v12, 1  ;;  %v6788_v12 = vld [vmem:[#allocation2 + $0x67] sm:$0xff] }
  0x4e   : > { %1725 = vrot.lane.b32.xlu0 %v1106_v22, %s6366_s7 }
  0x4f   : > { %1851 = vrot.lane.b32.xlu1 %v1139_v29, %s6367_s11  ;;  %v1075_v29 = vsel %vm6735_vm10, %v6717_v11, 0.0 }
  0x52   : > { %1375 = vrot.lane.b32.xlu0 %v1038_v32, %s6363_s25  ;;  %v6747_v32 = vld [vmem:[#allocation2 + $0x5f] sm:$0xff] }
  0x53   : > { %1501 = vrot.lane.b32.xlu1 %v1071_v34, %s6364_s30  ;;  %v915_v34 = vld [vmem:[#allocation2 + $0x58] sm:$0xff] }
  0x56   : > { %1853 = vrot.lane.b32.xlu0 %v6640_v36, %s6367_s11 }
  0x57   : > { %1949 = vrot.lane.b32.xlu1 %v911_v39, %s6368_s22 }
  0x5a   : > { %1503 = vrot.lane.b32.xlu0 %v6640_v36, %s6364_s30 }
  0x5b   : > { %1599 = vrot.lane.b32.xlu1 %v911_v39, %s6365_s6 }
  0x5e   : > { %1951 = vrot.lane.b32.xlu0 %v912_v40, %s6368_s22 }
  0x5f   : > { %2077 = vrot.lane.b32.xlu1 %v943_v41, %s6369_s26 }
  0x62   : > { %1249 = vrot.lane.b32.xlu0 %v911_v39, %s6362_s24 }
  0x63   : > { %1601 = vrot.lane.b32.xlu1 %v912_v40, %s6365_s6 }
  0x66   : > { %1727 = vrot.lane.b32.xlu0 %v943_v41, %s6366_s7 }
  0x67   : > { %2079 = vrot.lane.b32.xlu1 %v1176_v45, %s6369_s26  ;;  %v947_v45 = vld [vmem:[#allocation2 + $0x59] sm:$0xff] }
  0x6a   : > { %1251 = vrot.lane.b32.xlu0 %v912_v40, %s6362_s24 }
  0x6b   : > { %1377 = vrot.lane.b32.xlu1 %v943_v41, %s6363_s25 }
  0x6e   : > { %1729 = vrot.lane.b32.xlu0 %v1108_v47, %s6366_s7  ;;  %v250_v47 = vld [vmem:[%s6434_s23 + $0x90] sm:$0xff] }
  0x6f   : > { %1855 = vrot.lane.b32.xlu1 %v1141_v51, %s6367_s11  ;;  %282 = vst.msk [vmem:[#allocation2 + $0xa8] sm:$0xff] %vm9488_vm0, %v250_v47 }
  0x72   : > { %1379 = vrot.lane.b32.xlu0 %v1040_v54, %s6363_s25 }
  0x73   : > { %1505 = vrot.lane.b32.xlu1 %v1073_v55, %s6364_s30  ;;  %v948_v55 = vld [vmem:[#allocation2 + $0x61] sm:$0xff] }
  0x74   : > { %v1180_v60 = vsel %vm6675_vm8, %v948_v55, 0.0  ;;  %vm9487_vm8 = vcmask 220160  }
  0x76   : > { %1857 = vrot.lane.b32.xlu0 %v6693_v56, %s6367_s11 }
  0x77   : > { %1953 = vrot.lane.b32.xlu1 %v913_v57, %s6368_s22 }
  0x7a   : > { %1507 = vrot.lane.b32.xlu0 %v6693_v56, %s6364_s30 }
  0x7b   : > { %1603 = vrot.lane.b32.xlu1 %v913_v57, %s6365_s6 }
  0x7e   : > { %1955 = vrot.lane.b32.xlu0 %v914_v58, %s6368_s22 }
  0x7f   : > { %2081 = vrot.lane.b32.xlu1 %v945_v59, %s6369_s26 }
  0x82   : > { %1253 = vrot.lane.b32.xlu0 %v913_v57, %s6362_s24  ;;  %v873_v57 = vsel %vm6490_vm2, %v777_v53, 0.0  ;;  %vm2333_vm2 = vcmask 146432  }
  0x83   : > { %1605 = vrot.lane.b32.xlu1 %v914_v58, %s6365_s6 }
  0x86   : > { %1731 = vrot.lane.b32.xlu0 %v945_v59, %s6366_s7 }
  0x87   : > { %2083 = vrot.lane.b32.xlu1 %v1178_v1, %s6369_s26  ;;  %v307_v1 = vadd.s32 80, %v6436_v2 }
  0x88   : > { %v1238_v5 = vpop.permute.xlu0 %1237 }
  0x89   : > { %v1366_v9 = vpop.permute.xlu1 %1365  ;;  %v2169_v61 = vsel %vm9488_vm0, %v873_v57, %v1238_v5  ;;  %v1112_v5 = vsel %vm6721_vm9, %v948_v55, 0.0 }
  0x8a   : > { %1255 = vrot.lane.b32.xlu0 %v914_v58, %s6362_s24  ;;  %v2202_v7 = vsel %vm9480_vm11, %v2169_v61, %v1366_v9  ;;  %v778_v9 = vld [vmem:[#allocation2 + $0xf] sm:$0xff] }
  0x8b   : > { %1381 = vrot.lane.b32.xlu1 %v945_v59, %s6363_s25  ;;  %v308_v59 = vadd.s32 88, %v6436_v2 }
  0x8c   : > { %v6719_v13 = vpop.permute.xlu0 %1239 }
  0x8d   : > { %v6731_v18 = vpop.permute.xlu1 %1495  ;;  %v410_v4 = vand.u32 15, %v308_v59 }
  0x8e   : > { %1733 = vrot.lane.b32.xlu0 %v1110_v10, %s6366_s7 }
  0x8f   : > { %1859 = vrot.lane.b32.xlu1 %v1143_v15, %s6367_s11  ;;  %v403_v15 = vand.u32 15, %v307_v1  ;;  %vm6792_vm14 = vcmp.le.s32.totalorder %v410_v4, 14 }
  0x90   : > { %v1592_v24 = vpop.permute.xlu0 %1591  ;;  %v1044_v47 = vsel %vm6792_vm14, %v948_v55, 0.0 }
  0x91   : > { %v6745_v31 = vpop.permute.xlu1 %1241  ;;  %vm6807_vm3 = vcmp.ge.s32.totalorder %v403_v15, 1 }
  0x92   : > { %1383 = vrot.lane.b32.xlu0 %v1042_v20, %s6363_s25 }
  0x93   : > { %1509 = vrot.lane.b32.xlu1 %v1075_v29, %s6364_s30 }
  0x94   : > { %v6749_v33 = vpop.permute.xlu0 %1593 }
  0x95   : > { %v1720_v39 = vpop.permute.xlu1 %1719 }
  0x96   : > { %1861 = vrot.lane.b32.xlu0 %v6747_v32, %s6367_s11 }
  0x97   : > { %1957 = vrot.lane.b32.xlu1 %v915_v34, %s6368_s22 }
  0x98   : > { %v1494_v40 = vpop.permute.xlu0 %1493 }
  0x99   : > { %v1368_v41 = vpop.permute.xlu1 %1367  ;;  %v2235_v50 = vsel %vm9479_vm12, %v2202_v7, %v1494_v40  ;;  %v251_v40 = vld [vmem:[%s6434_s23 + $0x98] sm:$0xff] }
  0x9a   : > { %1511 = vrot.lane.b32.xlu0 %v6747_v32, %s6364_s30  ;;  %v2268_v29 = vsel %vm9481_vm13, %v2235_v50, %v1592_v24  ;;  %283 = vst.msk [vmem:[#allocation2 + $0xb0] sm:$0xff] %vm9488_vm0, %v251_v40 }
  0x9b   : > { %1607 = vrot.lane.b32.xlu1 %v915_v34, %s6365_s6  ;;  %v2301_v57 = vsel %vm9469_vm15, %v2268_v29, %v1720_v39  ;;  %v918_v29 = vld [vmem:[#allocation2 + $0x70] sm:$0xff] }
  0x9c   : > { %v6757_v43 = vpop.permute.xlu0 %1243 }
  0x9d   : > { %v6761_v46 = vpop.permute.xlu1 %1369 }
  0x9e   : > { %1959 = vrot.lane.b32.xlu0 %v916_v42, %s6368_s22 }
  0x9f   : > { %2085 = vrot.lane.b32.xlu1 %v947_v45, %s6369_s26 }
  0xa0   : > { %v6764_v51 = vpop.permute.xlu0 %1721 }
  0xa1   : > { %v1848_v54 = vpop.permute.xlu1 %1847 }
  0xa2   : > { %1257 = vrot.lane.b32.xlu0 %v915_v34, %s6362_s24  ;;  %v1145_v34 = vsel %vm6735_vm10, %v6788_v12, 0.0  ;;  %v2334_v55 = vsel %vm2333_vm2, %v2301_v57, %v1848_v54  ;;  %v917_v54 = vld [vmem:[#allocation2 + $0x68] sm:$0xff] }
  0xa3   : > { %1609 = vrot.lane.b32.xlu1 %v916_v42, %s6365_s6 }
  0xa4   : > { %v6771_v58 = vpop.permute.xlu0 %1371 }
  0xa5   : > { %v6779_v62 = vpop.permute.xlu1 %1497 }
  0xa6   : > { %1735 = vrot.lane.b32.xlu0 %v947_v45, %s6366_s7 }
  0xa7   : > { %2087 = vrot.lane.b32.xlu1 %v1180_v60, %s6369_s26  ;;  %v1077_v60 = vsel %vm6807_vm3, %v6788_v12, 0.0 }
  0xa8   : > { %v1850_v30 = vpop.permute.xlu0 %1849 }
  0xa9   : > { %v1946_v10 = vpop.permute.xlu1 %1945 }
  0xaa   : > { %1259 = vrot.lane.b32.xlu0 %v916_v42, %s6362_s24  ;;  %v2367_v61 = vsel %vm9498_vm4, %v2334_v55, %v1946_v10 }
  0xab   : > { %1385 = vrot.lane.b32.xlu1 %v947_v45, %s6363_s25  ;;  %v2170_v45 = vsel %vm9488_vm0, %v778_v9, %v6719_v13  ;;  %v6823_v13 = vld [vmem:[#allocation2 + $0x6f] sm:$0xff] }
  0xac   : > { %v6790_v16 = vpop.permute.xlu0 %1499  ;;  %v2203_v59 = vsel %vm9480_vm11, %v2170_v45, %v1368_v41  ;;  %v950_v45 = vld [vmem:[#allocation2 + $0x71] sm:$0xff] }
  0xad   : > { %v6803_v42 = vpop.permute.xlu1 %1595  ;;  %v2236_v41 = vsel %vm9479_vm12, %v2203_v59, %v6731_v18  ;;  %v310_v59 = vadd.s32 104, %v6436_v2  ;;  %v1182_v55 = vsel %vm6721_vm9, %v950_v45, 0.0 }
  0xae   : > { %1737 = vrot.lane.b32.xlu0 %v1112_v5, %s6366_s7  ;;  %v2269_v50 = vsel %vm9481_vm13, %v2236_v41, %v6749_v33  ;;  %v949_v33 = vld [vmem:[#allocation2 + $0x69] sm:$0xff] }
  0xaf   : > { %1863 = vrot.lane.b32.xlu1 %v1145_v34, %s6367_s11  ;;  %v2302_v5 = vsel %vm9469_vm15, %v2269_v50, %v6764_v51  ;;  %v6871_v50 = vld [vmem:[#allocation2 + $0x77] sm:$0xff] }
  0xb0   : > { %v1948_v24 = vpop.permute.xlu0 %1947  ;;  %v2335_v18 = vsel %vm2333_vm2, %v2302_v5, %v1850_v30  ;;  %v252_v30 = vld [vmem:[%s6434_s23 + $0xa0] sm:$0xff] }
  0xb1   : > { %v2074_v1 = vpop.permute.xlu1 %2073  ;;  %v2368_v15 = vsel %vm9498_vm4, %v2335_v18, %v1948_v24  ;;  %284 = vst.msk [vmem:[#allocation2 + $0xb8] sm:$0xff] %vm9488_vm0, %v252_v30 }
  0xb2   : > { %1387 = vrot.lane.b32.xlu0 %v1044_v47, %s6363_s25  ;;  %v2400_v39 = vsel %vm9467_vm6, %v2367_v61, %v2074_v1  ;;  %v309_v61 = vadd.s32 96, %v6436_v2 }
  0xb3   : > { %1513 = vrot.lane.b32.xlu1 %v1077_v60, %s6364_s30  ;;  %6069 = vmatprep.mubr.msk.f32.mxu0 %vm9487_vm8, %v2400_v39  ;;  %v424_v39 = vand.u32 15, %v310_v59 }
  0xb4   : > { %v6826_v4 = vpop.permute.xlu0 %1245  ;;  %v417_v5 = vand.u32 15, %v309_v61  ;;  %v6914_v61 = vld [vmem:[#allocation2 + $0x7f] sm:$0xff] }
  0xb5   : > { %v6834_v7 = vpop.permute.xlu1 %1597  ;;  %vm6875_vm9 = vcmp.le.s32.totalorder %v424_v39, 14 }
  0xb6   : > { %1865 = vrot.lane.b32.xlu0 %v6823_v13, %s6367_s11  ;;  %v1046_v26 = vsel %vm6875_vm9, %v950_v45, 0.0  ;;  %vm6899_vm1 = vcmp.ge.s32.totalorder %v417_v5, 1 }
  0xb7   : > { %1961 = vrot.lane.b32.xlu1 %v917_v54, %s6368_s22 }
  0xb8   : > { %v1724_v10 = vpop.permute.xlu0 %1723 }
  0xb9   : > { %v2076_v9 = vpop.permute.xlu1 %2075 }
  0xba   : > { %1515 = vrot.lane.b32.xlu0 %v6823_v13, %s6364_s30  ;;  %v2401_v34 = vsel %vm9467_vm6, %v2368_v15, %v2076_v9  ;;  %v2171_v15 = vsel %vm9488_vm0, %v875_v27, %v6745_v31 }
  0xbb   : > { %1611 = vrot.lane.b32.xlu1 %v917_v54, %s6365_s6  ;;  %6070 = vmatmul.mubr.msk.f32.vlgmr.msra.gmra.mrb[0].mxu0 %vm9487_vm8, %v2401_v34  ;;  %v2204_v9 = vsel %vm9480_vm11, %v2171_v15, %v6761_v46  ;;  %v253_v34 = vld [vmem:[%s6434_s23 + $0xa8] sm:$0xff] }
  0xbc   : > { %v6846_v40 = vpop.permute.xlu0 %1247  ;;  %v2237_v30 = vsel %vm9479_vm12, %v2204_v9, %v6779_v62  ;;  %285 = vst.msk [vmem:[#allocation2 + $0xc0] sm:$0xff] %vm9488_vm0, %v253_v34 }
  0xbd   : > { %v6851_v51 = vpop.permute.xlu1 %1373  ;;  %v2270_v31 = vsel %vm9481_vm13, %v2237_v30, %v6803_v42 }
  0xbe   : > { %1963 = vrot.lane.b32.xlu0 %v918_v29, %s6368_s22 }
  0xbf   : > { %2089 = vrot.lane.b32.xlu1 %v949_v33, %s6369_s26 }
  0xc0   : > { %v1726_v47 = vpop.permute.xlu0 %1725 }
  0xc1   : > { %v1852_v24 = vpop.permute.xlu1 %1851 }
  0xc2   : > { %1261 = vrot.lane.b32.xlu0 %v917_v54, %s6362_s24  ;;  %v1114_v54 = vsel %vm6792_vm14, %v950_v45, 0.0  ;;  %v1079_v45 = vsel %vm6899_vm1, %v6871_v50, 0.0 }
  0xc3   : > { %1613 = vrot.lane.b32.xlu1 %v918_v29, %s6365_s6 }
  0xc4   : > { %v6857_v57 = vpop.permute.xlu0 %1375 }
  0xc5   : > { %v6864_v60 = vpop.permute.xlu1 %1501 }
  0xc6   : > { %1739 = vrot.lane.b32.xlu0 %v949_v33, %s6366_s7 }
  0xc7   : > { %2091 = vrot.lane.b32.xlu1 %v1182_v55, %s6369_s26 }
  0xc8   : > { %v1854_v1 = vpop.permute.xlu0 %1853 }
  0xc9   : > { %v1950_v41 = vpop.permute.xlu1 %1949 }
  0xca   : > { %1263 = vrot.lane.b32.xlu0 %v918_v29, %s6362_s24  ;;  %v1147_v29 = vsel %vm6807_vm3, %v6871_v50, 0.0 }
  0xcb   : > { %1389 = vrot.lane.b32.xlu1 %v949_v33, %s6363_s25  ;;  %v2303_v33 = vsel %vm9469_vm15, %v2270_v31, %v1724_v10  ;;  %v2172_v10 = vsel %vm9488_vm0, %v6474_v21, %v6757_v43 }
  0xcc   : > { %v6873_v14 = vpop.permute.xlu0 %1503  ;;  %v2336_v62 = vsel %vm2333_vm2, %v2303_v33, %v1852_v24  ;;  %v2205_v24 = vsel %vm9480_vm11, %v2172_v10, %v6771_v58 }
  0xcd   : > { %v6895_v25 = vpop.permute.xlu1 %1599  ;;  %v2369_v59 = vsel %vm9498_vm4, %v2336_v62, %v1950_v41  ;;  %v919_v41 = vld [vmem:[#allocation2 + $0x78] sm:$0xff]  ;;  %v312_v62 = vadd.s32 120, %v6436_v2 }
  0xce   : > { %1741 = vrot.lane.b32.xlu0 %v1114_v54, %s6366_s7  ;;  %v2238_v54 = vsel %vm9479_vm12, %v2205_v24, %v6790_v16  ;;  %v920_v16 = vld [vmem:[#allocation2 + $0x80] sm:$0xff] }
  0xcf   : > { %1867 = vrot.lane.b32.xlu1 %v1147_v29, %s6367_s11  ;;  %v2271_v15 = vsel %vm9481_vm13, %v2238_v54, %v6834_v7  ;;  %v951_v7 = vld [vmem:[#allocation2 + $0x79] sm:$0xff]  ;;  %v438_v10 = vand.u32 15, %v312_v62  ;;  %v6966_v54 = vld [vmem:[#allocation2 + $0x87] sm:$0xff] }
  0xd0   : > { %v1952_v46 = vpop.permute.xlu0 %1951  ;;  %v2304_v43 = vsel %vm9469_vm15, %v2271_v15, %v1726_v47 }
  0xd1   : > { %v2078_v55 = vpop.permute.xlu1 %2077  ;;  %v2337_v58 = vsel %vm2333_vm2, %v2304_v43, %v1854_v1  ;;  %v254_v1 = vld [vmem:[%s6434_s23 + $0xb0] sm:$0xff]  ;;  %v797_v43 = vld [vmem:[#allocation2 + $0xa7] sm:$0xff] }
  0xd2   : > { %1391 = vrot.lane.b32.xlu0 %v1046_v26, %s6363_s25  ;;  %v2402_v42 = vsel %vm9467_vm6, %v2369_v59, %v2078_v55  ;;  %v2370_v9 = vsel %vm9498_vm4, %v2337_v58, %v1952_v46  ;;  %286 = vst.msk [vmem:[#allocation2 + $0xc8] sm:$0xff] %vm9488_vm0, %v254_v1  ;;  %v952_v46 = vld [vmem:[#allocation2 + $0x81] sm:$0xff]  ;;  %v311_v55 = vadd.s32 112, %v6436_v2  ;;  %v2173_v58 = vsel %vm9488_vm0, %v877_v6, %v6826_v4 }
  0xd3   : > { %1517 = vrot.lane.b32.xlu1 %v1079_v45, %s6364_s30  ;;  %6072 = vmatprep.mubr.msk.f32.mxu0 %vm9487_vm8, %v2402_v42  ;;  %v1184_v45 = vsel %vm6792_vm14, %v952_v46, 0.0  ;;  %vm6970_vm14 = vcmp.le.s32.totalorder %v438_v10, 14  ;;  %v921_v10 = vld [vmem:[#allocation2 + $0x88] sm:$0xff] }
  0xd4   : > { %v6917_v39 = vpop.permute.xlu0 %1249  ;;  %v431_v15 = vand.u32 15, %v311_v55  ;;  %v1048_v49 = vsel %vm6970_vm14, %v952_v46, 0.0 }
  0xd5   : > { %v6930_v5 = vpop.permute.xlu1 %1601 }
  0xd6   : > { %1869 = vrot.lane.b32.xlu0 %v6914_v61, %s6367_s11  ;;  %vm6994_vm5 = vcmp.ge.s32.totalorder %v431_v15, 1 }
  0xd7   : > { %1965 = vrot.lane.b32.xlu1 %v919_v41, %s6368_s22  ;;  %v1081_v1 = vsel %vm6994_vm5, %v6966_v54, 0.0 }
  0xd8   : > { %v1728_v21 = vpop.permute.xlu0 %1727 }
  0xd9   : > { %v2080_v29 = vpop.permute.xlu1 %2079 }
  0xda   : > { %1519 = vrot.lane.b32.xlu0 %v6914_v61, %s6364_s30  ;;  %v2403_v34 = vsel %vm9467_vm6, %v2370_v9, %v2080_v29  ;;  %v2206_v9 = vsel %vm9480_vm11, %v2173_v58, %v6851_v51  ;;  %v1149_v29 = vsel %vm6899_vm1, %v6966_v54, 0.0 }
  0xdb   : > { %1615 = vrot.lane.b32.xlu1 %v919_v41, %s6365_s6  ;;  %6073 = vmatmul.mubr.msk.f32.gmra.mrb[2].mxu0 %vm9487_vm8, %v2403_v34  ;;  %v2239_v34 = vsel %vm9479_vm12, %v2206_v9, %v6864_v60 }
  0xdc   : > { %v6941_v30 = vpop.permute.xlu0 %1251  ;;  %v2272_v4 = vsel %vm9481_vm13, %v2239_v34, %v6895_v25 }
  0xdd   : > { %v6946_v47 = vpop.permute.xlu1 %1377 }
  0xde   : > { %1967 = vrot.lane.b32.xlu0 %v920_v16, %s6368_s22 }
  0xdf   : > { %2093 = vrot.lane.b32.xlu1 %v951_v7, %s6369_s26 }
  0xe0   : > { %v1730_v26 = vpop.permute.xlu0 %1729 }
  0xe1   : > { %v1856_v31 = vpop.permute.xlu1 %1855 }
  0xe2   : > { %1265 = vrot.lane.b32.xlu0 %v919_v41, %s6362_s24  ;;  %v1116_v41 = vsel %vm6875_vm9, %v952_v46, 0.0 }
  0xe3   : > { %1617 = vrot.lane.b32.xlu1 %v920_v16, %s6365_s6 }
  0xe4   : > { %v6952_v33 = vpop.permute.xlu0 %1379 }
  0xe5   : > { %v6959_v59 = vpop.permute.xlu1 %1505 }
  0xe6   : > { %1743 = vrot.lane.b32.xlu0 %v951_v7, %s6366_s7 }
  0xe7   : > { %2095 = vrot.lane.b32.xlu1 %v1184_v45, %s6369_s26  ;;  %v7009_v45 = vld [vmem:[#allocation2 + $0x8f] sm:$0xff] }
  0xe8   : > { %v1858_v42 = vpop.permute.xlu0 %1857 }
  0xe9   : > { %v1954_v24 = vpop.permute.xlu1 %1953 }
  0xea   : > { %1267 = vrot.lane.b32.xlu0 %v920_v16, %s6362_s24  ;;  %v255_v16 = vld [vmem:[%s6434_s23 + $0xb8] sm:$0xff] }
  0xeb   : > { %1393 = vrot.lane.b32.xlu1 %v951_v7, %s6363_s25  ;;  %287 = vst.msk [vmem:[#allocation2 + $0xd0] sm:$0xff] %vm9488_vm0, %v255_v16  ;;  %v2305_v7 = vsel %vm9469_vm15, %v2272_v4, %v1728_v21  ;;  %v2174_v21 = vsel %vm9488_vm0, %v6571_v63, %v6846_v40  ;;  %v954_v4 = vld [vmem:[#allocation2 + $0x91] sm:$0xff] }
  0xec   : > { %v6968_v20 = vpop.permute.xlu0 %1507  ;;  %v2338_v60 = vsel %vm2333_vm2, %v2305_v7, %v1856_v31  ;;  %v2207_v31 = vsel %vm9480_vm11, %v2174_v21, %v6857_v57  ;;  %v314_v7 = vadd.s32 136, %v6436_v2 }
  0xed   : > { %v6990_v3 = vpop.permute.xlu1 %1603  ;;  %v2371_v46 = vsel %vm9498_vm4, %v2338_v60, %v1954_v24  ;;  %v2240_v24 = vsel %vm9479_vm12, %v2207_v31, %v6873_v14  ;;  %v922_v14 = vld [vmem:[#allocation2 + $0x90] sm:$0xff]  ;;  %v1186_v60 = vsel %vm6875_vm9, %v954_v4, 0.0  ;;  %v1118_v31 = vsel %vm6970_vm14, %v954_v4, 0.0 }
  0xee   : > { %1745 = vrot.lane.b32.xlu0 %v1116_v41, %s6366_s7  ;;  %v2273_v15 = vsel %vm9481_vm13, %v2240_v24, %v6930_v5  ;;  %v953_v5 = vld [vmem:[#allocation2 + $0x89] sm:$0xff] }
  0xef   : > { %1871 = vrot.lane.b32.xlu1 %v1149_v29, %s6367_s11  ;;  %v2306_v40 = vsel %vm9469_vm15, %v2273_v15, %v1730_v26 }
  0xf0   : > { %v1956_v51 = vpop.permute.xlu0 %1955  ;;  %v2339_v57 = vsel %vm2333_vm2, %v2306_v40, %v1858_v42  ;;  %v256_v42 = vld [vmem:[%s6434_s23 + $0xc0] sm:$0xff]  ;;  %v2175_v40 = vsel %vm9488_vm0, %v879_v38, %v6917_v39 }
  0xf1   : > { %v2082_v62 = vpop.permute.xlu1 %2081  ;;  %v2372_v58 = vsel %vm9498_vm4, %v2339_v57, %v1956_v51  ;;  %288 = vst.msk [vmem:[#allocation2 + $0xd8] sm:$0xff] %vm9488_vm0, %v256_v42  ;;  %v2208_v57 = vsel %vm9480_vm11, %v2175_v40, %v6946_v47  ;;  %v924_v40 = vld [vmem:[#allocation2 + $0xa0] sm:$0xff] }
  0xf2   : > { %1395 = vrot.lane.b32.xlu0 %v1048_v49, %s6363_s25  ;;  %v2404_v25 = vsel %vm9467_vm6, %v2371_v46, %v2082_v62  ;;  %v313_v46 = vadd.s32 128, %v6436_v2 }
  0xf3   : > { %1521 = vrot.lane.b32.xlu1 %v1081_v1, %s6364_s30  ;;  %6075 = vmatprep.mubr.msk.f32.mxu0 %vm9487_vm8, %v2404_v25  ;;  %v452_v25 = vand.u32 15, %v314_v7 }
  0xf4   : > { %v7012_v55 = vpop.permute.xlu0 %1253  ;;  %v445_v24 = vand.u32 15, %v313_v46 }
  0xf5   : > { %v7025_v41 = vpop.permute.xlu1 %1605  ;;  %vm7065_vm9 = vcmp.le.s32.totalorder %v452_v25, 14 }
  0xf6   : > { %1873 = vrot.lane.b32.xlu0 %v7009_v45, %s6367_s11  ;;  %v1050_v23 = vsel %vm7065_vm9, %v954_v4, 0.0  ;;  %vm7088_vm7 = vcmp.ge.s32.totalorder %v445_v24, 1  ;;  %v796_v4 = vld [vmem:[#allocation2 + $0x9f] sm:$0xff] }
  0xf7   : > { %1969 = vrot.lane.b32.xlu1 %v921_v10, %s6368_s22 }
  0xf8   : > { %v1732_v63 = vpop.permute.xlu0 %1731 }
  0xf9   : > { %v2084_v9 = vpop.permute.xlu1 %2083 }
  0xfa   : > { %1523 = vrot.lane.b32.xlu0 %v7009_v45, %s6364_s30  ;;  %v2405_v29 = vsel %vm9467_vm6, %v2372_v58, %v2084_v9  ;;  %v2241_v9 = vsel %vm9479_vm12, %v2208_v57, %v6959_v59 }
  0xfb   : > { %1619 = vrot.lane.b32.xlu1 %v921_v10, %s6365_s6  ;;  %6076 = vmatmul.mubr.msk.f32.gmra.mrb[4].mxu0 %vm9487_vm8, %v2405_v29  ;;  %v2274_v38 = vsel %vm9481_vm13, %v2241_v9, %v6990_v3 }
  0xfc   : > { %v7036_v16 = vpop.permute.xlu0 %1255  ;;  %v2307_v47 = vsel %vm9469_vm15, %v2274_v38, %v1732_v63  ;;  %v2176_v63 = vsel %vm9488_vm0, %v6640_v36, %v6941_v30 }
  0xfd   : > { %v7041_v26 = vpop.permute.xlu1 %1381 }
  0xfe   : > { %1971 = vrot.lane.b32.xlu0 %v922_v14, %s6368_s22 }
  0xff   : > { %2097 = vrot.lane.b32.xlu1 %v953_v5, %s6369_s26 }
 0x100   : > { %v1734_v34 = vpop.permute.xlu0 %1733 }
 0x101   : > { %v1860_v49 = vpop.permute.xlu1 %1859 }
 0x102   : > { %1269 = vrot.lane.b32.xlu0 %v921_v10, %s6362_s24  ;;  %v7061_v10 = vld [vmem:[#allocation2 + $0x97] sm:$0xff]  ;;  %v2340_v29 = vsel %vm2333_vm2, %v2307_v47, %v1860_v49  ;;  %v2209_v49 = vsel %vm9480_vm11, %v2176_v63, %v6952_v33 }
 0x103   : > { %1621 = vrot.lane.b32.xlu1 %v922_v14, %s6365_s6  ;;  %v1151_v58 = vsel %vm6994_vm5, %v7061_v10, 0.0  ;;  %v1083_v59 = vsel %vm7088_vm7, %v7061_v10, 0.0  ;;  %v2242_v46 = vsel %vm9479_vm12, %v2209_v49, %v6968_v20  ;;  %v258_v49 = vld [vmem:[%s6434_s23 + $0xd0] sm:$0xff] }
 0x104   : > { %v7047_v51 = vpop.permute.xlu0 %1383  ;;  %290 = vst.msk [vmem:[#allocation2 + $0xe8] sm:$0xff] %vm9488_vm0, %v258_v49 }
 0x105   : > { %v7054_v1 = vpop.permute.xlu1 %1509 }
 0x106   : > { %1747 = vrot.lane.b32.xlu0 %v953_v5, %s6366_s7 }
 0x107   : > { %2099 = vrot.lane.b32.xlu1 %v1186_v60, %s6369_s26  ;;  %v923_v60 = vld [vmem:[#allocation2 + $0x98] sm:$0xff] }
 0x108   : > { %v1862_v62 = vpop.permute.xlu0 %1861 }
 0x109   : > { %v1958_v21 = vpop.permute.xlu1 %1957 }
 0x10a   : > { %1271 = vrot.lane.b32.xlu0 %v922_v14, %s6362_s24 }
 0x10b   : > { %1397 = vrot.lane.b32.xlu1 %v953_v5, %s6363_s25  ;;  %v2373_v5 = vsel %vm9498_vm4, %v2340_v29, %v1958_v21  ;;  %v2275_v21 = vsel %vm9481_vm13, %v2242_v46, %v7025_v41  ;;  %v955_v41 = vld [vmem:[#allocation2 + $0x99] sm:$0xff]  ;;  %v801_v46 = vld [vmem:[#allocation2 + $0xc7] sm:$0xff] }
 0x10c   : > { %v7063_v15 = vpop.permute.xlu0 %1511  ;;  %v2308_v30 = vsel %vm9469_vm15, %v2275_v21, %v1734_v34  ;;  %v1153_v21 = vsel %vm7088_vm7, %v797_v43, 0.0 }
 0x10d   : > { %v7084_v14 = vpop.permute.xlu1 %1607 }
 0x10e   : > { %1749 = vrot.lane.b32.xlu0 %v1118_v31, %s6366_s7  ;;  %v2341_v31 = vsel %vm2333_vm2, %v2308_v30, %v1862_v62 }
 0x10f   : > { %1875 = vrot.lane.b32.xlu1 %v1151_v58, %s6367_s11  ;;  %v257_v58 = vld [vmem:[%s6434_s23 + $0xc8] sm:$0xff] }
 0x110   : > { %v1960_v39 = vpop.permute.xlu0 %1959  ;;  %289 = vst.msk [vmem:[#allocation2 + $0xe0] sm:$0xff] %vm9488_vm0, %v257_v58 }
 0x111   : > { %v2086_v42 = vpop.permute.xlu1 %2085  ;;  %v2374_v33 = vsel %vm9498_vm4, %v2341_v31, %v1960_v39  ;;  %v316_v39 = vadd.s32 152, %v6436_v2 }
 0x112   : > { %1399 = vrot.lane.b32.xlu0 %v1050_v23, %s6363_s25  ;;  %v2406_v7 = vsel %vm9467_vm6, %v2373_v5, %v2086_v42  ;;  %v956_v23 = vld [vmem:[#allocation2 + $0xa1] sm:$0xff] }
 0x113   : > { %1525 = vrot.lane.b32.xlu1 %v1083_v59, %s6364_s30  ;;  %6078 = vmatprep.mubr.msk.f32.mxu0 %vm9487_vm8, %v2406_v7  ;;  %v1188_v47 = vsel %vm6970_vm14, %v956_v23, 0.0  ;;  %v315_v59 = vadd.s32 144, %v6436_v2  ;;  %v466_v42 = vand.u32 15, %v316_v39  ;;  %v1120_v7 = vsel %vm7065_vm9, %v956_v23, 0.0 }
 0x114   : > { %v7103_v3 = vpop.permute.xlu0 %1257 }
 0x115   : > { %v7115_v25 = vpop.permute.xlu1 %1609  ;;  %v459_v63 = vand.u32 15, %v315_v59  ;;  %vm7164_vm14 = vcmp.le.s32.totalorder %v466_v42, 14 }
 0x116   : > { %1877 = vrot.lane.b32.xlu0 %v796_v4, %s6367_s11 }
 0x117   : > { %1973 = vrot.lane.b32.xlu1 %v923_v60, %s6368_s22 }
 0x118   : > { %v1736_v36 = vpop.permute.xlu0 %1735 }
 0x119   : > { %v2088_v24 = vpop.permute.xlu1 %2087 }
 0x11a   : > { %1527 = vrot.lane.b32.xlu0 %v796_v4, %s6364_s30  ;;  %v2407_v20 = vsel %vm9467_vm6, %v2374_v33, %v2088_v24  ;;  %vm9468_vm6 = vcmask 130048   ;;  %v881_v4 = vsel %vm6735_vm10, %v6673_v48, 0.0  ;;  %v1052_v33 = vsel %vm7164_vm14, %v956_v23, 0.0  ;;  %v798_v23 = vld [vmem:[#allocation2 + $0xaf] sm:$0xff] }
 0x11b   : > { %1623 = vrot.lane.b32.xlu1 %v923_v60, %s6365_s6  ;;  %6079 = vmatmul.mubr.msk.f32.gmra.mrb[6].mxu0 %vm9487_vm8, %v2407_v20  ;;  %4539 = vst.msk [vmem:[#allocation3] sm:$0xff] %vm9468_vm6, %v6361_v0  ;;  %4540 = vst.msk [vmem:[#allocation3 + $0x8] sm:$0xff] %vm9468_vm6, %v6361_v0  ;;  %v2177_v48 = vsel %vm9488_vm0, %v881_v4, %v7012_v55  ;;  %vm7183_vm10 = vcmp.ge.s32.totalorder %v459_v63, 1 }
 0x11c   : > { %v7125_v57 = vpop.permute.xlu0 %1259  ;;  %4541 = vst.msk [vmem:[#allocation3 + $0x50] sm:$0xff] %vm9468_vm6, %v6361_v0  ;;  %4542 = vst.msk [vmem:[#allocation3 + $0x58] sm:$0xff] %vm9468_vm6, %v6361_v0  ;;  %v2210_v22 = vsel %vm9480_vm11, %v2177_v48, %v7041_v26  ;;  %vm9552_vm6 = vcmask 195584  }
 0x11d   : > { %v7132_v34 = vpop.permute.xlu1 %1385  ;;  %v2243_v30 = vsel %vm9479_vm12, %v2210_v22, %v7054_v1  ;;  %v1085_v1 = vsel %vm7183_vm10, %v797_v43, 0.0  ;;  %v926_v43 = vld [vmem:[#allocation2 + $0xb0] sm:$0xff] }
 0x11e   : > { %1975 = vrot.lane.b32.xlu0 %v924_v40, %s6368_s22  ;;  %v2276_v26 = vsel %vm9481_vm13, %v2243_v30, %v7084_v14  ;;  %v2178_v14 = vsel %vm9488_vm0, %v6693_v56, %v7036_v16  ;;  %v958_v22 = vld [vmem:[#allocation2 + $0xb1] sm:$0xff]  ;;  %v318_v30 = vadd.s32 168, %v6436_v2 }
 0x11f   : > { %2101 = vrot.lane.b32.xlu1 %v955_v41, %s6369_s26  ;;  %v1122_v18 = vsel %vm7164_vm14, %v958_v22, 0.0 }
 0x120   : > { %v1738_v62 = vpop.permute.xlu0 %1737 }
 0x121   : > { %v1864_v9 = vpop.permute.xlu1 %1863 }
 0x122   : > { %1273 = vrot.lane.b32.xlu0 %v923_v60, %s6362_s24 }
 0x123   : > { %1625 = vrot.lane.b32.xlu1 %v924_v40, %s6365_s6 }
 0x124   : > { %v7136_v38 = vpop.permute.xlu0 %1387 }
 0x125   : > { %v7151_v29 = vpop.permute.xlu1 %1513 }
 0x126   : > { %1751 = vrot.lane.b32.xlu0 %v955_v41, %s6366_s7 }
 0x127   : > { %2103 = vrot.lane.b32.xlu1 %v1188_v47, %s6369_s26 }
 0x128   : > { %v1866_v5 = vpop.permute.xlu0 %1865 }
 0x129   : > { %v1962_v0 = vpop.permute.xlu1 %1961 }
 0x12a   : > { %1275 = vrot.lane.b32.xlu0 %v924_v40, %s6362_s24  ;;  %v2309_v40 = vsel %vm9469_vm15, %v2276_v26, %v1736_v36  ;;  %v2211_v36 = vsel %vm9480_vm11, %v2178_v14, %v7047_v51 }
 0x12b   : > { %1401 = vrot.lane.b32.xlu1 %v955_v41, %s6363_s25  ;;  %v2342_v20 = vsel %vm2333_vm2, %v2309_v40, %v1864_v9  ;;  %v925_v9 = vld [vmem:[#allocation2 + $0xa8] sm:$0xff]  ;;  %v2244_v59 = vsel %vm9479_vm12, %v2211_v36, %v7063_v15 }
 0x12c   : > { %v7162_v60 = vpop.permute.xlu0 %1515  ;;  %v2375_v58 = vsel %vm9498_vm4, %v2342_v20, %v1962_v0  ;;  %v2277_v4 = vsel %vm9481_vm13, %v2244_v59, %v7115_v25  ;;  %v957_v25 = vld [vmem:[#allocation2 + $0xa9] sm:$0xff]  ;;  %v480_v20 = vand.u32 15, %v318_v30 }
 0x12d   : > { %v7179_v31 = vpop.permute.xlu1 %1611  ;;  %v2310_v16 = vsel %vm9469_vm15, %v2277_v4, %v1738_v62  ;;  %v259_v62 = vld [vmem:[%s6434_s23 + $0xd8] sm:$0xff] }
 0x12e   : > { %1753 = vrot.lane.b32.xlu0 %v1120_v7, %s6366_s7  ;;  %v2343_v0 = vsel %vm2333_vm2, %v2310_v16, %v1866_v5  ;;  %291 = vst.msk [vmem:[#allocation2 + $0xf0] sm:$0xff] %vm9488_vm0, %v259_v62  ;;  %v260_v16 = vld [vmem:[%s6434_s23 + $0xe0] sm:$0xff] }
 0x12f   : > { %1879 = vrot.lane.b32.xlu1 %v1153_v21, %s6367_s11  ;;  %292 = vst.msk [vmem:[#allocation2 + $0xf8] sm:$0xff] %vm9488_vm0, %v260_v16  ;;  %v319_v16 = vadd.s32 176, %v6436_v2 }
 0x130   : > { %v1964_v24 = vpop.permute.xlu0 %1963 }
 0x131   : > { %v2090_v41 = vpop.permute.xlu1 %2089  ;;  %v2376_v51 = vsel %vm9498_vm4, %v2343_v0, %v1964_v24  ;;  %v317_v24 = vadd.s32 160, %v6436_v2 }
 0x132   : > { %1403 = vrot.lane.b32.xlu0 %v1052_v33, %s6363_s25  ;;  %v2408_v39 = vsel %vm9552_vm6, %v2375_v58, %v2090_v41  ;;  %v1190_v33 = vsel %vm7065_vm9, %v958_v22, 0.0  ;;  %v799_v41 = vld [vmem:[#allocation2 + $0xb7] sm:$0xff]  ;;  %vm7249_vm9 = vcmp.le.s32.totalorder %v480_v20, 14 }
 0x133   : > { %1529 = vrot.lane.b32.xlu1 %v1085_v1, %s6364_s30  ;;  %6081 = vmatprep.mubr.msk.f32.mxu0 %vm9487_vm8, %v2408_v39  ;;  %v883_v1 = vsel %vm6807_vm3, %v6717_v11, 0.0  ;;  %v1155_v53 = vsel %vm7183_vm10, %v799_v41, 0.0  ;;  %v1054_v4 = vsel %vm7249_vm9, %v958_v22, 0.0  ;;  %v927_v22 = vld [vmem:[#allocation2 + $0xb8] sm:$0xff] }
 0x134   : > { %v7197_v47 = vpop.permute.xlu0 %1261  ;;  %v2179_v36 = vsel %vm9488_vm0, %v883_v1, %v7103_v3 }
 0x135   : > { %v7209_v42 = vpop.permute.xlu1 %1613  ;;  %v2212_v11 = vsel %vm9480_vm11, %v2179_v36, %v7132_v34  ;;  %v960_v36 = vld [vmem:[#allocation2 + $0xc1] sm:$0xff] }
 0x136   : > { %1881 = vrot.lane.b32.xlu0 %v798_v23, %s6367_s11 }
 0x137   : > { %1977 = vrot.lane.b32.xlu1 %v925_v9, %s6368_s22 }
 0x138   : > { %v1740_v56 = vpop.permute.xlu0 %1739 }
 0x139   : > { %v2092_v7 = vpop.permute.xlu1 %2091 }
 0x13a   : > { %1531 = vrot.lane.b32.xlu0 %v798_v23, %s6364_s30  ;;  %v2409_v15 = vsel %vm9552_vm6, %v2376_v51, %v2092_v7  ;;  %v473_v23 = vand.u32 15, %v317_v24 }
 0x13b   : > { %1627 = vrot.lane.b32.xlu1 %v925_v9, %s6365_s6  ;;  %6082 = vmatmul.mubr.msk.f32.gmra.mrb[8].mxu0 %vm9487_vm8, %v2409_v15 }
 0x13c   : > { %v7219_v63 = vpop.permute.xlu0 %1263  ;;  %vm7267_vm3 = vcmp.ge.s32.totalorder %v473_v23, 1 }
 0x13d   : > { %v7225_v49 = vpop.permute.xlu1 %1389  ;;  %v1087_v7 = vsel %vm7267_vm3, %v799_v41, 0.0 }
 0x13e   : > { %1979 = vrot.lane.b32.xlu0 %v926_v43, %s6368_s22 }
 0x13f   : > { %2105 = vrot.lane.b32.xlu1 %v957_v25, %s6369_s26 }
 0x140   : > { %v1742_v5 = vpop.permute.xlu0 %1741 }
 0x141   : > { %v1868_v48 = vpop.permute.xlu1 %1867 }
 0x142   : > { %1277 = vrot.lane.b32.xlu0 %v925_v9, %s6362_s24  ;;  %v2245_v9 = vsel %vm9479_vm12, %v2212_v11, %v7151_v29 }
 0x143   : > { %1629 = vrot.lane.b32.xlu1 %v926_v43, %s6365_s6  ;;  %v2278_v34 = vsel %vm9481_vm13, %v2245_v9, %v7179_v31  ;;  %v1192_v9 = vsel %vm7164_vm14, %v960_v36, 0.0 }
 0x144   : > { %v7230_v21 = vpop.permute.xlu0 %1391  ;;  %v2311_v51 = vsel %vm9469_vm15, %v2278_v34, %v1740_v56  ;;  %v2180_v56 = vsel %vm9488_vm0, %v6747_v32, %v7125_v57 }
 0x145   : > { %v7237_v26 = vpop.permute.xlu1 %1517  ;;  %v2344_v29 = vsel %vm2333_vm2, %v2311_v51, %v1868_v48  ;;  %v2213_v48 = vsel %vm9480_vm11, %v2180_v56, %v7136_v38  ;;  %v885_v51 = vsel %vm6899_vm1, %v6788_v12, 0.0  ;;  %v1157_v56 = vsel %vm7267_vm3, %v801_v46, 0.0 }
 0x146   : > { %1755 = vrot.lane.b32.xlu0 %v957_v25, %s6366_s7  ;;  %v2246_v30 = vsel %vm9479_vm12, %v2213_v48, %v7162_v60  ;;  %v2181_v12 = vsel %vm9488_vm0, %v885_v51, %v7197_v47  ;;  %v9559_v47 = vmov 0 }
 0x147   : > { %2107 = vrot.lane.b32.xlu1 %v1190_v33, %s6369_s26  ;;  %v2279_v24 = vsel %vm9481_vm13, %v2246_v30, %v7209_v42  ;;  %v959_v42 = vld [vmem:[#allocation2 + $0xb9] sm:$0xff]  ;;  %v2214_v27 = vsel %vm9480_vm11, %v2181_v12, %v7225_v49 }
 0x148   : > { %v1870_v40 = vpop.permute.xlu0 %1869  ;;  %v2312_v57 = vsel %vm9469_vm15, %v2279_v24, %v1742_v5  ;;  %v261_v5 = vld [vmem:[%s6434_s23 + $0xe8] sm:$0xff]  ;;  %v2247_v48 = vsel %vm9479_vm12, %v2214_v27, %v7237_v26 }
 0x149   : > { %v1966_v58 = vpop.permute.xlu1 %1965  ;;  %v2345_v20 = vsel %vm2333_vm2, %v2312_v57, %v1870_v40  ;;  %293 = vst.msk [vmem:[#allocation2 + $0x100] sm:$0xff] %vm9488_vm0, %v261_v5  ;;  %v929_v5 = vld [vmem:[#allocation2 + $0xc8] sm:$0xff] }
 0x14a   : > { %1279 = vrot.lane.b32.xlu0 %v926_v43, %s6362_s24  ;;  %v2377_v43 = vsel %vm9498_vm4, %v2344_v29, %v1966_v58  ;;  %v928_v58 = vld [vmem:[#allocation2 + $0xc0] sm:$0xff] }
 0x14b   : > { %1405 = vrot.lane.b32.xlu1 %v957_v25, %s6363_s25  ;;  %v800_v25 = vld [vmem:[#allocation2 + $0xbf] sm:$0xff] }
 0x14c   : > { %v7247_v39 = vpop.permute.xlu0 %1519 }
 0x14d   : > { %v7263_v59 = vpop.permute.xlu1 %1615 }
 0x14e   : > { %1757 = vrot.lane.b32.xlu0 %v1122_v18, %s6366_s7  ;;  %v2280_v49 = vsel %vm9481_vm13, %v2247_v48, %v7263_v59  ;;  %v2182_v59 = vsel %vm9488_vm0, %v6823_v13, %v7219_v63 }
 0x14f   : > { %1883 = vrot.lane.b32.xlu1 %v1155_v53, %s6367_s11  ;;  %v320_v53 = vadd.s32 184, %v6436_v2 }
 0x150   : > { %v1968_v0 = vpop.permute.xlu0 %1967 }
 0x151   : > { %v2094_v15 = vpop.permute.xlu1 %2093  ;;  %v2378_v38 = vsel %vm9498_vm4, %v2345_v20, %v1968_v0  ;;  %v494_v0 = vand.u32 15, %v320_v53 }
 0x152   : > { %1407 = vrot.lane.b32.xlu0 %v1054_v4, %s6363_s25  ;;  %v2410_v31 = vsel %vm9552_vm6, %v2377_v43, %v2094_v15  ;;  %v487_v43 = vand.u32 15, %v319_v16  ;;  %v262_v15 = vld [vmem:[%s6434_s23 + $0xf0] sm:$0xff] }
 0x153   : > { %1533 = vrot.lane.b32.xlu1 %v1087_v7, %s6364_s30  ;;  %6084 = vmatprep.mubr.msk.f32.mxu0 %vm9487_vm8, %v2410_v31  ;;  %v1124_v7 = vsel %vm7249_vm9, %v960_v36, 0.0  ;;  %vm7336_vm14 = vcmp.le.s32.totalorder %v494_v0, 14  ;;  %294 = vst.msk [vmem:[#allocation2 + $0x108] sm:$0xff] %vm9488_vm0, %v262_v15  ;;  %v930_v0 = vld [vmem:[#allocation2 + $0xd0] sm:$0xff]  ;;  %v322_v15 = vadd.s32 200, %v6436_v2  ;;  %v7544_v31 = vld [vmem:[#allocation2 + $0xe7] sm:$0xff] }
 0x154   : > { %v7283_v62 = vpop.permute.xlu0 %1265  ;;  %v1056_v30 = vsel %vm7336_vm14, %v960_v36, 0.0  ;;  %vm7355_vm1 = vcmp.ge.s32.totalorder %v487_v43, 1 }
 0x155   : > { %v7295_v33 = vpop.permute.xlu1 %1617  ;;  %v9560_v47 = vsel %vm7355_vm1, 4294967295, %v9559_v47  ;;  %v1089_v26 = vsel %vm7355_vm1, %v801_v46, 0.0  ;;  %v962_v46 = vld [vmem:[#allocation2 + $0xd1] sm:$0xff] }
 0x156   : > { %1885 = vrot.lane.b32.xlu0 %v800_v25, %s6367_s11  ;;  %9561 = vst [vmem:[#allocation11_spill] sm:$0xff] %v9560_v47  ;;  %v1194_v12 = vsel %vm7249_vm9, %v962_v46, 0.0  ;;  %v1126_v14 = vsel %vm7336_vm14, %v962_v46, 0.0 }
 0x157   : > { %1981 = vrot.lane.b32.xlu1 %v927_v22, %s6368_s22 }
 0x158   : > { %v1744_v32 = vpop.permute.xlu0 %1743 }
 0x159   : > { %v2096_v1 = vpop.permute.xlu1 %2095  ;;  %v2313_v57 = vsel %vm9469_vm15, %v2280_v49, %v1744_v32  ;;  %v2215_v32 = vsel %vm9480_vm11, %v2182_v59, %v7230_v21  ;;  %v6370_v49 = vmov 1983009808   ;;  %v7438_v59 = vld [vmem:[%s9463_s2] ss:$0 sm:$0xff] }
 0x15a   : > { %1535 = vrot.lane.b32.xlu0 %v800_v25, %s6364_s30  ;;  %v2411_v60 = vsel %vm9552_vm6, %v2378_v38, %v2096_v1 }
 0x15b   : > { %1631 = vrot.lane.b32.xlu1 %v927_v22, %s6365_s6  ;;  %6085 = vmatmul.mubr.msk.f32.gmra.mrb[10].mxu0 %vm9487_vm8, %v2411_v60 }
 0x15c   : > { %v7305_v18 = vpop.permute.xlu0 %1267 }
 0x15d   : > { %v7311_v41 = vpop.permute.xlu1 %1393 }
 0x15e   : > { %1983 = vrot.lane.b32.xlu0 %v928_v58, %s6368_s22 }
 0x15f   : > { %2109 = vrot.lane.b32.xlu1 %v959_v42, %s6369_s26 }
 0x160   : > { %v1746_v40 = vpop.permute.xlu0 %1745 }
 0x161   : > { %v1872_v23 = vpop.permute.xlu1 %1871 }
 0x162   : > { %1281 = vrot.lane.b32.xlu0 %v927_v22, %s6362_s24  ;;  %v2346_v20 = vsel %vm2333_vm2, %v2313_v57, %v1872_v23  ;;  %v2248_v23 = vsel %vm9479_vm12, %v2215_v32, %v7247_v39  ;;  %v887_v57 = vsel %vm6994_vm5, %v6871_v50, 0.0 }
 0x163   : > { %1633 = vrot.lane.b32.xlu1 %v928_v58, %s6365_s6  ;;  %v2281_v53 = vsel %vm9481_vm13, %v2248_v23, %v7295_v33  ;;  %v961_v33 = vld [vmem:[#allocation2 + $0xc9] sm:$0xff] }
 0x164   : > { %v7316_v11 = vpop.permute.xlu0 %1395  ;;  %v2314_v63 = vsel %vm9469_vm15, %v2281_v53, %v1746_v40  ;;  %v263_v40 = vld [vmem:[%s6434_s23 + $0xf8] sm:$0xff]  ;;  %s6377_s23 = smov 112  }
 0x165   : > { %v7323_v4 = vpop.permute.xlu1 %1521  ;;  %295 = vst.msk [vmem:[#allocation2 + $0x110] sm:$0xff] %vm9488_vm0, %v263_v40 }
 0x166   : > { %1759 = vrot.lane.b32.xlu0 %v959_v42, %s6366_s7 }
 0x167   : > { %2111 = vrot.lane.b32.xlu1 %v1192_v9, %s6369_s26 }
 0x168   : > { %v1874_v34 = vpop.permute.xlu0 %1873 }
 0x169   : > { %v1970_v29 = vpop.permute.xlu1 %1969  ;;  %v2347_v9 = vsel %vm2333_vm2, %v2314_v63, %v1874_v34 }
 0x16a   : > { %1283 = vrot.lane.b32.xlu0 %v928_v58, %s6362_s24  ;;  %v2379_v38 = vsel %vm9498_vm4, %v2346_v20, %v1970_v29  ;;  %v802_v58 = vld [vmem:[#allocation2 + $0xcf] sm:$0xff] }
 0x16b   : > { %1409 = vrot.lane.b32.xlu1 %v959_v42, %s6363_s25 }
 0x16c   : > { %v7334_v25 = vpop.permute.xlu0 %1523 }
 0x16d   : > { %v7351_v22 = vpop.permute.xlu1 %1619 }
 0x16e   : > { %1761 = vrot.lane.b32.xlu0 %v1124_v7, %s6366_s7 }
 0x16f   : > { %1887 = vrot.lane.b32.xlu1 %v1157_v56, %s6367_s11  ;;  %v321_v56 = vadd.s32 192, %v6436_v2 }
 0x170   : > { %v1972_v24 = vpop.permute.xlu0 %1971 }
 0x171   : > { %v2098_v1 = vpop.permute.xlu1 %2097  ;;  %v2380_v21 = vsel %vm9498_vm4, %v2347_v9, %v1972_v24  ;;  %v2779_v24 = vunpack.c.l.s4 %v6370_v49 }
 0x172   : > { %1411 = vrot.lane.b32.xlu0 %v1056_v30, %s6363_s25  ;;  %v2412_v60 = vsel %vm9552_vm6, %v2379_v38, %v2098_v1  ;;  %v508_v30 = vand.u32 15, %v322_v15  ;;  %v501_v38 = vand.u32 15, %v321_v56  ;;  %v804_v15 = vld [vmem:[#allocation2 + $0xdf] sm:$0xff] }
 0x173   : > { %1537 = vrot.lane.b32.xlu1 %v1089_v26, %s6364_s30  ;;  %6087 = vmatprep.mubr.msk.f32.mxu0 %vm9487_vm8, %v2412_v60  ;;  %v803_v26 = vld [vmem:[#allocation2 + $0xd7] sm:$0xff]  ;;  %v2183_v60 = vsel %vm9488_vm0, %v887_v57, %v7283_v62  ;;  %v2780_v50 = vunpack.c.0.s8 %v2779_v24 }
 0x174   : > { %v7369_v42 = vpop.permute.xlu0 %1269  ;;  %vm7425_vm9 = vcmp.le.s32.totalorder %v508_v30, 14  ;;  %v2216_v6 = vsel %vm9480_vm11, %v2183_v60, %v7311_v41  ;;  %v1159_v32 = vsel %vm7355_vm1, %v803_v26, 0.0  ;;  %vm7448_vm5 = vcmp.ge.s32.totalorder %v501_v38, 1 }
 0x175   : > { %v7381_v36 = vpop.permute.xlu1 %1621  ;;  %v1058_v23 = vsel %vm7425_vm9, %v962_v46, 0.0  ;;  %v9564_v41 = vmov 0 }
 0x176   : > { %1889 = vrot.lane.b32.xlu0 %v802_v58, %s6367_s11  ;;  %v9565_v41 = vsel %vm7448_vm5, 4294967295, %v9564_v41 }
 0x177   : > { %1985 = vrot.lane.b32.xlu1 %v929_v5, %s6368_s22  ;;  %9566 = vst [vmem:[#allocation12_spill] sm:$0xff] %v9565_v41 }
 0x178   : > { %v1748_v13 = vpop.permute.xlu0 %1747 }
 0x179   : > { %v2100_v16 = vpop.permute.xlu1 %2099 }
 0x17a   : > { %1539 = vrot.lane.b32.xlu0 %v802_v58, %s6364_s30  ;;  %v2413_v39 = vsel %vm9552_vm6, %v2380_v21, %v2100_v16  ;;  %vm9478_vm6 = vcmask 123904  }
 0x17b   : > { %1635 = vrot.lane.b32.xlu1 %v929_v5, %s6365_s6  ;;  %6088 = vmatmul.mubr.msk.f32.gmra.mrb[12].mxu0 %vm9487_vm8, %v2413_v39 }
 0x17c   : > { %v7391_v51 = vpop.permute.xlu0 %1271 }
 0x17d   : > { %v7397_v29 = vpop.permute.xlu1 %1397 }
 0x17e   : > { %1987 = vrot.lane.b32.xlu0 %v930_v0, %s6368_s22 }
 0x17f   : > { %2113 = vrot.lane.b32.xlu1 %v961_v33, %s6369_s26 }
 0x180   : > { %v7400_v34 = vpop.permute.xlu0 %1749 }
 0x181   : > { %v1876_v7 = vpop.permute.xlu1 %1875 }
 0x182   : > { %1285 = vrot.lane.b32.xlu0 %v929_v5, %s6362_s24  ;;  %v2249_v5 = vsel %vm9479_vm12, %v2216_v6, %v7323_v4  ;;  %v7459_v4 = vsub.s32 %v2780_v50, %v6436_v2 }
 0x183   : > { %1637 = vrot.lane.b32.xlu1 %v930_v0, %s6365_s6  ;;  %v2282_v53 = vsel %vm9481_vm13, %v2249_v5, %v7351_v22  ;;  %v1091_v22 = vsel %vm7448_vm5, %v803_v26, 0.0 }
 0x184   : > { %v7404_v43 = vpop.permute.xlu0 %1399  ;;  %v2315_v21 = vsel %vm9469_vm15, %v2282_v53, %v1748_v13  ;;  %vm9567_vm15 = vcmask 195584  }
 0x185   : > { %v7411_v27 = vpop.permute.xlu1 %1525  ;;  %v2348_v39 = vsel %vm2333_vm2, %v2315_v21, %v1876_v7 }
 0x186   : > { %1763 = vrot.lane.b32.xlu0 %v961_v33, %s6366_s7 }
 0x187   : > { %2115 = vrot.lane.b32.xlu1 %v1194_v12, %s6369_s26 }
 0x188   : > { %v7414_v48 = vpop.permute.xlu0 %1877 }
 0x189   : > { %v1974_v20 = vpop.permute.xlu1 %1973 }
 0x18a   : > { %1287 = vrot.lane.b32.xlu0 %v930_v0, %s6362_s24  ;;  %v2381_v40 = vsel %vm9498_vm4, %v2348_v39, %v1974_v20  ;;  %v931_v20 = vld [vmem:[#allocation2 + $0xd8] sm:$0xff] }
 0x18b   : > { %1413 = vrot.lane.b32.xlu1 %v961_v33, %s6363_s25 }
 0x18c   : > { %v7423_v1 = vpop.permute.xlu0 %1527 }
 0x18d   : > { %v7444_v62 = vpop.permute.xlu1 %1623 }
 0x18e   : > { %1765 = vrot.lane.b32.xlu0 %v1126_v14, %s6366_s7  ;;  %v6071_v63 = vpop.f32.mrb[0].mxu0 }
 0x18f   : > { %v2560_v16 = vadd.f32 %v6071_v63, %v7438_v59  ;;  %1891 = vrot.lane.b32.xlu1 %v1159_v32, %s6367_s11  ;;  %v2554_v0 = vpop.f32.mrb[1].mxu0 }
 0x190   : > { %v7454_v9 = vpop.permute.xlu0 %1975  ;;  %v2555_v33 = vadd.f32 %v7438_v59, %v2554_v0 }
 0x191   : > { %v2714_v13 = vmax.f32 %v2560_v16, 0.0  ;;  %v2102_v46 = vpop.permute.xlu1 %2101 }
 0x192   : > { %1415 = vrot.lane.b32.xlu0 %v1058_v23, %s6363_s25  ;;  %v2713_v12 = vmax.f32 %v2555_v33, 0.0  ;;  %v2414_v56 = vsel %vm9567_vm15, %v2381_v40, %v2102_v46  ;;  %v7491_v46 = vld [vmem:[#allocation2 + $0xe0] sm:$0xff]  ;;  %vm9568_vm15 = vcmask 121856  }
 0x193   : > { %v2794_v49 = vcombine.high %v2714_v13, %v2714_v13  ;;  %v2801_v7 = vrot.slane %v2714_v13, %v7459_v4  ;;  %1541 = vrot.lane.b32.xlu1 %v1091_v22, %s6364_s30  ;;  %6090 = vmatprep.mubr.msk.f32.mxu0 %vm9487_vm8, %v2414_v56 }
 0x194   : > { %v7469_v30 = vpop.permute.xlu0 %1273  ;;  %v2777_v24 = vcombine.high %v2713_v12, %v2713_v12  ;;  %v2784_v57 = vrot.slane %v2713_v12, %v7459_v4 }
 0x195   : > { %v2808_v14 = vrot.slane %v2794_v49, %v7459_v4  ;;  %v2809_v26 = vcombine.high %v2801_v7, %v2801_v7  ;;  %v3478_v38 = vsel %vm9478_vm6, %v2801_v7, -inf  ;;  %v7478_v60 = vpop.permute.xlu1 %1625 }
 0x196   : > { %1893 = vrot.lane.b32.xlu0 %v804_v15, %s6367_s11  ;;  %v3479_v50 = vrot.slane %v3478_v38, 4  ;;  %v2791_v6 = vrot.slane %v2777_v24, %v7459_v4  ;;  %v2792_v32 = vcombine.high %v2784_v57, %v2784_v57  ;;  %v3450_v5 = vsel %vm9478_vm6, %v2784_v57, -inf }
 0x197   : > { %v2810_v53 = vcombine.high %v2808_v14, %v2808_v14  ;;  %v3485_v63 = vsel %vm9478_vm6, %v2809_v26, -inf  ;;  %v3492_v21 = vsel %vm9478_vm6, %v2808_v14, -inf  ;;  %1989 = vrot.lane.b32.xlu1 %v931_v20, %s6368_s22  ;;  %v3451_v0 = vrot.slane %v3450_v5, 4  ;;  %v7499_v14 = vld [vmem:[#allocation2 + $0xd9] sm:$0xff] }
 0x198   : > { %v7482_v23 = vpop.permute.xlu0 %1751  ;;  %v2793_v16 = vcombine.high %v2791_v6, %v2791_v6  ;;  %v3486_v39 = vrot.slane %v3485_v63, 4  ;;  %v3457_v22 = vsel %vm9478_vm6, %v2792_v32, -inf  ;;  %v3464_v40 = vsel %vm9478_vm6, %v2791_v6, -inf }
 0x199   : > { %v3499_v33 = vsel %vm9478_vm6, %v2810_v53, -inf  ;;  %v2104_v13 = vpop.permute.xlu1 %2103  ;;  %v3480_v12 = vmax.f32 %v3478_v38, %v3479_v50  ;;  %v3493_v56 = vrot.slane %v3492_v21, 4  ;;  %v3458_v24 = vrot.slane %v3457_v22, 4 }
 0x19a   : > { %1543 = vrot.lane.b32.xlu0 %v804_v15, %s6364_s30  ;;  %v3500_v7 = vrot.slane %v3499_v33, 4  ;;  %v3465_v57 = vrot.slane %v3464_v40, 4  ;;  %v3471_v15 = vsel %vm9478_vm6, %v2793_v16, -inf  ;;  %v324_v26 = vadd.s32 216, %v6436_v2 }
 0x19b   : > { %1639 = vrot.lane.b32.xlu1 %v931_v20, %s6365_s6  ;;  %v3487_v6 = vmax.f32 %v3485_v63, %v3486_v39  ;;  %v3452_v32 = vmax.f32 %v3450_v5, %v3451_v0  ;;  %v323_v50 = vadd.s32 208, %v6436_v2  ;;  %v3481_v53 = vrot.slane %v3480_v12, 2  ;;  %v7515_v39 = vld [vmem:[#allocation2 + $0xe1] sm:$0xff] }
 0x19c   : > { %v7493_v49 = vpop.permute.xlu0 %1275  ;;  %v3494_v28 = vmax.f32 %v3492_v21, %v3493_v56  ;;  %v2184_v16 = vsel %vm9488_vm0, %v6914_v61, %v7305_v18  ;;  %v3501_v17 = vmax.f32 %v3499_v33, %v3500_v7  ;;  %v3472_v52 = vrot.slane %v3471_v15, 4 }
 0x19d   : > { %v7502_v38 = vpop.permute.xlu1 %1401  ;;  %v2217_v5 = vsel %vm9480_vm11, %v2184_v16, %v7316_v11  ;;  %v3459_v63 = vmax.f32 %v3457_v22, %v3458_v24  ;;  %v3466_v0 = vmax.f32 %v3464_v40, %v3465_v57  ;;  %v522_v21 = vand.u32 15, %v324_v26 }
 0x19e   : > { %1991 = vrot.lane.b32.xlu0 %v7491_v46, %s6368_s22  ;;  %v2250_v56 = vsel %vm9479_vm12, %v2217_v5, %v7334_v25  ;;  %v3488_v8 = vrot.slane %v3487_v6, 2  ;;  %v3453_v61 = vrot.slane %v3452_v32, 2  ;;  %v515_v33 = vand.u32 15, %v323_v50 }
 0x19f   : > { %2117 = vrot.lane.b32.xlu1 %v7499_v14, %s6369_s26  ;;  %v2283_v7 = vsel %vm9481_vm13, %v2250_v56, %v7381_v36  ;;  %v3482_v35 = vmax.f32 %v3480_v12, %v3481_v53  ;;  %v3495_v11 = vrot.slane %v3494_v28, 2  ;;  %v3502_v40 = vrot.slane %v3501_v17, 2 }
 0x1a0   : > { %v7505_v44 = vpop.permute.xlu0 %1753  ;;  %v3473_v24 = vmax.f32 %v3471_v15, %v3472_v52  ;;  %v1196_v25 = vsel %vm7336_vm14, %v7515_v39, 0.0  ;;  %v3460_v36 = vrot.slane %v3459_v63, 2  ;;  %v3467_v12 = vrot.slane %v3466_v0, 2 }
 0x1a1   : > { %v7519_v18 = vpop.permute.xlu1 %1879  ;;  %vm7536_vm6 = vcmp.le.s32.totalorder %v522_v21, 14  ;;  %v3489_v52 = vmax.f32 %v3487_v6, %v3488_v8  ;;  %vm7546_vm14 = vcmp.ge.s32.totalorder %v515_v33, 1  ;;  %v3483_v53 = vrot.slane %v3482_v35, 1 }
 0x1a2   : > { %1289 = vrot.lane.b32.xlu0 %v931_v20, %s6362_s24  ;;  %v2316_v20 = vsel %vm9568_vm15, %v2283_v7, %v7400_v34  ;;  %v3454_v34 = vmax.f32 %v3452_v32, %v3453_v61  ;;  %v3496_v16 = vmax.f32 %v3494_v28, %v3495_v11  ;;  %vm9573_vm15 = vcmask 195584   ;;  %v7564_v28 = vld [vmem:[#allocation2 + $0xf1] sm:$0xff] }
 0x1a3   : > { %1641 = vrot.lane.b32.xlu1 %v7491_v46, %s6365_s6  ;;  %v2349_v57 = vsel %vm2333_vm2, %v2316_v20, %v7414_v48  ;;  %v7554_v8 = vadd.s32 232, %v6436_v2  ;;  %v3503_v6 = vmax.f32 %v3501_v17, %v3502_v40  ;;  %v3474_v32 = vrot.slane %v3473_v24, 2 }
 0x1a4   : > { %v7523_v22 = vpop.permute.xlu0 %1403  ;;  %v2382_v15 = vsel %vm9498_vm4, %v2349_v57, %v7454_v9  ;;  %v889_v9 = vsel %vm7088_vm7, %v6966_v54, 0.0  ;;  %v3468_v61 = vmax.f32 %v3466_v0, %v3467_v12  ;;  %v1128_v17 = vsel %vm7425_vm9, %v7515_v39, 0.0 }
 0x1a5   : > { %v7542_v50 = vpop.permute.xlu1 %1529  ;;  %v2415_v5 = vsel %vm9573_vm15, %v2382_v15, %v2104_v13  ;;  %v3461_v13 = vmax.f32 %v3459_v63, %v3460_v36  ;;  %v1161_v54 = vsel %vm7448_vm5, %v7544_v31, 0.0  ;;  %v3490_v37 = vrot.slane %v3489_v52, 1 }
 0x1a6   : > { %1767 = vrot.lane.b32.xlu0 %v7499_v14, %s6366_s7  ;;  %6091 = vmatmul.mubr.msk.f32.gmra.mrb[14].mxu0 %vm9487_vm8, %v2415_v5  ;;  %v3455_v33 = vrot.slane %v3454_v34, 1  ;;  %v1060_v11 = vsel %vm7536_vm6, %v7515_v39, 0.0  ;;  %v1093_v63 = vsel %vm7546_vm14, %v7544_v31, 0.0  ;;  %v3497_v0 = vrot.slane %v3496_v16, 1 }
 0x1a7   : > { %2119 = vrot.lane.b32.xlu1 %v1196_v25, %s6369_s26  ;;  %v2185_v57 = vsel %vm9488_vm0, %v889_v9, %v7369_v42  ;;  %v3504_v36 = vrot.slane %v3503_v6, 1  ;;  %v3475_v12 = vmax.f32 %v3473_v24, %v3474_v32  ;;  %v7591_v39 = vadd.s32 224, %v6436_v2 }
 0x1a8   : > { %v7551_v21 = vpop.permute.xlu0 %1881  ;;  %v2218_v15 = vsel %vm9480_vm11, %v2185_v57, %v7397_v29  ;;  %v3462_v31 = vrot.slane %v3461_v13, 1  ;;  %v3491_v24 = vmax.f32 %v3489_v52, %v3490_v37  ;;  %v3456_v5 = vmax.f32 %v3454_v34, %v3455_v33 }
 0x1a9   : > { %v1978_v7 = vpop.permute.xlu1 %1977  ;;  %v3498_v29 = vmax.f32 %v3496_v16, %v3497_v0  ;;  %vm9574_vm7 = vcmask 130048   ;;  %vm9575_vm15 = vcmask 121856   ;;  %v806_v0 = vld [vmem:[#allocation2 + $0xef] sm:$0xff]  ;;  %v1130_v58 = vsel %vm7536_vm6, %v7564_v28, 0.0 }
 0x1aa   : > { %1291 = vrot.lane.b32.xlu0 %v7491_v46, %s6362_s24  ;;  %v3484_v46 = vmax.f32 %v3482_v35, %v3483_v53  ;;  %v2186_v35 = vsel %vm9488_vm0, %v7009_v45, %v7391_v51  ;;  %v3469_v53 = vrot.slane %v3468_v61, 1  ;;  %v3463_v34 = vmax.f32 %v3461_v13, %v3462_v31 }
 0x1ab   : > { %1417 = vrot.lane.b32.xlu1 %v7499_v14, %s6363_s25  ;;  %v2219_v42 = vsel %vm9480_vm11, %v2186_v35, %v7404_v43  ;;  %v2251_v14 = vsel %vm9479_vm12, %v2218_v15, %v7411_v27  ;;  %v3505_v43 = vmax.f32 %v3503_v6, %v3504_v36  ;;  %v3476_v35 = vrot.slane %v3475_v12, 1 }
 0x1ac   : > { %v7580_v20 = vpop.permute.xlu0 %1531  ;;  %v2252_v45 = vsel %vm9479_vm12, %v2219_v42, %v7423_v1  ;;  %v2284_v51 = vsel %vm9481_vm13, %v2251_v14, %v7444_v62  ;;  %v7610_v32 = vsel %vm9574_vm7, %v3484_v46, -inf  ;;  %v3470_v37 = vmax.f32 %v3468_v61, %v3469_v53  ;;  %vm9576_vm12 = vmmov %vm9574_vm7 }
 0x1ad   : > { %v7603_v9 = vpop.permute.xlu1 %1627  ;;  %v2317_v27 = vsel %vm9575_vm15, %v2284_v51, %v7482_v23  ;;  %v7623_v6 = vsel %vm9574_vm7, %v3491_v24, -inf  ;;  %v7626_v33 = vsel %vm9576_vm12, %v3456_v5, -inf  ;;  %vm9577_vm15 = vmmov %vm9574_vm7  ;;  %vm9578_vm11 = vcmask 195584  }
 0x1ae   : > { %1769 = vrot.lane.b32.xlu0 %v1128_v17, %s6366_s7  ;;  %v6074_v17 = vpop.f32.mrb[2].mxu0  ;;  %v2350_v62 = vsel %vm2333_vm2, %v2317_v27, %v7519_v18  ;;  %v7630_v13 = vsel %vm9577_vm15, %v3498_v29, -inf  ;;  %v2285_v18 = vsel %vm9481_vm13, %v2252_v45, %v7478_v60  ;;  %v7638_v15 = vsel %vm9574_vm7, %v3505_v43, -inf  ;;  %vm9580_vm12 = vmmov %vm9574_vm7 }
 0x1af   : > { %v2570_v52 = vadd.f32 %v6074_v17, %v7438_v59  ;;  %1895 = vrot.lane.b32.xlu1 %v1161_v54, %s6367_s11  ;;  %v2564_v1 = vpop.f32.mrb[3].mxu0  ;;  %v2383_v23 = vsel %vm9498_vm4, %v2350_v62, %v1978_v7  ;;  %v7640_v31 = vmax.f32 %v3475_v12, %v3476_v35  ;;  %v7646_v42 = vsel %vm9580_vm12, %v3463_v34, -inf  ;;  %vm9581_vm15 = vmmov %vm9574_vm7  ;;  %v7653_v12 = vld [vmem:[#allocation2 + $0xe8] sm:$0xff] }
 0x1b0   : > { %v7612_v57 = vpop.permute.xlu0 %1979  ;;  %v2565_v16 = vadd.f32 %v7438_v59, %v2564_v1  ;;  %v7649_v60 = vsel %vm9581_vm15, %v3470_v37, -inf  ;;  %vm9583_vm7 = vcmask 123904   ;;  %v9632_v26 = vmov 0 }
 0x1b1   : > { %v2716_v46 = vmax.f32 %v2570_v52, 0.0  ;;  %v2106_v54 = vpop.permute.xlu1 %2105  ;;  %vm9584_vm12 = vmmov %vm9583_vm7 }
 0x1b2   : > { %1419 = vrot.lane.b32.xlu0 %v1060_v11, %s6363_s25  ;;  %v2715_v61 = vmax.f32 %v2565_v16, 0.0  ;;  %v2416_v11 = vsel %vm9578_vm11, %v2383_v23, %v2106_v54  ;;  %vm9582_vm11 = vcmask 121856   ;;  %vm9585_vm15 = vmmov %vm9583_vm7 }
 0x1b3   : > { %v2828_v7 = vcombine.high %v2716_v46, %v2716_v46  ;;  %v2835_v53 = vrot.slane %v2716_v46, %v7459_v4  ;;  %1545 = vrot.lane.b32.xlu1 %v1093_v63, %s6364_s30  ;;  %6093 = vmatprep.mubr.msk.f32.mxu0 %vm9487_vm8, %v2416_v11  ;;  %v7657_v5 = vsel %vm9582_vm11, %v2285_v18, %v7505_v44  ;;  %vm9586_vm11 = vmmov %vm9583_vm7 }
 0x1b4   : > { %v7635_v36 = vpop.permute.xlu0 %1277  ;;  %v2811_v14 = vcombine.high %v2715_v61, %v2715_v61  ;;  %v2818_v24 = vrot.slane %v2715_v61, %v7459_v4  ;;  %vm9588_vm13 = vmmov %vm9583_vm7 }
 0x1b5   : > { %9579 = vst [vmem:[#allocation13_spill] sm:$0xff] %v7635_v36  ;;  %v2842_v63 = vrot.slane %v2828_v7, %v7459_v4  ;;  %v2843_v45 = vcombine.high %v2835_v53, %v2835_v53  ;;  %v3534_v51 = vsel %vm9583_vm7, %v2835_v53, -inf  ;;  %v7661_v29 = vpop.permute.xlu1 %1629  ;;  %v7677_v53 = vld [vmem:[#allocation2 + $0xf0] sm:$0xff] }
 0x1b6   : > { %1897 = vrot.lane.b32.xlu0 %v806_v0, %s6367_s11  ;;  %v3535_v17 = vrot.slane %v3534_v51, 4  ;;  %v2825_v43 = vrot.slane %v2811_v14, %v7459_v4  ;;  %v2826_v35 = vcombine.high %v2818_v24, %v2818_v24  ;;  %v3506_v27 = vsel %vm9584_vm12, %v2818_v24, -inf  ;;  %vm9587_vm12 = vmmov %vm9583_vm7 }
 0x1b7   : > { %v2844_v1 = vcombine.high %v2842_v63, %v2842_v63  ;;  %v3541_v34 = vsel %vm9585_vm15, %v2843_v45, -inf  ;;  %v3548_v44 = vsel %vm9586_vm11, %v2842_v63, -inf  ;;  %v3507_v37 = vrot.slane %v3506_v27, 4  ;;  %1993 = vrot.lane.b32.xlu1 %v7653_v12, %s6368_s22  ;;  %vm9590_vm15 = vmmov %vm9583_vm7 }
 0x1b8   : > { %v7665_v52 = vpop.permute.xlu0 %1755  ;;  %v3536_v62 = vmax.f32 %v3534_v51, %v3535_v17  ;;  %v3542_v16 = vrot.slane %v3541_v34, 4  ;;  %v3549_v23 = vrot.slane %v3548_v44, 4  ;;  %v2827_v46 = vcombine.high %v2825_v43, %v2825_v43 }
 0x1b9   : > { %v3555_v54 = vsel %vm9583_vm7, %v2844_v1, -inf  ;;  %v3508_v18 = vmax.f32 %v3506_v27, %v3507_v37  ;;  %v3513_v61 = vsel %vm9587_vm12, %v2826_v35, -inf  ;;  %v3520_v11 = vsel %vm9588_vm13, %v2825_v43, -inf  ;;  %v7675_v7 = vpop.permute.xlu1 %2107 }
 0x1ba   : > { %1547 = vrot.lane.b32.xlu0 %v806_v0, %s6364_s30  ;;  %v3537_v14 = vrot.slane %v3536_v62, 2  ;;  %v3543_v24 = vmax.f32 %v3541_v34, %v3542_v16  ;;  %v3550_v63 = vmax.f32 %v3548_v44, %v3549_v23  ;;  %v3556_v45 = vrot.slane %v3555_v54, 4  ;;  %v7686_v34 = vld [vmem:[#allocation2 + $0xe9] sm:$0xff] }
 0x1bb   : > { %v3509_v17 = vrot.slane %v3508_v18, 2  ;;  %v3514_v56 = vrot.slane %v3513_v61, 4  ;;  %v3521_v0 = vrot.slane %v3520_v11, 4  ;;  %v3527_v1 = vsel %vm9590_vm15, %v2827_v46, -inf  ;;  %1643 = vrot.lane.b32.xlu1 %v7653_v12, %s6365_s6 }
 0x1bc   : > { %v7679_v51 = vpop.permute.xlu0 %1279  ;;  %v3538_v35 = vmax.f32 %v3536_v62, %v3537_v14  ;;  %v3544_v43 = vrot.slane %v3543_v24, 2  ;;  %v3551_v27 = vrot.slane %v3550_v63, 2  ;;  %v3557_v37 = vmax.f32 %v3555_v54, %v3556_v45 }
 0x1bd   : > { %9589 = vst [vmem:[#allocation14_spill] sm:$0xff] %v7679_v51  ;;  %v3510_v44 = vmax.f32 %v3508_v18, %v3509_v17  ;;  %v3515_v16 = vmax.f32 %v3513_v61, %v3514_v56  ;;  %v3522_v23 = vmax.f32 %v3520_v11, %v3521_v0  ;;  %v3528_v25 = vrot.slane %v3527_v1, 4  ;;  %v7688_v40 = vpop.permute.xlu1 %1405 }
 0x1be   : > { %1995 = vrot.lane.b32.xlu0 %v7677_v53, %s6368_s22  ;;  %9591 = vst [vmem:[#allocation15_spill] sm:$0xff] %v7688_v40  ;;  %v3539_v41 = vrot.slane %v3538_v35, 1  ;;  %v3545_v46 = vmax.f32 %v3543_v24, %v3544_v43  ;;  %v3552_v19 = vmax.f32 %v3550_v63, %v3551_v27  ;;  %v3558_v51 = vrot.slane %v3557_v37, 2 }
 0x1bf   : > { %v3511_v62 = vrot.slane %v3510_v44, 1  ;;  %v3516_v14 = vrot.slane %v3515_v16, 2  ;;  %v3523_v54 = vrot.slane %v3522_v23, 2  ;;  %v3529_v45 = vmax.f32 %v3527_v1, %v3528_v25  ;;  %2121 = vrot.lane.b32.xlu1 %v7686_v34, %s6369_s26 }
 0x1c0   : > { %v7690_v36 = vpop.permute.xlu0 %1757  ;;  %vm9486_vm13 = vcmask 1041409   ;;  %v3540_v18 = vmax.f32 %v3538_v35, %v3539_v41  ;;  %v3546_v56 = vrot.slane %v3545_v46, 1  ;;  %v3553_v61 = vrot.slane %v3552_v19, 1 }
 0x1c1   : > { %v3559_v11 = vmax.f32 %v3557_v37, %v3558_v51  ;;  %v3512_v24 = vmax.f32 %v3510_v44, %v3511_v62  ;;  %v3517_v63 = vmax.f32 %v3515_v16, %v3516_v14  ;;  %v3524_v17 = vmax.f32 %v3522_v23, %v3523_v54  ;;  %v7696_v43 = vpop.permute.xlu1 %1883 }
 0x1c2   : > { %1293 = vrot.lane.b32.xlu0 %v7653_v12, %s6362_s24  ;;  %v3530_v0 = vrot.slane %v3529_v45, 2  ;;  %v3547_v27 = vmax.f32 %v3545_v46, %v3546_v56  ;;  %v3554_v25 = vmax.f32 %v3552_v19, %v3553_v61  ;;  %vm9592_vm7 = vcmask 130048  }
 0x1c3   : > { %v3560_v1 = vrot.slane %v3559_v11, 1  ;;  %v4360_v40 = vsel %vm9592_vm7, %v3540_v18, -inf  ;;  %v3518_v51 = vrot.slane %v3517_v63, 1  ;;  %v3525_v35 = vrot.slane %v3524_v17, 1  ;;  %1645 = vrot.lane.b32.xlu1 %v7677_v53, %s6365_s6  ;;  %vm9593_vm12 = vmmov %vm9592_vm7 }
 0x1c4   : > { %v7699_v47 = vpop.permute.xlu0 %1407  ;;  %v4361_v41 = vmax.f32 %v7610_v32, %v4360_v40  ;;  %v3531_v37 = vmax.f32 %v3529_v45, %v3530_v0  ;;  %v4363_v44 = vsel %vm9593_vm12, %v3547_v27, -inf  ;;  %vm9594_vm15 = vmmov %vm9592_vm7  ;;  %v2351_v14 = vsel %vm2333_vm2, %v7657_v5, %v7551_v21 }
 0x1c5   : > { %v3561_v12 = vmax.f32 %v3559_v11, %v3560_v1  ;;  %v4366_v16 = vsel %vm9594_vm15, %v3554_v25, -inf  ;;  %vm9595_vm11 = vmmov %vm9592_vm7  ;;  %v4364_v23 = vmax.f32 %v7623_v6, %v4363_v44  ;;  %v3519_v32 = vmax.f32 %v3517_v63, %v3518_v51  ;;  %v7711_v62 = vpop.permute.xlu1 %1533  ;;  %v807_v63 = vld [vmem:[#allocation2 + $0xf7] sm:$0xff] }
 0x1c6   : > { %v4348_v19 = vsel %vm9595_vm11, %v3512_v24, -inf  ;;  %1771 = vrot.lane.b32.xlu0 %v7686_v34, %s6366_s7  ;;  %v4367_v40 = vmax.f32 %v7630_v13, %v4366_v16  ;;  %v3526_v46 = vmax.f32 %v3524_v17, %v3525_v35  ;;  %v3532_v45 = vrot.slane %v3531_v37, 1  ;;  %vm9596_vm11 = vmmov %vm9592_vm7 }
 0x1c7   : > { %v4369_v54 = vsel %vm9592_vm7, %v3561_v12, -inf  ;;  %v4349_v18 = vmax.f32 %v7626_v33, %v4348_v19  ;;  %v2384_v6 = vsel %vm9498_vm4, %v2351_v14, %v7612_v57  ;;  %v4351_v13 = vsel %vm9596_vm11, %v3519_v32, -inf  ;;  %vm9597_vm12 = vmmov %vm9592_vm7 }
 0x1c8   : > { %v7718_v56 = vpop.permute.xlu0 %1885  ;;  %v4370_v61 = vmax.f32 %v7638_v15, %v4369_v54  ;;  %v4354_v11 = vsel %vm9597_vm12, %v3526_v46, -inf  ;;  %v9598_v21 = vsel %vm7425_vm9, %v7564_v28, 0.0  ;;  %v3533_v5 = vmax.f32 %v3531_v37, %v3532_v45  ;;  %vm9600_vm9 = vmmov %vm9596_vm11  ;;  %v808_v45 = vld [vmem:[#allocation2 + $0xff] sm:$0xff] }
 0x1c9   : > { %2123 = vrot.lane.b32.xlu1 %v9598_v21, %s6369_s26  ;;  %v4352_v33 = vmax.f32 %v7646_v42, %v4351_v13  ;;  %v4355_v24 = vmax.f32 %v7649_v60, %v4354_v11  ;;  %vm9599_vm15 = vcmask 195584   ;;  %vm9499_vm7 = vcmask 1043459   ;;  %v1982_v57 = vpop.permute.xlu1 %1981  ;;  %vm9601_vm11 = vmmov %vm9600_vm9  ;;  %v935_v21 = vld [vmem:[#allocation2 + $0xf8] sm:$0xff] }
 0x1ca   : > { %v2417_v15 = vsel %vm9599_vm15, %v2384_v6, %v7675_v7  ;;  %1295 = vrot.lane.b32.xlu0 %v7677_v53, %s6362_s24  ;;  %v529_v17 = vand.u32 15, %v7591_v39  ;;  %v4356_v42 = vsel %vm9600_vm9, %v7640_v31, -inf  ;;  %v4357_v60 = vsel %vm9601_vm11, %v3533_v5, -inf }
 0x1cb   : > { %6094 = vmatmul.mubr.msk.f32.gmra.mrb[16].mxu0 %vm9487_vm8, %v2417_v15  ;;  %v4608_v7 = vsel %vm9486_vm13, %v4352_v33, %v4349_v18  ;;  %v9602_v53 = vand.u32 15, %v7554_v8  ;;  %v9605_v39 = vsel %vm7183_vm10, %v7061_v10, 0.0  ;;  %v4358_v31 = vmax.f32 %v4356_v42, %v4357_v60 }
 0x1cc   : > { %v7745_v0 = vpop.permute.xlu0 %1535  ;;  %v2187_v25 = vsel %vm9488_vm0, %v9605_v39, %v7469_v30  ;;  %vm9606_vm15 = vcmask 1042434   ;;  %vm9492_vm9 = vcmask 1044484   ;;  %vm9607_vm11 = vcmask 48128  }
 0x1cd   : > { %vm7749_vm12 = vcmp.le.s32.totalorder %v9602_v53, 14  ;;  %v4610_v1 = vsel %vm9606_vm15, %v4355_v24, %v4608_v7  ;;  %1421 = vrot.lane.b32.xlu1 %v7686_v34, %s6363_s25  ;;  %v2220_v8 = vsel %vm9607_vm11, %v2187_v25, %v7502_v38  ;;  %vm9491_vm13 = vcmask 1045509   ;;  %v7770_v51 = vpop.permute.xlu1 %1631 }
 0x1ce   : > { %vm9489_vm8 = vcmask 1046534   ;;  %1773 = vrot.lane.b32.xlu0 %v1130_v58, %s6366_s7  ;;  %v1163_v55 = vsel %vm7546_vm14, %v807_v63, 0.0  ;;  %vm9608_vm10 = vcmask 72704   ;;  %v4612_v30 = vsel %vm9499_vm7, %v4358_v31, %v4610_v1  ;;  %v6077_v12 = vpop.f32.mrb[4].mxu0 }
 0x1cf   : > { %v2253_v10 = vsel %vm9608_vm10, %v2220_v8, %v7542_v50  ;;  %v1062_v34 = vsel %vm7749_vm12, %v7564_v28, 0.0  ;;  %vm7775_vm15 = vcmp.ge.s32.totalorder %v529_v17, 1  ;;  %v9609_v38 = vmov 0  ;;  %v2574_v19 = vpop.f32.mrb[5].mxu0 }
 0x1d0   : > { %v9610_v38 = vsel %vm7775_vm15, 4294967295, %v9609_v38  ;;  %vm9612_vm11 = vcmask 97280   ;;  %v4614_v37 = vsel %vm9492_vm9, %v4361_v41, %v4612_v30  ;;  %vm9490_vm0 = vcmask 1047559   ;;  %v7782_v50 = vpop.permute.xlu0 %1983  ;;  %v7822_v30 = vld [vmem:[#allocation2 + $0x100] sm:$0xff] }
 0x1d1   : > { %9611 = vst [vmem:[#allocation16_spill] sm:$0xff] %v9610_v38  ;;  %v2286_v35 = vsel %vm9612_vm11, %v2253_v10, %v7603_v9  ;;  %v4616_v44 = vsel %vm9491_vm13, %v4364_v23, %v4614_v37  ;;  %vm9613_vm10 = vcmask 121856   ;;  %v2580_v28 = vadd.f32 %v6077_v12, %v7438_v59  ;;  %1899 = vrot.lane.b32.xlu1 %v1163_v55, %s6367_s11  ;;  %v2110_v54 = vpop.permute.xlu1 %2109 }
 0x1d2   : > { %v2319_v16 = vsel %vm9613_vm10, %v2286_v35, %v7665_v52  ;;  %v4618_v32 = vsel %vm9489_vm8, %v4367_v40, %v4616_v44  ;;  %v2575_v41 = vadd.f32 %v7438_v59, %v2574_v19  ;;  %1423 = vrot.lane.b32.xlu0 %v1062_v34, %s6363_s25  ;;  %v1095_v23 = vsel %vm7775_vm15, %v807_v63, 0.0  ;;  %v7830_v19 = vld [vmem:[#allocation2 + $0xf9] sm:$0xff] }
 0x1d3   : > { %v2352_v9 = vsel %vm2333_vm2, %v2319_v16, %v7696_v43  ;;  %v4620_v46 = vsel %vm9490_vm0, %v4370_v61, %v4618_v32  ;;  %v2718_v14 = vmax.f32 %v2580_v28, 0.0  ;;  %vm9614_vm11 = vcmask 130048  }
 0x1d4   : > { %v2385_v52 = vsel %vm9498_vm4, %v2352_v9, %v1982_v57  ;;  %4678 = vst.msk [vmem:[#allocation3 + $0x10] sm:$0xff] %vm9614_vm11, %v4620_v46  ;;  %v2717_v40 = vmax.f32 %v2575_v41, 0.0  ;;  %vm9615_vm10 = vcmask 195584   ;;  %v7800_v43 = vpop.permute.xlu0 %1281  ;;  %vm9616_vm8 = vcmask 220160  }
 0x1d5   : > { %v2418_v18 = vsel %vm9615_vm10, %v2385_v52, %v2110_v54  ;;  %v2862_v6 = vcombine.high %v2718_v14, %v2718_v14  ;;  %v2869_v13 = vrot.slane %v2718_v14, %v7459_v4  ;;  %1549 = vrot.lane.b32.xlu1 %v1095_v23, %s6364_s30  ;;  %vm9617_vm11 = vcmask 123904   ;;  %v7809_v15 = vpop.permute.xlu1 %1633 }
 0x1d6   : > { %6096 = vmatprep.mubr.msk.f32.mxu0 %vm9616_vm8, %v2418_v18  ;;  %v2845_v61 = vcombine.high %v2717_v40, %v2717_v40  ;;  %v2852_v11 = vrot.slane %v2717_v40, %v7459_v4  ;;  %1901 = vrot.lane.b32.xlu0 %v808_v45, %s6367_s11  ;;  %vm9618_vm10 = vmmov %vm9617_vm11  ;;  %v328_v23 = vadd.s32 248, %v6436_v2  ;;  %v327_v54 = vadd.s32 240, %v6436_v2 }
 0x1d7   : > { %v2876_v5 = vrot.slane %v2862_v6, %v7459_v4  ;;  %v2877_v33 = vcombine.high %v2869_v13, %v2869_v13  ;;  %v3590_v24 = vsel %vm9617_vm11, %v2869_v13, -inf  ;;  %vm9619_vm8 = vmmov %vm9618_vm10 }
 0x1d8   : > { %v3591_v57 = vrot.slane %v3590_v24, 4  ;;  %v2859_v58 = vrot.slane %v2845_v61, %v7459_v4  ;;  %v2860_v63 = vcombine.high %v2852_v11, %v2852_v11  ;;  %v3562_v17 = vsel %vm9618_vm10, %v2852_v11, -inf  ;;  %v7813_v42 = vpop.permute.xlu0 %1759  ;;  %vm9620_vm0 = vmmov %vm9619_vm8 }
 0x1d9   : > { %v2878_v60 = vcombine.high %v2876_v5, %v2876_v5  ;;  %v3597_v7 = vsel %vm9619_vm8, %v2877_v33, -inf  ;;  %v3604_v53 = vsel %vm9620_vm0, %v2876_v5, -inf  ;;  %1997 = vrot.lane.b32.xlu1 %v935_v21, %s6368_s22  ;;  %v3563_v25 = vrot.slane %v3562_v17, 4  ;;  %vm9621_vm11 = vmmov %vm9620_vm0  ;;  %v2112_v10 = vpop.permute.xlu1 %2111 }
 0x1da   : > { %v2861_v39 = vcombine.high %v2859_v58, %v2859_v58  ;;  %1551 = vrot.lane.b32.xlu0 %v808_v45, %s6364_s30  ;;  %v3598_v31 = vrot.slane %v3597_v7, 4  ;;  %vm9622_vm13 = vmmov %vm9620_vm0  ;;  %v3592_v34 = vmax.f32 %v3590_v24, %v3591_v57  ;;  %v3605_v35 = vrot.slane %v3604_v53, 4  ;;  %v6331_v45 = vld [vmem:[#allocation2 + $0x9f] sm:$0xff] }
 0x1db   : > { %v3611_v1 = vsel %vm9621_vm11, %v2878_v60, -inf  ;;  %v3569_v8 = vsel %vm9622_vm13, %v2860_v63, -inf  ;;  %vm9623_vm9 = vmmov %vm9620_vm0  ;;  %v3564_v9 = vmax.f32 %v3562_v17, %v3563_v25  ;;  %vm9624_vm13 = vcmask 23552  }
 0x1dc   : > { %v3576_v55 = vsel %vm9623_vm9, %v2859_v58, -inf  ;;  %v7824_v37 = vpop.permute.xlu0 %1283  ;;  %v3612_v12 = vrot.slane %v3611_v1, 4  ;;  %v3570_v44 = vrot.slane %v3569_v8, 4  ;;  %v3583_v28 = vsel %vm9620_vm0, %v2861_v39, -inf }
 0x1dd   : > { %1647 = vrot.lane.b32.xlu1 %v935_v21, %s6365_s6  ;;  %v3577_v16 = vrot.slane %v3576_v55, 4  ;;  %v3599_v32 = vmax.f32 %v3597_v7, %v3598_v31  ;;  %v7832_v41 = vpop.permute.xlu1 %1409  ;;  %v3593_v46 = vrot.slane %v3592_v34, 2  ;;  %v3606_v52 = vmax.f32 %v3604_v53, %v3605_v35 }
 0x1de   : > { %1999 = vrot.lane.b32.xlu0 %v7822_v30, %s6368_s22  ;;  %v2188_v40 = vsel %vm9624_vm13, %v6331_v45, %v7493_v49  ;;  %v3613_v18 = vmax.f32 %v3611_v1, %v3612_v12  ;;  %v3584_v6 = vrot.slane %v3583_v28, 4  ;;  %vm9625_vm9 = vcmask 48128   ;;  %v7849_v49 = vld [vmem:[#allocation2 + $0x101] sm:$0xff] }
 0x1df   : > { %v2221_v13 = vsel %vm9625_vm9, %v2188_v40, %v7523_v22  ;;  %v3571_v61 = vmax.f32 %v3569_v8, %v3570_v44  ;;  %v3578_v11 = vmax.f32 %v3576_v55, %v3577_v16  ;;  %vm9626_vm10 = vcmask 72704  }
 0x1e0   : > { %v7835_v14 = vpop.permute.xlu0 %1761  ;;  %v2254_v5 = vsel %vm9626_vm10, %v2221_v13, %v7580_v20  ;;  %v3600_v33 = vrot.slane %v3599_v32, 2  ;;  %v3565_v24 = vrot.slane %v3564_v9, 2  ;;  %v550_v58 = vand.u32 15, %v328_v23  ;;  %v7885_v23 = vld [vmem:[#allocation2 + $0xb7] sm:$0xff] }
 0x1e1   : > { %2125 = vrot.lane.b32.xlu1 %v7830_v19, %s6369_s26  ;;  %v7847_v57 = vpop.permute.xlu1 %1887  ;;  %vm9627_vm8 = vcmask 97280   ;;  %v3594_v17 = vmax.f32 %v3592_v34, %v3593_v46  ;;  %v3607_v60 = vrot.slane %v3606_v52, 2  ;;  %v543_v7 = vand.u32 15, %v327_v54  ;;  %v7870_v34 = vld [vmem:[#allocation2 + $0x107] sm:$0xff] }
 0x1e2   : > { %1297 = vrot.lane.b32.xlu0 %v935_v21, %s6362_s24  ;;  %v2287_v63 = vsel %vm9627_vm8, %v2254_v5, %v7661_v29  ;;  %vm9628_vm11 = vcmask 121856   ;;  %v3614_v53 = vrot.slane %v3613_v18, 2  ;;  %v3585_v20 = vmax.f32 %v3583_v28, %v3584_v6 }
 0x1e3   : > { %v2320_v21 = vsel %vm9628_vm11, %v2287_v63, %v7690_v36  ;;  %v3572_v25 = vrot.slane %v3571_v61, 2  ;;  %v3579_v31 = vrot.slane %v3578_v11, 2  ;;  %v1200_v29 = vsel %vm7536_vm6, %v7849_v49, 0.0 }
 0x1e4   : > { %v7853_v22 = vpop.permute.xlu0 %1411  ;;  %v2353_v39 = vsel %vm2333_vm2, %v2320_v21, %v7718_v56  ;;  %v3601_v1 = vmax.f32 %v3599_v32, %v3600_v33  ;;  %v3566_v8 = vmax.f32 %v3564_v9, %v3565_v24  ;;  %vm7872_vm0 = vcmp.le.s32.totalorder %v550_v58, 14 }
 0x1e5   : > { %1649 = vrot.lane.b32.xlu1 %v7822_v30, %s6365_s6  ;;  %v2386_v36 = vsel %vm9498_vm4, %v2353_v39, %v7782_v50  ;;  %v7868_v55 = vpop.permute.xlu1 %1537  ;;  %v3595_v35 = vrot.slane %v3594_v17, 1  ;;  %v3608_v12 = vmax.f32 %v3606_v52, %v3607_v60  ;;  %vm9631_vm13 = vcmask 195584   ;;  %v6332_v50 = vld [vmem:[#allocation2 + $0xa7] sm:$0xff]  ;;  %v9637_v60 = vld [vmem:[#allocation13_spill] sm:$0xff] }
 0x1e6   : > { %1775 = vrot.lane.b32.xlu0 %v7830_v19, %s6366_s7  ;;  %v2419_v44 = vsel %vm9631_vm13, %v2386_v36, %v2112_v10  ;;  %vm7879_vm6 = vcmp.ge.s32.totalorder %v543_v7, 1  ;;  %v893_v28 = vsel %vm7267_vm3, %v6332_v50, 0.0  ;;  %v3615_v32 = vmax.f32 %v3613_v18, %v3614_v53  ;;  %v7892_v10 = vld [vmem:[#allocation2 + $0x111] sm:$0xff]  ;;  %v9639_v39 = vld [vmem:[#allocation14_spill] sm:$0xff] }
 0x1e7   : > { %v9633_v26 = vsel %vm7879_vm6, 4294967295, %v9632_v26  ;;  %v3586_v9 = vrot.slane %v3585_v20, 2  ;;  %vm9636_vm9 = vcmask 220160   ;;  %v3573_v54 = vmax.f32 %v3571_v61, %v3572_v25  ;;  %v7902_v18 = vld [vmem:[#allocation2 + $0x117] sm:$0xff]  ;;  %v6334_v53 = vld [vmem:[#allocation2 + $0xaf] sm:$0xff] }
 0x1e8   : > { %v7877_v16 = vpop.permute.xlu0 %1889  ;;  %9634 = vst [vmem:[#allocation17_spill] sm:$0xff] %v9633_v26  ;;  %6097 = vmatmul.mubr.msk.f32.gmra.mrb[18].mxu0 %vm9636_vm9, %v2419_v44  ;;  %v3580_v45 = vmax.f32 %v3578_v11, %v3579_v31  ;;  %v1132_v3 = vsel %vm7749_vm12, %v7849_v49, 0.0  ;;  %v1165_v40 = vsel %vm7775_vm15, %v7870_v34, 0.0  ;;  %v3602_v6 = vrot.slane %v3601_v1, 1  ;;  %v9641_v31 = vld [vmem:[#allocation15_spill] sm:$0xff] }
 0x1e9   : > { %2127 = vrot.lane.b32.xlu1 %v1200_v29, %s6369_s26  ;;  %v3567_v13 = vrot.slane %v3566_v8, 1  ;;  %v1986_v5 = vpop.permute.xlu1 %1985  ;;  %v1064_v61 = vsel %vm7872_vm0, %v7849_v49, 0.0  ;;  %v3596_v11 = vmax.f32 %v3594_v17, %v3595_v35  ;;  %v3609_v33 = vrot.slane %v3608_v12, 1 }
 0x1ea   : > { %1299 = vrot.lane.b32.xlu0 %v7822_v30, %s6362_s24  ;;  %v1097_v30 = vsel %vm7879_vm6, %v7870_v34, 0.0  ;;  %vm9638_vm3 = vcmask 23552   ;;  %v3616_v49 = vrot.slane %v3615_v32, 1  ;;  %v3587_v21 = vmax.f32 %v3585_v20, %v3586_v9 }
 0x1eb   : > { %v2189_v7 = vsel %vm9638_vm3, %v893_v28, %v9637_v60  ;;  %vm9640_vm10 = vmmov %vm9638_vm3  ;;  %vm9642_vm8 = vcmask 48128   ;;  %v3574_v36 = vrot.slane %v3573_v54, 1  ;;  %v3581_v34 = vrot.slane %v3580_v45, 1 }
 0x1ec   : > { %v7910_v24 = vpop.permute.xlu0 %1539  ;;  %v2190_v25 = vsel %vm9640_vm10, %v6334_v53, %v9639_v39  ;;  %v2222_v29 = vsel %vm9642_vm8, %v2189_v7, %v9641_v31  ;;  %vm9643_vm11 = vmmov %vm9642_vm8  ;;  %vm9644_vm13 = vcmask 72704   ;;  %v3603_v35 = vmax.f32 %v3601_v1, %v3602_v6 }
 0x1ed   : > { %1425 = vrot.lane.b32.xlu1 %v7830_v19, %s6363_s25  ;;  %v2223_v20 = vsel %vm9643_vm11, %v2190_v25, %v7699_v47  ;;  %v2255_v19 = vsel %vm9644_vm13, %v2222_v29, %v7711_v62  ;;  %v3568_v44 = vmax.f32 %v3566_v8, %v3567_v13  ;;  %v7934_v50 = vpop.permute.xlu1 %1635  ;;  %vm9645_vm9 = vmmov %vm9644_vm13  ;;  %vm9646_vm3 = vcmask 97280  }
 0x1ee   : > { %1777 = vrot.lane.b32.xlu0 %v1132_v3, %s6366_s7  ;;  %v2256_v28 = vsel %vm9645_vm9, %v2223_v20, %v7745_v0  ;;  %v2288_v9 = vsel %vm9646_vm3, %v2255_v19, %v7770_v51  ;;  %v3610_v60 = vmax.f32 %v3608_v12, %v3609_v33  ;;  %vm9647_vm10 = vcmask 130048   ;;  %v6080_v3 = vpop.f32.mrb[6].mxu0  ;;  %v1066_v33 = vld [vmem:[#allocation2 + $0x10f] sm:$0xff] }
 0x1ef   : > { %v7941_v7 = vsel %vm9647_vm10, %v3596_v11, -inf  ;;  %v3617_v47 = vmax.f32 %v3615_v32, %v3616_v49  ;;  %v3588_v39 = vrot.slane %v3587_v21, 1  ;;  %vm9648_vm8 = vcmask 121856   ;;  %v2584_v0 = vpop.f32.mrb[7].mxu0  ;;  %vm9649_vm11 = vmmov %vm9647_vm10 }
 0x1f0   : > { %v7943_v53 = vpop.permute.xlu0 %1987  ;;  %v2321_v62 = vsel %vm9648_vm8, %v2288_v9, %v7813_v42  ;;  %v2590_v1 = vadd.f32 %v6080_v3, %v7438_v59  ;;  %v3575_v8 = vmax.f32 %v3573_v54, %v3574_v36  ;;  %v3582_v6 = vmax.f32 %v3580_v45, %v3581_v34  ;;  %vm9650_vm13 = vmmov %vm9647_vm10 }
 0x1f1   : > { %1903 = vrot.lane.b32.xlu1 %v1165_v40, %s6367_s11  ;;  %v2354_v51 = vsel %vm2333_vm2, %v2321_v62, %v7847_v57  ;;  %v2585_v12 = vadd.f32 %v7438_v59, %v2584_v0  ;;  %v7954_v32 = vsel %vm9649_vm11, %v3603_v35, -inf  ;;  %v7957_v13 = vsel %vm9650_vm13, %v3568_v44, -inf  ;;  %v2114_v40 = vpop.permute.xlu1 %2113  ;;  %vm9651_vm9 = vmmov %vm9647_vm10 }
 0x1f2   : > { %1427 = vrot.lane.b32.xlu0 %v1064_v61, %s6363_s25  ;;  %v2387_v42 = vsel %vm9498_vm4, %v2354_v51, %v1986_v5  ;;  %v2720_v11 = vmax.f32 %v2590_v1, 0.0  ;;  %v7961_v54 = vsel %vm9651_vm9, %v3610_v60, -inf  ;;  %v2289_v57 = vsel %vm9646_vm3, %v2256_v28, %v7809_v15  ;;  %vm9653_vm8 = vmmov %vm9651_vm9 }
 0x1f3   : > { %v2719_v59 = vmax.f32 %v2585_v12, 0.0  ;;  %vm9652_vm10 = vcmask 195584   ;;  %v7969_v49 = vsel %vm9653_vm8, %v3617_v47, -inf  ;;  %v7971_v25 = vmax.f32 %v3587_v21, %v3588_v39  ;;  %vm9655_vm13 = vmmov %vm9653_vm8  ;;  %v1099_v21 = vld [vmem:[#allocation2 + $0x108] sm:$0xff] }
 0x1f4   : > { %v2420_v45 = vsel %vm9652_vm10, %v2387_v42, %v2114_v40  ;;  %v7966_v61 = vpop.permute.xlu0 %1285  ;;  %v2896_v5 = vcombine.high %v2720_v11, %v2720_v11  ;;  %v2903_v31 = vrot.slane %v2720_v11, %v7459_v4  ;;  %vm9654_vm11 = vcmask 220160   ;;  %vm9656_vm9 = vmmov %vm9653_vm8 }
 0x1f5   : > { %1553 = vrot.lane.b32.xlu1 %v1097_v30, %s6364_s30  ;;  %6099 = vmatprep.mubr.msk.f32.mxu0 %vm9654_vm11, %v2420_v45  ;;  %v7977_v29 = vsel %vm9655_vm13, %v3575_v8, -inf  ;;  %v7980_v15 = vsel %vm9656_vm9, %v3582_v6, -inf  ;;  %v2879_v36 = vcombine.high %v2719_v59, %v2719_v59  ;;  %v2886_v34 = vrot.slane %v2719_v59, %v7459_v4  ;;  %v7990_v44 = vpop.permute.xlu1 %1637  ;;  %v1100_v59 = vld [vmem:[#allocation2 + $0x110] sm:$0xff] }
 0x1f6   : > { %1905 = vrot.lane.b32.xlu0 %v1066_v33, %s6367_s11  ;;  %vm9657_vm3 = vcmask 121856   ;;  %v2910_v30 = vrot.slane %v2896_v5, %v7459_v4  ;;  %v2911_v19 = vcombine.high %v2903_v31, %v2903_v31  ;;  %vm9658_vm10 = vcmask 123904  }
 0x1f7   : > { %v7986_v20 = vsel %vm9657_vm3, %v2289_v57, %v7835_v14  ;;  %v3646_v35 = vsel %vm9658_vm10, %v2903_v31, -inf  ;;  %v2893_v9 = vrot.slane %v2879_v36, %v7459_v4  ;;  %v2894_v60 = vcombine.high %v2886_v34, %v2886_v34  ;;  %vm9659_vm8 = vmmov %vm9658_vm10 }
 0x1f8   : > { %v3647_v28 = vrot.slane %v3646_v35, 4  ;;  %v3618_v3 = vsel %vm9659_vm8, %v2886_v34, -inf  ;;  %v7994_v47 = vpop.permute.xlu0 %1763  ;;  %v2912_v39 = vcombine.high %v2910_v30, %v2910_v30  ;;  %vm9660_vm11 = vmmov %vm9659_vm8 }
 0x1f9   : > { %v3653_v62 = vsel %vm9660_vm11, %v2911_v19, -inf  ;;  %vm9661_vm13 = vmmov %vm9659_vm8  ;;  %v3619_v1 = vrot.slane %v3618_v3, 4  ;;  %2001 = vrot.lane.b32.xlu1 %v1099_v21, %s6368_s22  ;;  %v2895_v51 = vcombine.high %v2893_v9, %v2893_v9  ;;  %v8003_v57 = vpop.permute.xlu1 %2115  ;;  %vm9667_vm11 = vcmask 130048  }
 0x1fa   : > { %v3660_v14 = vsel %vm9661_vm13, %v2910_v30, -inf  ;;  %v3648_v0 = vmax.f32 %v3646_v35, %v3647_v28  ;;  %v3654_v8 = vrot.slane %v3653_v62, 4  ;;  %1555 = vrot.lane.b32.xlu0 %v1066_v33, %s6364_s30  ;;  %vm9662_vm9 = vmmov %vm9659_vm8  ;;  %s6371_s30 = smov 16  }
 0x1fb   : > { %v3661_v6 = vrot.slane %v3660_v14, 4  ;;  %v3667_v12 = vsel %vm9662_vm9, %v2912_v39, -inf  ;;  %v3620_v42 = vmax.f32 %v3618_v3, %v3619_v1  ;;  %vm9663_vm3 = vmmov %vm9659_vm8  ;;  %v1101_v39 = vld [vmem:[#allocation2 + $0x109] sm:$0xff] }
 0x1fc   : > { %v3625_v11 = vsel %vm9663_vm3, %v2894_v60, -inf  ;;  %vm9664_vm10 = vmmov %vm9663_vm3  ;;  %v3649_v45 = vrot.slane %v3648_v0, 2  ;;  %v3655_v5 = vmax.f32 %v3653_v62, %v3654_v8  ;;  %v3668_v36 = vrot.slane %v3667_v12, 4  ;;  %v8005_v34 = vpop.permute.xlu0 %1287 }
 0x1fd   : > { %v3632_v40 = vsel %vm9664_vm10, %v2893_v9, -inf  ;;  %v3662_v31 = vmax.f32 %v3660_v14, %v3661_v6  ;;  %v3621_v30 = vrot.slane %v3620_v42, 2  ;;  %v3626_v19 = vrot.slane %v3625_v11, 4  ;;  %vm9665_vm8 = vmmov %vm9663_vm3  ;;  %1651 = vrot.lane.b32.xlu1 %v1099_v21, %s6365_s6  ;;  %v8010_v6 = vpop.permute.xlu1 %1413 }
 0x1fe   : > { %v3633_v35 = vrot.slane %v3632_v40, 4  ;;  %v3639_v33 = vsel %vm9665_vm8, %v2895_v51, -inf  ;;  %v3650_v28 = vmax.f32 %v3648_v0, %v3649_v45  ;;  %v3656_v60 = vrot.slane %v3655_v5, 2  ;;  %2003 = vrot.lane.b32.xlu0 %v1100_v59, %s6368_s22  ;;  %9666 = vst [vmem:[#allocation11_spill] sm:$0xff] %v8010_v6  ;;  %vm9668_vm13 = vmmov %vm9667_vm11 }
 0x1ff   : > { %v3663_v3 = vrot.slane %v3662_v31, 2  ;;  %v3669_v9 = vmax.f32 %v3667_v12, %v3668_v36  ;;  %v3622_v1 = vmax.f32 %v3620_v42, %v3621_v30  ;;  %v3627_v62 = vmax.f32 %v3625_v11, %v3626_v19  ;;  %vm9669_vm9 = vmmov %vm9667_vm11 }
 0x200   : > { %v3634_v14 = vmax.f32 %v3632_v40, %v3633_v35  ;;  %v3640_v8 = vrot.slane %v3639_v33, 4  ;;  %v3651_v52 = vrot.slane %v3650_v28, 1  ;;  %v3657_v17 = vmax.f32 %v3655_v5, %v3656_v60  ;;  %v8012_v51 = vpop.permute.xlu0 %1765  ;;  %vm9670_vm3 = vmmov %vm9669_vm9 }
 0x201   : > { %v3664_v63 = vmax.f32 %v3662_v31, %v3663_v3  ;;  %v3670_v58 = vrot.slane %v3669_v9, 2  ;;  %v3623_v21 = vrot.slane %v3622_v1, 1  ;;  %v3628_v0 = vrot.slane %v3627_v62, 2  ;;  %2129 = vrot.lane.b32.xlu1 %v1101_v39, %s6369_s26  ;;  %v8016_v31 = vpop.permute.xlu1 %1891  ;;  %vm9672_vm10 = vmmov %vm9670_vm3 }
 0x202   : > { %v3635_v45 = vrot.slane %v3634_v14, 2  ;;  %v3641_v38 = vmax.f32 %v3639_v33, %v3640_v8  ;;  %v3652_v12 = vmax.f32 %v3650_v28, %v3651_v52  ;;  %v3658_v36 = vrot.slane %v3657_v17, 1  ;;  %1653 = vrot.lane.b32.xlu0 %v1100_v59, %s6365_s6  ;;  %vm9674_vm8 = vmmov %vm9670_vm3  ;;  %s6372_s6 = smov 32  }
 0x203   : > { %v3665_v42 = vrot.slane %v3664_v63, 1  ;;  %v3671_v11 = vmax.f32 %v3669_v9, %v3670_v58  ;;  %v3624_v40 = vmax.f32 %v3622_v1, %v3623_v21  ;;  %v3629_v30 = vmax.f32 %v3627_v62, %v3628_v0 }
 0x204   : > { %v3636_v19 = vmax.f32 %v3634_v14, %v3635_v45  ;;  %v3642_v5 = vrot.slane %v3641_v38, 2  ;;  %v3659_v35 = vmax.f32 %v3657_v17, %v3658_v36  ;;  %v4384_v6 = vsel %vm9667_vm11, %v3652_v12, -inf  ;;  %v8019_v33 = vpop.permute.xlu0 %1415 }
 0x205   : > { %v3666_v60 = vmax.f32 %v3664_v63, %v3665_v42  ;;  %v3672_v3 = vrot.slane %v3671_v11, 1  ;;  %v4385_v52 = vmax.f32 %v7941_v7, %v4384_v6  ;;  %v3630_v28 = vrot.slane %v3629_v30, 1  ;;  %1779 = vrot.lane.b32.xlu1 %v1101_v39, %s6366_s7  ;;  %v8033_v39 = vpop.permute.xlu1 %1541 }
 0x206   : > { %v3637_v8 = vrot.slane %v3636_v19, 1  ;;  %v3643_v58 = vmax.f32 %v3641_v38, %v3642_v5  ;;  %v4387_v9 = vsel %vm9668_vm13, %v3659_v35, -inf  ;;  %v4372_v17 = vsel %vm9670_vm3, %v3624_v40, -inf }
 0x207   : > { %v3673_v59 = vmax.f32 %v3671_v11, %v3672_v3  ;;  %v4390_v1 = vsel %vm9669_vm9, %v3666_v60, -inf  ;;  %v9671_v63 = vsel %vm7749_vm12, %v7892_v10, 0.0  ;;  %v4388_v7 = vmax.f32 %v7954_v32, %v4387_v9  ;;  %vm9673_vm12 = vmmov %vm9670_vm3  ;;  %v1136_v11 = vld [vmem:[#allocation2 + $0x11f] sm:$0xff] }
 0x208   : > { %2131 = vrot.lane.b32.xlu0 %v9671_v63, %s6369_s26  ;;  %v4391_v62 = vmax.f32 %v7961_v54, %v4390_v1  ;;  %v3631_v38 = vmax.f32 %v3629_v30, %v3630_v28  ;;  %v3638_v14 = vmax.f32 %v3636_v19, %v3637_v8  ;;  %v2355_v6 = vsel %vm2333_vm2, %v7986_v20, %v7877_v16  ;;  %v8040_v45 = vpop.permute.xlu0 %1893  ;;  %vm9679_vm9 = vmmov %vm9670_vm3  ;;  %v1170_v60 = vld [vmem:[#allocation2 + $0x120] sm:$0xff]  ;;  %v4830_v63 = vld [vmem:[#allocation3 + $0x8] sm:$0xff] }
 0x209   : > { %v4393_v21 = vsel %vm9672_vm10, %v3673_v59, -inf  ;;  %v3644_v0 = vrot.slane %v3643_v58, 1  ;;  %v4373_v27 = vmax.f32 %v7957_v13, %v4372_v17  ;;  %v2388_v32 = vsel %vm9498_vm4, %v2355_v6, %v7943_v53  ;;  %v1990_v40 = vpop.permute.xlu1 %1989 }
 0x20a   : > { %v4394_v12 = vmax.f32 %v7969_v49, %v4393_v21  ;;  %v4375_v54 = vsel %vm9673_vm12, %v3631_v38, -inf  ;;  %v4378_v36 = vsel %vm9674_vm8, %v3638_v14, -inf  ;;  %v9675_v16 = vsel %vm7872_vm0, %v7892_v10, 0.0  ;;  %v1169_v10 = vld [vmem:[#allocation2 + $0x118] sm:$0xff] }
 0x20b   : > { %1781 = vrot.lane.b32.xlu1 %v9675_v16, %s6366_s7  ;;  %v3645_v20 = vmax.f32 %v3643_v58, %v3644_v0  ;;  %v4376_v13 = vmax.f32 %v7977_v29, %v4375_v54  ;;  %v4379_v42 = vmax.f32 %v7980_v15, %v4378_v36  ;;  %vm9676_vm11 = vcmask 195584   ;;  %s6373_s7 = smov 48  }
 0x20c   : > { %v2421_v49 = vsel %vm9676_vm11, %v2388_v32, %v8003_v57  ;;  %v9677_v53 = vsel %vm7879_vm6, %v7902_v18, 0.0  ;;  %vm9678_vm13 = vcmask 220160   ;;  %v4380_v30 = vsel %vm9679_vm9, %v7971_v25, -inf  ;;  %v8066_v19 = vpop.permute.xlu0 %1543 }
 0x20d   : > { %1907 = vrot.lane.b32.xlu0 %v9677_v53, %s6367_s11  ;;  %6100 = vmatmul.mubr.msk.f32.gmra.mrb[20].mxu0 %vm9678_vm13, %v2421_v49  ;;  %v4381_v29 = vsel %vm9670_vm3, %v3645_v20, -inf  ;;  %vm9680_vm10 = vcmask 1041409   ;;  %v9681_v18 = vsel %vm7355_vm1, %v7885_v23, 0.0  ;;  %vm9682_vm12 = vcmask 23552   ;;  %v8082_v28 = vpop.permute.xlu1 %1639  ;;  %v1171_v23 = vld [vmem:[#allocation2 + $0x119] sm:$0xff] }
 0x20e   : > { %v4621_v15 = vsel %vm9680_vm10, %v4376_v13, %v4373_v27  ;;  %v2191_v57 = vsel %vm9682_vm12, %v9681_v18, %v7800_v43  ;;  %v4382_v5 = vmax.f32 %v4380_v30, %v4381_v29  ;;  %vm9683_vm8 = vcmask 1042434   ;;  %v1172_v43 = vld [vmem:[#allocation2 + $0x121] sm:$0xff]  ;;  %v6083_v59 = vpop.f32.mrb[8].mxu0 }
 0x20f   : > { %v4622_v35 = vsel %vm9683_vm8, %v4379_v42, %v4621_v15  ;;  %1909 = vrot.lane.b32.xlu1 %v1136_v11, %s6367_s11  ;;  %vm9684_vm11 = vcmask 48128   ;;  %vm9685_vm13 = vcmask 72704   ;;  %vm9686_vm1 = vcmask 97280  }
 0x210   : > { %v2224_v25 = vsel %vm9684_vm11, %v2191_v57, %v7832_v41  ;;  %v4623_v46 = vsel %vm9499_vm7, %v4382_v5, %v4622_v35  ;;  %vm9687_vm9 = vcmask 1044484   ;;  %v8087_v9 = vpop.permute.xlu0 %1991  ;;  %vm9688_vm3 = vcmask 1045509  }
 0x211   : > { %2005 = vrot.lane.b32.xlu0 %v1169_v10, %s6368_s22  ;;  %v2257_v3 = vsel %vm9685_vm13, %v2224_v25, %v7868_v55  ;;  %v4624_v58 = vsel %vm9687_vm9, %v4385_v52, %v4623_v46  ;;  %vm9689_vm10 = vcmask 121856   ;;  %v8095_v55 = vld [vmem:[%s9463_s2] ss:$0 sm:$0xff]  ;;  %vm9690_vm12 = vcmask 1046534   ;;  %v2118_v27 = vpop.permute.xlu1 %2117 }
 0x212   : > { %v2290_v8 = vsel %vm9686_vm1, %v2257_v3, %v7934_v50  ;;  %v4625_v41 = vsel %vm9688_vm3, %v4388_v7, %v4624_v58  ;;  %v2600_v17 = vadd.f32 %v8095_v55, %v6083_v59  ;;  %v2594_v50 = vpop.f32.mrb[9].mxu0  ;;  %v8099_v52 = vld [vmem:[#allocation3 + $0x10] sm:$0xff]  ;;  %v1204_v14 = vsel %vm7872_vm0, %v1172_v43, 0.0 }
 0x213   : > { %v2323_v1 = vsel %vm9689_vm10, %v2290_v8, %v7994_v47  ;;  %2007 = vrot.lane.b32.xlu1 %v1170_v60, %s6368_s22  ;;  %v4626_v38 = vsel %vm9690_vm12, %v4391_v62, %v4625_v41  ;;  %v2595_v47 = vadd.f32 %v8095_v55, %v2594_v50  ;;  %vm9691_vm8 = vcmask 1047559  }
 0x214   : > { %v2356_v7 = vsel %vm2333_vm2, %v2323_v1, %v8016_v31  ;;  %v4627_v6 = vsel %vm9691_vm8, %v4394_v12, %v4626_v38  ;;  %v2722_v0 = vmax.f32 %v2600_v17, 0.0  ;;  %vm9692_vm11 = vcmask 130048   ;;  %v8112_v54 = vpop.permute.xlu0 %1289 }
 0x215   : > { %2133 = vrot.lane.b32.xlu0 %v1171_v23, %s6369_s26  ;;  %v2389_v21 = vsel %vm9498_vm4, %v2356_v7, %v1990_v40  ;;  %4679 = vst.msk [vmem:[#allocation3 + $0x18] sm:$0xff] %vm9692_vm11, %v4627_v6  ;;  %v2721_v32 = vmax.f32 %v2595_v47, 0.0  ;;  %vm9693_vm13 = vcmask 195584   ;;  %v6206_v31 = vpack.i.bf16 %v8099_v52, %v4830_v63  ;;  %v8122_v49 = vpop.permute.xlu1 %1641  ;;  %v9703_v47 = vld [vmem:[#allocation5_spill] sm:$0xff] }
 0x216   : > { %v2422_v62 = vsel %vm9693_vm13, %v2389_v21, %v2118_v27  ;;  %v2930_v36 = vcombine.high %v2722_v0, %v2722_v0  ;;  %v2937_v16 = vrot.slane %v2722_v0, %v7459_v4  ;;  %vm9694_vm0 = vcmask 220160   ;;  %v6336_v0 = vld [vmem:[#allocation2 + $0xbf] sm:$0xff] }
 0x217   : > { %2135 = vrot.lane.b32.xlu1 %v1204_v14, %s6369_s26  ;;  %6102 = vmatprep.mubr.msk.f32.mxu0 %vm9694_vm0, %v2422_v62  ;;  %v2913_v56 = vcombine.high %v2721_v32, %v2721_v32  ;;  %v2920_v12 = vrot.slane %v2721_v32, %v7459_v4  ;;  %vm9695_vm1 = vcmask 123904   ;;  %v4690_v17 = vand.u32 7, %v6436_v2 }
 0x218   : > { %v2944_v20 = vrot.slane %v2930_v36, %v7459_v4  ;;  %v2945_v13 = vcombine.high %v2937_v16, %v2937_v16  ;;  %v3702_v42 = vsel %vm9695_vm1, %v2937_v16, -inf  ;;  %vm9696_vm9 = vmmov %vm9695_vm1  ;;  %v8126_v30 = vpop.permute.xlu0 %1767  ;;  %v4697_v14 = vand.u32 7, %v9703_v47  ;;  %v5209_v16 = vld [vmem:[%s9464_s3 + $0xa8] sm:$0xff] }
 0x219   : > { %6207 = vrot.lane.b32.xlu0 %v6206_v31, %s6371_s30  ;;  %v3703_v53 = vrot.slane %v3702_v42, 4  ;;  %v2927_v11 = vrot.slane %v2913_v56, %v7459_v4  ;;  %v2928_v40 = vcombine.high %v2920_v12, %v2920_v12  ;;  %v3674_v10 = vsel %vm9696_vm9, %v2920_v12, -inf  ;;  %vm9697_vm3 = vmmov %vm9695_vm1  ;;  %v2120_v23 = vpop.permute.xlu1 %2119 }
 0x21a   : > { %v2946_v29 = vcombine.high %v2944_v20, %v2944_v20  ;;  %v3709_v15 = vsel %vm9697_vm3, %v2945_v13, -inf  ;;  %vm9698_vm10 = vmmov %vm9695_vm1  ;;  %v3675_v35 = vrot.slane %v3674_v10, 4  ;;  %vm9704_vm0 = vcmask 23552  }
 0x21b   : > { %v3716_v18 = vsel %vm9698_vm10, %v2944_v20, -inf  ;;  %v3704_v57 = vmax.f32 %v3702_v42, %v3703_v53  ;;  %v2929_v5 = vcombine.high %v2927_v11, %v2927_v11  ;;  %v3710_v25 = vrot.slane %v3709_v15, 4  ;;  %vm9699_vm12 = vmmov %vm9695_vm1  ;;  %v4838_v42 = vld [vmem:[#allocation3 + $0x9] sm:$0xff] }
 0x21c   : > { %v3723_v60 = vsel %vm9699_vm12, %v2946_v29, -inf  ;;  %vm9700_vm8 = vmmov %vm9695_vm1  ;;  %v3717_v43 = vrot.slane %v3716_v18, 4  ;;  %v8133_v8 = vpop.permute.xlu0 %1291  ;;  %v3676_v38 = vmax.f32 %v3674_v10, %v3675_v35  ;;  %v2192_v27 = vsel %vm9704_vm0, %v6336_v0, %v7824_v37 }
 0x21d   : > { %v3681_v3 = vsel %vm9700_vm8, %v2928_v40, -inf  ;;  %vm9701_vm11 = vmmov %vm9695_vm1  ;;  %v3724_v58 = vrot.slane %v3723_v60, 4  ;;  %v3705_v50 = vrot.slane %v3704_v57, 2  ;;  %v3711_v63 = vmax.f32 %v3709_v15, %v3710_v25  ;;  %v8137_v7 = vpop.permute.xlu1 %1417 }
 0x21e   : > { %v3688_v46 = vsel %vm9701_vm11, %v2927_v11, -inf  ;;  %v3682_v59 = vrot.slane %v3681_v3, 4  ;;  %vm9702_vm13 = vmmov %vm9695_vm1  ;;  %v3718_v6 = vmax.f32 %v3716_v18, %v3717_v43  ;;  %vm9705_vm1 = vcmask 48128   ;;  %v8168_v18 = vld [vmem:[#allocation3 + $0x11] sm:$0xff] }
 0x21f   : > { %v3689_v41 = vrot.slane %v3688_v46, 4  ;;  %v3695_v1 = vsel %vm9702_vm13, %v2929_v5, -inf  ;;  %v3725_v32 = vmax.f32 %v3723_v60, %v3724_v58  ;;  %v2225_v31 = vsel %vm9705_vm1, %v2192_v27, %v7853_v22  ;;  %v8174_v5 = vld [vmem:[#allocation3 + $0x17] sm:$0xff] }
 0x220   : > { %v8140_v21 = vpop.permute.xlu0 %1769  ;;  %v3696_v62 = vrot.slane %v3695_v1, 4  ;;  %v3683_v2 = vmax.f32 %v3681_v3, %v3682_v59  ;;  %vm8146_vm9 = vcmp.le.s32.totalorder %v4690_v17, 6  ;;  %vm9708_vm3 = vcmask 72704   ;;  %v4799_v3 = vld [vmem:[#allocation3 + $0xf] sm:$0xff] }
 0x221   : > { %v3690_v36 = vmax.f32 %v3688_v46, %v3689_v41  ;;  %v2258_v56 = vsel %vm9708_vm3, %v2225_v31, %v7910_v24  ;;  %v3706_v12 = vmax.f32 %v3704_v57, %v3705_v50  ;;  %v3712_v20 = vrot.slane %v3711_v63, 2  ;;  %v8152_v53 = vpop.permute.xlu1 %1895  ;;  %v8198_v31 = vld [vmem:[#allocation3 + $0x18] sm:$0xff] }
 0x222   : > { %v3677_v13 = vrot.slane %v3676_v38, 2  ;;  %vm8154_vm10 = vcmp.ge.s32.totalorder %v4697_v14, 1  ;;  %v9709_v37 = vmov 0  ;;  %vm8158_vm12 = vcmp.le.s32.totalorder %v4697_v14, 6  ;;  %9721 = vst [vmem:[#allocation14_spill] sm:$0xff] %v8198_v31 }
 0x223   : > { %v9710_v37 = vsel %vm8154_vm10, 4294967295, %v9709_v37  ;;  %vm9714_vm8 = vcmask 97280   ;;  %v3719_v40 = vrot.slane %v3718_v6, 2  ;;  %vm9715_vm11 = vcmask 121856  }
 0x224   : > { %9711 = vst [vmem:[#allocation13_spill] sm:$0xff] %v9710_v37  ;;  %v2291_v11 = vsel %vm9714_vm8, %v2258_v56, %v7990_v44  ;;  %v8164_v10 = vpop.permute.xlu0 %1419  ;;  %v3726_v29 = vrot.slane %v3725_v32, 2  ;;  %v3697_v15 = vmax.f32 %v3695_v1, %v3696_v62  ;;  %vm8170_vm13 = vcmp.ge.s32.totalorder %v4690_v17, 1 }
 0x225   : > { %v2324_v24 = vsel %vm9715_vm11, %v2291_v11, %v8012_v51  ;;  %v3684_v44 = vrot.slane %v3683_v2, 2  ;;  %v3691_v25 = vrot.slane %v3690_v36, 2  ;;  %v4862_v60 = vsel %vm8146_vm9, %v4838_v42, 0.0  ;;  %v8182_v59 = vpop.permute.xlu1 %1545  ;;  %v8201_v11 = vld [vmem:[#allocation2 + $0xd7] sm:$0xff] }
 0x226   : > { %v2357_v35 = vsel %vm2333_vm2, %v2324_v24, %v8040_v45  ;;  %v3707_v51 = vrot.slane %v3706_v12, 1  ;;  %v3713_v46 = vmax.f32 %v3711_v63, %v3712_v20  ;;  %v3678_v58 = vmax.f32 %v3676_v38, %v3677_v13  ;;  %v6337_v38 = vld [vmem:[#allocation2 + $0xc7] sm:$0xff] }
 0x227   : > { %v2390_v43 = vsel %vm9498_vm4, %v2357_v35, %v8087_v9  ;;  %v3720_v41 = vmax.f32 %v3718_v6, %v3719_v40  ;;  %vm9718_vm0 = vcmask 195584   ;;  %v4863_v45 = vsel %vm8158_vm12, %v8168_v18, 0.0 }
 0x228   : > { %v2423_v1 = vsel %vm9718_vm0, %v2390_v43, %v2120_v23  ;;  %v4872_v17 = vsel %vm8154_vm10, %v8174_v5, 0.0  ;;  %v8191_v50 = vpop.permute.xlu0 %1897  ;;  %v3727_v63 = vmax.f32 %v3725_v32, %v3726_v29  ;;  %v3698_v47 = vrot.slane %v3697_v15, 2 }
 0x229   : > { %v6211_v14 = vpack.i.bf16 %v4863_v45, %v4862_v60  ;;  %v4871_v9 = vsel %vm8170_vm13, %v4799_v3, 0.0  ;;  %vm9719_vm1 = vcmask 220160   ;;  %v897_v6 = vsel %vm7448_vm5, %v6337_v38, 0.0  ;;  %v1994_v32 = vpop.permute.xlu1 %1993  ;;  %v9724_v60 = vld [vmem:[#allocation11_spill] sm:$0xff] }
 0x22a   : > { %6103 = vmatmul.mubr.msk.f32.gmra.mrb[22].mxu0 %vm9719_vm1, %v2423_v1  ;;  %v3685_v0 = vmax.f32 %v3683_v2, %v3684_v44  ;;  %v3692_v27 = vmax.f32 %v3690_v36, %v3691_v25  ;;  %v6216_v62 = vpack.i.bf16 %v4872_v17, %v4871_v9  ;;  %v3714_v56 = vrot.slane %v3713_v46, 1  ;;  %v6339_v44 = vld [vmem:[#allocation2 + $0xcf] sm:$0xff] }
 0x22b   : > { %v3679_v20 = vrot.slane %v3678_v58, 1  ;;  %6212 = vrot.lane.b32.xlu1 %v6211_v14, %s6372_s6  ;;  %v3708_v13 = vmax.f32 %v3706_v12, %v3707_v51  ;;  %v3721_v42 = vrot.slane %v3720_v41, 1  ;;  %vm9722_vm5 = vcmask 23552  }
 0x22c   : > { %6217 = vrot.lane.b32.xlu0 %v6216_v62, %s6373_s7  ;;  %v8207_v2 = vpop.permute.xlu0 %1547  ;;  %v2193_v24 = vsel %vm9722_vm5, %v897_v6, %v7966_v61  ;;  %v3728_v12 = vrot.slane %v3727_v63, 1  ;;  %v3699_v29 = vmax.f32 %v3697_v15, %v3698_v47  ;;  %v6221_v35 = vpack.i.bf16 %v8198_v31, %v8099_v52  ;;  %vm9723_vm3 = vmmov %vm9722_vm5 }
 0x22d   : > { %v2194_v25 = vsel %vm9723_vm3, %v6339_v44, %v8005_v34  ;;  %vm9725_vm8 = vcmask 48128   ;;  %v3686_v51 = vrot.slane %v3685_v0, 1  ;;  %v3693_v43 = vrot.slane %v3692_v27, 1  ;;  %v8225_v52 = vpop.permute.xlu1 %1643 }
 0x22e   : > { %v2226_v3 = vsel %vm9725_vm8, %v2193_v24, %v9724_v60  ;;  %vm9726_vm11 = vmmov %vm9725_vm8  ;;  %vm9727_vm0 = vcmask 72704   ;;  %v3715_v45 = vmax.f32 %v3713_v46, %v3714_v56  ;;  %v3680_v15 = vmax.f32 %v3678_v58, %v3679_v20 }
 0x22f   : > { %v2227_v1 = vsel %vm9726_vm11, %v2194_v25, %v8019_v33  ;;  %v2259_v61 = vsel %vm9727_vm0, %v2226_v3, %v8033_v39  ;;  %6222 = vrot.lane.b32.xlu1 %v6221_v35, %s6374_s28  ;;  %vm9728_vm1 = vmmov %vm9727_vm0  ;;  %vm9729_vm5 = vcmask 97280   ;;  %v3722_v47 = vmax.f32 %v3720_v41, %v3721_v42  ;;  %v6086_v33 = vpop.f32.mrb[10].mxu0 }
 0x230   : > { %v2260_v34 = vsel %vm9728_vm1, %v2227_v1, %v8066_v19  ;;  %v2292_v17 = vsel %vm9729_vm5, %v2259_v61, %v8082_v28  ;;  %vm9730_vm3 = vcmask 130048   ;;  %v8234_v9 = vpop.permute.xlu0 %1995  ;;  %v3729_v39 = vmax.f32 %v3727_v63, %v3728_v12  ;;  %v2604_v23 = vpop.f32.mrb[11].mxu0 }
 0x231   : > { %v8232_v14 = vsel %vm9730_vm3, %v3708_v13, -inf  ;;  %v3700_v46 = vrot.slane %v3699_v29, 1  ;;  %vm9731_vm8 = vcmask 121856   ;;  %v2610_v38 = vadd.f32 %v8095_v55, %v6086_v33  ;;  %vm9732_vm11 = vmmov %vm9730_vm3 }
 0x232   : > { %v2325_v58 = vsel %vm9731_vm8, %v2292_v17, %v8126_v30  ;;  %v3687_v6 = vmax.f32 %v3685_v0, %v3686_v51  ;;  %v3694_v19 = vmax.f32 %v3692_v27, %v3693_v43  ;;  %v2605_v41 = vadd.f32 %v8095_v55, %v2604_v23  ;;  %vm9733_vm0 = vmmov %vm9730_vm3  ;;  %v2122_v30 = vpop.permute.xlu1 %2121 }
 0x233   : > { %v2358_v28 = vsel %vm2333_vm2, %v2325_v58, %v8152_v53  ;;  %v8243_v62 = vsel %vm9732_vm11, %v3715_v45, -inf  ;;  %v8246_v56 = vsel %vm9733_vm0, %v3680_v15, -inf  ;;  %v2724_v20 = vmax.f32 %v2610_v38, 0.0  ;;  %vm9734_vm1 = vmmov %vm9733_vm0 }
 0x234   : > { %v2391_v63 = vsel %vm9498_vm4, %v2358_v28, %v1994_v32  ;;  %v8250_v13 = vsel %vm9734_vm1, %v3722_v47, -inf  ;;  %v2293_v0 = vsel %vm9729_vm5, %v2260_v34, %v8122_v49  ;;  %v2723_v27 = vmax.f32 %v2605_v41, 0.0  ;;  %v8255_v42 = vpop.permute.xlu0 %1293  ;;  %vm9736_vm8 = vmmov %vm9733_vm0 }
 0x235   : > { %vm9735_vm3 = vcmask 195584   ;;  %v8258_v24 = vsel %vm9736_vm8, %v3729_v39, -inf  ;;  %v8260_v12 = vmax.f32 %v3699_v29, %v3700_v46  ;;  %v2964_v35 = vcombine.high %v2724_v20, %v2724_v20  ;;  %vm9738_vm1 = vmmov %vm9733_vm0 }
 0x236   : > { %v2424_v53 = vsel %vm9735_vm3, %v2391_v63, %v2122_v30  ;;  %v2971_v32 = vrot.slane %v2724_v20, %v7459_v4  ;;  %vm9737_vm11 = vcmask 220160   ;;  %v8265_v44 = vsel %vm9733_vm0, %v3687_v6, -inf  ;;  %v8277_v1 = vpop.permute.xlu1 %1645 }
 0x237   : > { %6105 = vmatprep.mubr.msk.f32.mxu0 %vm9737_vm11, %v2424_v53  ;;  %v8268_v49 = vsel %vm9738_vm1, %v3694_v19, -inf  ;;  %v2947_v25 = vcombine.high %v2723_v27, %v2723_v27  ;;  %v2954_v60 = vrot.slane %v2723_v27, %v7459_v4  ;;  %vm9739_vm5 = vcmask 121856  }
 0x238   : > { %v8273_v3 = vsel %vm9739_vm5, %v2293_v0, %v8140_v21  ;;  %v2978_v29 = vrot.slane %v2964_v35, %v7459_v4  ;;  %v2979_v51 = vcombine.high %v2971_v32, %v2971_v32  ;;  %vm9740_vm3 = vcmask 123904   ;;  %v8281_v17 = vpop.permute.xlu0 %1771 }
 0x239   : > { %v3758_v43 = vsel %vm9740_vm3, %v2971_v32, -inf  ;;  %v2961_v45 = vrot.slane %v2947_v25, %v7459_v4  ;;  %v2962_v15 = vcombine.high %v2954_v60, %v2954_v60  ;;  %vm9741_vm8 = vmmov %vm9740_vm3 }
 0x23a   : > { %v3759_v61 = vrot.slane %v3758_v43, 4  ;;  %v3730_v34 = vsel %vm9741_vm8, %v2954_v60, -inf  ;;  %v2980_v47 = vcombine.high %v2978_v29, %v2978_v29  ;;  %vm9742_vm11 = vmmov %vm9740_vm3 }
 0x23b   : > { %v3765_v33 = vsel %vm9742_vm11, %v2979_v51, -inf  ;;  %vm9743_vm0 = vmmov %vm9740_vm3  ;;  %v3731_v39 = vrot.slane %v3730_v34, 4  ;;  %v2963_v23 = vcombine.high %v2961_v45, %v2961_v45  ;;  %v8288_v63 = vpop.permute.xlu1 %2123  ;;  %vm9749_vm11 = vcmask 130048  }
 0x23c   : > { %v3772_v21 = vsel %vm9743_vm0, %v2978_v29, -inf  ;;  %v3760_v46 = vmax.f32 %v3758_v43, %v3759_v61  ;;  %v3766_v58 = vrot.slane %v3765_v33, 4  ;;  %vm9744_vm1 = vmmov %vm9743_vm0  ;;  %v8290_v53 = vpop.permute.xlu0 %1295 }
 0x23d   : > { %v3773_v38 = vrot.slane %v3772_v21, 4  ;;  %v3779_v6 = vsel %vm9744_vm1, %v2980_v47, -inf  ;;  %v3732_v19 = vmax.f32 %v3730_v34, %v3731_v39  ;;  %vm9745_vm5 = vmmov %vm9743_vm0 }
 0x23e   : > { %v3737_v28 = vsel %vm9745_vm5, %v2962_v15, -inf  ;;  %vm9746_vm3 = vmmov %vm9743_vm0  ;;  %v3761_v20 = vrot.slane %v3760_v46, 2  ;;  %v3767_v30 = vmax.f32 %v3765_v33, %v3766_v58  ;;  %v3780_v27 = vrot.slane %v3779_v6, 4 }
 0x23f   : > { %v3744_v41 = vsel %vm9746_vm3, %v2961_v45, -inf  ;;  %v3774_v0 = vmax.f32 %v3772_v21, %v3773_v38  ;;  %v3733_v35 = vrot.slane %v3732_v19, 2  ;;  %v3738_v32 = vrot.slane %v3737_v28, 4  ;;  %vm9747_vm8 = vmmov %vm9743_vm0  ;;  %v8293_v39 = vpop.permute.xlu1 %1421 }
 0x240   : > { %v3745_v25 = vrot.slane %v3744_v41, 4  ;;  %v3751_v60 = vsel %vm9747_vm8, %v2963_v23, -inf  ;;  %v3762_v29 = vmax.f32 %v3760_v46, %v3761_v20  ;;  %v3768_v51 = vrot.slane %v3767_v30, 2  ;;  %9748 = vst [vmem:[#allocation15_spill] sm:$0xff] %v8293_v39  ;;  %v8295_v36 = vpop.permute.xlu0 %1773  ;;  %vm9750_vm0 = vmmov %vm9749_vm11 }
 0x241   : > { %v3775_v43 = vrot.slane %v3774_v0, 2  ;;  %v3781_v61 = vmax.f32 %v3779_v6, %v3780_v27  ;;  %v3734_v15 = vmax.f32 %v3732_v19, %v3733_v35  ;;  %v3739_v34 = vmax.f32 %v3737_v28, %v3738_v32  ;;  %vm9751_vm1 = vmmov %vm9750_vm0 }
 0x242   : > { %v3746_v45 = vmax.f32 %v3744_v41, %v3745_v25  ;;  %v3752_v47 = vrot.slane %v3751_v60, 4  ;;  %v3763_v33 = vrot.slane %v3762_v29, 1  ;;  %v3769_v21 = vmax.f32 %v3767_v30, %v3768_v51  ;;  %vm9752_vm5 = vmmov %vm9750_vm0 }
 0x243   : > { %v3776_v58 = vmax.f32 %v3774_v0, %v3775_v43  ;;  %v3782_v38 = vrot.slane %v3781_v61, 2  ;;  %v3735_v40 = vrot.slane %v3734_v15, 1  ;;  %v3740_v26 = vrot.slane %v3739_v34, 2  ;;  %v1900_v35 = vpop.permute.xlu1 %1899  ;;  %vm9753_vm3 = vmmov %vm9750_vm0 }
 0x244   : > { %v3747_v31 = vrot.slane %v3746_v45, 2  ;;  %v3753_v23 = vmax.f32 %v3751_v60, %v3752_v47  ;;  %v3764_v46 = vmax.f32 %v3762_v29, %v3763_v33  ;;  %v3770_v20 = vrot.slane %v3769_v21, 1  ;;  %v8298_v51 = vpop.permute.xlu0 %1423  ;;  %vm9754_vm8 = vmmov %vm9750_vm0 }
 0x245   : > { %v3777_v37 = vrot.slane %v3776_v58, 1  ;;  %v3783_v6 = vmax.f32 %v3781_v61, %v3782_v38  ;;  %v3736_v19 = vmax.f32 %v3734_v15, %v3735_v40  ;;  %v3741_v28 = vmax.f32 %v3739_v34, %v3740_v26 }
 0x246   : > { %v3748_v41 = vmax.f32 %v3746_v45, %v3747_v31  ;;  %v3754_v27 = vrot.slane %v3753_v23, 2  ;;  %v3771_v32 = vmax.f32 %v3769_v21, %v3770_v20  ;;  %v4408_v0 = vsel %vm9749_vm11, %v3764_v46, -inf  ;;  %vm9755_vm11 = vmmov %vm9750_vm0 }
 0x247   : > { %v3778_v25 = vmax.f32 %v3776_v58, %v3777_v37  ;;  %v3784_v30 = vrot.slane %v3783_v6, 1  ;;  %v4409_v43 = vmax.f32 %v8232_v14, %v4408_v0  ;;  %v3742_v39 = vrot.slane %v3741_v28, 1  ;;  %v8306_v45 = vpop.permute.xlu1 %1549 }
 0x248   : > { %v3749_v60 = vrot.slane %v3748_v41, 1  ;;  %v3755_v29 = vmax.f32 %v3753_v23, %v3754_v27  ;;  %v4411_v61 = vsel %vm9750_vm0, %v3771_v32, -inf  ;;  %v4396_v31 = vsel %vm9752_vm5, %v3736_v19, -inf  ;;  %v8313_v38 = vpop.permute.xlu0 %1901  ;;  %vm9758_vm5 = vmmov %vm9753_vm3 }
 0x249   : > { %v3785_v47 = vmax.f32 %v3783_v6, %v3784_v30  ;;  %v4414_v26 = vsel %vm9751_vm1, %v3778_v25, -inf  ;;  %v4412_v40 = vmax.f32 %v8243_v62, %v4411_v61  ;;  %v3743_v15 = vmax.f32 %v3741_v28, %v3742_v39  ;;  %v5204_v30 = vld [vmem:[%s9464_s3 + $0x80] sm:$0xff] }
 0x24a   : > { %v4415_v37 = vmax.f32 %v8250_v13, %v4414_v26  ;;  %v3750_v34 = vmax.f32 %v3748_v41, %v3749_v60  ;;  %v2359_v14 = vsel %vm2333_vm2, %v8273_v3, %v8191_v50  ;;  %v3756_v21 = vrot.slane %v3755_v29, 1 }
 0x24b   : > { %v4417_v33 = vsel %vm9753_vm3, %v3785_v47, -inf  ;;  %v4397_v58 = vmax.f32 %v8246_v56, %v4396_v31  ;;  %v2392_v62 = vsel %vm9498_vm4, %v2359_v14, %v8234_v9  ;;  %v4399_v13 = vsel %vm9754_vm8, %v3743_v15, -inf  ;;  %v1998_v56 = vpop.permute.xlu1 %1997  ;;  %v5189_v47 = vld [vmem:[%s9464_s3 + $0x8] sm:$0xff] }
 0x24c   : > { %v4418_v23 = vmax.f32 %v8258_v24, %v4417_v33  ;;  %v4402_v39 = vsel %vm9755_vm11, %v3750_v34, -inf  ;;  %v3757_v46 = vmax.f32 %v3755_v29, %v3756_v21  ;;  %v4400_v20 = vmax.f32 %v8265_v44, %v4399_v13  ;;  %v8329_v19 = vpop.permute.xlu0 %1551  ;;  %v5188_v29 = vld [vmem:[%s9464_s3] sm:$0xff]  ;;  %v5190_v13 = vld [vmem:[%s9464_s3 + $0x10] sm:$0xff] }
 0x24d   : > { %v4403_v50 = vmax.f32 %v8268_v49, %v4402_v39  ;;  %vm9756_vm0 = vcmask 195584   ;;  %vm9757_vm1 = vcmask 220160   ;;  %v4404_v24 = vsel %vm9758_vm5, %v8260_v12, -inf  ;;  %v5191_v39 = vld [vmem:[%s9464_s3 + $0x18] sm:$0xff] }
 0x24e   : > { %v2425_v3 = vsel %vm9756_vm0, %v2392_v62, %v8288_v63  ;;  %v4405_v9 = vsel %vm9753_vm3, %v3757_v46, -inf  ;;  %vm9759_vm4 = vcmask 1041409   ;;  %v9760_v44 = vsel %vm7546_vm14, %v8201_v11, 0.0  ;;  %v6089_v25 = vpop.f32.mrb[12].mxu0 }
 0x24f   : > { %6106 = vmatmul.mubr.msk.f32.gmra.mrb[24].mxu0 %vm9757_vm1, %v2425_v3  ;;  %v4628_v6 = vsel %vm9759_vm4, %v4400_v20, %v4397_v58  ;;  %vm9761_vm8 = vcmask 23552   ;;  %v4406_v63 = vmax.f32 %v4404_v24, %v4405_v9  ;;  %vm9762_vm11 = vcmask 1042434   ;;  %v8343_v32 = vpop.permute.xlu1 %1647  ;;  %v2614_v60 = vpop.f32.mrb[13].mxu0 }
 0x250   : > { %v2195_v49 = vsel %vm9761_vm8, %v9760_v44, %v8112_v54  ;;  %v4629_v28 = vsel %vm9762_vm11, %v4403_v50, %v4628_v6  ;;  %vm9763_vm0 = vcmask 48128   ;;  %vm9764_vm1 = vcmask 72704   ;;  %v8348_v54 = vpop.permute.xlu0 %1999 }
 0x251   : > { %v2228_v41 = vsel %vm9763_vm0, %v2195_v49, %v8137_v7  ;;  %v4630_v27 = vsel %vm9499_vm7, %v4406_v63, %v4629_v28  ;;  %vm9765_vm4 = vcmask 97280   ;;  %vm9766_vm5 = vcmask 1044484   ;;  %v5205_v7 = vld [vmem:[%s9464_s3 + $0x88] sm:$0xff] }
 0x252   : > { %v2261_v12 = vsel %vm9764_vm1, %v2228_v41, %v8182_v59  ;;  %v4631_v11 = vsel %vm9766_vm5, %v4409_v43, %v4630_v27  ;;  %vm9767_vm14 = vcmask 1045509   ;;  %vm9768_vm3 = vcmask 121856  }
 0x253   : > { %v2294_v48 = vsel %vm9765_vm4, %v2261_v12, %v8225_v52  ;;  %v4632_v59 = vsel %vm9767_vm14, %v4412_v40, %v4631_v11  ;;  %v2620_v52 = vadd.f32 %v8095_v55, %v6089_v25  ;;  %v6149_v43 = vpack.c.bf16 %v5205_v7, %v5204_v30  ;;  %v2126_v14 = vpop.permute.xlu1 %2125  ;;  %v6340_v7 = vld [vmem:[#allocation2 + $0xdf] sm:$0xff] }
 0x254   : > { %v2327_v0 = vsel %vm9768_vm3, %v2294_v48, %v8281_v17  ;;  %vm9769_vm8 = vcmask 1046534   ;;  %v2615_v31 = vadd.f32 %v8095_v55, %v2614_v60  ;;  %v6151_v40 = vpack.c.bf16 %v5189_v47, %v5188_v29  ;;  %v8373_v21 = vpop.permute.xlu0 %1297 }
 0x255   : > { %v4633_v61 = vsel %vm9769_vm8, %v4415_v37, %v4632_v59  ;;  %v2360_v26 = vsel %vm2333_vm2, %v2327_v0, %v1900_v35  ;;  %vm9770_vm11 = vcmask 1047559   ;;  %vm9771_vm0 = vcmask 171008   ;;  %6150 = vmatprep.subr.bf16.mxu1 %v6149_v43  ;;  %v5206_v35 = vld [vmem:[%s9464_s3 + $0x90] sm:$0xff]  ;;  %v5207_v37 = vld [vmem:[%s9464_s3 + $0x98] sm:$0xff] }
 0x256   : > { %v4634_v17 = vsel %vm9770_vm11, %v4418_v23, %v4633_v61  ;;  %v2393_v15 = vsel %vm9771_vm0, %v2360_v26, %v1998_v56  ;;  %v2726_v34 = vmax.f32 %v2620_v52, 0.0  ;;  %vm9772_vm1 = vcmask 130048   ;;  %6152 = vmatpush3.bf16.msra.mxu1 %v6151_v40 }
 0x257   : > { %4680 = vst.msk [vmem:[#allocation3 + $0x20] sm:$0xff] %vm9772_vm1, %v4634_v17  ;;  %vm9773_vm4 = vcmask 195584   ;;  %v2725_v23 = vmax.f32 %v2615_v31, 0.0  ;;  %vm9774_vm5 = vcmask 220160   ;;  %v6153_v62 = vpack.c.bf16 %v5207_v37, %v5206_v35  ;;  %v8388_v20 = vpop.permute.xlu1 %1649  ;;  %v6341_v35 = vld [vmem:[#allocation2 + $0xe7] sm:$0xff] }
 0x258   : > { %v2426_v33 = vsel %vm9773_vm4, %v2393_v15, %v2126_v14  ;;  %v2998_v58 = vcombine.high %v2726_v34, %v2726_v34  ;;  %v6155_v46 = vpack.c.bf16 %v5191_v39, %v5190_v13  ;;  %v3005_v50 = vrot.slane %v2726_v34, %v7459_v4  ;;  %v8391_v3 = vpop.permute.xlu0 %1775 }
 0x259   : > { %6108 = vmatprep.mubr.msk.f32.mxu0 %vm9774_vm5, %v2426_v33  ;;  %6154 = vmatprep.subr.bf16.mxu1 %v6153_v62  ;;  %v2981_v24 = vcombine.high %v2725_v23, %v2725_v23  ;;  %v2988_v9 = vrot.slane %v2725_v23, %v7459_v4  ;;  %vm9775_vm14 = vcmask 123904   ;;  %vm9779_vm0 = vcmask 23552  }
 0x25a   : > { %6156 = vmatpush3.bf16.msra.mxu1 %v6155_v46  ;;  %v3012_v56 = vrot.slane %v2998_v58, %v7459_v4  ;;  %v3013_v44 = vcombine.high %v3005_v50, %v3005_v50  ;;  %v3814_v12 = vsel %vm9775_vm14, %v3005_v50, -inf  ;;  %vm9776_vm3 = vmmov %vm9775_vm14  ;;  %v2196_v59 = vsel %vm9779_vm0, %v6340_v7, %v8133_v8 }
 0x25b   : > { %v2128_v6 = vpop.permute.xlu1 %2127  ;;  %v2995_v28 = vrot.slane %v2981_v24, %v7459_v4  ;;  %v2996_v41 = vcombine.high %v2988_v9, %v2988_v9  ;;  %vm9777_vm8 = vmmov %vm9776_vm3  ;;  %vm9781_vm4 = vcmask 48128   ;;  %v3815_v43 = vrot.slane %v3814_v12, 4 }
 0x25c   : > { %v8395_v49 = vpop.permute.xlu0 %1299  ;;  %v3014_v63 = vcombine.high %v3012_v56, %v3012_v56  ;;  %v3821_v48 = vsel %vm9776_vm3, %v3013_v44, -inf  ;;  %v3828_v11 = vsel %vm9777_vm8, %v3012_v56, -inf  ;;  %vm9778_vm11 = vmmov %vm9776_vm3  ;;  %v2229_v60 = vsel %vm9781_vm4, %v2196_v59, %v8164_v10 }
 0x25d   : > { %v3786_v25 = vsel %vm9778_vm11, %v2988_v9, -inf  ;;  %vm9780_vm1 = vmmov %vm9776_vm3  ;;  %v2997_v52 = vcombine.high %v2995_v28, %v2995_v28  ;;  %vm9783_vm14 = vcmask 72704   ;;  %v3822_v61 = vrot.slane %v3821_v48, 4 }
 0x25e   : > { %v3835_v0 = vsel %vm9780_vm1, %v3014_v63, -inf  ;;  %vm9782_vm5 = vmmov %vm9780_vm1  ;;  %v2262_v47 = vsel %vm9783_vm14, %v2229_v60, %v8207_v2  ;;  %v3829_v26 = vrot.slane %v3828_v11, 4  ;;  %v3787_v31 = vrot.slane %v3786_v25, 4  ;;  %v8424_v2 = vld [vmem:[#allocation3 + $0x19] sm:$0xff] }
 0x25f   : > { %v8399_v27 = vpop.permute.xlu1 %1425  ;;  %v3793_v29 = vsel %vm9782_vm5, %v2996_v41, -inf  ;;  %vm9784_vm3 = vcmask 97280   ;;  %v3836_v17 = vrot.slane %v3835_v0, 4  ;;  %vm9785_vm8 = vmmov %vm9780_vm1  ;;  %vm9786_vm11 = vcmask 121856   ;;  %v8433_v50 = vld [vmem:[#allocation3 + $0x1f] sm:$0xff] }
 0x260   : > { %v8404_v30 = vpop.permute.xlu0 %1777  ;;  %v2295_v8 = vsel %vm9784_vm3, %v2262_v47, %v8277_v1  ;;  %v3800_v15 = vsel %vm9785_vm8, %v2995_v28, -inf  ;;  %v3794_v14 = vrot.slane %v3793_v29, 4  ;;  %vm9787_vm0 = vmmov %vm9780_vm1  ;;  %v901_v58 = vsel %vm7775_vm15, %v6341_v35, 0.0  ;;  %v5193_v47 = vld [vmem:[%s9464_s3 + $0x28] sm:$0xff] }
 0x261   : > { %v2328_v10 = vsel %vm9786_vm11, %v2295_v8, %v8295_v36  ;;  %v3807_v33 = vsel %vm9787_vm0, %v2997_v52, -inf  ;;  %v3816_v23 = vmax.f32 %v3814_v12, %v3815_v43  ;;  %v4890_v62 = vsel %vm8170_vm13, %v8174_v5, 0.0  ;;  %v8463_v52 = vld [vmem:[#allocation3 + $0x20] sm:$0xff] }
 0x262   : > { %v2361_v1 = vsel %vm2333_vm2, %v2328_v10, %v8313_v38  ;;  %v3823_v13 = vmax.f32 %v3821_v48, %v3822_v61  ;;  %v3830_v39 = vmax.f32 %v3828_v11, %v3829_v26  ;;  %v3788_v36 = vmax.f32 %v3786_v25, %v3787_v31  ;;  %v5208_v11 = vld [vmem:[%s9464_s3 + $0xa0] sm:$0xff]  ;;  %v6342_v25 = vld [vmem:[#allocation2 + $0xef] sm:$0xff]  ;;  %v5211_v26 = vld [vmem:[%s9464_s3 + $0xb8] sm:$0xff] }
 0x263   : > { %v8414_v40 = vpop.permute.xlu1 %1903  ;;  %v3801_v46 = vrot.slane %v3800_v15, 4  ;;  %v3837_v24 = vmax.f32 %v3835_v0, %v3836_v17  ;;  %v3808_v9 = vrot.slane %v3807_v33, 4  ;;  %v4882_v44 = vsel %vm8158_vm12, %v8424_v2, 0.0  ;;  %v5210_v61 = vld [vmem:[%s9464_s3 + $0xb0] sm:$0xff]  ;;  %v9797_v31 = vld [vmem:[#allocation15_spill] sm:$0xff] }
 0x264   : > { %v8419_v34 = vpop.permute.xlu0 %1427  ;;  %v4900_v38 = vsel %vm8146_vm9, %v8424_v2, 0.0  ;;  %vm9789_vm15 = vcmask 23552   ;;  %vm9790_vm1 = vcmask 171008   ;;  %v3795_v41 = vmax.f32 %v3793_v29, %v3794_v14 }
 0x265   : > { %v2197_v5 = vsel %vm9789_vm15, %v901_v58, %v8255_v42  ;;  %v2394_v28 = vsel %vm9790_vm1, %v2361_v1, %v8348_v54  ;;  %vm9791_vm4 = vcmask 130048   ;;  %v9792_v12 = vsel %vm8146_vm9, %v8168_v18, 0.0  ;;  %vm9793_vm5 = vmmov %vm9789_vm15  ;;  %v5192_v18 = vld [vmem:[%s9464_s3 + $0x20] sm:$0xff] }
 0x266   : > { %5921 = vmatprep.mubr.msk.f32.mxu1 %vm9791_vm4, %v4900_v38  ;;  %v6226_v48 = vpack.i.bf16 %v4882_v44, %v9792_v12  ;;  %v2198_v7 = vsel %vm9793_vm5, %v6342_v25, %v8290_v53  ;;  %v3817_v42 = vrot.slane %v3816_v23, 2  ;;  %vm9794_vm14 = vcmask 195584   ;;  %v9801_v1 = vld [vmem:[#allocation14_spill] sm:$0xff] }
 0x267   : > { %v8435_v56 = vpop.permute.xlu1 %1553  ;;  %v2427_v59 = vsel %vm9794_vm14, %v2394_v28, %v2128_v6  ;;  %v4891_v0 = vsel %vm8154_vm10, %v8433_v50, 0.0  ;;  %v3824_v60 = vrot.slane %v3823_v13, 2  ;;  %v3789_v43 = vrot.slane %v3788_v36, 2  ;;  %vm9806_vm5 = vmmov %vm9794_vm14 }
 0x268   : > { %v8443_v63 = vpop.permute.xlu0 %1905  ;;  %v3802_v53 = vmax.f32 %v3800_v15, %v3801_v46  ;;  %v6231_v29 = vpack.i.bf16 %v4891_v0, %v4890_v62  ;;  %6227 = vrot.lane.b32.xlu0 %v6226_v48, %s6375_s10  ;;  %vm9796_vm9 = vcmask 220160   ;;  %vm9798_vm3 = vcmask 48128   ;;  %v5213_v48 = vld [vmem:[%s9464_s3 + $0xc8] sm:$0xff] }
 0x269   : > { %6109 = vmatmul.mubr.msk.f32.gmra.mrb[26].mxu0 %vm9796_vm9, %v2427_v59  ;;  %v2230_v8 = vsel %vm9798_vm3, %v2197_v5, %v9797_v31  ;;  %v3831_v17 = vrot.slane %v3830_v39, 2  ;;  %v3838_v15 = vrot.slane %v3837_v24, 2  ;;  %v3809_v10 = vmax.f32 %v3807_v33, %v3808_v9  ;;  %vm9799_vm8 = vmmov %vm9798_vm3  ;;  %v5194_v33 = vld [vmem:[%s9464_s3 + $0x30] sm:$0xff] }
 0x26a   : > { %v2231_v35 = vsel %vm9799_vm8, %v2198_v7, %v8298_v51  ;;  %vm9800_vm11 = vcmask 72704   ;;  %v3796_v58 = vrot.slane %v3795_v41, 2  ;;  %6232 = vrot.lane.b32.xlu1 %v6231_v29, %s6376_s17  ;;  %v6236_v62 = vpack.i.bf16 %v8463_v52, %v9801_v1  ;;  %v5195_v51 = vld [vmem:[%s9464_s3 + $0x38] sm:$0xff]  ;;  %vm9811_vm8 = vmmov %vm9806_vm5 }
 0x26b   : > { %v2002_v6 = vpop.permute.xlu1 %2001  ;;  %v2263_v37 = vsel %vm9800_vm11, %v2230_v8, %v8306_v45  ;;  %v3818_v46 = vmax.f32 %v3816_v23, %v3817_v42  ;;  %v6157_v44 = vpack.c.bf16 %v5209_v16, %v5208_v11  ;;  %v6159_v38 = vpack.c.bf16 %v5193_v47, %v5192_v18  ;;  %v5212_v23 = vld [vmem:[%s9464_s3 + $0xc0] sm:$0xff]  ;;  %vm9804_vm1 = vmmov %vm9800_vm11  ;;  %v5215_v47 = vld [vmem:[%s9464_s3 + $0xd8] sm:$0xff] }
 0x26c   : > { %v8484_v14 = vpop.permute.xlu0 %1555  ;;  %v6161_v5 = vpack.c.bf16 %v5211_v26, %v5210_v61  ;;  %v3825_v45 = vmax.f32 %v3823_v13, %v3824_v60  ;;  %v3790_v9 = vmax.f32 %v3788_v36, %v3789_v43  ;;  %v3803_v28 = vrot.slane %v3802_v53, 2  ;;  %6237 = vrot.lane.b32.xlu0 %v6236_v62, %s6377_s23  ;;  %vm9812_vm11 = vmmov %vm9796_vm9 }
 0x26d   : > { %vm9802_vm0 = vcmask 97280   ;;  %v3832_v25 = vmax.f32 %v3830_v39, %v3831_v17  ;;  %v3839_v13 = vmax.f32 %v3837_v24, %v3838_v15  ;;  %v3810_v36 = vrot.slane %v3809_v10, 2  ;;  %6158 = vmatprep.subr.bf16.mxu1 %v6157_v44  ;;  %v5196_v24 = vld [vmem:[%s9464_s3 + $0x40] sm:$0xff]  ;;  %v5198_v44 = vld [vmem:[%s9464_s3 + $0x50] sm:$0xff] }
 0x26e   : > { %v2296_v11 = vsel %vm9802_vm0, %v2263_v37, %v8343_v32  ;;  %v3797_v42 = vmax.f32 %v3795_v41, %v3796_v58  ;;  %vm9803_vm15 = vcmask 121856   ;;  %6242 = vrot.lane.b32.xlu1 %v6236_v62, %s6371_s30  ;;  %6160 = vmatpush3.bf16.msra.mxu1 %v6159_v38  ;;  %v6163_v0 = vpack.c.bf16 %v5195_v51, %v5194_v33  ;;  %vm9807_vm14 = vmmov %vm9802_vm0  ;;  %v6343_v37 = vld [vmem:[#allocation2 + $0xf7] sm:$0xff] }
 0x26f   : > { %v8500_v12 = vpop.permute.xlu1 %1651  ;;  %v2329_v59 = vsel %vm9803_vm15, %v2296_v11, %v8391_v3  ;;  %v2264_v16 = vsel %vm9804_vm1, %v2231_v35, %v8329_v19  ;;  %v3819_v18 = vrot.slane %v3818_v46, 1  ;;  %6162 = vmatprep.subr.bf16.mxu1 %v6161_v5  ;;  %v6165_v39 = vpack.c.bf16 %v5213_v48, %v5212_v23  ;;  %v5197_v3 = vld [vmem:[%s9464_s3 + $0x48] sm:$0xff]  ;;  %vm9809_vm3 = vmmov %vm9803_vm15 }
 0x270   : > { %v2004_v7 = vpop.permute.xlu0 %2003  ;;  %v2362_v32 = vsel %vm2333_vm2, %v2329_v59, %v8414_v40  ;;  %v3826_v41 = vrot.slane %v3825_v45, 1  ;;  %v3791_v60 = vrot.slane %v3790_v9, 1  ;;  %v3804_v43 = vmax.f32 %v3802_v53, %v3803_v28  ;;  %v5214_v40 = vld [vmem:[%s9464_s3 + $0xd0] sm:$0xff]  ;;  %v5217_v28 = vld [vmem:[%s9464_s3 + $0xe8] sm:$0xff] }
 0x271   : > { %vm9805_vm4 = vcmask 171008   ;;  %v3833_v61 = vrot.slane %v3832_v25, 1  ;;  %v3840_v26 = vrot.slane %v3839_v13, 1  ;;  %v3811_v31 = vmax.f32 %v3809_v10, %v3810_v36 }
 0x272   : > { %v2395_v29 = vsel %vm9805_vm4, %v2362_v32, %v2002_v6  ;;  %v3798_v15 = vrot.slane %v3797_v42, 1  ;;  %v2297_v53 = vsel %vm9807_vm14, %v2264_v16, %v8388_v20  ;;  %6164 = vmatpush3.bf16.msra.mxu1 %v6163_v0  ;;  %v6167_v6 = vpack.c.bf16 %v5197_v3, %v5196_v24  ;;  %v5199_v20 = vld [vmem:[%s9464_s3 + $0x58] sm:$0xff]  ;;  %v5200_v16 = vld [vmem:[%s9464_s3 + $0x60] sm:$0xff] }
 0x273   : > { %v2130_v19 = vpop.permute.xlu1 %2129  ;;  %v3820_v35 = vmax.f32 %v3818_v46, %v3819_v18  ;;  %v903_v1 = vsel %vm7879_vm6, %v6343_v37, 0.0  ;;  %v2330_v10 = vsel %vm9809_vm3, %v2297_v53, %v8404_v30  ;;  %6166 = vmatprep.subr.bf16.mxu1 %v6165_v39  ;;  %v6169_v62 = vpack.c.bf16 %v5215_v47, %v5214_v40  ;;  %v5216_v30 = vld [vmem:[%s9464_s3 + $0xe0] sm:$0xff]  ;;  %vm9810_vm6 = vmmov %vm9805_vm4  ;;  %v5218_v39 = vld [vmem:[%s9464_s3 + $0xf0] sm:$0xff] }
 0x274   : > { %v2428_v8 = vsel %vm9806_vm5, %v2395_v29, %v2130_v19  ;;  %v8531_v17 = vpop.permute.xlu0 %1653  ;;  %v3827_v38 = vmax.f32 %v3825_v45, %v3826_v41  ;;  %v3792_v5 = vmax.f32 %v3790_v9, %v3791_v60  ;;  %v3805_v46 = vrot.slane %v3804_v43, 1  ;;  %v5219_v24 = vld [vmem:[%s9464_s3 + $0xf8] sm:$0xff] }
 0x275   : > { %6111 = vmatprep.mubr.msk.f32.mxu0 %vm9796_vm9, %v2428_v8  ;;  %v2363_v33 = vsel %vm2333_vm2, %v2330_v10, %v8443_v63  ;;  %v3834_v23 = vmax.f32 %v3832_v25, %v3833_v61  ;;  %v3841_v48 = vmax.f32 %v3839_v13, %v3840_v26  ;;  %v3812_v11 = vrot.slane %v3811_v31, 1  ;;  %v5201_v25 = vld [vmem:[%s9464_s3 + $0x68] sm:$0xff]  ;;  %v6344_v40 = vld [vmem:[#allocation2 + $0xff] sm:$0xff] }
 0x276   : > { %v2396_v36 = vsel %vm9810_vm6, %v2363_v33, %v2004_v7  ;;  %v3799_v9 = vmax.f32 %v3797_v42, %v3798_v15  ;;  %6168 = vmatpush3.bf16.msra.mxu1 %v6167_v6  ;;  %v6171_v63 = vpack.c.bf16 %v5199_v20, %v5198_v44  ;;  %v6173_v0 = vpack.c.bf16 %v5217_v28, %v5216_v30  ;;  %v5202_v15 = vld [vmem:[%s9464_s3 + $0x70] sm:$0xff] }
 0x277   : > { %v1780_v51 = vpop.permute.xlu1 %1779  ;;  %6170 = vmatprep.subr.bf16.mxu1 %v6169_v62  ;;  %vm9813_vm0 = vcmask 130048   ;;  %v3806_v7 = vmax.f32 %v3804_v43, %v3805_v46  ;;  %vm9815_vm1 = vcmask 23552   ;;  %v8586_v43 = vmax.f32 %v3811_v31, %v3812_v11  ;;  %v5203_v31 = vld [vmem:[%s9464_s3 + $0x78] sm:$0xff] }
 0x278   : > { %v8564_v13 = vsel %vm9813_vm0, %v3820_v35, -inf  ;;  %vm9814_vm15 = vmmov %vm9813_vm0  ;;  %v2199_v18 = vsel %vm9815_vm1, %v903_v1, %v8373_v21  ;;  %v6175_v8 = vpack.c.bf16 %v5201_v25, %v5200_v16  ;;  %vm9821_vm6 = vcmask 48128  }
 0x279   : > { %v8567_v42 = vsel %vm9814_vm15, %v3792_v5, -inf  ;;  %vm9816_vm4 = vmmov %vm9813_vm0  ;;  %v6092_v21 = vpop.f32.mrb[14].mxu0  ;;  %v2232_v53 = vsel %vm9821_vm6, %v2199_v18, %v8399_v27  ;;  %v6177_v35 = vpack.c.bf16 %v5219_v24, %v5218_v39  ;;  %v6179_v20 = vpack.c.bf16 %v5203_v31, %v5202_v15 }
 0x27a   : > { %v2132_v45 = vpop.permute.xlu0 %2131  ;;  %v8578_v3 = vsel %vm9816_vm4, %v3827_v38, -inf  ;;  %vm9817_vm5 = vmmov %vm9813_vm0  ;;  %v2630_v61 = vadd.f32 %v8095_v55, %v6092_v21  ;;  %v2624_v26 = vpop.f32.mrb[15].mxu0  ;;  %6172 = vmatpush3.bf16.msra.mxu1 %v6171_v63 }
 0x27b   : > { %v2429_v59 = vsel %vm9811_vm8, %v2396_v36, %v2132_v45  ;;  %v8581_v41 = vsel %vm9817_vm5, %v3834_v23, -inf  ;;  %vm9818_vm14 = vmmov %vm9813_vm0  ;;  %6174 = vmatprep.subr.bf16.mxu1 %v6173_v0  ;;  %vm9828_vm5 = vcmask 121856  }
 0x27c   : > { %6112 = vmatmul.mubr.msk.f32.gmra.mrb[28].mxu0 %vm9812_vm11, %v2429_v59  ;;  %v8584_v60 = vsel %vm9818_vm14, %v3841_v48, -inf  ;;  %vm9819_vm9 = vmmov %vm9813_vm0  ;;  %v2728_v10 = vmax.f32 %v2630_v61, 0.0 }
 0x27d   : > { %v1782_v32 = vpop.permute.xlu1 %1781  ;;  %v8589_v19 = vsel %vm9819_vm9, %v3799_v9, -inf  ;;  %vm9820_vm3 = vmmov %vm9815_vm1  ;;  %vm9826_vm1 = vcmask 97280   ;;  %vm9830_vm9 = vcmask 123904  }
 0x27e   : > { %v2200_v47 = vsel %vm9820_vm3, %v6344_v40, %v8395_v49  ;;  %vm9822_vm8 = vmmov %vm9821_vm6  ;;  %v2625_v49 = vadd.f32 %v8095_v55, %v2624_v26  ;;  %v3032_v38 = vcombine.high %v2728_v10, %v2728_v10  ;;  %v3039_v5 = vrot.slane %v2728_v10, %v7459_v4  ;;  %6176 = vmatpush3.bf16.msra.mxu1 %v6175_v8 }
 0x27f   : > { %v1908_v29 = vpop.permute.xlu0 %1907  ;;  %v2233_v6 = vsel %vm9822_vm8, %v2200_v47, %v8419_v34  ;;  %vm9823_vm11 = vmmov %vm9813_vm0  ;;  %vm9824_vm0 = vcmask 72704   ;;  %6178 = vmatprep.subr.bf16.mxu1 %v6177_v35  ;;  %vm9831_vm3 = vcmask 171008  }
 0x280   : > { %v8606_v37 = vsel %vm9823_vm11, %v3806_v7, -inf  ;;  %v2265_v58 = vsel %vm9824_vm0, %v2232_v53, %v8435_v56  ;;  %vm9825_vm15 = vmmov %vm9824_vm0  ;;  %v2727_v44 = vmax.f32 %v2625_v49, 0.0  ;;  %v3047_v28 = vcombine.high %v3039_v5, %v3039_v5 }
 0x281   : > { %v2266_v1 = vsel %vm9825_vm15, %v2233_v6, %v8484_v14  ;;  %v1910_v62 = vpop.permute.xlu1 %1909  ;;  %v2298_v27 = vsel %vm9826_vm1, %v2265_v58, %v8500_v12  ;;  %vm9827_vm4 = vmmov %vm9826_vm1  ;;  %v3870_v23 = vsel %vm9830_vm9, %v3039_v5, -inf }
 0x282   : > { %v2299_v55 = vsel %vm9827_vm4, %v2266_v1, %v8531_v17  ;;  %v2331_v46 = vsel %vm9828_vm5, %v2298_v27, %v1780_v51  ;;  %vm9829_vm14 = vmmov %vm9828_vm5  ;;  %v3015_v14 = vcombine.high %v2727_v44, %v2727_v44  ;;  %v3022_v33 = vrot.slane %v2727_v44, %v7459_v4  ;;  %6180 = vmatpush3.bf16.msra.mxu1 %v6179_v20 }
 0x283   : > { %v2006_v34 = vpop.permute.xlu0 %2005  ;;  %v2332_v56 = vsel %vm9829_vm14, %v2299_v55, %v1782_v32  ;;  %v2364_v30 = vsel %vm2333_vm2, %v2331_v46, %v1908_v29  ;;  %v3046_v17 = vrot.slane %v3032_v38, %v7459_v4  ;;  %v3871_v51 = vrot.slane %v3870_v23, 4  ;;  %vm9832_vm6 = vmmov %vm9830_vm9 }
 0x284   : > { %v8622_v12 = vsel %vm2333_vm2, %v2332_v56, %v1910_v62  ;;  %v8627_v48 = vsel %vm9831_vm3, %v2364_v30, %v2006_v34  ;;  %v3029_v11 = vrot.slane %v3015_v14, %v7459_v4  ;;  %v3030_v36 = vcombine.high %v3022_v33, %v3022_v33  ;;  %vm9833_vm8 = vmmov %vm9832_vm6 }
 0x285   : > { %v3842_v45 = vsel %vm9832_vm6, %v3022_v33, -inf  ;;  %v3048_v9 = vcombine.high %v3046_v17, %v3046_v17  ;;  %v3877_v59 = vsel %vm9833_vm8, %v3047_v28, -inf  ;;  %vm9834_vm2 = vmmov %vm9832_vm6  ;;  %v3872_v16 = vmax.f32 %v3870_v23, %v3871_v51  ;;  %v2008_v56 = vpop.permute.xlu1 %2007 }
 0x286   : > { %v3884_v63 = vsel %vm9834_vm2, %v3046_v17, -inf  ;;  %v3843_v0 = vrot.slane %v3842_v45, 4  ;;  %v3878_v25 = vrot.slane %v3877_v59, 4  ;;  %v3031_v18 = vcombine.high %v3029_v11, %v3029_v11  ;;  %vm9835_vm11 = vmmov %vm9834_vm2 }
 0x287   : > { %v3885_v7 = vrot.slane %v3884_v63, 4  ;;  %v3891_v32 = vsel %vm9835_vm11, %v3048_v9, -inf  ;;  %vm9836_vm0 = vmmov %vm9834_vm2  ;;  %v3873_v29 = vrot.slane %v3872_v16, 2  ;;  %vm9839_vm4 = vcmask 130048  }
 0x288   : > { %v3844_v39 = vmax.f32 %v3842_v45, %v3843_v0  ;;  %v3849_v24 = vsel %vm9836_vm0, %v3030_v36, -inf  ;;  %vm9837_vm15 = vmmov %vm9836_vm0  ;;  %v3879_v40 = vmax.f32 %v3877_v59, %v3878_v25  ;;  %v3892_v61 = vrot.slane %v3891_v32, 4 }
 0x289   : > { %v3856_v21 = vsel %vm9837_vm15, %v3029_v11, -inf  ;;  %v3886_v47 = vmax.f32 %v3884_v63, %v3885_v7  ;;  %v3850_v8 = vrot.slane %v3849_v24, 4  ;;  %vm9838_vm1 = vmmov %vm9836_vm0  ;;  %v3874_v53 = vmax.f32 %v3872_v16, %v3873_v29 }
 0x28a   : > { %v3845_v26 = vrot.slane %v3844_v39, 2  ;;  %v3857_v15 = vrot.slane %v3856_v21, 4  ;;  %v3863_v31 = vsel %vm9838_vm1, %v3031_v18, -inf  ;;  %v3880_v6 = vrot.slane %v3879_v40, 2  ;;  %vm9840_vm5 = vmmov %vm9839_vm4 }
 0x28b   : > { %v3887_v49 = vrot.slane %v3886_v47, 2  ;;  %v3893_v35 = vmax.f32 %v3891_v32, %v3892_v61  ;;  %v3851_v1 = vmax.f32 %v3849_v24, %v3850_v8  ;;  %v3864_v62 = vrot.slane %v3863_v31, 4  ;;  %vm9841_vm14 = vmmov %vm9839_vm4  ;;  %v2134_v24 = vpop.permute.xlu0 %2133  ;;  %v2136_v61 = vpop.permute.xlu1 %2135 }
 0x28c   : > { %v3846_v58 = vmax.f32 %v3844_v39, %v3845_v26  ;;  %v3858_v10 = vmax.f32 %v3856_v21, %v3857_v15  ;;  %v3875_v27 = vrot.slane %v3874_v53, 1  ;;  %v3881_v44 = vmax.f32 %v3879_v40, %v3880_v6  ;;  %vm9842_vm9 = vmmov %vm9839_vm4 }
 0x28d   : > { %v3888_v55 = vmax.f32 %v3886_v47, %v3887_v49  ;;  %v3894_v34 = vrot.slane %v3893_v35, 2  ;;  %v3852_v38 = vrot.slane %v3851_v1, 2  ;;  %v3865_v46 = vmax.f32 %v3863_v31, %v3864_v62  ;;  %vm9843_vm3 = vmmov %vm9839_vm4 }
 0x28e   : > { %v3847_v20 = vrot.slane %v3846_v58, 1  ;;  %v3859_v5 = vrot.slane %v3858_v10, 2  ;;  %v3876_v14 = vmax.f32 %v3874_v53, %v3875_v27  ;;  %v3882_v33 = vrot.slane %v3881_v44, 1  ;;  %vm9845_vm8 = vmmov %vm9843_vm3 }
 0x28f   : > { %v3889_v30 = vrot.slane %v3888_v55, 1  ;;  %v3895_v17 = vmax.f32 %v3893_v35, %v3894_v34  ;;  %v3853_v23 = vmax.f32 %v3851_v1, %v3852_v38  ;;  %v3866_v11 = vrot.slane %v3865_v46, 2  ;;  %vm9846_vm2 = vmmov %vm9843_vm3 }
 0x290   : > { %v3848_v28 = vmax.f32 %v3846_v58, %v3847_v20  ;;  %v3860_v51 = vmax.f32 %v3858_v10, %v3859_v5  ;;  %v3883_v36 = vmax.f32 %v3881_v44, %v3882_v33  ;;  %v4432_v59 = vsel %vm9839_vm4, %v3876_v14, -inf  ;;  %vm9851_vm4 = vmmov %vm9846_vm2 }
 0x291   : > { %v3890_v45 = vmax.f32 %v3888_v55, %v3889_v30  ;;  %v3896_v9 = vrot.slane %v3895_v17, 1  ;;  %v4433_v63 = vmax.f32 %v8564_v13, %v4432_v59  ;;  %v3854_v0 = vrot.slane %v3853_v23, 1 }
 0x292   : > { %v3861_v16 = vrot.slane %v3860_v51, 1  ;;  %v3867_v25 = vmax.f32 %v3865_v46, %v3866_v11  ;;  %v4435_v18 = vsel %vm9840_vm5, %v3883_v36, -inf  ;;  %v4420_v39 = vsel %vm9842_vm9, %v3848_v28, -inf  ;;  %vm9852_vm5 = vmmov %vm9846_vm2 }
 0x293   : > { %v3897_v7 = vmax.f32 %v3895_v17, %v3896_v9  ;;  %v4438_v32 = vsel %vm9841_vm14, %v3890_v45, -inf  ;;  %v4436_v21 = vmax.f32 %v8578_v3, %v4435_v18  ;;  %v3855_v40 = vmax.f32 %v3853_v23, %v3854_v0 }
 0x294   : > { %v4439_v29 = vmax.f32 %v8581_v41, %v4438_v32  ;;  %v3862_v47 = vmax.f32 %v3860_v51, %v3861_v16  ;;  %v3868_v26 = vrot.slane %v3867_v25, 1  ;;  %v4421_v8 = vmax.f32 %v8567_v42, %v4420_v39 }
 0x295   : > { %v4441_v13 = vsel %vm9843_vm3, %v3897_v7, -inf  ;;  %vm9844_vm6 = vcmask 171008   ;;  %v4423_v53 = vsel %vm9845_vm8, %v3855_v40, -inf  ;;  %vm9847_vm11 = vcmask 195584  }
 0x296   : > { %v2398_v15 = vsel %vm9844_vm6, %v8622_v12, %v2008_v56  ;;  %v4442_v31 = vmax.f32 %v8584_v60, %v4441_v13  ;;  %v4426_v6 = vsel %vm9846_vm2, %v3862_v47, -inf  ;;  %v2430_v3 = vsel %vm9847_vm11, %v8627_v48, %v2134_v24  ;;  %vm9848_vm0 = vmmov %vm9847_vm11  ;;  %v9868_v13 = vld [vmem:[#allocation6_spill] sm:$0xff] }
 0x297   : > { %v3869_v41 = vmax.f32 %v3867_v25, %v3868_v26  ;;  %v4424_v49 = vmax.f32 %v8589_v19, %v4423_v53  ;;  %v4427_v35 = vmax.f32 %v8606_v37, %v4426_v6  ;;  %v2431_v58 = vsel %vm9848_vm0, %v2398_v15, %v2136_v61  ;;  %vm9859_vm11 = vmmov %vm9851_vm4 }
 0x298   : > { %vm9849_vm15 = vcmask 220160   ;;  %v4428_v42 = vsel %vm9851_vm4, %v8586_v43, -inf  ;;  %vm9853_vm14 = vcmask 1041409   ;;  %vm9854_vm9 = vcmask 1042434   ;;  %v8671_v43 = vld [vmem:[%s9463_s2] ss:$0 sm:$0xff] }
 0x299   : > { %6114 = vmatprep.mubr.msk.f32.mxu0 %vm9849_vm15, %v2430_v3  ;;  %vm9850_vm1 = vmmov %vm9849_vm15  ;;  %v4429_v60 = vsel %vm9852_vm5, %v3869_v41, -inf  ;;  %v4635_v12 = vsel %vm9853_vm14, %v4424_v49, %v4421_v8  ;;  %vm9855_vm3 = vcmask 1044484   ;;  %vm9856_vm6 = vcmask 1045509   ;;  %v9869_v8 = vld [vmem:[#allocation4_spill] sm:$0xff] }
 0x29a   : > { %6115 = vmatmul.mubr.msk.f32.gmra.mrb[30].mxu0 %vm9850_vm1, %v2431_v58  ;;  %v4430_v1 = vmax.f32 %v4428_v42, %v4429_v60  ;;  %v4636_v48 = vsel %vm9854_vm9, %v4427_v35, %v4635_v12  ;;  %vm9857_vm8 = vcmask 1046534   ;;  %vm9858_vm2 = vcmask 1047559  }
 0x29b   : > { %vm9860_vm0 = vcmask 123904   ;;  %v4711_v26 = vand.u32 7, %v9868_v13  ;;  %v4704_v15 = vand.u32 7, %v9869_v8 }
 0x29c   : > { %v4637_v19 = vsel %vm9499_vm7, %v4430_v1, %v4636_v48  ;;  %vm9861_vm15 = vmmov %vm9860_vm0 }
 0x29d   : > { %v4638_v37 = vsel %vm9855_vm3, %v4433_v63, %v4637_v19  ;;  %vm9862_vm1 = vmmov %vm9860_vm0 }
 0x29e   : > { %v4639_v10 = vsel %vm9856_vm6, %v4436_v21, %v4638_v37  ;;  %v6095_v27 = vpop.f32.mrb[16].mxu0  ;;  %vm9863_vm4 = vmmov %vm9860_vm0  ;;  %vm8692_vm6 = vcmp.ge.s32.totalorder %v4711_v26, 1 }
 0x29f   : > { %v4640_v62 = vsel %vm9857_vm8, %v4439_v29, %v4639_v10  ;;  %v2640_v55 = vadd.f32 %v8671_v43, %v6095_v27  ;;  %v2634_v34 = vpop.f32.mrb[17].mxu0  ;;  %vm9864_vm5 = vmmov %vm9860_vm0  ;;  %vm8696_vm8 = vcmp.ge.s32.totalorder %v4704_v15, 1 }
 0x2a0   : > { %v4641_v44 = vsel %vm9858_vm2, %v4442_v31, %v4640_v62  ;;  %v2635_v20 = vadd.f32 %v8671_v43, %v2634_v34  ;;  %vm9865_vm14 = vmmov %vm9860_vm0  ;;  %vm8700_vm2 = vcmp.le.s32.totalorder %v4711_v26, 6  ;;  %v4873_v62 = vsel %vm8696_vm8, %v8433_v50, 0.0 }
 0x2a1   : > { %4681 = vst.msk [vmem:[#allocation3 + $0x28] sm:$0xff] %vm9859_vm11, %v4641_v44  ;;  %v2730_v38 = vmax.f32 %v2640_v55, 0.0  ;;  %vm9866_vm9 = vmmov %vm9860_vm0  ;;  %vm8704_vm11 = vcmp.le.s32.totalorder %v4704_v15, 6 }
 0x2a2   : > { %v2729_v5 = vmax.f32 %v2635_v20, 0.0  ;;  %vm9867_vm3 = vmmov %vm9860_vm0 }
 0x2a3   : > { %v3066_v46 = vcombine.high %v2730_v38, %v2730_v38  ;;  %v3073_v56 = vrot.slane %v2730_v38, %v7459_v4 }
 0x2a4   : > { %v3049_v14 = vcombine.high %v2729_v5, %v2729_v5  ;;  %v3056_v33 = vrot.slane %v2729_v5, %v7459_v4 }
 0x2a5   : > { %v3080_v30 = vrot.slane %v3066_v46, %v7459_v4  ;;  %v3081_v17 = vcombine.high %v3073_v56, %v3073_v56  ;;  %v3926_v28 = vsel %vm9860_vm0, %v3073_v56, -inf  ;;  %v4864_v56 = vsel %vm8704_vm11, %v8424_v2, 0.0 }
 0x2a6   : > { %v3063_v23 = vrot.slane %v3049_v14, %v7459_v4  ;;  %v3064_v51 = vcombine.high %v3056_v33, %v3056_v33  ;;  %v3898_v11 = vsel %vm9861_vm15, %v3056_v33, -inf  ;;  %v3927_v59 = vrot.slane %v3926_v28, 4 }
 0x2a7   : > { %v3082_v36 = vcombine.high %v3080_v30, %v3080_v30  ;;  %v3933_v45 = vsel %vm9862_vm1, %v3081_v17, -inf  ;;  %v3940_v9 = vsel %vm9863_vm4, %v3080_v30, -inf  ;;  %v3899_v16 = vrot.slane %v3898_v11, 4 }
 0x2a8   : > { %v3934_v63 = vrot.slane %v3933_v45, 4  ;;  %v3065_v0 = vcombine.high %v3063_v23, %v3063_v23  ;;  %v3941_v25 = vrot.slane %v3940_v9, 4  ;;  %v3905_v32 = vsel %vm9865_vm14, %v3064_v51, -inf  ;;  %v8690_v42 = vld [vmem:[#allocation3 + $0x27] sm:$0xff]  ;;  %vm9883_vm14 = vmmov %vm9867_vm3 }
 0x2a9   : > { %v3947_v7 = vsel %vm9864_vm5, %v3082_v36, -inf  ;;  %v3912_v39 = vsel %vm9866_vm9, %v3063_v23, -inf  ;;  %v3928_v24 = vmax.f32 %v3926_v28, %v3927_v59  ;;  %v3900_v29 = vmax.f32 %v3898_v11, %v3899_v16  ;;  %v8711_v27 = vld [vmem:[#allocation3 + $0x21] sm:$0xff]  ;;  %vm9884_vm9 = vmmov %vm9867_vm3 }
 0x2aa   : > { %v3948_v18 = vrot.slane %v3947_v7, 4  ;;  %v3935_v21 = vmax.f32 %v3933_v45, %v3934_v63  ;;  %v3919_v40 = vsel %vm9867_vm3, %v3065_v0, -inf  ;;  %v3942_v47 = vmax.f32 %v3940_v9, %v3941_v25  ;;  %v8723_v11 = vld [vmem:[#allocation3 + $0x28] sm:$0xff] }
 0x2ab   : > { %v3906_v61 = vrot.slane %v3905_v32, 4  ;;  %v3913_v53 = vrot.slane %v3912_v39, 4  ;;  %v3920_v6 = vrot.slane %v3919_v40, 4  ;;  %v3929_v3 = vrot.slane %v3928_v24, 2 }
 0x2ac   : > { %v3949_v31 = vmax.f32 %v3947_v7, %v3948_v18  ;;  %v3936_v41 = vrot.slane %v3935_v21, 2  ;;  %v3901_v49 = vrot.slane %v3900_v29, 2  ;;  %v3943_v35 = vrot.slane %v3942_v47, 2 }
 0x2ad   : > { %v3907_v58 = vmax.f32 %v3905_v32, %v3906_v61  ;;  %v3914_v1 = vmax.f32 %v3912_v39, %v3913_v53  ;;  %v3921_v10 = vmax.f32 %v3919_v40, %v3920_v6  ;;  %v3930_v44 = vmax.f32 %v3928_v24, %v3929_v3 }
 0x2ae   : > { %v3950_v12 = vrot.slane %v3949_v31, 2  ;;  %v3937_v55 = vmax.f32 %v3935_v21, %v3936_v41  ;;  %v3902_v34 = vmax.f32 %v3900_v29, %v3901_v49  ;;  %v4874_v20 = vsel %vm8692_vm6, %v8690_v42, 0.0 }
 0x2af   : > { %v3944_v38 = vmax.f32 %v3942_v47, %v3943_v35  ;;  %v3908_v5 = vrot.slane %v3907_v58, 2  ;;  %v6251_v46 = vpack.i.bf16 %v4874_v20, %v4873_v62  ;;  %v3915_v33 = vrot.slane %v3914_v1, 2 }
 0x2b0   : > { %v3951_v14 = vmax.f32 %v3949_v31, %v3950_v12  ;;  %v4865_v50 = vsel %vm8700_vm2, %v8711_v27, 0.0  ;;  %v3922_v30 = vrot.slane %v3921_v10, 2  ;;  %v3931_v28 = vrot.slane %v3930_v44, 1 }
 0x2b1   : > { %6252 = vrot.lane.b32.xlu1 %v6251_v46, %s6373_s7  ;;  %v6246_v17 = vpack.i.bf16 %v4865_v50, %v4864_v56  ;;  %v3938_v23 = vrot.slane %v3937_v55, 1  ;;  %v3903_v51 = vrot.slane %v3902_v34, 1  ;;  %v3945_v36 = vrot.slane %v3944_v38, 1 }
 0x2b2   : > { %v3909_v45 = vmax.f32 %v3907_v58, %v3908_v5  ;;  %v3952_v2 = vrot.slane %v3951_v14, 1  ;;  %v3916_v9 = vmax.f32 %v3914_v1, %v3915_v33  ;;  %v3923_v59 = vmax.f32 %v3921_v10, %v3922_v30 }
 0x2b3   : > { %6247 = vrot.lane.b32.xlu0 %v6246_v17, %s6372_s6  ;;  %v6256_v63 = vpack.i.bf16 %v8723_v11, %v8463_v52  ;;  %v3932_v0 = vmax.f32 %v3930_v44, %v3931_v28  ;;  %v3939_v16 = vmax.f32 %v3937_v55, %v3938_v23  ;;  %v3904_v25 = vmax.f32 %v3902_v34, %v3903_v51 }
 0x2b4   : > { %v3946_v18 = vmax.f32 %v3944_v38, %v3945_v36  ;;  %v3910_v32 = vrot.slane %v3909_v45, 1  ;;  %v3953_v21 = vmax.f32 %v3951_v14, %v3952_v2  ;;  %v3917_v29 = vrot.slane %v3916_v9, 1 }
 0x2b5   : > { %v3924_v47 = vrot.slane %v3923_v59, 1  ;;  %vm9878_vm0 = vcmask 130048  }
 0x2b6   : > { %v8732_v13 = vsel %vm9878_vm0, %v3932_v0, -inf  ;;  %vm9879_vm15 = vmmov %vm9878_vm0  ;;  %v8743_v31 = vmax.f32 %v3909_v45, %v3910_v32  ;;  %v8749_v41 = vmax.f32 %v3916_v9, %v3917_v29 }
 0x2b7   : > { %6257 = vrot.lane.b32.xlu0 %v6256_v63, %s6374_s28  ;;  %v8735_v52 = vsel %vm9879_vm15, %v3939_v16, -inf  ;;  %vm9880_vm1 = vmmov %vm9878_vm0  ;;  %v8752_v58 = vmax.f32 %v3923_v59, %v3924_v47 }
 0x2b8   : > { %v8738_v26 = vsel %vm9880_vm1, %v3904_v25, -inf  ;;  %vm9881_vm4 = vmmov %vm9878_vm0 }
 0x2b9   : > { %v8741_v15 = vsel %vm9881_vm4, %v3946_v18, -inf  ;;  %vm9882_vm5 = vmmov %vm9878_vm0 }
 0x2ba   : > { %v8747_v3 = vsel %vm9882_vm5, %v3953_v21, -inf  ;;  %vm9885_vm0 = vmmov %vm9867_vm3 }
 0x2bb   : > { %v6098_v7 = vpop.f32.mrb[18].mxu0  ;;  %vm9886_vm15 = vmmov %vm9885_vm0 }
 0x2bc   : > { %v2650_v39 = vadd.f32 %v8671_v43, %v6098_v7  ;;  %v2644_v24 = vpop.f32.mrb[19].mxu0  ;;  %vm9887_vm1 = vmmov %vm9885_vm0 }
 0x2bd   : > { %v2645_v40 = vadd.f32 %v8671_v43, %v2644_v24  ;;  %vm9888_vm4 = vmmov %vm9885_vm0 }
 0x2be   : > { %v2732_v61 = vmax.f32 %v2650_v39, 0.0  ;;  %vm9889_vm5 = vmmov %vm9885_vm0 }
 0x2bf   : > { %v2731_v8 = vmax.f32 %v2645_v40, 0.0 }
 0x2c0   : > { %v3100_v53 = vcombine.high %v2732_v61, %v2732_v61  ;;  %v3107_v6 = vrot.slane %v2732_v61, %v7459_v4 }
 0x2c1   : > { %v3083_v49 = vcombine.high %v2731_v8, %v2731_v8  ;;  %v3090_v35 = vrot.slane %v2731_v8, %v7459_v4 }
 0x2c2   : > { %v3114_v12 = vrot.slane %v3100_v53, %v7459_v4  ;;  %v3115_v1 = vcombine.high %v3107_v6, %v3107_v6  ;;  %v3982_v10 = vsel %vm9883_vm14, %v3107_v6, -inf  ;;  %vm9890_vm14 = vcmask 130048  }
 0x2c3   : > { %v3983_v62 = vrot.slane %v3982_v10, 4  ;;  %v3097_v44 = vrot.slane %v3083_v49, %v7459_v4  ;;  %v3098_v55 = vcombine.high %v3090_v35, %v3090_v35  ;;  %v3954_v34 = vsel %vm9884_vm9, %v3090_v35, -inf  ;;  %vm9891_vm9 = vmmov %vm9890_vm14 }
 0x2c4   : > { %v3116_v20 = vcombine.high %v3114_v12, %v3114_v12  ;;  %v3989_v38 = vsel %vm9867_vm3, %v3115_v1, -inf  ;;  %v3996_v5 = vsel %vm9885_vm0, %v3114_v12, -inf  ;;  %v3955_v46 = vrot.slane %v3954_v34, 4  ;;  %vm9892_vm3 = vmmov %vm9891_vm9 }
 0x2c5   : > { %v3984_v56 = vmax.f32 %v3982_v10, %v3983_v62  ;;  %v3990_v14 = vrot.slane %v3989_v38, 4  ;;  %v3997_v33 = vrot.slane %v3996_v5, 4  ;;  %v3099_v50 = vcombine.high %v3097_v44, %v3097_v44  ;;  %vm9893_vm0 = vmmov %vm9892_vm3 }
 0x2c6   : > { %v4003_v30 = vsel %vm9886_vm15, %v3116_v20, -inf  ;;  %v3956_v17 = vmax.f32 %v3954_v34, %v3955_v46  ;;  %v3961_v28 = vsel %vm9887_vm1, %v3098_v55, -inf  ;;  %v3968_v23 = vsel %vm9888_vm4, %v3097_v44, -inf  ;;  %vm9894_vm15 = vmmov %vm9893_vm0 }
 0x2c7   : > { %v3985_v51 = vrot.slane %v3984_v56, 2  ;;  %v3991_v36 = vmax.f32 %v3989_v38, %v3990_v14  ;;  %v3998_v45 = vmax.f32 %v3996_v5, %v3997_v33  ;;  %v4004_v2 = vrot.slane %v4003_v30, 4  ;;  %vm9895_vm1 = vmmov %vm9893_vm0 }
 0x2c8   : > { %v3957_v9 = vrot.slane %v3956_v17, 2  ;;  %v3962_v59 = vrot.slane %v3961_v28, 4  ;;  %v3969_v63 = vrot.slane %v3968_v23, 4  ;;  %v3975_v0 = vsel %vm9889_vm5, %v3099_v50, -inf  ;;  %vm9896_vm4 = vmmov %vm9893_vm0 }
 0x2c9   : > { %v3986_v16 = vmax.f32 %v3984_v56, %v3985_v51  ;;  %v3992_v25 = vrot.slane %v3991_v36, 2  ;;  %v3999_v7 = vrot.slane %v3998_v45, 2  ;;  %v4005_v18 = vmax.f32 %v4003_v30, %v4004_v2  ;;  %v8766_v30 = vpop.permute.xlu0 %6207  ;;  %vm9897_vm5 = vmmov %vm9893_vm0 }
 0x2ca   : > { %v3958_v32 = vmax.f32 %v3956_v17, %v3957_v9  ;;  %v3963_v39 = vmax.f32 %v3961_v28, %v3962_v59  ;;  %v3970_v24 = vmax.f32 %v3968_v23, %v3969_v63  ;;  %v3976_v21 = vrot.slane %v3975_v0, 4  ;;  %v4798_v59 = vld [vmem:[#allocation3 + $0x7] sm:$0xff] }
 0x2cb   : > { %v3987_v29 = vrot.slane %v3986_v16, 1  ;;  %v3993_v40 = vmax.f32 %v3991_v36, %v3992_v25  ;;  %v4000_v47 = vmax.f32 %v3998_v45, %v3999_v7  ;;  %v4006_v61 = vrot.slane %v4005_v18, 2  ;;  %v8771_v36 = vpop.permute.xlu1 %6212 }
 0x2cc   : > { %v3959_v8 = vrot.slane %v3958_v32, 1  ;;  %v3964_v53 = vrot.slane %v3963_v39, 2  ;;  %v3971_v6 = vrot.slane %v3970_v24, 2  ;;  %v3977_v49 = vmax.f32 %v3975_v0, %v3976_v21 }
 0x2cd   : > { %v3988_v35 = vmax.f32 %v3986_v16, %v3987_v29  ;;  %v3994_v12 = vrot.slane %v3993_v40, 1  ;;  %v4001_v1 = vrot.slane %v4000_v47, 1  ;;  %v4007_v10 = vmax.f32 %v4005_v18, %v4006_v61 }
 0x2ce   : > { %v3960_v62 = vmax.f32 %v3958_v32, %v3959_v8  ;;  %v3965_v44 = vmax.f32 %v3963_v39, %v3964_v53  ;;  %v3972_v55 = vmax.f32 %v3970_v24, %v3971_v6  ;;  %v3978_v34 = vrot.slane %v3977_v49, 2 }
 0x2cf   : > { %v3995_v20 = vmax.f32 %v3993_v40, %v3994_v12  ;;  %v4002_v38 = vmax.f32 %v4000_v47, %v4001_v1  ;;  %v4008_v5 = vrot.slane %v4007_v10, 1  ;;  %v4456_v46 = vsel %vm9890_vm14, %v3988_v35, -inf  ;;  %vm9898_vm14 = vmmov %vm9893_vm0  ;;  %v8794_v47 = vpop.permute.xlu1 %6222 }
 0x2d0   : > { %v4457_v56 = vmax.f32 %v8732_v13, %v4456_v46  ;;  %v3966_v14 = vrot.slane %v3965_v44, 1  ;;  %v3973_v33 = vrot.slane %v3972_v55, 1  ;;  %v3979_v50 = vmax.f32 %v3977_v49, %v3978_v34 }
 0x2d1   : > { %v4009_v17 = vmax.f32 %v4007_v10, %v4008_v5  ;;  %v4459_v28 = vsel %vm9891_vm9, %v3995_v20, -inf  ;;  %v4462_v23 = vsel %vm9892_vm3, %v4002_v38, -inf  ;;  %v4444_v51 = vsel %vm9893_vm0, %v3960_v62, -inf  ;;  %vm9899_vm9 = vmmov %vm9893_vm0 }
 0x2d2   : > { %v4460_v45 = vmax.f32 %v8735_v52, %v4459_v28  ;;  %v4463_v2 = vmax.f32 %v8741_v15, %v4462_v23  ;;  %v3967_v9 = vmax.f32 %v3965_v44, %v3966_v14  ;;  %v3974_v13 = vmax.f32 %v3972_v55, %v3973_v33  ;;  %vm9900_vm3 = vmmov %vm9893_vm0 }
 0x2d3   : > { %v4446_v63 = vsel %vm9894_vm15, %v8743_v31, -inf  ;;  %v4465_v0 = vsel %vm9895_vm1, %v4009_v17, -inf  ;;  %v3980_v16 = vrot.slane %v3979_v50, 1  ;;  %v4445_v25 = vmax.f32 %v8738_v26, %v4444_v51  ;;  %v8788_v26 = vpop.permute.xlu0 %6217 }
 0x2d4   : > { %v4449_v7 = vsel %vm9896_vm4, %v8749_v41, -inf  ;;  %v4466_v18 = vmax.f32 %v8747_v3, %v4465_v0  ;;  %v4447_v52 = vsel %vm9897_vm5, %v3967_v9, -inf  ;;  %v4450_v15 = vsel %vm9898_vm14, %v3974_v13, -inf }
 0x2d5   : > { %v3981_v32 = vmax.f32 %v3979_v50, %v3980_v16  ;;  %v4448_v39 = vmax.f32 %v4446_v63, %v4447_v52  ;;  %v4451_v24 = vmax.f32 %v4449_v7, %v4450_v15  ;;  %v4822_v31 = vsel %vm8170_vm13, %v4798_v59, 0.0  ;;  %vm9903_vm13 = vmmov %vm9900_vm3 }
 0x2d6   : > { %v6209_v21 = vunpack.i.l.bf16 %v8766_v30  ;;  %v6214_v29 = vunpack.i.l.bf16 %v8771_v36  ;;  %v4452_v41 = vsel %vm9899_vm9, %v8752_v58, -inf  ;;  %vm9901_vm0 = vcmask 1041409  }
 0x2d7   : > { %v4453_v3 = vsel %vm9900_vm3, %v3981_v32, -inf  ;;  %v4642_v40 = vsel %vm9901_vm0, %v4448_v39, %v4445_v25  ;;  %vm5126_vm15 = vcmask 261120   ;;  %vm9902_vm1 = vcmask 1042434  }
 0x2d8   : > { %v4454_v61 = vmax.f32 %v4452_v41, %v4453_v3  ;;  %v4643_v57 = vsel %vm9902_vm1, %v4451_v24, %v4642_v40  ;;  %v5118_v8 = vsel %vm9903_vm13, %v4822_v31, %v6209_v21  ;;  %v6219_v53 = vunpack.i.l.bf16 %v8788_v26  ;;  %v6346_v41 = vld [vmem:[#allocation3 + $0xf] sm:$0xff] }
 0x2d9   : > { %v5127_v49 = vsel %vm5126_vm15, %v5118_v8, %v6214_v29  ;;  %vm9504_vm4 = vcmask 392192   ;;  %v6224_v58 = vunpack.i.l.bf16 %v8794_v47  ;;  %vm9904_vm5 = vcmask 1044484  }
 0x2da   : > { %v4644_v6 = vsel %vm9499_vm7, %v4454_v61, %v4643_v57  ;;  %vm9503_vm14 = vcmask 523264   ;;  %vm9905_vm9 = vcmask 1045509   ;;  %v8804_v1 = vpop.permute.xlu0 %6227  ;;  %vm9906_vm3 = vcmask 1046534  }
 0x2db   : > { %v4645_v35 = vsel %vm9904_vm5, %v4457_v56, %v4644_v6  ;;  %v6229_v62 = vunpack.i.l.bf16 %v8804_v1  ;;  %vm9502_vm0 = vcmask 654336   ;;  %v5136_v55 = vsel %vm9504_vm4, %v5127_v49, %v6219_v53 }
 0x2dc   : > { %v4646_v12 = vsel %vm9905_vm9, %v4460_v45, %v4645_v35  ;;  %vm9907_vm1 = vcmask 1047559   ;;  %v8810_v20 = vpop.permute.xlu1 %6232  ;;  %v5145_v46 = vsel %vm9503_vm14, %v5136_v55, %v6224_v58  ;;  %vm9500_vm5 = vcmask 785408  }
 0x2dd   : > { %v4647_v10 = vsel %vm9906_vm3, %v4463_v2, %v4646_v12  ;;  %v6234_v56 = vunpack.i.l.bf16 %v8810_v20  ;;  %v5154_v17 = vsel %vm9502_vm0, %v5145_v46, %v6229_v62  ;;  %vm9501_vm9 = vcmask 916480  }
 0x2de   : > { %v4648_v34 = vsel %vm9907_vm1, %v4466_v18, %v4647_v10  ;;  %v8817_v50 = vpop.permute.xlu0 %6237  ;;  %v6210_v51 = vunpack.i.h.bf16 %v8766_v30  ;;  %v6215_v9 = vunpack.i.h.bf16 %v8771_v36  ;;  %vm9908_vm3 = vcmask 123904  }
 0x2df   : > { %4682 = vst.msk [vmem:[#allocation3 + $0x30] sm:$0xff] %vm9903_vm13, %v4648_v34  ;;  %v6239_v23 = vunpack.i.l.bf16 %v8817_v50  ;;  %v5163_v63 = vsel %vm9500_vm5, %v5154_v17, %v6234_v56  ;;  %vm9909_vm1 = vmmov %vm9908_vm3  ;;  %v4901_v36 = vsel %vm8158_vm12, %v8711_v27, 0.0  ;;  %vm9912_vm5 = vcmask 130048  }
 0x2e0   : > { %v6101_v44 = vpop.f32.mrb[20].mxu0  ;;  %vm9910_vm13 = vmmov %vm9909_vm1  ;;  %v4823_v3 = vsel %vm8154_vm10, %v6346_v41, 0.0  ;;  %v6220_v49 = vunpack.i.h.bf16 %v8788_v26  ;;  %v6225_v35 = vunpack.i.h.bf16 %v8794_v47  ;;  %v6230_v34 = vunpack.i.h.bf16 %v8804_v1 }
 0x2e1   : > { %v2660_v38 = vadd.f32 %v8671_v43, %v6101_v44  ;;  %v2654_v5 = vpop.f32.mrb[21].mxu0  ;;  %v5172_v7 = vsel %vm9501_vm9, %v5163_v63, %v6239_v23  ;;  %vm9911_vm7 = vmmov %vm9909_vm1 }
 0x2e2   : > { %v2655_v14 = vadd.f32 %v8671_v43, %v2654_v5  ;;  %5292 = vmatmul.mubr.f32.vlgmr.msra.gmra.mrb[0].mxu1 %v5172_v7 }
 0x2e3   : > { %v2734_v33 = vmax.f32 %v2660_v38, 0.0  ;;  %5922 = vmatprep.mubr.msk.f32.mxu1 %vm9912_vm5, %v4901_v36 }
 0x2e4   : > { %v2733_v28 = vmax.f32 %v2655_v14, 0.0  ;;  %v9918_v14 = vld [vmem:[#allocation7_spill] sm:$0xff] }
 0x2e5   : > { %v3134_v45 = vcombine.high %v2734_v33, %v2734_v33  ;;  %v3141_v2 = vrot.slane %v2734_v33, %v7459_v4  ;;  %v4718_v33 = vand.u32 7, %v9918_v14 }
 0x2e6   : > { %v3117_v13 = vcombine.high %v2733_v28, %v2733_v28  ;;  %v3124_v59 = vrot.slane %v2733_v28, %v7459_v4  ;;  %v6235_v28 = vunpack.i.h.bf16 %v8810_v20 }
 0x2e7   : > { %v3148_v0 = vrot.slane %v3134_v45, %v7459_v4  ;;  %v3149_v16 = vcombine.high %v3141_v2, %v3141_v2  ;;  %v4038_v25 = vsel %vm9908_vm3, %v3141_v2, -inf  ;;  %vm9913_vm3 = vmmov %vm9909_vm1  ;;  %vm8856_vm10 = vcmp.le.s32.totalorder %v4718_v33, 6 }
 0x2e8   : > { %v3131_v18 = vrot.slane %v3117_v13, %v7459_v4  ;;  %v3132_v30 = vcombine.high %v3124_v59, %v3124_v59  ;;  %v4010_v52 = vsel %vm9909_vm1, %v3124_v59, -inf  ;;  %v4039_v32 = vrot.slane %v4038_v25, 4  ;;  %vm9914_vm1 = vmmov %vm9912_vm5 }
 0x2e9   : > { %v3150_v15 = vcombine.high %v3148_v0, %v3148_v0  ;;  %v4045_v39 = vsel %vm9910_vm13, %v3149_v16, -inf  ;;  %v4052_v24 = vsel %vm9911_vm7, %v3148_v0, -inf  ;;  %v4011_v29 = vrot.slane %v4010_v52, 4  ;;  %vm9915_vm12 = vmmov %vm9913_vm3  ;;  %v8860_v0 = vld [vmem:[#allocation3 + $0x29] sm:$0xff] }
 0x2ea   : > { %v4046_v31 = vrot.slane %v4045_v39, 4  ;;  %v3133_v21 = vcombine.high %v3131_v18, %v3131_v18  ;;  %v4053_v40 = vrot.slane %v4052_v24, 4  ;;  %v5119_v22 = vsel %vm9914_vm1, %v4823_v3, %v6210_v51  ;;  %vm9916_vm13 = vmmov %vm9913_vm3 }
 0x2eb   : > { %v4059_v61 = vsel %vm9913_vm3, %v3150_v15, -inf  ;;  %v4017_v8 = vsel %vm9915_vm12, %v3132_v30, -inf  ;;  %v4024_v53 = vsel %vm9916_vm13, %v3131_v18, -inf  ;;  %v5128_v6 = vsel %vm5126_vm15, %v5119_v22, %v6215_v9  ;;  %vm9917_vm7 = vmmov %vm9913_vm3 }
 0x2ec   : > { %v4060_v57 = vrot.slane %v4059_v61, 4  ;;  %v4040_v58 = vmax.f32 %v4038_v25, %v4039_v32  ;;  %v4047_v12 = vmax.f32 %v4045_v39, %v4046_v31  ;;  %v4012_v54 = vmax.f32 %v4010_v52, %v4011_v29  ;;  %v8866_v52 = vld [vmem:[#allocation3 + $0x2f] sm:$0xff]  ;;  %vm9922_vm3 = vmmov %vm9914_vm1 }
 0x2ed   : > { %v4031_v10 = vsel %vm9917_vm7, %v3133_v21, -inf  ;;  %v4054_v62 = vmax.f32 %v4052_v24, %v4053_v40  ;;  %v4018_v44 = vrot.slane %v4017_v8, 4  ;;  %v4025_v55 = vrot.slane %v4024_v53, 4  ;;  %vm9924_vm12 = vmmov %vm9914_vm1 }
 0x2ee   : > { %v4061_v38 = vmax.f32 %v4059_v61, %v4060_v57  ;;  %v5137_v5 = vsel %vm9504_vm4, %v5128_v6, %v6220_v49  ;;  %v4041_v46 = vrot.slane %v4040_v58, 2  ;;  %v4032_v56 = vrot.slane %v4031_v10, 4  ;;  %vm9925_vm13 = vmmov %vm9914_vm1 }
 0x2ef   : > { %v5146_v26 = vsel %vm9503_vm14, %v5137_v5, %v6225_v35  ;;  %v4048_v17 = vrot.slane %v4047_v12, 2  ;;  %v4013_v47 = vrot.slane %v4012_v54, 2  ;;  %v4055_v23 = vrot.slane %v4054_v62, 2  ;;  %vm9926_vm7 = vmmov %vm9914_vm1 }
 0x2f0   : > { %v4019_v51 = vmax.f32 %v4017_v8, %v4018_v44  ;;  %v4026_v45 = vmax.f32 %v4024_v53, %v4025_v55  ;;  %v4062_v2 = vrot.slane %v4061_v38, 2  ;;  %v6240_v9 = vunpack.i.h.bf16 %v8817_v50  ;;  %v8885_v8 = vld [vmem:[#allocation3 + $0x30] sm:$0xff] }
 0x2f1   : > { %v5155_v1 = vsel %vm9502_vm0, %v5146_v26, %v6230_v34  ;;  %v4042_v13 = vmax.f32 %v4040_v58, %v4041_v46  ;;  %v4033_v59 = vmax.f32 %v4031_v10, %v4032_v56  ;;  %v4049_v16 = vmax.f32 %v4047_v12, %v4048_v17 }
 0x2f2   : > { %v4014_v20 = vmax.f32 %v4012_v54, %v4013_v47  ;;  %v4883_v25 = vsel %vm8704_vm11, %v8711_v27, 0.0  ;;  %v4056_v7 = vmax.f32 %v4054_v62, %v4055_v23  ;;  %v4020_v50 = vrot.slane %v4019_v51, 2 }
 0x2f3   : > { %v4027_v18 = vrot.slane %v4026_v45, 2  ;;  %vm9921_vm5 = vcmask 785408   ;;  %v4063_v36 = vmax.f32 %v4061_v38, %v4062_v2  ;;  %v4866_v32 = vsel %vm8856_vm10, %v8860_v0, 0.0 }
 0x2f4   : > { %v5164_v30 = vsel %vm9921_vm5, %v5155_v1, %v6235_v28  ;;  %v4884_v39 = vsel %vm8700_vm2, %v8860_v0, 0.0  ;;  %v4043_v24 = vrot.slane %v4042_v13, 1  ;;  %v4034_v27 = vrot.slane %v4033_v59, 2 }
 0x2f5   : > { %v5173_v15 = vsel %vm9501_vm9, %v5164_v30, %v6240_v9  ;;  %v4902_v31 = vsel %vm8704_vm11, %v8860_v0, 0.0  ;;  %v4892_v21 = vsel %vm8696_vm8, %v8690_v42, 0.0  ;;  %v4050_v29 = vrot.slane %v4049_v16, 1  ;;  %vm9923_vm11 = vmmov %vm9914_vm1  ;;  %v9007_v0 = vpop.permute.xlu1 %6242 }
 0x2f6   : > { %5297 = vmatmul.mubr.f32.gmra.mrb[2].mxu1 %v5173_v15  ;;  %v4015_v41 = vrot.slane %v4014_v20, 1  ;;  %v6261_v3 = vpack.i.bf16 %v4884_v39, %v4883_v25  ;;  %v4893_v40 = vsel %vm8692_vm6, %v8866_v52, 0.0  ;;  %v4057_v61 = vrot.slane %v4056_v7, 1 }
 0x2f7   : > { %5923 = vmatprep.mubr.msk.f32.mxu1 %vm9922_vm3, %v4902_v31  ;;  %v4021_v22 = vmax.f32 %v4019_v51, %v4020_v50  ;;  %v6266_v57 = vpack.i.bf16 %v4893_v40, %v4892_v21  ;;  %v4064_v37 = vrot.slane %v4063_v36, 1  ;;  %v4028_v53 = vmax.f32 %v4026_v45, %v4027_v18 }
 0x2f8   : > { %6262 = vrot.lane.b32.xlu1 %v6261_v3, %s6375_s10  ;;  %v4035_v6 = vmax.f32 %v4033_v59, %v4034_v27  ;;  %v4044_v42 = vmax.f32 %v4042_v13, %v4043_v24  ;;  %v4051_v49 = vmax.f32 %v4049_v16, %v4050_v29  ;;  %v4016_v58 = vmax.f32 %v4014_v20, %v4015_v41 }
 0x2f9   : > { %6267 = vrot.lane.b32.xlu0 %v6266_v57, %s6376_s17  ;;  %v6271_v35 = vpack.i.bf16 %v8885_v8, %v8723_v11  ;;  %v4058_v54 = vmax.f32 %v4056_v7, %v4057_v61  ;;  %v4022_v10 = vrot.slane %v4021_v22, 1  ;;  %v4065_v55 = vmax.f32 %v4063_v36, %v4064_v37 }
 0x2fa   : > { %v4029_v34 = vrot.slane %v4028_v53, 1  ;;  %v4036_v5 = vrot.slane %v4035_v6, 1  ;;  %v8896_v56 = vsel %vm9923_vm11, %v4044_v42, -inf  ;;  %v8899_v11 = vsel %vm9914_vm1, %v4051_v49, -inf }
 0x2fb   : > { %v8902_v26 = vsel %vm9924_vm12, %v4016_v58, -inf  ;;  %v8905_v47 = vsel %vm9925_vm13, %v4058_v54, -inf  ;;  %v8907_v28 = vmax.f32 %v4021_v22, %v4022_v10  ;;  %v8911_v45 = vsel %vm9926_vm7, %v4065_v55, -inf }
 0x2fc   : > { %6272 = vrot.lane.b32.xlu1 %v6271_v35, %s6377_s23  ;;  %v8913_v2 = vmax.f32 %v4028_v53, %v4029_v34  ;;  %v8916_v13 = vmax.f32 %v4035_v6, %v4036_v5  ;;  %vm9927_vm5 = vcmask 123904   ;;  %vm9948_vm9 = vcmask 1044484  }
 0x2fd   : > { %v6104_v12 = vpop.f32.mrb[22].mxu0  ;;  %6277 = vrot.lane.b32.xlu0 %v6271_v35, %s6371_s30  ;;  %vm9928_vm3 = vmmov %vm9927_vm5  ;;  %vm9951_vm0 = vcmask 1047559   ;;  %vm9999_vm14 = vcmask 1046534   ;;  %vm10001_vm4 = vcmask 1047559  }
 0x2fe   : > { %v2670_v62 = vadd.f32 %v8671_v43, %v6104_v12  ;;  %v2664_v44 = vpop.f32.mrb[23].mxu0  ;;  %vm9929_vm11 = vmmov %vm9928_vm3 }
 0x2ff   : > { %v2665_v38 = vadd.f32 %v8671_v43, %v2664_v44  ;;  %vm9930_vm1 = vmmov %vm9928_vm3 }
 0x300   : > { %v2736_v46 = vmax.f32 %v2670_v62, 0.0  ;;  %vm9931_vm12 = vmmov %vm9930_vm1 }
 0x301   : > { %v2735_v17 = vmax.f32 %v2665_v38, 0.0  ;;  %vm9932_vm13 = vmmov %vm9930_vm1 }
 0x302   : > { %v3168_v23 = vcombine.high %v2736_v46, %v2736_v46  ;;  %v3175_v51 = vrot.slane %v2736_v46, %v7459_v4  ;;  %vm9933_vm7 = vmmov %vm9930_vm1 }
 0x303   : > { %v3151_v9 = vcombine.high %v2735_v17, %v2735_v17  ;;  %v3158_v1 = vrot.slane %v2735_v17, %v7459_v4 }
 0x304   : > { %v3182_v59 = vrot.slane %v3168_v23, %v7459_v4  ;;  %v3183_v16 = vcombine.high %v3175_v51, %v3175_v51  ;;  %v4094_v20 = vsel %vm9927_vm5, %v3175_v51, -inf  ;;  %vm9934_vm5 = vmmov %vm9930_vm1 }
 0x305   : > { %v4095_v25 = vrot.slane %v4094_v20, 4  ;;  %v3165_v7 = vrot.slane %v3151_v9, %v7459_v4  ;;  %v3166_v50 = vcombine.high %v3158_v1, %v3158_v1  ;;  %v4066_v18 = vsel %vm9928_vm3, %v3158_v1, -inf }
 0x306   : > { %v3184_v30 = vcombine.high %v3182_v59, %v3182_v59  ;;  %v4101_v36 = vsel %vm9929_vm11, %v3183_v16, -inf  ;;  %v4108_v15 = vsel %vm9930_vm1, %v3182_v59, -inf  ;;  %v4067_v39 = vrot.slane %v4066_v18, 4 }
 0x307   : > { %v4096_v24 = vmax.f32 %v4094_v20, %v4095_v25  ;;  %v4102_v27 = vrot.slane %v4101_v36, 4  ;;  %v4109_v31 = vrot.slane %v4108_v15, 4  ;;  %v3167_v21 = vcombine.high %v3165_v7, %v3165_v7 }
 0x308   : > { %v4115_v29 = vsel %vm9931_vm12, %v3184_v30, -inf  ;;  %v4068_v41 = vmax.f32 %v4066_v18, %v4067_v39  ;;  %v4073_v3 = vsel %vm9932_vm13, %v3166_v50, -inf  ;;  %v4080_v40 = vsel %vm9933_vm7, %v3165_v7, -inf }
 0x309   : > { %v4097_v61 = vrot.slane %v4096_v24, 2  ;;  %v4103_v22 = vmax.f32 %v4101_v36, %v4102_v27  ;;  %v4110_v57 = vmax.f32 %v4108_v15, %v4109_v31  ;;  %v4116_v37 = vrot.slane %v4115_v29, 4 }
 0x30a   : > { %v4069_v53 = vrot.slane %v4068_v41, 2  ;;  %v4074_v6 = vrot.slane %v4073_v3, 4  ;;  %v4081_v42 = vrot.slane %v4080_v40, 4  ;;  %v4087_v49 = vsel %vm9934_vm5, %v3167_v21, -inf }
 0x30b   : > { %v4098_v58 = vmax.f32 %v4096_v24, %v4097_v61  ;;  %v4104_v35 = vrot.slane %v4103_v22, 2  ;;  %v4111_v12 = vrot.slane %v4110_v57, 2  ;;  %v4117_v54 = vmax.f32 %v4115_v29, %v4116_v37 }
 0x30c   : > { %v4070_v10 = vmax.f32 %v4068_v41, %v4069_v53  ;;  %v4075_v62 = vmax.f32 %v4073_v3, %v4074_v6  ;;  %v4082_v44 = vmax.f32 %v4080_v40, %v4081_v42  ;;  %v4088_v55 = vrot.slane %v4087_v49, 4 }
 0x30d   : > { %v4099_v34 = vrot.slane %v4098_v58, 1  ;;  %v4105_v38 = vmax.f32 %v4103_v22, %v4104_v35  ;;  %v4112_v5 = vmax.f32 %v4110_v57, %v4111_v12  ;;  %v4118_v46 = vrot.slane %v4117_v54, 2 }
 0x30e   : > { %v4071_v17 = vrot.slane %v4070_v10, 1  ;;  %v4076_v23 = vrot.slane %v4075_v62, 2  ;;  %v4083_v51 = vrot.slane %v4082_v44, 2  ;;  %v4089_v9 = vmax.f32 %v4087_v49, %v4088_v55 }
 0x30f   : > { %v4100_v1 = vmax.f32 %v4098_v58, %v4099_v34  ;;  %v4106_v59 = vrot.slane %v4105_v38, 1  ;;  %v4113_v16 = vrot.slane %v4112_v5, 1  ;;  %v4119_v20 = vmax.f32 %v4117_v54, %v4118_v46 }
 0x310   : > { %v4072_v25 = vmax.f32 %v4070_v10, %v4071_v17  ;;  %v4077_v7 = vmax.f32 %v4075_v62, %v4076_v23  ;;  %v4084_v50 = vmax.f32 %v4082_v44, %v4083_v51  ;;  %v4090_v18 = vrot.slane %v4089_v9, 2 }
 0x311   : > { %v4107_v30 = vmax.f32 %v4105_v38, %v4106_v59  ;;  %v4114_v36 = vmax.f32 %v4112_v5, %v4113_v16  ;;  %v4120_v15 = vrot.slane %v4119_v20, 1  ;;  %vm9935_vm3 = vcmask 130048  }
 0x312   : > { %v4480_v39 = vsel %vm9935_vm3, %v4100_v1, -inf  ;;  %v4078_v27 = vrot.slane %v4077_v7, 1  ;;  %v4085_v31 = vrot.slane %v4084_v50, 1  ;;  %v4091_v21 = vmax.f32 %v4089_v9, %v4090_v18  ;;  %vm9936_vm11 = vmmov %vm9935_vm3 }
 0x313   : > { %v4481_v24 = vmax.f32 %v8896_v56, %v4480_v39  ;;  %v4121_v29 = vmax.f32 %v4119_v20, %v4120_v15  ;;  %v4483_v41 = vsel %vm9936_vm11, %v4107_v30, -inf  ;;  %vm9937_vm1 = vmmov %vm9935_vm3 }
 0x314   : > { %v4486_v3 = vsel %vm9937_vm1, %v4114_v36, -inf  ;;  %vm9938_vm12 = vmmov %vm9937_vm1  ;;  %v4484_v61 = vmax.f32 %v8899_v11, %v4483_v41  ;;  %v4079_v57 = vmax.f32 %v4077_v7, %v4078_v27  ;;  %v4086_v37 = vmax.f32 %v4084_v50, %v4085_v31 }
 0x315   : > { %v4468_v40 = vsel %vm9938_vm12, %v4072_v25, -inf  ;;  %v4487_v22 = vmax.f32 %v8905_v47, %v4486_v3  ;;  %vm9939_vm13 = vmmov %vm9937_vm1  ;;  %v4092_v6 = vrot.slane %v4091_v21, 1 }
 0x316   : > { %v4470_v53 = vsel %vm9939_vm13, %v8907_v28, -inf  ;;  %vm9940_vm7 = vmmov %vm9937_vm1  ;;  %v4469_v42 = vmax.f32 %v8902_v26, %v4468_v40  ;;  %v4476_v28 = vsel %vm9937_vm1, %v8916_v13, -inf  ;;  %vm9945_vm13 = vcmask 1041409  }
 0x317   : > { %v4489_v56 = vsel %vm9940_vm7, %v4121_v29, -inf  ;;  %vm9941_vm5 = vmmov %vm9937_vm1  ;;  %v4093_v47 = vmax.f32 %v4091_v21, %v4092_v6  ;;  %vm9946_vm7 = vcmask 1042434  }
 0x318   : > { %v4473_v49 = vsel %vm9941_vm5, %v8913_v2, -inf  ;;  %v4490_v58 = vmax.f32 %v8911_v45, %v4489_v56  ;;  %vm9942_vm3 = vmmov %vm9937_vm1  ;;  %vm9947_vm5 = vcmask 1043459  }
 0x319   : > { %v4471_v35 = vsel %vm9942_vm3, %v4079_v57, -inf  ;;  %vm9943_vm11 = vmmov %vm9937_vm1  ;;  %vm9949_vm3 = vcmask 1045509  }
 0x31a   : > { %v4474_v11 = vsel %vm9943_vm11, %v4086_v37, -inf  ;;  %v4472_v12 = vmax.f32 %v4470_v53, %v4471_v35  ;;  %vm9944_vm12 = vmmov %vm9937_vm1  ;;  %vm9950_vm11 = vcmask 1046534  }
 0x31b   : > { %v4475_v54 = vmax.f32 %v4473_v49, %v4474_v11  ;;  %v4477_v10 = vsel %vm9944_vm12, %v4093_v47, -inf }
 0x31c   : > { %v4649_v62 = vsel %vm9945_vm13, %v4472_v12, %v4469_v42  ;;  %v4478_v26 = vmax.f32 %v4476_v28, %v4477_v10 }
 0x31d   : > { %v4650_v44 = vsel %vm9946_vm7, %v4475_v54, %v4649_v62  ;;  %v9960_v54 = vld [vmem:[#allocation8_spill] sm:$0xff] }
 0x31e   : > { %v4651_v2 = vsel %vm9947_vm5, %v4478_v26, %v4650_v44  ;;  %v4725_v28 = vand.u32 7, %v9960_v54 }
 0x31f   : > { %v4652_v45 = vsel %vm9948_vm9, %v4481_v24, %v4651_v2  ;;  %vm9952_vm9 = vcmask 123904  }
 0x320   : > { %v4653_v55 = vsel %vm9949_vm3, %v4484_v61, %v4652_v45 }
 0x321   : > { %v4654_v34 = vsel %vm9950_vm11, %v4487_v22, %v4653_v55 }
 0x322   : > { %v6107_v38 = vpop.f32.mrb[24].mxu0  ;;  %v4655_v5 = vsel %vm9951_vm0, %v4490_v58, %v4654_v34  ;;  %vm9953_vm0 = vmmov %vm9952_vm9 }
 0x323   : > { %v2680_v13 = vadd.f32 %v8671_v43, %v6107_v38  ;;  %v2674_v46 = vpop.f32.mrb[25].mxu0  ;;  %4683 = vst.msk [vmem:[#allocation3 + $0x38] sm:$0xff] %vm9937_vm1, %v4655_v5  ;;  %vm9954_vm12 = vmmov %vm9953_vm0  ;;  %vm8970_vm1 = vcmp.le.s32.totalorder %v4725_v28, 6 }
 0x324   : > { %v2675_v17 = vadd.f32 %v8671_v43, %v2674_v46  ;;  %vm9955_vm13 = vmmov %vm9953_vm0 }
 0x325   : > { %v2738_v23 = vmax.f32 %v2680_v13, 0.0  ;;  %vm9956_vm7 = vmmov %vm9953_vm0 }
 0x326   : > { %v2737_v51 = vmax.f32 %v2675_v17, 0.0  ;;  %vm9957_vm5 = vmmov %vm9953_vm0 }
 0x327   : > { %v3202_v9 = vcombine.high %v2738_v23, %v2738_v23  ;;  %v3209_v1 = vrot.slane %v2738_v23, %v7459_v4  ;;  %vm9958_vm3 = vmmov %vm9953_vm0 }
 0x328   : > { %v3185_v59 = vcombine.high %v2737_v51, %v2737_v51  ;;  %v3192_v16 = vrot.slane %v2737_v51, %v7459_v4  ;;  %vm9959_vm11 = vmmov %vm9953_vm0 }
 0x329   : > { %v3216_v20 = vrot.slane %v3202_v9, %v7459_v4  ;;  %v3217_v25 = vcombine.high %v3209_v1, %v3209_v1  ;;  %v4150_v7 = vsel %vm9952_vm9, %v3209_v1, -inf  ;;  %vm8980_vm9 = vcmp.ge.s32.totalorder %v4718_v33, 1 }
 0x32a   : > { %v3200_v50 = vcombine.high %v3192_v16, %v3192_v16  ;;  %v4122_v36 = vsel %vm9954_vm12, %v3192_v16, -inf  ;;  %v3199_v15 = vrot.slane %v3185_v59, %v7459_v4  ;;  %v4151_v39 = vrot.slane %v4150_v7, 4  ;;  %v8974_v55 = vld [vmem:[#allocation3 + $0x31] sm:$0xff] }
 0x32b   : > { %v3218_v18 = vcombine.high %v3216_v20, %v3216_v20  ;;  %v4157_v30 = vsel %vm9953_vm0, %v3217_v25, -inf  ;;  %v4164_v43 = vsel %vm9955_vm13, %v3216_v20, -inf  ;;  %v4123_v21 = vrot.slane %v4122_v36, 4  ;;  %v8976_v34 = vld [vmem:[#allocation3 + $0x37] sm:$0xff] }
 0x32c   : > { %v4129_v27 = vsel %vm9957_vm5, %v3200_v50, -inf  ;;  %v4158_v31 = vrot.slane %v4157_v30, 4  ;;  %v4165_v29 = vrot.slane %v4164_v43, 4  ;;  %v3201_v3 = vcombine.high %v3199_v15, %v3199_v15 }
 0x32d   : > { %v4171_v24 = vsel %vm9956_vm7, %v3218_v18, -inf  ;;  %v4130_v40 = vrot.slane %v4129_v27, 4  ;;  %v4152_v61 = vmax.f32 %v4150_v7, %v4151_v39  ;;  %v4136_v22 = vsel %vm9958_vm3, %v3199_v15, -inf  ;;  %v9001_v18 = vld [vmem:[#allocation3 + $0x38] sm:$0xff] }
 0x32e   : > { %v4172_v41 = vrot.slane %v4171_v24, 4  ;;  %v4159_v57 = vmax.f32 %v4157_v30, %v4158_v31  ;;  %v4124_v37 = vmax.f32 %v4122_v36, %v4123_v21  ;;  %v4166_v53 = vmax.f32 %v4164_v43, %v4165_v29 }
 0x32f   : > { %v4131_v6 = vmax.f32 %v4129_v27, %v4130_v40  ;;  %v4137_v42 = vrot.slane %v4136_v22, 4  ;;  %v4143_v49 = vsel %vm9959_vm11, %v3201_v3, -inf  ;;  %v4153_v58 = vrot.slane %v4152_v61, 2  ;;  %v9013_v3 = vld [vmem:[%s9463_s2] ss:$0 sm:$0xff] }
 0x330   : > { %v4173_v56 = vmax.f32 %v4171_v24, %v4172_v41  ;;  %v4160_v35 = vrot.slane %v4159_v57, 2  ;;  %v4125_v11 = vrot.slane %v4124_v37, 2  ;;  %v4144_v12 = vrot.slane %v4143_v49, 4 }
 0x331   : > { %v4138_v47 = vmax.f32 %v4136_v22, %v4137_v42  ;;  %v4167_v10 = vrot.slane %v4166_v53, 2  ;;  %v4132_v26 = vrot.slane %v4131_v6, 2  ;;  %v4154_v5 = vmax.f32 %v4152_v61, %v4153_v58  ;;  %v9967_v22 = vld [vmem:[#allocation10_spill] sm:$0xff] }
 0x332   : > { %v4174_v62 = vrot.slane %v4173_v56, 2  ;;  %v4145_v44 = vmax.f32 %v4143_v49, %v4144_v12  ;;  %v4161_v13 = vmax.f32 %v4159_v57, %v4160_v35  ;;  %v4126_v46 = vmax.f32 %v4124_v37, %v4125_v11 }
 0x333   : > { %v4139_v45 = vrot.slane %v4138_v47, 2  ;;  %vm8984_vm0 = vcmp.ge.s32.totalorder %v4725_v28, 1  ;;  %v4168_v23 = vmax.f32 %v4166_v53, %v4167_v10  ;;  %v4875_v9 = vsel %vm8980_vm9, %v8866_v52, 0.0 }
 0x334   : > { %v4175_v51 = vmax.f32 %v4173_v56, %v4174_v62  ;;  %v4133_v1 = vmax.f32 %v4131_v6, %v4132_v26  ;;  %v4146_v59 = vrot.slane %v4145_v44, 2  ;;  %v4867_v14 = vsel %vm8970_vm1, %v8974_v55, 0.0  ;;  %v9019_v6 = vld [vmem:[#allocation3 + $0x17] sm:$0xff] }
 0x335   : > { %v4876_v33 = vsel %vm8984_vm0, %v8976_v34, 0.0  ;;  %v4140_v16 = vmax.f32 %v4138_v47, %v4139_v45  ;;  %v6281_v20 = vpack.i.bf16 %v4867_v14, %v4866_v32  ;;  %v4155_v7 = vrot.slane %v4154_v5, 1 }
 0x336   : > { %v6286_v25 = vpack.i.bf16 %v4876_v33, %v4875_v9  ;;  %v4162_v50 = vrot.slane %v4161_v13, 1  ;;  %v4127_v52 = vrot.slane %v4126_v46, 1  ;;  %v4169_v30 = vrot.slane %v4168_v23, 1 }
 0x337   : > { %v4176_v36 = vrot.slane %v4175_v51, 1  ;;  %6282 = vrot.lane.b32.xlu1 %v6281_v20, %s6372_s6  ;;  %v4134_v43 = vrot.slane %v4133_v1, 1  ;;  %v4147_v15 = vmax.f32 %v4145_v44, %v4146_v59  ;;  %v4141_v39 = vrot.slane %v4140_v16, 1 }
 0x338   : > { %6287 = vrot.lane.b32.xlu0 %v6286_v25, %s6373_s7  ;;  %v6291_v24 = vpack.i.bf16 %v9001_v18, %v8885_v8  ;;  %v4156_v32 = vmax.f32 %v4154_v5, %v4155_v7  ;;  %v4163_v27 = vmax.f32 %v4161_v13, %v4162_v50  ;;  %v4128_v31 = vmax.f32 %v4126_v46, %v4127_v52 }
 0x339   : > { %v4170_v29 = vmax.f32 %v4168_v23, %v4169_v30  ;;  %v4177_v41 = vmax.f32 %v4175_v51, %v4176_v36  ;;  %v4739_v8 = vand.u32 7, %v9967_v22  ;;  %v4135_v57 = vmax.f32 %v4133_v1, %v4134_v43 }
 0x33a   : > { %v4148_v37 = vrot.slane %v4147_v15, 1  ;;  %v6245_v56 = vunpack.i.h.bf16 %v9007_v0  ;;  %v4824_v42 = vsel %vm8696_vm8, %v9019_v6, 0.0  ;;  %v4142_v49 = vmax.f32 %v4140_v16, %v4141_v39 }
 0x33b   : > { %6292 = vrot.lane.b32.xlu1 %v6291_v24, %s6374_s28  ;;  %vm9968_vm12 = vcmask 130048   ;;  %vm9118_vm8 = vcmp.ge.s32.totalorder %v4739_v8, 1 }
 0x33c   : > { %v6110_v21 = vpop.f32.mrb[26].mxu0  ;;  %v9025_v35 = vsel %vm9968_vm12, %v4156_v32, -inf  ;;  %vm9969_vm13 = vmmov %vm9968_vm12  ;;  %v9040_v26 = vmax.f32 %v4147_v15, %v4148_v37 }
 0x33d   : > { %v2690_v40 = vadd.f32 %v9013_v3, %v6110_v21  ;;  %v2684_v61 = vpop.f32.mrb[27].mxu0  ;;  %v9028_v11 = vsel %vm9969_vm13, %v4163_v27, -inf  ;;  %vm9970_vm7 = vmmov %vm9968_vm12  ;;  %vm9975_vm13 = vcmask 123904  }
 0x33e   : > { %v2685_v53 = vadd.f32 %v9013_v3, %v2684_v61  ;;  %v9031_v47 = vsel %vm9970_vm7, %v4128_v31, -inf  ;;  %vm9971_vm5 = vmmov %vm9970_vm7 }
 0x33f   : > { %v2740_v58 = vmax.f32 %v2690_v40, 0.0  ;;  %v9034_v54 = vsel %vm9971_vm5, %v4170_v29, -inf  ;;  %vm9972_vm3 = vmmov %vm9971_vm5 }
 0x340   : > { %v2739_v12 = vmax.f32 %v2685_v53, 0.0  ;;  %v9037_v28 = vsel %vm9972_vm3, %v4177_v41, -inf  ;;  %vm9973_vm11 = vmmov %vm9972_vm3 }
 0x341   : > { %v3236_v10 = vcombine.high %v2740_v58, %v2740_v58  ;;  %v3243_v62 = vrot.slane %v2740_v58, %v7459_v4  ;;  %v9043_v44 = vsel %vm9973_vm11, %v4135_v57, -inf  ;;  %vm9974_vm12 = vmmov %vm9972_vm3 }
 0x342   : > { %v3219_v45 = vcombine.high %v2739_v12, %v2739_v12  ;;  %v3226_v5 = vrot.slane %v2739_v12, %v7459_v4  ;;  %v9047_v13 = vsel %vm9974_vm12, %v4142_v49, -inf  ;;  %vm9976_vm7 = vmmov %vm9975_vm13 }
 0x343   : > { %v3250_v46 = vrot.slane %v3236_v10, %v7459_v4  ;;  %v3251_v23 = vcombine.high %v3243_v62, %v3243_v62  ;;  %v4206_v51 = vsel %vm9975_vm13, %v3243_v62, -inf  ;;  %vm9977_vm5 = vmmov %vm9976_vm7 }
 0x344   : > { %v4207_v9 = vrot.slane %v4206_v51, 4  ;;  %v3233_v1 = vrot.slane %v3219_v45, %v7459_v4  ;;  %v3234_v59 = vcombine.high %v3226_v5, %v3226_v5  ;;  %v4178_v14 = vsel %vm9976_vm7, %v3226_v5, -inf  ;;  %vm9978_vm3 = vmmov %vm9977_vm5 }
 0x345   : > { %v3252_v33 = vcombine.high %v3250_v46, %v3250_v46  ;;  %v4213_v16 = vsel %vm9977_vm5, %v3251_v23, -inf  ;;  %v4220_v20 = vsel %vm9978_vm3, %v3250_v46, -inf  ;;  %v4179_v25 = vrot.slane %v4178_v14, 4  ;;  %vm9979_vm11 = vmmov %vm9978_vm3 }
 0x346   : > { %v4208_v7 = vmax.f32 %v4206_v51, %v4207_v9  ;;  %v4214_v50 = vrot.slane %v4213_v16, 4  ;;  %v4221_v52 = vrot.slane %v4220_v20, 4  ;;  %v3235_v30 = vcombine.high %v3233_v1, %v3233_v1  ;;  %vm9980_vm12 = vmmov %vm9978_vm3 }
 0x347   : > { %v4227_v36 = vsel %vm9979_vm11, %v3252_v33, -inf  ;;  %v4180_v43 = vmax.f32 %v4178_v14, %v4179_v25  ;;  %v4185_v15 = vsel %vm9980_vm12, %v3234_v59, -inf  ;;  %vm9981_vm13 = vmmov %vm9978_vm3  ;;  %vm9983_vm5 = vcmask 130048  }
 0x348   : > { %v4192_v39 = vsel %vm9981_vm13, %v3233_v1, -inf  ;;  %v4209_v24 = vrot.slane %v4208_v7, 2  ;;  %v4215_v32 = vmax.f32 %v4213_v16, %v4214_v50  ;;  %v4222_v27 = vmax.f32 %v4220_v20, %v4221_v52  ;;  %vm9982_vm7 = vmmov %vm9978_vm3 }
 0x349   : > { %v4228_v31 = vrot.slane %v4227_v36, 4  ;;  %v4181_v21 = vrot.slane %v4180_v43, 2  ;;  %v4186_v29 = vrot.slane %v4185_v15, 4  ;;  %v4193_v41 = vrot.slane %v4192_v39, 4  ;;  %vm9984_vm3 = vmmov %vm9983_vm5 }
 0x34a   : > { %v4199_v40 = vsel %vm9982_vm7, %v3235_v30, -inf  ;;  %v4210_v61 = vmax.f32 %v4208_v7, %v4209_v24  ;;  %v4216_v57 = vrot.slane %v4215_v32, 2  ;;  %v4223_v37 = vrot.slane %v4222_v27, 2  ;;  %vm9985_vm11 = vmmov %vm9984_vm3 }
 0x34b   : > { %v4229_v53 = vmax.f32 %v4227_v36, %v4228_v31  ;;  %v4182_v49 = vmax.f32 %v4180_v43, %v4181_v21  ;;  %v4187_v58 = vmax.f32 %v4185_v15, %v4186_v29  ;;  %v4194_v12 = vmax.f32 %v4192_v39, %v4193_v41  ;;  %vm9986_vm12 = vmmov %vm9984_vm3 }
 0x34c   : > { %v4200_v10 = vrot.slane %v4199_v40, 4  ;;  %v4211_v45 = vrot.slane %v4210_v61, 1  ;;  %v4217_v5 = vmax.f32 %v4215_v32, %v4216_v57  ;;  %v4224_v46 = vmax.f32 %v4222_v27, %v4223_v37  ;;  %vm9987_vm13 = vmmov %vm9984_vm3 }
 0x34d   : > { %v4230_v23 = vrot.slane %v4229_v53, 2  ;;  %v4183_v9 = vrot.slane %v4182_v49, 1  ;;  %v4188_v1 = vrot.slane %v4187_v58, 2  ;;  %v4195_v59 = vrot.slane %v4194_v12, 2  ;;  %vm9988_vm7 = vmmov %vm9984_vm3 }
 0x34e   : > { %v4201_v14 = vmax.f32 %v4199_v40, %v4200_v10  ;;  %v4212_v33 = vmax.f32 %v4210_v61, %v4211_v45  ;;  %v4218_v16 = vrot.slane %v4217_v5, 1  ;;  %v4225_v20 = vrot.slane %v4224_v46, 1 }
 0x34f   : > { %v6113_v62 = vpop.f32.mrb[28].mxu0  ;;  %v4231_v25 = vmax.f32 %v4229_v53, %v4230_v23  ;;  %v4184_v7 = vmax.f32 %v4182_v49, %v4183_v9  ;;  %v4189_v50 = vmax.f32 %v4187_v58, %v4188_v1  ;;  %v4196_v52 = vmax.f32 %v4194_v12, %v4195_v59  ;;  %v9066_v49 = vpop.permute.xlu0 %6247 }
 0x350   : > { %v2694_v51 = vpop.f32.mrb[29].mxu0  ;;  %v4202_v30 = vrot.slane %v4201_v14, 2  ;;  %v4219_v36 = vmax.f32 %v4217_v5, %v4218_v16  ;;  %v4226_v43 = vmax.f32 %v4224_v46, %v4225_v20  ;;  %v4504_v39 = vsel %vm9983_vm5, %v4212_v33, -inf  ;;  %vm9989_vm5 = vmmov %vm9984_vm3 }
 0x351   : > { %v4232_v15 = vrot.slane %v4231_v25, 1  ;;  %v4505_v24 = vmax.f32 %v9025_v35, %v4504_v39  ;;  %v4190_v32 = vrot.slane %v4189_v50, 1  ;;  %v4197_v27 = vrot.slane %v4196_v52, 1 }
 0x352   : > { %v4203_v31 = vmax.f32 %v4201_v14, %v4202_v30  ;;  %v4507_v29 = vsel %vm9984_vm3, %v4219_v36, -inf  ;;  %v4510_v41 = vsel %vm9985_vm11, %v4226_v43, -inf  ;;  %v4492_v40 = vsel %vm9986_vm12, %v4184_v7, -inf  ;;  %vm9990_vm11 = vmmov %vm9984_vm3 }
 0x353   : > { %v4233_v21 = vmax.f32 %v4231_v25, %v4232_v15  ;;  %v4508_v61 = vmax.f32 %v9028_v11, %v4507_v29  ;;  %v4511_v57 = vmax.f32 %v9034_v54, %v4510_v41  ;;  %v4191_v37 = vmax.f32 %v4189_v50, %v4190_v32 }
 0x354   : > { %v4198_v53 = vmax.f32 %v4196_v52, %v4197_v27  ;;  %v4204_v58 = vrot.slane %v4203_v31, 1  ;;  %v4493_v12 = vmax.f32 %v9031_v47, %v4492_v40  ;;  %v2700_v10 = vadd.f32 %v9013_v3, %v6113_v62 }
 0x355   : > { %v4513_v35 = vsel %vm9987_vm13, %v4233_v21, -inf  ;;  %v4495_v5 = vsel %vm9988_vm7, %v4191_v37, -inf  ;;  %v2695_v11 = vadd.f32 %v9013_v3, %v2694_v51  ;;  %v6244_v59 = vunpack.i.l.bf16 %v9007_v0 }
 0x356   : > { %v4514_v45 = vmax.f32 %v9037_v28, %v4513_v35  ;;  %v4498_v46 = vsel %vm9989_vm5, %v4198_v53, -inf  ;;  %v4205_v54 = vmax.f32 %v4203_v31, %v4204_v58  ;;  %v4496_v23 = vmax.f32 %v9043_v44, %v4495_v5 }
 0x357   : > { %v4499_v9 = vmax.f32 %v9047_v13, %v4498_v46  ;;  %v2742_v1 = vmax.f32 %v2700_v10, 0.0  ;;  %v6250_v47 = vunpack.i.h.bf16 %v9066_v49  ;;  %v4500_v62 = vsel %vm9984_vm3, %v9040_v26, -inf }
 0x358   : > { %v2741_v28 = vmax.f32 %v2695_v11, 0.0  ;;  %v4501_v14 = vsel %vm9990_vm11, %v4205_v54, -inf  ;;  %vm9991_vm12 = vcmask 1041409   ;;  %vm9992_vm13 = vcmask 1042434   ;;  %v6253_v54 = vpop.permute.xlu1 %6252 }
 0x359   : > { %v4656_v33 = vsel %vm9991_vm12, %v4496_v23, %v4493_v12  ;;  %v3270_v16 = vcombine.high %v2742_v1, %v2742_v1  ;;  %v3277_v51 = vrot.slane %v2742_v1, %v7459_v4  ;;  %v4502_v20 = vmax.f32 %v4500_v62, %v4501_v14  ;;  %v6349_v62 = vld [vmem:[#allocation3 + $0x1f] sm:$0xff] }
 0x35a   : > { %v4657_v44 = vsel %vm9992_vm13, %v4499_v9, %v4656_v33  ;;  %v3253_v13 = vcombine.high %v2741_v28, %v2741_v28  ;;  %v3260_v25 = vrot.slane %v2741_v28, %v7459_v4  ;;  %v6249_v7 = vunpack.i.l.bf16 %v9066_v49  ;;  %v6258_v28 = vpop.permute.xlu0 %6257 }
 0x35b   : > { %v3284_v50 = vrot.slane %v3270_v16, %v7459_v4  ;;  %v3285_v52 = vcombine.high %v3277_v51, %v3277_v51  ;;  %vm9993_vm7 = vcmask 123904   ;;  %vm9994_vm5 = vcmask 1043459  }
 0x35c   : > { %v4262_v26 = vsel %vm9993_vm7, %v3277_v51, -inf  ;;  %v4658_v30 = vsel %vm9994_vm5, %v4502_v20, %v4657_v44  ;;  %v3267_v43 = vrot.slane %v3253_v13, %v7459_v4  ;;  %v3268_v15 = vcombine.high %v3260_v25, %v3260_v25  ;;  %vm9996_vm11 = vmmov %vm9993_vm7 }
 0x35d   : > { %v4263_v36 = vrot.slane %v4262_v26, 4  ;;  %vm9995_vm3 = vcmask 1044484   ;;  %v3286_v32 = vcombine.high %v3284_v50, %v3284_v50  ;;  %v4269_v27 = vsel %vm9996_vm11, %v3285_v52, -inf  ;;  %vm9997_vm12 = vmmov %vm9993_vm7 }
 0x35e   : > { %v4659_v39 = vsel %vm9995_vm3, %v4505_v24, %v4658_v30  ;;  %v4276_v31 = vsel %vm9997_vm12, %v3284_v50, -inf  ;;  %vm9998_vm13 = vcmask 1045509   ;;  %v4270_v41 = vrot.slane %v4269_v27, 4  ;;  %vm10000_vm5 = vmmov %vm9993_vm7 }
 0x35f   : > { %v4660_v21 = vsel %vm9998_vm13, %v4508_v61, %v4659_v39  ;;  %v4264_v29 = vmax.f32 %v4262_v26, %v4263_v36  ;;  %v4277_v40 = vrot.slane %v4276_v31, 4  ;;  %v4283_v53 = vsel %vm9993_vm7, %v3286_v32, -inf  ;;  %vm10003_vm11 = vmmov %vm10000_vm5 }
 0x360   : > { %v4661_v37 = vsel %vm9999_vm14, %v4511_v57, %v4660_v21  ;;  %v3269_v49 = vcombine.high %v3267_v43, %v3267_v43  ;;  %v4234_v35 = vsel %vm10000_vm5, %v3260_v25, -inf  ;;  %v4271_v12 = vmax.f32 %v4269_v27, %v4270_v41  ;;  %vm10004_vm12 = vmmov %vm10000_vm5 }
 0x361   : > { %v4662_v58 = vsel %vm10001_vm4, %v4514_v45, %v4661_v37  ;;  %v4265_v24 = vrot.slane %v4264_v29, 2  ;;  %v4278_v10 = vmax.f32 %v4276_v31, %v4277_v40  ;;  %vm10002_vm3 = vcmask 130048   ;;  %vm10006_vm14 = vmmov %vm10000_vm5 }
 0x362   : > { %4684 = vst.msk [vmem:[#allocation3 + $0x40] sm:$0xff] %vm10002_vm3, %v4662_v58  ;;  %v4284_v5 = vrot.slane %v4283_v53, 4  ;;  %v4235_v46 = vrot.slane %v4234_v35, 4  ;;  %v4241_v61 = vsel %vm10003_vm11, %v3268_v15, -inf  ;;  %v4248_v11 = vsel %vm10004_vm12, %v3267_v43, -inf  ;;  %vm10005_vm4 = vmmov %vm10002_vm3 }
 0x363   : > { %v4266_v57 = vmax.f32 %v4264_v29, %v4265_v24  ;;  %v4272_v23 = vrot.slane %v4271_v12, 2  ;;  %v4279_v9 = vrot.slane %v4278_v10, 2  ;;  %v4242_v1 = vrot.slane %v4241_v61, 4  ;;  %vm10007_vm13 = vmmov %vm10002_vm3 }
 0x364   : > { %v4825_v45 = vsel %vm8692_vm6, %v6349_v62, 0.0  ;;  %v4285_v14 = vmax.f32 %v4283_v53, %v4284_v5  ;;  %v4236_v33 = vmax.f32 %v4234_v35, %v4235_v46  ;;  %v4249_v16 = vrot.slane %v4248_v11, 4  ;;  %vm10014_vm11 = vmmov %vm10005_vm4 }
 0x365   : > { %v5121_v51 = vsel %vm10005_vm4, %v4825_v45, %v6245_v56  ;;  %v4273_v20 = vmax.f32 %v4271_v12, %v4272_v23  ;;  %v4280_v44 = vmax.f32 %v4278_v10, %v4279_v9  ;;  %v4255_v13 = vsel %vm10006_vm14, %v3269_v49, -inf }
 0x366   : > { %v5120_v25 = vsel %vm10007_vm13, %v4824_v42, %v6244_v59  ;;  %v6255_v60 = vunpack.i.h.bf16 %v6253_v54  ;;  %v6254_v50 = vunpack.i.l.bf16 %v6253_v54  ;;  %v5130_v52 = vsel %vm5126_vm15, %v5121_v51, %v6250_v47 }
 0x367   : > { %v5129_v26 = vsel %vm5126_vm15, %v5120_v25, %v6249_v7  ;;  %v6259_v30 = vunpack.i.l.bf16 %v6258_v28  ;;  %v4267_v0 = vrot.slane %v4266_v57, 1  ;;  %v4243_v36 = vmax.f32 %v4241_v61, %v4242_v1 }
 0x368   : > { %v4286_v56 = vrot.slane %v4285_v14, 2  ;;  %v4237_v43 = vrot.slane %v4236_v33, 2  ;;  %v4250_v15 = vmax.f32 %v4248_v11, %v4249_v16  ;;  %v4256_v39 = vrot.slane %v4255_v13, 4 }
 0x369   : > { %v6260_v32 = vunpack.i.h.bf16 %v6258_v28  ;;  %v4274_v27 = vrot.slane %v4273_v20, 1  ;;  %v4281_v48 = vrot.slane %v4280_v44, 1  ;;  %vm10008_vm6 = vcmask 392192   ;;  %v9128_v61 = vld [vmem:[#allocation3 + $0x39] sm:$0xff] }
 0x36a   : > { %v5138_v6 = vsel %vm10008_vm6, %v5129_v26, %v6254_v50  ;;  %vm10011_vm7 = vmmov %vm10008_vm6  ;;  %vm10012_vm5 = vcmask 523264   ;;  %v4268_v7 = vmax.f32 %v4266_v57, %v4267_v0  ;;  %v4244_v21 = vrot.slane %v4243_v36, 2  ;;  %v6263_v40 = vpop.permute.xlu1 %6262  ;;  %v9140_v62 = vld [vmem:[#allocation3 + $0x3f] sm:$0xff] }
 0x36b   : > { %v5139_v59 = vsel %vm10011_vm7, %v5130_v52, %v6255_v60  ;;  %v5147_v47 = vsel %vm10012_vm5, %v5138_v6, %v6259_v30  ;;  %v4287_v41 = vmax.f32 %v4285_v14, %v4286_v56  ;;  %v4238_v37 = vmax.f32 %v4236_v33, %v4237_v43  ;;  %vm10013_vm3 = vmmov %vm10012_vm5  ;;  %v6268_v10 = vpop.permute.xlu0 %6267  ;;  %v9160_v43 = vld [vmem:[#allocation3 + $0x40] sm:$0xff] }
 0x36c   : > { %v4251_v53 = vrot.slane %v4250_v15, 2  ;;  %v4257_v49 = vmax.f32 %v4255_v13, %v4256_v39  ;;  %v5148_v35 = vsel %vm10013_vm3, %v5139_v59, %v6260_v32  ;;  %v4275_v58 = vmax.f32 %v4273_v20, %v4274_v27 }
 0x36d   : > { %v6116_v31 = vpop.f32.mrb[30].mxu0  ;;  %v4282_v24 = vmax.f32 %v4280_v44, %v4281_v48  ;;  %v6264_v12 = vunpack.i.l.bf16 %v6263_v40  ;;  %v6269_v5 = vunpack.i.l.bf16 %v6268_v10  ;;  %v4903_v46 = vsel %vm8700_vm2, %v8974_v55, 0.0  ;;  %vm10016_vm2 = vmmov %vm10005_vm4 }
 0x36e   : > { %v2704_v29 = vpop.f32.mrb[31].mxu0  ;;  %v4894_v11 = vsel %vm8980_vm9, %v8976_v34, 0.0  ;;  %v4885_v54 = vsel %vm8856_vm10, %v8974_v55, 0.0  ;;  %v9137_v57 = vsel %vm10014_vm11, %v4268_v7, -inf  ;;  %v6265_v23 = vunpack.i.h.bf16 %v6263_v40  ;;  %v6273_v33 = vpop.permute.xlu1 %6272  ;;  %vm10017_vm4 = vmmov %vm10016_vm2 }
 0x36f   : > { %v4245_v9 = vmax.f32 %v4243_v36, %v4244_v21  ;;  %vm10015_vm12 = vcmask 654336   ;;  %v4288_v19 = vrot.slane %v4287_v41, 1  ;;  %v4239_v45 = vrot.slane %v4238_v37, 1  ;;  %vm10021_vm7 = vmmov %vm10016_vm2 }
 0x370   : > { %v5156_v1 = vsel %vm10015_vm12, %v5147_v47, %v6264_v12  ;;  %v9142_v28 = vmax.f32 %v4250_v15, %v4251_v53  ;;  %v4258_v14 = vrot.slane %v4257_v49, 2  ;;  %v9145_v34 = vsel %vm10016_vm2, %v4275_v58, -inf  ;;  %vm10020_vm6 = vmmov %vm10015_vm12 }
 0x371   : > { %v9148_v55 = vsel %vm10017_vm4, %v4282_v24, -inf  ;;  %v6274_v16 = vunpack.i.l.bf16 %v6273_v33  ;;  %v4886_v51 = vsel %vm8970_vm1, %v9128_v61, 0.0  ;;  %v6270_v20 = vunpack.i.h.bf16 %v6268_v10  ;;  %vm10025_vm11 = vmmov %vm10016_vm2 }
 0x372   : > { %vm10018_vm14 = vcmask 785408   ;;  %v2710_v13 = vadd.f32 %v9013_v3, %v6116_v31  ;;  %v4895_v25 = vsel %vm8984_vm0, %v9140_v62, 0.0  ;;  %v6275_v60 = vunpack.i.h.bf16 %v6273_v33  ;;  %vm10026_vm12 = vmmov %vm10016_vm2 }
 0x373   : > { %v5165_v44 = vsel %vm10018_vm14, %v5156_v1, %v6269_v5  ;;  %vm10019_vm13 = vcmask 916480   ;;  %v5157_v52 = vsel %vm10020_vm6, %v5148_v35, %v6265_v23  ;;  %v6301_v26 = vpack.i.bf16 %v4895_v25, %v4894_v11  ;;  %vm10022_vm5 = vmmov %vm10018_vm14 }
 0x374   : > { %v5174_v50 = vsel %vm10019_vm13, %v5165_v44, %v6274_v16  ;;  %v4289_v30 = vmax.f32 %v4287_v41, %v4288_v19  ;;  %v4246_v0 = vrot.slane %v4245_v9, 1  ;;  %v2744_v36 = vmax.f32 %v2710_v13, 0.0  ;;  %vm10023_vm3 = vmmov %vm10019_vm13 }
 0x375   : > { %5302 = vmatmul.mubr.f32.gmra.mrb[4].mxu1 %v5174_v50  ;;  %v6296_v56 = vpack.i.bf16 %v4886_v51, %v4885_v54  ;;  %v9162_v15 = vmax.f32 %v4238_v37, %v4239_v45  ;;  %v4253_v39 = vrot.slane %v9142_v28, 1  ;;  %v4904_v32 = vsel %vm8856_vm10, %v9128_v61, 0.0  ;;  %6302 = vrot.lane.b32.xlu1 %v6301_v26, %s6376_s17 }
 0x376   : > { %5924 = vmatprep.mubr.msk.f32.mxu1 %vm10021_vm7, %v4903_v46  ;;  %v2705_v27 = vadd.f32 %v9013_v3, %v2704_v29  ;;  %v5166_v48 = vsel %vm10022_vm5, %v5157_v52, %v6270_v20  ;;  %v3304_v6 = vcombine.high %v2744_v36, %v2744_v36  ;;  %v3311_v31 = vrot.slane %v2744_v36, %v7459_v4 }
 0x377   : > { %6297 = vrot.lane.b32.xlu0 %v6296_v56, %s6375_s10  ;;  %v4829_v59 = vsel %vm9118_vm8, %v9140_v62, 0.0  ;;  %v9177_v47 = vmax.f32 %v4257_v49, %v4258_v14  ;;  %v5175_v63 = vsel %vm10023_vm3, %v5166_v48, %v6275_v60  ;;  %v6311_v21 = vpack.i.bf16 %v9160_v43, %v9001_v18  ;;  %vm10034_vm3 = vmmov %vm10025_vm11 }
 0x378   : > { %v2743_v7 = vmax.f32 %v2705_v27, 0.0  ;;  %v3318_v3 = vrot.slane %v3304_v6, %v7459_v4  ;;  %v3319_v29 = vcombine.high %v3311_v31, %v3311_v31  ;;  %vm10024_vm10 = vcmask 123904  }
 0x379   : > { %5307 = vmatmul.mubr.f32.gmra.mrb[6].mxu1 %v5175_v63  ;;  %v4318_v41 = vsel %vm10024_vm10, %v3311_v31, -inf  ;;  %v9184_v40 = vmax.f32 %v4245_v9, %v4246_v0  ;;  %6312 = vrot.lane.b32.xlu1 %v6311_v21, %s6371_s30  ;;  %v9190_v35 = vsel %vm10026_vm12, %v4289_v30, -inf  ;;  %vm10027_vm2 = vmmov %vm10024_vm10  ;;  %v4260_v11 = vrot.slane %v9177_v47, 1 }
 0x37a   : > { %5925 = vmatprep.mubr.msk.f32.mxu1 %vm10025_vm11, %v4904_v32  ;;  %v4319_v37 = vrot.slane %v4318_v41, 4  ;;  %v3287_v53 = vcombine.high %v2743_v7, %v2743_v7  ;;  %v3294_v49 = vrot.slane %v2743_v7, %v7459_v4  ;;  %v3320_v18 = vcombine.high %v3318_v3, %v3318_v3  ;;  %vm10028_vm4 = vmmov %vm10027_vm2 }
 0x37b   : > { %v4325_v58 = vsel %vm10027_vm2, %v3319_v29, -inf  ;;  %v4332_v24 = vsel %vm10028_vm4, %v3318_v3, -inf  ;;  %6307 = vrot.lane.b32.xlu0 %v6311_v21, %s6377_s23  ;;  %vm10029_vm14 = vmmov %vm10027_vm2 }
 0x37c   : > { %v4320_v12 = vmax.f32 %v4318_v41, %v4319_v37  ;;  %v4326_v10 = vrot.slane %v4325_v58, 4  ;;  %v4333_v5 = vrot.slane %v4332_v24, 4  ;;  %v3301_v46 = vrot.slane %v3287_v53, %v7459_v4  ;;  %vm10030_vm13 = vmmov %vm10027_vm2 }
 0x37d   : > { %v4339_v54 = vsel %vm10029_vm14, %v3320_v18, -inf  ;;  %v3302_v23 = vcombine.high %v3294_v49, %v3294_v49  ;;  %v4290_v9 = vsel %vm10030_vm13, %v3294_v49, -inf  ;;  %vm10031_vm6 = vmmov %vm10027_vm2 }
 0x37e   : > { %v4321_v1 = vrot.slane %v4320_v12, 2  ;;  %v4327_v19 = vmax.f32 %v4325_v58, %v4326_v10  ;;  %v4334_v45 = vmax.f32 %v4332_v24, %v4333_v5  ;;  %v4340_v14 = vrot.slane %v4339_v54, 4  ;;  %vm10032_vm7 = vmmov %vm10027_vm2 }
 0x37f   : > { %v3303_v33 = vcombine.high %v3301_v46, %v3301_v46  ;;  %v4291_v16 = vrot.slane %v4290_v9, 4  ;;  %v4297_v51 = vsel %vm10031_vm6, %v3302_v23, -inf  ;;  %v4304_v20 = vsel %vm10032_vm7, %v3301_v46, -inf  ;;  %vm10033_vm5 = vmmov %vm10027_vm2 }
 0x380   : > { %v4322_v44 = vmax.f32 %v4320_v12, %v4321_v1  ;;  %v4328_v13 = vrot.slane %v4327_v19, 2  ;;  %v4335_v25 = vrot.slane %v4334_v45, 2  ;;  %v4341_v60 = vmax.f32 %v4339_v54, %v4340_v14  ;;  %vm10035_vm10 = vmmov %vm10034_vm3 }
 0x381   : > { %v4292_v50 = vmax.f32 %v4290_v9, %v4291_v16  ;;  %v4298_v52 = vrot.slane %v4297_v51, 4  ;;  %v4305_v26 = vrot.slane %v4304_v20, 4  ;;  %v4311_v30 = vsel %vm10033_vm5, %v3303_v33, -inf  ;;  %vm10036_vm11 = vmmov %vm10034_vm3 }
 0x382   : > { %v4323_v0 = vrot.slane %v4322_v44, 1  ;;  %v4329_v36 = vmax.f32 %v4327_v19, %v4328_v13  ;;  %v4336_v56 = vmax.f32 %v4334_v45, %v4335_v25  ;;  %v4342_v32 = vrot.slane %v4341_v60, 2  ;;  %vm10037_vm12 = vmmov %vm10034_vm3 }
 0x383   : > { %v4293_v27 = vrot.slane %v4292_v50, 2  ;;  %v4299_v48 = vmax.f32 %v4297_v51, %v4298_v52  ;;  %v4306_v6 = vmax.f32 %v4304_v20, %v4305_v26  ;;  %v4312_v31 = vrot.slane %v4311_v30, 4  ;;  %vm10038_vm2 = vmmov %vm10034_vm3 }
 0x384   : > { %v4324_v63 = vmax.f32 %v4322_v44, %v4323_v0  ;;  %v4330_v7 = vrot.slane %v4329_v36, 1  ;;  %v4337_v21 = vrot.slane %v4336_v56, 1  ;;  %v4343_v3 = vmax.f32 %v4341_v60, %v4342_v32  ;;  %vm10039_vm4 = vmmov %vm10038_vm2 }
 0x385   : > { %v4294_v29 = vmax.f32 %v4292_v50, %v4293_v27  ;;  %v4300_v41 = vrot.slane %v4299_v48, 2  ;;  %v4307_v37 = vrot.slane %v4306_v6, 2  ;;  %v4313_v53 = vmax.f32 %v4311_v30, %v4312_v31  ;;  %vm10040_vm14 = vmmov %vm10038_vm2 }
 0x386   : > { %v4331_v49 = vmax.f32 %v4329_v36, %v4330_v7  ;;  %v4338_v18 = vmax.f32 %v4336_v56, %v4337_v21  ;;  %v4344_v58 = vrot.slane %v4343_v3, 1  ;;  %v4528_v24 = vsel %vm10034_vm3, %v4324_v63, -inf  ;;  %vm10041_vm13 = vmmov %vm10038_vm2  ;;  %v10054_v63 = vld [vmem:[#allocation9_spill] sm:$0xff] }
 0x387   : > { %v4529_v12 = vmax.f32 %v9137_v57, %v4528_v24  ;;  %v4295_v10 = vrot.slane %v4294_v29, 1  ;;  %v4301_v5 = vmax.f32 %v4299_v48, %v4300_v41  ;;  %v4308_v46 = vmax.f32 %v4306_v6, %v4307_v37  ;;  %vm10042_vm6 = vmmov %vm10038_vm2 }
 0x388   : > { %v4345_v54 = vmax.f32 %v4343_v3, %v4344_v58  ;;  %v4531_v23 = vsel %vm10035_vm10, %v4331_v49, -inf  ;;  %v4534_v9 = vsel %vm10036_vm11, %v4338_v18, -inf  ;;  %v4314_v1 = vrot.slane %v4313_v53, 2  ;;  %vm10043_vm7 = vmmov %vm10038_vm2 }
 0x389   : > { %v4532_v19 = vmax.f32 %v9145_v34, %v4531_v23  ;;  %v4535_v45 = vmax.f32 %v9148_v55, %v4534_v9  ;;  %v4296_v14 = vmax.f32 %v4294_v29, %v4295_v10  ;;  %v4302_v33 = vrot.slane %v4301_v5, 1  ;;  %vm10044_vm5 = vmmov %vm10038_vm2  ;;  %v4898_v9 = vld [vmem:[#allocation3 + $0x50] sm:$0xff] }
 0x38a   : > { %v4254_v16 = vmax.f32 %v9142_v28, %v4253_v39  ;;  %v4537_v57 = vsel %vm10037_vm12, %v4345_v54, -inf  ;;  %v4309_v51 = vrot.slane %v4308_v46, 1  ;;  %v4315_v20 = vmax.f32 %v4313_v53, %v4314_v1  ;;  %vm10045_vm3 = vmmov %vm10038_vm2 }
 0x38b   : > { %v4515_v44 = vsel %vm10038_vm2, %v9162_v15, -inf  ;;  %v4538_v13 = vmax.f32 %v9190_v35, %v4537_v57  ;;  %v4303_v25 = vmax.f32 %v4301_v5, %v4302_v33  ;;  %v4516_v34 = vsel %vm10039_vm4, %v4296_v14, -inf }
 0x38c   : > { %v4261_v55 = vmax.f32 %v9177_v47, %v4260_v11  ;;  %v4310_v60 = vmax.f32 %v4308_v46, %v4309_v51  ;;  %v4316_v50 = vrot.slane %v4315_v20, 1  ;;  %v4517_v52 = vmax.f32 %v4515_v44, %v4516_v34 }
 0x38d   : > { %v4518_v28 = vsel %vm10040_vm14, %v9184_v40, -inf  ;;  %v4519_v39 = vsel %vm10041_vm13, %v4303_v25, -inf  ;;  %v4521_v26 = vsel %vm10042_vm6, %v4254_v16, -inf  ;;  %vm10046_vm10 = vcmask 1041409   ;;  %vm10053_vm6 = vmmov %vm10045_vm3 }
 0x38e   : > { %v4317_v30 = vmax.f32 %v4315_v20, %v4316_v50  ;;  %v4520_v0 = vmax.f32 %v4518_v28, %v4519_v39  ;;  %v4522_v15 = vsel %vm10043_vm7, %v4310_v60, -inf  ;;  %v4524_v36 = vsel %vm10044_vm5, %v4261_v55, -inf }
 0x38f   : > { %v4523_v35 = vmax.f32 %v4521_v26, %v4522_v15  ;;  %vm10047_vm11 = vcmask 1042434   ;;  %vm10048_vm12 = vcmask 1043459   ;;  %vm10049_vm2 = vcmask 1044484  }
 0x390   : > { %v4525_v56 = vsel %vm10045_vm3, %v4317_v30, -inf  ;;  %v4663_v47 = vsel %vm10046_vm10, %v4520_v0, %v4517_v52  ;;  %vm10050_vm4 = vcmask 1045509   ;;  %vm10051_vm14 = vcmask 1046534  }
 0x391   : > { %v4526_v11 = vmax.f32 %v4524_v36, %v4525_v56  ;;  %v4664_v32 = vsel %vm10047_vm11, %v4523_v35, %v4663_v47  ;;  %vm10052_vm13 = vcmask 1047559   ;;  %v4732_v7 = vand.u32 7, %v10054_v63  ;;  %vm10061_vm11 = vmmov %vm10053_vm6 }
 0x392   : > { %vm9235_vm7 = vcmp.le.s32.totalorder %v4739_v8, 6  ;;  %vm5516_vm10 = vcmask 254976  }
 0x393   : > { %v4665_v40 = vsel %vm10048_vm12, %v4526_v11, %v4664_v32  ;;  %vm9239_vm5 = vcmp.le.s32.totalorder %v4732_v7, 6  ;;  %vm9243_vm3 = vcmp.ge.s32.totalorder %v4732_v7, 1  ;;  %vm10063_vm12 = vmmov %vm10053_vm6 }
 0x394   : > { %v4666_v27 = vsel %vm10049_vm2, %v4529_v12, %v4665_v40  ;;  %v4868_v53 = vsel %vm9239_vm5, %v9128_v61, 0.0  ;;  %v4877_v22 = vsel %vm9243_vm3, %v9140_v62, 0.0  ;;  %vm10064_vm2 = vcmask 1042434  }
 0x395   : > { %v4667_v48 = vsel %vm10050_vm4, %v4532_v19, %v4666_v27  ;;  %v9288_v19 = vld [vmem:[%s9465_s4] ss:$0 sm:$0xff]  ;;  %vm10065_vm4 = vcmask 392192  }
 0x396   : > { %v4668_v6 = vsel %vm10051_vm14, %v4535_v45, %v4667_v48  ;;  %vm10066_vm14 = vcmask 1043459  }
 0x397   : > { %v4669_v31 = vsel %vm10052_vm13, %v4538_v13, %v4668_v6  ;;  %vm10068_vm13 = vcmask 654336  }
 0x398   : > { %4685 = vst.msk [vmem:[#allocation3 + $0x48] sm:$0xff] %vm10053_vm6, %v4669_v31  ;;  %vm10069_vm6 = vmmov %vm10065_vm4 }
 0x39f   : > { %v4870_v41 = vld [vmem:[#allocation3 + $0x47] sm:$0xff]  ;;  %v4889_v54 = vld [vmem:[#allocation3 + $0x4f] sm:$0xff] }
 0x3a0   : > { %v9247_v37 = vld [vmem:[#allocation3 + $0x41] sm:$0xff]  ;;  %v4878_v8 = vsel %vm9118_vm8, %v4870_v41, 0.0  ;;  %v9260_v18 = vld [vmem:[#allocation3 + $0x49] sm:$0xff]  ;;  %v4896_v46 = vsel %vm9243_vm3, %v4870_v41, 0.0  ;;  %v4897_v23 = vsel %vm9118_vm8, %v4889_v54, 0.0 }
 0x3a1   : > { %v4869_v49 = vsel %vm9235_vm7, %v9247_v37, 0.0  ;;  %v6321_v58 = vpack.i.bf16 %v4878_v8, %v4877_v22  ;;  %v4879_v12 = vld [vmem:[#allocation3 + $0x48] sm:$0xff]  ;;  %v4906_v61 = vsel %vm9239_vm5, %v9260_v18, 0.0  ;;  %v4887_v5 = vsel %vm9239_vm5, %v9247_v37, 0.0  ;;  %vm10079_vm5 = vmmov %vm10069_vm6 }
 0x3a2   : > { %v6316_v24 = vpack.i.bf16 %v4869_v49, %v4868_v53  ;;  %v6326_v10 = vpack.i.bf16 %v4879_v12, %v9160_v43  ;;  %v4888_v43 = vsel %vm9235_vm7, %v9260_v18, 0.0  ;;  %vm10084_vm8 = vmmov %vm10079_vm5 }
 0x3a3   : > { %6322 = vrot.lane.b32.xlu1 %v6321_v58, %s6373_s7  ;;  %s5932_s7 = sshll.u32 %s10102_s19, 4 }
 0x3a4   : > { %6317 = vrot.lane.b32.xlu0 %v6316_v24, %s6372_s6 }
 0x3a7   : > { %5049 = vrot.lane.b32.xlu1 %v4887_v5, %s6375_s10 }
 0x3a8   : > { %6327 = vrot.lane.b32.xlu0 %v6326_v10, %s6374_s28 }
 0x3ab   : > { %5106 = vrot.lane.b32.xlu1 %v4879_v12, %s6377_s23 }
 0x3ac   : > { %5081 = vrot.lane.b32.xlu0 %v4896_v46, %s6376_s17 }
 0x3af   : > { %5083 = vrot.lane.b32.xlu1 %v4897_v23, %s6376_s17  ;;  %s9395_s17 = scalar_lea.vmem %s9466_s5, %s5932_s7 }
 0x3b0   : > { %5051 = vrot.lane.b32.xlu0 %v4888_v43, %s6375_s10 }
 0x3b4   : > { %5108 = vrot.lane.b32.xlu0 %v4898_v9, %s6377_s23 }
 0x3b5   : > { %v6013_v1 = vpop.f32.mrb[0].mxu1 }
 0x3b6   : > { %v6014_v45 = vpop.f32.mrb[1].mxu1 }
 0x3b7   : > { %v6015_v14 = vadd.f32 %v6014_v45, %v6013_v1 }
 0x3b9   : > { %v5294_v33 = vadd.f32 %v6015_v14, %v9288_v19 }
 0x3bb   : > { %v5332_v16 = vmax.f32 %v5294_v33, 0.0 }
 0x3bd   : > { %v5348_v57 = vcombine.high %v5332_v16, %v5332_v16  ;;  %v5355_v51 = vrot.slane %v5332_v16, %v7459_v4 }
 0x3bf   : > { %v5362_v20 = vrot.slane %v5348_v57, %v7459_v4  ;;  %v5363_v44 = vcombine.high %v5355_v51, %v5355_v51  ;;  %v5517_v13 = vsel %vm5516_vm10, %v5355_v51, -inf  ;;  %v6278_v57 = vpop.permute.xlu0 %6277 }
 0x3c0   : > { %v5518_v55 = vrot.slane %v5517_v13, 4 }
 0x3c1   : > { %v5364_v25 = vcombine.high %v5362_v20, %v5362_v20  ;;  %v5524_v34 = vsel %vm5516_vm10, %v5363_v44, -inf  ;;  %v5531_v60 = vsel %vm5516_vm10, %v5362_v20, -inf }
 0x3c2   : > { %v5525_v50 = vrot.slane %v5524_v34, 4  ;;  %v5532_v39 = vrot.slane %v5531_v60, 4  ;;  %v5519_v30 = vmax.f32 %v5517_v13, %v5518_v55 }
 0x3c3   : > { %v5538_v52 = vsel %vm5516_vm10, %v5364_v25, -inf  ;;  %v6283_v25 = vpop.permute.xlu1 %6282 }
 0x3c4   : > { %v5539_v0 = vrot.slane %v5538_v52, 4  ;;  %v5526_v35 = vmax.f32 %v5524_v34, %v5525_v50  ;;  %v5533_v36 = vmax.f32 %v5531_v60, %v5532_v39  ;;  %v5520_v47 = vrot.slane %v5519_v30, 2 }
 0x3c5   : > { %v6279_v39 = vunpack.i.l.bf16 %v6278_v57 }
 0x3c6   : > { %v5540_v11 = vmax.f32 %v5538_v52, %v5539_v0  ;;  %v5527_v40 = vrot.slane %v5526_v35, 2  ;;  %v5534_v27 = vrot.slane %v5533_v36, 2  ;;  %v5521_v31 = vmax.f32 %v5519_v30, %v5520_v47 }
 0x3c8   : > { %v5541_v63 = vrot.slane %v5540_v11, 2  ;;  %v5528_v22 = vmax.f32 %v5526_v35, %v5527_v40  ;;  %v5535_v49 = vmax.f32 %v5533_v36, %v5534_v27  ;;  %v5522_v54 = vrot.slane %v5521_v31, 1  ;;  %v6288_v27 = vpop.permute.xlu0 %6287 }
 0x3c9   : > { %v6016_v28 = vpop.f32.mrb[2].mxu1 }
 0x3ca   : > { %v6017_v26 = vpop.f32.mrb[3].mxu1  ;;  %v5542_v23 = vmax.f32 %v5540_v11, %v5541_v63  ;;  %v5529_v33 = vrot.slane %v5528_v22, 1  ;;  %v5536_v16 = vrot.slane %v5535_v49, 1  ;;  %v5523_v34 = vmax.f32 %v5521_v31, %v5522_v54 }
 0x3cb   : > { %v6018_v15 = vadd.f32 %v6017_v26, %v6016_v28  ;;  %v6284_v11 = vunpack.i.l.bf16 %v6283_v25 }
 0x3cc   : > { %v5543_v55 = vrot.slane %v5542_v23, 1  ;;  %v5530_v26 = vmax.f32 %v5528_v22, %v5529_v33  ;;  %v5537_v30 = vmax.f32 %v5535_v49, %v5536_v16  ;;  %v5741_v40 = vsel %vm5126_vm15, %v5523_v34, -inf }
 0x3cd   : > { %v5299_v56 = vadd.f32 %v6018_v15, %v9288_v19 }
 0x3ce   : > { %v5744_v22 = vsel %vm5126_vm15, %v5530_v26, -inf  ;;  %v5747_v38 = vsel %vm5126_vm15, %v5537_v30, -inf }
 0x3cf   : > { %v5333_v32 = vmax.f32 %v5299_v56, 0.0  ;;  %v6350_v56 = vld [vmem:[#allocation3 + $0x27] sm:$0xff] }
 0x3d0   : > { %v4826_v47 = vsel %vm8980_vm9, %v6350_v56, 0.0  ;;  %vm10062_vm9 = vcmask 1041409  }
 0x3d1   : > { %v5365_v48 = vcombine.high %v5333_v32, %v5333_v32  ;;  %v5372_v6 = vrot.slane %v5333_v32, %v7459_v4  ;;  %v5544_v32 = vmax.f32 %v5542_v23, %v5543_v55 }
 0x3d3   : > { %v5379_v7 = vrot.slane %v5365_v48, %v7459_v4  ;;  %v5380_v41 = vcombine.high %v5372_v6, %v5372_v6  ;;  %v5545_v53 = vsel %vm5516_vm10, %v5372_v6, -inf }
 0x3d4   : > { %v5546_v8 = vrot.slane %v5545_v53, 4 }
 0x3d5   : > { %v5381_v58 = vcombine.high %v5379_v7, %v5379_v7  ;;  %v5552_v24 = vsel %vm5516_vm10, %v5380_v41, -inf  ;;  %v5559_v12 = vsel %vm5516_vm10, %v5379_v7, -inf  ;;  %v6280_v7 = vunpack.i.h.bf16 %v6278_v57 }
 0x3d6   : > { %v5547_v10 = vmax.f32 %v5545_v53, %v5546_v8  ;;  %v5553_v5 = vrot.slane %v5552_v24, 4  ;;  %v5560_v46 = vrot.slane %v5559_v12, 4  ;;  %v5122_v41 = vsel %vm10061_vm11, %v4826_v47, %v6279_v39  ;;  %v6293_v53 = vpop.permute.xlu1 %6292 }
 0x3d7   : > { %v5566_v43 = vsel %vm5516_vm10, %v5381_v58, -inf  ;;  %v5131_v54 = vsel %vm5126_vm15, %v5122_v41, %v6284_v11  ;;  %v6294_v23 = vunpack.i.l.bf16 %v6293_v53  ;;  %v6295_v17 = vunpack.i.h.bf16 %v6293_v53 }
 0x3d8   : > { %v5548_v9 = vrot.slane %v5547_v10, 2  ;;  %v5554_v1 = vmax.f32 %v5552_v24, %v5553_v5  ;;  %v5561_v45 = vmax.f32 %v5559_v12, %v5560_v46  ;;  %v5567_v14 = vrot.slane %v5566_v43, 4 }
 0x3d9   : > { %v6285_v12 = vunpack.i.h.bf16 %v6283_v25  ;;  %v4905_v11 = vsel %vm8970_vm1, %v9247_v37, 0.0 }
 0x3da   : > { %v5549_v51 = vmax.f32 %v5547_v10, %v5548_v9  ;;  %v5555_v20 = vrot.slane %v5554_v1, 2  ;;  %v5562_v44 = vrot.slane %v5561_v45, 2  ;;  %v5568_v13 = vmax.f32 %v5566_v43, %v5567_v14 }
 0x3db   : > { %v6289_v10 = vunpack.i.l.bf16 %v6288_v27  ;;  %v5750_v43 = vsel %vm5126_vm15, %v5544_v32, -inf }
 0x3dc   : > { %v5550_v60 = vrot.slane %v5549_v51, 1  ;;  %v5556_v50 = vmax.f32 %v5554_v1, %v5555_v20  ;;  %v5563_v52 = vmax.f32 %v5561_v45, %v5562_v44  ;;  %v5569_v28 = vrot.slane %v5568_v13, 2  ;;  %v6351_v1 = vld [vmem:[#allocation3 + $0x2f] sm:$0xff] }
 0x3dd   : > { %v4827_v45 = vsel %vm8984_vm0, %v6351_v1, 0.0  ;;  %v6290_v44 = vunpack.i.h.bf16 %v6288_v27  ;;  %vm10067_vm0 = vcmask 523264  }
 0x3de   : > { %v5551_v0 = vmax.f32 %v5549_v51, %v5550_v60  ;;  %v5557_v15 = vrot.slane %v5556_v50, 1  ;;  %v5564_v35 = vrot.slane %v5563_v52, 1  ;;  %v5570_v36 = vmax.f32 %v5568_v13, %v5569_v28  ;;  %vm10070_vm11 = vmmov %vm10067_vm0 }
 0x3df   : > { %v5123_v57 = vsel %vm10063_vm12, %v4827_v45, %v6280_v7  ;;  %v5140_v13 = vsel %vm10065_vm4, %v5131_v54, %v6289_v10  ;;  %vm10072_vm12 = vcmask 916480   ;;  %vm10074_vm4 = vcmask 130048  }
 0x3e0   : > { %v5558_v48 = vmax.f32 %v5556_v50, %v5557_v15  ;;  %v5565_v6 = vmax.f32 %v5563_v52, %v5564_v35  ;;  %v5571_v31 = vrot.slane %v5570_v36, 1  ;;  %v5742_v63 = vsel %vm5126_vm15, %v5551_v0, -inf  ;;  %vm10078_vm1 = vmmov %vm10074_vm4 }
 0x3e1   : > { %v5743_v8 = vmax.f32 %v5741_v40, %v5742_v63  ;;  %v5132_v55 = vsel %vm5126_vm15, %v5123_v57, %v6285_v12  ;;  %v5149_v60 = vsel %vm10067_vm0, %v5140_v13, %v6294_v23  ;;  %vm10076_vm0 = vmmov %vm10072_vm12  ;;  %v6352_v63 = vld [vmem:[#allocation3 + $0x37] sm:$0xff] }
 0x3e2   : > { %v5572_v49 = vmax.f32 %v5570_v36, %v5571_v31  ;;  %v5745_v58 = vsel %vm5126_vm15, %v5558_v48, -inf  ;;  %v5748_v24 = vsel %vm5126_vm15, %v5565_v6, -inf  ;;  %v5141_v26 = vsel %vm10069_vm6, %v5132_v55, %v6290_v44  ;;  %vm10080_vm6 = vmmov %vm10078_vm1 }
 0x3e3   : > { %v5746_v5 = vmax.f32 %v5744_v22, %v5745_v58  ;;  %v5749_v46 = vmax.f32 %v5747_v38, %v5748_v24  ;;  %v5150_v0 = vsel %vm10070_vm11, %v5141_v26, %v6295_v17  ;;  %v4828_v2 = vsel %vm9243_vm3, %v6352_v63, 0.0  ;;  %vm10081_vm3 = vmmov %vm10070_vm11 }
 0x3e4   : > { %v5751_v9 = vsel %vm5126_vm15, %v5572_v49, -inf  ;;  %v4899_v49 = vld [vmem:[#allocation3 + $0x51] sm:$0xff] }
 0x3e5   : > { %v5752_v14 = vmax.f32 %v5750_v43, %v5751_v9  ;;  %v5805_v33 = vsel %vm10062_vm9, %v5746_v5, %v5743_v8  ;;  %vm10071_vm9 = vcmask 785408   ;;  %v4907_v43 = vsel %vm9235_vm7, %v4899_v49, 0.0 }
 0x3e6   : > { %v5806_v51 = vsel %vm10064_vm2, %v5749_v46, %v5805_v33  ;;  %vm10073_vm2 = vmmov %vm10068_vm13  ;;  %vm10090_vm7 = vcmask 1044484  }
 0x3e7   : > { %v6303_v16 = vpop.permute.xlu1 %6302  ;;  %v9323_v34 = vsel %vm10066_vm14, %v5752_v14, %v5806_v51  ;;  %vm10075_vm14 = vmmov %vm10071_vm9 }
 0x3e8   : > { %v6304_v50 = vunpack.i.l.bf16 %v6303_v16  ;;  %v6305_v15 = vunpack.i.h.bf16 %v6303_v16  ;;  %vm10082_vm11 = vmmov %vm10073_vm2 }
 0x3e9   : > { %v6298_v20 = vpop.permute.xlu0 %6297 }
 0x3ea   : > { %v6299_v25 = vunpack.i.l.bf16 %v6298_v20  ;;  %v6300_v52 = vunpack.i.h.bf16 %v6298_v20 }
 0x3eb   : > { %v6313_v27 = vpop.permute.xlu1 %6312 }
 0x3ec   : > { %v5158_v28 = vsel %vm10068_vm13, %v5149_v60, %v6299_v25  ;;  %v5159_v47 = vsel %vm10073_vm2, %v5150_v0, %v6300_v52  ;;  %vm10077_vm13 = vmmov %vm10074_vm4  ;;  %v6314_v48 = vunpack.i.l.bf16 %v6313_v27  ;;  %v6315_v53 = vunpack.i.h.bf16 %v6313_v27 }
 0x3ed   : > { %v6308_v39 = vpop.permute.xlu0 %6307  ;;  %v5167_v35 = vsel %vm10071_vm9, %v5158_v28, %v6304_v50  ;;  %v5168_v32 = vsel %vm10075_vm14, %v5159_v47, %v6305_v15  ;;  %vm10085_vm2 = vmmov %vm10081_vm3 }
 0x3ee   : > { %v6309_v30 = vunpack.i.l.bf16 %v6308_v39  ;;  %v6310_v36 = vunpack.i.h.bf16 %v6308_v39  ;;  %v5124_v7 = vsel %vm10078_vm1, %v4828_v2, %v6314_v48  ;;  %v5125_v29 = vsel %vm10080_vm6, %v4829_v59, %v6315_v53  ;;  %vm10087_vm14 = vmmov %vm10082_vm11 }
 0x3ef   : > { %vm10093_vm6 = vcmask 1047559  }
 0x3f0   : > { %v5176_v56 = vsel %vm10072_vm12, %v5167_v35, %v6309_v30  ;;  %v5177_v40 = vsel %vm10076_vm0, %v5168_v32, %v6310_v36  ;;  %vm10083_vm12 = vmmov %vm10076_vm0 }
 0x3f1   : > { %5312 = vmatmul.mubr.f32.gmra.mrb[8].mxu1 %v5176_v56  ;;  %vm10088_vm0 = vmmov %vm10071_vm9 }
 0x3f2   : > { %5926 = vmatprep.mubr.msk.f32.mxu1 %vm10074_vm4, %v4905_v11  ;;  %vm10086_vm4 = vmmov %vm10078_vm1  ;;  %vm10091_vm1 = vcmask 1045509  }
 0x3f5   : > { %5317 = vmatmul.mubr.f32.gmra.mrb[10].mxu1 %v5177_v40 }
 0x3f6   : > { %5927 = vmatprep.mubr.msk.f32.mxu1 %vm10077_vm13, %v4906_v61  ;;  %vm10089_vm13 = vmmov %vm10083_vm12 }
 0x415   : > { %v6323_v6 = vpop.permute.xlu1 %6322 }
 0x416   : > { %v6318_v31 = vpop.permute.xlu0 %6317  ;;  %v6324_v41 = vunpack.i.l.bf16 %v6323_v6  ;;  %v6325_v58 = vunpack.i.h.bf16 %v6323_v6 }
 0x417   : > { %v6319_v37 = vunpack.i.l.bf16 %v6318_v31  ;;  %v6320_v3 = vunpack.i.h.bf16 %v6318_v31 }
 0x419   : > { %v5133_v22 = vsel %vm5126_vm15, %v5124_v7, %v6319_v37  ;;  %v5050_v8 = vpop.permute.xlu1 %5049  ;;  %v5134_v12 = vsel %vm5126_vm15, %v5125_v29, %v6320_v3 }
 0x41a   : > { %v6328_v18 = vpop.permute.xlu0 %6327  ;;  %v5142_v61 = vsel %vm10079_vm5, %v5133_v22, %v6324_v41  ;;  %v5143_v62 = vsel %vm10084_vm8, %v5134_v12, %v6325_v58  ;;  %vm10092_vm5 = vcmask 1046534  }
 0x41b   : > { %v6329_v38 = vunpack.i.l.bf16 %v6328_v18  ;;  %v6330_v10 = vunpack.i.h.bf16 %v6328_v18  ;;  %vm10099_vm8 = vmmov %vm10092_vm5 }
 0x41d   : > { %v5151_v24 = vsel %vm10081_vm3, %v5142_v61, %v6329_v38  ;;  %v5107_v5 = vpop.permute.xlu1 %5106  ;;  %v5152_v9 = vsel %vm10085_vm2, %v5143_v62, %v6330_v10  ;;  %vm10094_vm3 = vcmask 1041409   ;;  %vm10100_vm2 = vmmov %vm10093_vm6 }
 0x41e   : > { %v5082_v46 = vpop.permute.xlu0 %5081  ;;  %v5160_v54 = vsel %vm10082_vm11, %v5151_v24, %v5050_v8  ;;  %vm10095_vm11 = vcmask 1042434  }
 0x41f   : > { %v5169_v23 = vsel %vm10071_vm9, %v5160_v54, %v5082_v46  ;;  %vm10096_vm9 = vcmask 1043459  }
 0x420   : > { %v5178_v42 = vsel %vm10083_vm12, %v5169_v23, %v5107_v5  ;;  %vm10098_vm12 = vmmov %vm10091_vm1 }
 0x421   : > { %5322 = vmatmul.mubr.f32.gmra.mrb[12].mxu1 %v5178_v42  ;;  %v5084_v1 = vpop.permute.xlu1 %5083 }
 0x422   : > { %v5052_v59 = vpop.permute.xlu0 %5051  ;;  %5928 = vmatprep.mubr.msk.f32.mxu1 %vm10086_vm4, %v4907_v43 }
 0x423   : > { %v5161_v45 = vsel %vm10087_vm14, %v5152_v9, %v5052_v59 }
 0x424   : > { %v5170_v33 = vsel %vm10088_vm0, %v5161_v45, %v5084_v1 }
 0x426   : > { %v5109_v14 = vpop.permute.xlu0 %5108 }
 0x427   : > { %v5179_v16 = vsel %vm10089_vm13, %v5170_v33, %v5109_v14 }
 0x428   : > { %5327 = vmatmul.mubr.f32.gmra.mrb[14].mxu1 %v5179_v16 }
 0x448   : > { %v6019_v21 = vpop.f32.mrb[4].mxu1 }
 0x449   : > { %v6020_v57 = vpop.f32.mrb[5].mxu1 }
 0x44a   : > { %v6021_v51 = vadd.f32 %v6020_v57, %v6019_v21 }
 0x44c   : > { %v5304_v20 = vadd.f32 %v6021_v51, %v9288_v19  ;;  %v6022_v44 = vpop.f32.mrb[6].mxu1 }
 0x44d   : > { %v6023_v13 = vpop.f32.mrb[7].mxu1 }
 0x44e   : > { %v5334_v25 = vmax.f32 %v5304_v20, 0.0  ;;  %v6024_v55 = vadd.f32 %v6023_v13, %v6022_v44 }
 0x450   : > { %v5382_v17 = vcombine.high %v5334_v25, %v5334_v25  ;;  %v5389_v60 = vrot.slane %v5334_v25, %v7459_v4  ;;  %v5309_v50 = vadd.f32 %v6024_v55, %v9288_v19 }
 0x452   : > { %v5396_v52 = vrot.slane %v5382_v17, %v7459_v4  ;;  %v5397_v28 = vcombine.high %v5389_v60, %v5389_v60  ;;  %v5573_v39 = vsel %vm5516_vm10, %v5389_v60, -inf  ;;  %v5335_v26 = vmax.f32 %v5309_v50, 0.0 }
 0x453   : > { %v5574_v30 = vrot.slane %v5573_v39, 4 }
 0x454   : > { %v5398_v0 = vcombine.high %v5396_v52, %v5396_v52  ;;  %v5580_v15 = vsel %vm5516_vm10, %v5397_v28, -inf  ;;  %v5587_v35 = vsel %vm5516_vm10, %v5396_v52, -inf  ;;  %v5399_v36 = vcombine.high %v5335_v26, %v5335_v26 }
 0x455   : > { %v5575_v56 = vmax.f32 %v5573_v39, %v5574_v30  ;;  %v5581_v47 = vrot.slane %v5580_v15, 4  ;;  %v5588_v11 = vrot.slane %v5587_v35, 4  ;;  %v5406_v32 = vrot.slane %v5335_v26, %v7459_v4 }
 0x456   : > { %v5594_v40 = vsel %vm5516_vm10, %v5398_v0, -inf  ;;  %v5413_v27 = vrot.slane %v5399_v36, %v7459_v4 }
 0x457   : > { %v5576_v48 = vrot.slane %v5575_v56, 2  ;;  %v5582_v6 = vmax.f32 %v5580_v15, %v5581_v47  ;;  %v5589_v31 = vmax.f32 %v5587_v35, %v5588_v11  ;;  %v5595_v63 = vrot.slane %v5594_v40, 4 }
 0x458   : > { %v5414_v2 = vcombine.high %v5406_v32, %v5406_v32  ;;  %v5415_v37 = vcombine.high %v5413_v27, %v5413_v27  ;;  %v5601_v7 = vsel %vm5516_vm10, %v5406_v32, -inf  ;;  %v5615_v41 = vsel %vm5516_vm10, %v5413_v27, -inf }
 0x459   : > { %v5577_v53 = vmax.f32 %v5575_v56, %v5576_v48  ;;  %v5583_v22 = vrot.slane %v5582_v6, 2  ;;  %v5590_v3 = vrot.slane %v5589_v31, 2  ;;  %v5596_v8 = vmax.f32 %v5594_v40, %v5595_v63 }
 0x45a   : > { %v5602_v18 = vrot.slane %v5601_v7, 4  ;;  %v5608_v38 = vsel %vm5516_vm10, %v5414_v2, -inf  ;;  %v5616_v61 = vrot.slane %v5615_v41, 4  ;;  %v5622_v49 = vsel %vm5516_vm10, %v5415_v37, -inf }
 0x45b   : > { %v5584_v29 = vmax.f32 %v5582_v6, %v5583_v22  ;;  %v5591_v58 = vmax.f32 %v5589_v31, %v5590_v3  ;;  %v5597_v24 = vrot.slane %v5596_v8, 2  ;;  %v5609_v10 = vrot.slane %v5608_v38, 4 }
 0x45c   : > { %v5603_v12 = vmax.f32 %v5601_v7, %v5602_v18  ;;  %v5617_v5 = vmax.f32 %v5615_v41, %v5616_v61  ;;  %v5623_v46 = vrot.slane %v5622_v49, 4  ;;  %v5578_v54 = vrot.slane %v5577_v53, 1 }
 0x45d   : > { %v5592_v23 = vrot.slane %v5591_v58, 1  ;;  %v5598_v43 = vmax.f32 %v5596_v8, %v5597_v24  ;;  %v5610_v62 = vmax.f32 %v5608_v38, %v5609_v10  ;;  %v5585_v1 = vrot.slane %v5584_v29, 1 }
 0x45e   : > { %v5604_v42 = vrot.slane %v5603_v12, 2  ;;  %v5618_v59 = vrot.slane %v5617_v5, 2  ;;  %v5624_v9 = vmax.f32 %v5622_v49, %v5623_v46  ;;  %v5579_v57 = vmax.f32 %v5577_v53, %v5578_v54 }
 0x45f   : > { %v5599_v45 = vrot.slane %v5598_v43, 1  ;;  %v5611_v33 = vrot.slane %v5610_v62, 2  ;;  %v5593_v51 = vmax.f32 %v5591_v58, %v5592_v23  ;;  %v5586_v55 = vmax.f32 %v5584_v29, %v5585_v1 }
 0x460   : > { %v5605_v14 = vmax.f32 %v5603_v12, %v5604_v42  ;;  %v5619_v16 = vmax.f32 %v5617_v5, %v5618_v59  ;;  %v5625_v21 = vrot.slane %v5624_v9, 2  ;;  %v5753_v39 = vsel %vm5126_vm15, %v5579_v57, -inf }
 0x461   : > { %v5612_v44 = vmax.f32 %v5610_v62, %v5611_v33  ;;  %v5600_v17 = vmax.f32 %v5598_v43, %v5599_v45  ;;  %v5759_v26 = vsel %vm5126_vm15, %v5593_v51, -inf  ;;  %v5756_v47 = vsel %vm5126_vm15, %v5586_v55, -inf }
 0x462   : > { %v5606_v20 = vrot.slane %v5605_v14, 1  ;;  %v5620_v13 = vrot.slane %v5619_v16, 1  ;;  %v5626_v25 = vmax.f32 %v5624_v9, %v5625_v21 }
 0x463   : > { %v5613_v50 = vrot.slane %v5612_v44, 1  ;;  %v5762_v11 = vsel %vm5126_vm15, %v5600_v17, -inf }
 0x464   : > { %v5607_v60 = vmax.f32 %v5605_v14, %v5606_v20  ;;  %v5621_v52 = vmax.f32 %v5619_v16, %v5620_v13  ;;  %v5627_v28 = vrot.slane %v5626_v25, 1 }
 0x465   : > { %v5614_v30 = vmax.f32 %v5612_v44, %v5613_v50 }
 0x466   : > { %v5628_v0 = vmax.f32 %v5626_v25, %v5627_v28  ;;  %v5754_v15 = vsel %vm5126_vm15, %v5607_v60, -inf  ;;  %v5760_v35 = vsel %vm5126_vm15, %v5621_v52, -inf }
 0x467   : > { %v5755_v36 = vmax.f32 %v5753_v39, %v5754_v15  ;;  %v5761_v56 = vmax.f32 %v5759_v26, %v5760_v35  ;;  %v5757_v32 = vsel %vm5126_vm15, %v5614_v30, -inf }
 0x468   : > { %v5763_v40 = vsel %vm5126_vm15, %v5628_v0, -inf  ;;  %v5758_v27 = vmax.f32 %v5756_v47, %v5757_v32 }
 0x469   : > { %v5764_v48 = vmax.f32 %v5762_v11, %v5763_v40  ;;  %v5808_v6 = vsel %vm10090_vm7, %v5755_v36, %v9323_v34 }
 0x46a   : > { %v5809_v31 = vsel %vm10091_vm1, %v5758_v27, %v5808_v6 }
 0x46b   : > { %v5810_v63 = vsel %vm10092_vm5, %v5761_v56, %v5809_v31 }
 0x46c   : > { %v5811_v2 = vsel %vm10093_vm6, %v5764_v48, %v5810_v63 }
 0x46d   : > { %5821 = vst.msk [vmem:[%s9395_s17] sm:$0xff] %vm5126_vm15, %v5811_v2 }
 0x4c4   : > { %v6025_v37 = vpop.f32.mrb[8].mxu1 }
 0x4c5   : > { %v6026_v7 = vpop.f32.mrb[9].mxu1 }
 0x4c6   : > { %v6027_v41 = vadd.f32 %v6026_v7, %v6025_v37 }
 0x4c8   : > { %v5314_v53 = vadd.f32 %v6027_v41, %v9288_v19  ;;  %v6028_v34 = vpop.f32.mrb[10].mxu1 }
 0x4c9   : > { %v6029_v22 = vpop.f32.mrb[11].mxu1 }
 0x4ca   : > { %v5336_v3 = vmax.f32 %v5314_v53, 0.0  ;;  %v6030_v8 = vadd.f32 %v6029_v22, %v6028_v34 }
 0x4cc   : > { %v5416_v18 = vcombine.high %v5336_v3, %v5336_v3  ;;  %v5423_v38 = vrot.slane %v5336_v3, %v7459_v4  ;;  %v5319_v61 = vadd.f32 %v6030_v8, %v9288_v19 }
 0x4ce   : > { %v5430_v49 = vrot.slane %v5416_v18, %v7459_v4  ;;  %v5431_v29 = vcombine.high %v5423_v38, %v5423_v38  ;;  %v5629_v58 = vsel %vm5516_vm10, %v5423_v38, -inf  ;;  %v5337_v24 = vmax.f32 %v5319_v61, 0.0 }
 0x4cf   : > { %v5630_v12 = vrot.slane %v5629_v58, 4 }
 0x4d0   : > { %v5432_v10 = vcombine.high %v5430_v49, %v5430_v49  ;;  %v5636_v5 = vsel %vm5516_vm10, %v5431_v29, -inf  ;;  %v5643_v46 = vsel %vm5516_vm10, %v5430_v49, -inf  ;;  %v5433_v54 = vcombine.high %v5337_v24, %v5337_v24 }
 0x4d1   : > { %v5631_v23 = vmax.f32 %v5629_v58, %v5630_v12  ;;  %v5637_v43 = vrot.slane %v5636_v5, 4  ;;  %v5644_v42 = vrot.slane %v5643_v46, 4  ;;  %v5440_v62 = vrot.slane %v5337_v24, %v7459_v4 }
 0x4d2   : > { %v5650_v59 = vsel %vm5516_vm10, %v5432_v10, -inf  ;;  %v5447_v9 = vrot.slane %v5433_v54, %v7459_v4 }
 0x4d3   : > { %v5632_v1 = vrot.slane %v5631_v23, 2  ;;  %v5638_v45 = vmax.f32 %v5636_v5, %v5637_v43  ;;  %v5645_v14 = vmax.f32 %v5643_v46, %v5644_v42  ;;  %v5651_v33 = vrot.slane %v5650_v59, 4 }
 0x4d4   : > { %v5448_v16 = vcombine.high %v5440_v62, %v5440_v62  ;;  %v5449_v21 = vcombine.high %v5447_v9, %v5447_v9  ;;  %v5657_v57 = vsel %vm5516_vm10, %v5440_v62, -inf  ;;  %v5671_v51 = vsel %vm5516_vm10, %v5447_v9, -inf }
 0x4d5   : > { %v5633_v20 = vmax.f32 %v5631_v23, %v5632_v1  ;;  %v5639_v44 = vrot.slane %v5638_v45, 2  ;;  %v5646_v13 = vrot.slane %v5645_v14, 2  ;;  %v5652_v25 = vmax.f32 %v5650_v59, %v5651_v33 }
 0x4d6   : > { %v5658_v55 = vrot.slane %v5657_v57, 4  ;;  %v5664_v17 = vsel %vm5516_vm10, %v5448_v16, -inf  ;;  %v5672_v60 = vrot.slane %v5671_v51, 4  ;;  %v5678_v50 = vsel %vm5516_vm10, %v5449_v21, -inf }
 0x4d7   : > { %v5640_v52 = vmax.f32 %v5638_v45, %v5639_v44  ;;  %v5647_v28 = vmax.f32 %v5645_v14, %v5646_v13  ;;  %v5653_v39 = vrot.slane %v5652_v25, 2  ;;  %v5665_v30 = vrot.slane %v5664_v17, 4 }
 0x4d8   : > { %v5659_v26 = vmax.f32 %v5657_v57, %v5658_v55  ;;  %v5673_v0 = vmax.f32 %v5671_v51, %v5672_v60  ;;  %v5679_v15 = vrot.slane %v5678_v50, 4  ;;  %v5634_v35 = vrot.slane %v5633_v20, 1 }
 0x4d9   : > { %v5648_v36 = vrot.slane %v5647_v28, 1  ;;  %v5654_v56 = vmax.f32 %v5652_v25, %v5653_v39  ;;  %v5666_v11 = vmax.f32 %v5664_v17, %v5665_v30  ;;  %v5641_v27 = vrot.slane %v5640_v52, 1 }
 0x4da   : > { %v5660_v47 = vrot.slane %v5659_v26, 2  ;;  %v5674_v32 = vrot.slane %v5673_v0, 2  ;;  %v5680_v40 = vmax.f32 %v5678_v50, %v5679_v15  ;;  %v5635_v37 = vmax.f32 %v5633_v20, %v5634_v35 }
 0x4db   : > { %v5655_v48 = vrot.slane %v5654_v56, 1  ;;  %v5667_v31 = vrot.slane %v5666_v11, 2  ;;  %v5649_v7 = vmax.f32 %v5647_v28, %v5648_v36  ;;  %v5642_v3 = vmax.f32 %v5640_v52, %v5641_v27 }
 0x4dc   : > { %v5661_v6 = vmax.f32 %v5659_v26, %v5660_v47  ;;  %v5675_v63 = vmax.f32 %v5673_v0, %v5674_v32  ;;  %v5681_v2 = vrot.slane %v5680_v40, 2  ;;  %v5765_v29 = vsel %vm5126_vm15, %v5635_v37, -inf }
 0x4dd   : > { %v5668_v53 = vmax.f32 %v5666_v11, %v5667_v31  ;;  %v5656_v8 = vmax.f32 %v5654_v56, %v5655_v48  ;;  %v5771_v58 = vsel %vm5126_vm15, %v5649_v7, -inf  ;;  %v5768_v23 = vsel %vm5126_vm15, %v5642_v3, -inf }
 0x4de   : > { %v5662_v41 = vrot.slane %v5661_v6, 1  ;;  %v5676_v34 = vrot.slane %v5675_v63, 1  ;;  %v5682_v22 = vmax.f32 %v5680_v40, %v5681_v2 }
 0x4df   : > { %v5669_v38 = vrot.slane %v5668_v53, 1  ;;  %v5774_v43 = vsel %vm5126_vm15, %v5656_v8, -inf }
 0x4e0   : > { %v5663_v18 = vmax.f32 %v5661_v6, %v5662_v41  ;;  %v5677_v61 = vmax.f32 %v5675_v63, %v5676_v34  ;;  %v5683_v49 = vrot.slane %v5682_v22, 1 }
 0x4e1   : > { %v5670_v24 = vmax.f32 %v5668_v53, %v5669_v38 }
 0x4e2   : > { %v5684_v12 = vmax.f32 %v5682_v22, %v5683_v49  ;;  %v5766_v10 = vsel %vm5126_vm15, %v5663_v18, -inf  ;;  %v5772_v5 = vsel %vm5126_vm15, %v5677_v61, -inf }
 0x4e3   : > { %v5767_v46 = vmax.f32 %v5765_v29, %v5766_v10  ;;  %v5773_v54 = vmax.f32 %v5771_v58, %v5772_v5  ;;  %v5769_v42 = vsel %vm5126_vm15, %v5670_v24, -inf }
 0x4e4   : > { %v5775_v62 = vsel %vm5126_vm15, %v5684_v12, -inf  ;;  %v5770_v59 = vmax.f32 %v5768_v23, %v5769_v42 }
 0x4e5   : > { %v5776_v9 = vmax.f32 %v5774_v43, %v5775_v62 }
 0x4e6   : > { %v5812_v1 = vsel %vm10094_vm3, %v5770_v59, %v5767_v46 }
 0x4e7   : > { %v5813_v45 = vsel %vm10095_vm11, %v5773_v54, %v5812_v1 }
 0x4e8   : > { %v9427_v14 = vsel %vm10096_vm9, %v5776_v9, %v5813_v45 }
 0x4f4   : > { %v6031_v33 = vpop.f32.mrb[12].mxu1 }
 0x4f5   : > { %v6032_v16 = vpop.f32.mrb[13].mxu1 }
 0x4f6   : > { %v6033_v21 = vadd.f32 %v6032_v16, %v6031_v33 }
 0x4f8   : > { %v5324_v57 = vadd.f32 %v6033_v21, %v9288_v19 }
 0x4fa   : > { %v5338_v51 = vmax.f32 %v5324_v57, 0.0 }
 0x4fb   : > { %v6034_v20 = vpop.f32.mrb[14].mxu1 }
 0x4fc   : > { %v5450_v44 = vcombine.high %v5338_v51, %v5338_v51  ;;  %v5457_v13 = vrot.slane %v5338_v51, %v7459_v4  ;;  %v6035_v25 = vpop.f32.mrb[15].mxu1 }
 0x4fd   : > { %v6036_v55 = vadd.f32 %v6035_v25, %v6034_v20 }
 0x4fe   : > { %v5464_v17 = vrot.slane %v5450_v44, %v7459_v4  ;;  %v5465_v60 = vcombine.high %v5457_v13, %v5457_v13  ;;  %v5685_v50 = vsel %vm5516_vm10, %v5457_v13, -inf }
 0x4ff   : > { %v5686_v52 = vrot.slane %v5685_v50, 4  ;;  %v5329_v28 = vadd.f32 %v6036_v55, %v9288_v19 }
 0x500   : > { %v5466_v39 = vcombine.high %v5464_v17, %v5464_v17  ;;  %v5692_v26 = vsel %vm5516_vm10, %v5465_v60, -inf  ;;  %v5699_v30 = vsel %vm5516_vm10, %v5464_v17, -inf }
 0x501   : > { %v5687_v0 = vmax.f32 %v5685_v50, %v5686_v52  ;;  %v5693_v15 = vrot.slane %v5692_v26, 4  ;;  %v5700_v35 = vrot.slane %v5699_v30, 4  ;;  %v5339_v36 = vmax.f32 %v5329_v28, 0.0 }
 0x502   : > { %v5706_v56 = vsel %vm5516_vm10, %v5466_v39, -inf }
 0x503   : > { %v5688_v47 = vrot.slane %v5687_v0, 2  ;;  %v5694_v11 = vmax.f32 %v5692_v26, %v5693_v15  ;;  %v5701_v32 = vmax.f32 %v5699_v30, %v5700_v35  ;;  %v5707_v40 = vrot.slane %v5706_v56, 4 }
 0x504   : > { %v5467_v27 = vcombine.high %v5339_v36, %v5339_v36  ;;  %v5474_v48 = vrot.slane %v5339_v36, %v7459_v4 }
 0x505   : > { %v5695_v6 = vrot.slane %v5694_v11, 2  ;;  %v5702_v19 = vrot.slane %v5701_v32, 2  ;;  %v5708_v31 = vmax.f32 %v5706_v56, %v5707_v40  ;;  %v5689_v7 = vmax.f32 %v5687_v0, %v5688_v47 }
 0x506   : > { %v5481_v63 = vrot.slane %v5467_v27, %v7459_v4  ;;  %v5482_v2 = vcombine.high %v5474_v48, %v5474_v48  ;;  %v5713_v37 = vsel %vm5516_vm10, %v5474_v48, -inf }
 0x507   : > { %v5709_v41 = vrot.slane %v5708_v31, 2  ;;  %v5714_v34 = vrot.slane %v5713_v37, 4  ;;  %v5696_v8 = vmax.f32 %v5694_v11, %v5695_v6  ;;  %v5703_v18 = vmax.f32 %v5701_v32, %v5702_v19 }
 0x508   : > { %v5483_v53 = vcombine.high %v5481_v63, %v5481_v63  ;;  %v5720_v22 = vsel %vm5516_vm10, %v5482_v2, -inf  ;;  %v5727_v3 = vsel %vm5516_vm10, %v5481_v63, -inf  ;;  %v5690_v58 = vrot.slane %v5689_v7, 1 }
 0x509   : > { %v5715_v38 = vmax.f32 %v5713_v37, %v5714_v34  ;;  %v5721_v61 = vrot.slane %v5720_v22, 4  ;;  %v5728_v49 = vrot.slane %v5727_v3, 4  ;;  %v5710_v4 = vmax.f32 %v5708_v31, %v5709_v41 }
 0x50a   : > { %v5734_v29 = vsel %vm5516_vm10, %v5483_v53, -inf  ;;  %v5697_v46 = vrot.slane %v5696_v8, 1  ;;  %v5704_v54 = vrot.slane %v5703_v18, 1  ;;  %v5691_v59 = vmax.f32 %v5689_v7, %v5690_v58  ;;  %vm10097_vm10 = vmmov %vm10090_vm7 }
 0x50b   : > { %v5716_v24 = vrot.slane %v5715_v38, 2  ;;  %v5722_v12 = vmax.f32 %v5720_v22, %v5721_v61  ;;  %v5729_v10 = vmax.f32 %v5727_v3, %v5728_v49  ;;  %v5735_v5 = vrot.slane %v5734_v29, 4 }
 0x50c   : > { %v5711_v9 = vrot.slane %v5710_v4, 1  ;;  %v5698_v21 = vmax.f32 %v5696_v8, %v5697_v46  ;;  %v5705_v57 = vmax.f32 %v5703_v18, %v5704_v54  ;;  %v5777_v55 = vsel %vm5126_vm15, %v5691_v59, -inf }
 0x50d   : > { %v5717_v23 = vmax.f32 %v5715_v38, %v5716_v24  ;;  %v5723_v43 = vrot.slane %v5722_v12, 2  ;;  %v5730_v42 = vrot.slane %v5729_v10, 2  ;;  %v5736_v62 = vmax.f32 %v5734_v29, %v5735_v5 }
 0x50e   : > { %v5712_v25 = vmax.f32 %v5710_v4, %v5711_v9  ;;  %v5780_v28 = vsel %vm5126_vm15, %v5698_v21, -inf  ;;  %v5783_v26 = vsel %vm5126_vm15, %v5705_v57, -inf }
 0x50f   : > { %v5718_v1 = vrot.slane %v5717_v23, 1  ;;  %v5724_v45 = vmax.f32 %v5722_v12, %v5723_v43  ;;  %v5731_v33 = vmax.f32 %v5729_v10, %v5730_v42  ;;  %v5737_v16 = vrot.slane %v5736_v62, 2 }
 0x510   : > { %v5786_v47 = vsel %vm5126_vm15, %v5712_v25, -inf }
 0x511   : > { %v5719_v51 = vmax.f32 %v5717_v23, %v5718_v1  ;;  %v5725_v20 = vrot.slane %v5724_v45, 1  ;;  %v5732_v44 = vrot.slane %v5731_v33, 1  ;;  %v5738_v13 = vmax.f32 %v5736_v62, %v5737_v16 }
 0x513   : > { %v5726_v17 = vmax.f32 %v5724_v45, %v5725_v20  ;;  %v5733_v60 = vmax.f32 %v5731_v33, %v5732_v44  ;;  %v5739_v50 = vrot.slane %v5738_v13, 1  ;;  %v5778_v52 = vsel %vm5126_vm15, %v5719_v51, -inf }
 0x514   : > { %v5779_v39 = vmax.f32 %v5777_v55, %v5778_v52 }
 0x515   : > { %v5740_v30 = vmax.f32 %v5738_v13, %v5739_v50  ;;  %v5781_v0 = vsel %vm5126_vm15, %v5726_v17, -inf  ;;  %v5784_v15 = vsel %vm5126_vm15, %v5733_v60, -inf }
 0x516   : > { %v5782_v35 = vmax.f32 %v5780_v28, %v5781_v0  ;;  %v5785_v36 = vmax.f32 %v5783_v26, %v5784_v15  ;;  %v5815_v56 = vsel %vm10097_vm10, %v5779_v39, %v9427_v14 }
 0x517   : > { %v5787_v11 = vsel %vm5126_vm15, %v5740_v30, -inf }
 0x518   : > { %v5788_v32 = vmax.f32 %v5786_v47, %v5787_v11  ;;  %v5816_v40 = vsel %vm10098_vm12, %v5782_v35, %v5815_v56 }
 0x519   : > { %v5817_v27 = vsel %vm10099_vm8, %v5785_v36, %v5816_v40 }
 0x51a   : > { %v5818_v48 = vsel %vm10100_vm2, %v5788_v32, %v5817_v27 }
 0x51b   : > { %5822 = vst.msk [vmem:[%s9395_s17 + $0x8] sm:$0xff] %vm5126_vm15, %v5818_v48 }
 0x51c PF: > { %s15_s18 = sadd.s32 1, %s6359_s18  }
 0x51d   : > { %p12_p4 = scmp.ge.s32.totalorder %s15_s18, 4  }
 0x51f   :  { %14 = sbr.rel (!%p12_p4) target bundleno = 1 (0x1), region = 70 }

</bundles_post_ra>
